<compile_context>
chip_gen: v7x
topology: tpu7x:2x2x1
jax: 0.10.0
libtpu: 0.0.40
codegen_flags: <defaults>
</compile_context>

<pallas_src>
import functools

import jax
import jax.numpy as jnp
from jax.experimental import pallas as pl
from jax.experimental.pallas import tpu as pltpu

_BF16 = jnp.bfloat16
_F32 = jnp.float32
_LN_EPS = 1e-6


# ------------------------------ small helpers --------------------------------


def _vmem_limit_bytes():
    try:
        cap = int(pltpu.get_tpu_info().vmem_capacity_bytes)
    except Exception:
        cap = 64 << 20
    return max(32 << 20, min((cap * 3) // 4, 96 << 20))


_VMEM_LIMIT = _vmem_limit_bytes()


def _gelu(x):
    # TODO(synk): tanh approximation; PyTorch nn.GELU default is exact erf.
    c = 0.7978845608028654  # sqrt(2/pi)
    return 0.5 * x * (1.0 + jnp.tanh(c * (x + 0.044715 * x * x * x)))


def _dot(a, b, dims=((1,), (0,))):
    """MXU matmul: bf16 operands, f32 accumulation, arbitrary 2D contraction dims."""
    return jax.lax.dot_general(a.astype(_BF16), b.astype(_BF16),
                               (dims, ((), ())), preferred_element_type=_F32)


def _ln_channels(y, lnw, lnb, eps=_LN_EPS):
    """LayerNorm2d on a channels-first (C, S) tile: normalize over the channel axis."""
    mu = jnp.mean(y, axis=0, keepdims=True)
    yc = y - mu
    var = jnp.mean(yc * yc, axis=0, keepdims=True)
    return yc * jax.lax.rsqrt(var + eps) * lnw + lnb


def _shift_tap(x, dy, dx, ww):
    """Zero-padded spatial shift of a channels-first (C, H*W) tile (in-VMEM, no im2col):
    out[:, y*ww + xx] = x[:, (y+dy)*ww + (xx+dx)], 0 outside the image."""
    c, s = x.shape
    k = dy * ww + dx
    if k > 0:
        x = jnp.concatenate([x[:, k:], jnp.zeros((c, k), x.dtype)], axis=1)
    elif k < 0:
        x = jnp.concatenate([jnp.zeros((c, -k), x.dtype), x[:, :k]], axis=1)
    if dx != 0:
        col = jax.lax.broadcasted_iota(jnp.int32, (1, s), 1) % ww
        valid = jnp.logical_and(col + dx >= 0, col + dx < ww)
        x = jnp.where(valid, x, jnp.zeros_like(x))
    return x


def _wspec(arr):
    """Whole-array block (shared weights), constant index map for any grid arity."""
    return pl.BlockSpec(arr.shape, lambda *_: (0,) * arr.ndim)


def _pick_spatial_tile(s, max_tile=2048):
    """Spatial (lane) tile for the per-pixel kernels; at real SAM sizes this splits S."""
    if s <= max_tile:
        return s, 1
    t = max_tile - (max_tile % 128)
    while t >= 128:
        if s % t == 0:
            return t, s // t
        t -= 128
    return s, 1


def _pcall(kernel, grid, in_specs, out_specs, out_shape, args):
    cp = pltpu.CompilerParams(dimension_semantics=("parallel",) * len(grid),
                              vmem_limit_bytes=_VMEM_LIMIT)
    return pl.pallas_call(kernel, grid=grid, in_specs=in_specs, out_specs=out_specs,
                          out_shape=out_shape, compiler_params=cp)(*args)


def _unphase(y, hh, ww):
    """Phase-major fused-ConvT output (B, 4[d1], 4*Cout[d2,c], hh*ww) -> (B, Cout, 4hh, 4ww)."""
    b = y.shape[0]
    cout = y.shape[2] // 4
    y = y.reshape(b, 2, 2, 2, 2, cout, hh, ww)        # (B, dy1, dx1, dy2, dx2, c, y, x)
    y = jnp.transpose(y, (0, 5, 6, 1, 3, 7, 2, 4))    # (B, c, y, dy1, dy2, x, dx1, dx2)
    return y.reshape(b, cout, 4 * hh, 4 * ww)


# --------------------------- fused Pallas kernels -----------------------------


def _outmlp_kernel(oe_ref, img_ref, w1, b1, w2, b2, w3, b3, o_ref):
    """image_embeddings += output_mlp(out_embeddings); channels-first, bf16 out."""
    x = oe_ref[0]                                                   # (C//2, Ts)
    h = jnp.maximum(_dot(w1[...], x) + b1[...], 0.0)
    h = jnp.maximum(_dot(w2[...], h) + b2[...], 0.0)
    o_ref[0] = (img_ref[0].astype(_F32) + _dot(w3[...], h) + b3[...]).astype(o_ref.dtype)


def _hq_fused_kernel(c4, c, img_ref, vit_ref,
                     ew1, eb1, elnw, elnb, ew2,
                     cw1, cb1, clnw, clnb, cw2, b2t, o_ref):
    """embedding_encoder_hf(img) + compress_vit_feat_hf(vit):  both ConvT+LN+GELU+ConvT,
    fused (mid activations never leave VMEM).  Output is phase-major (1,4[d1],4*C8,Ts)."""
    x_img = img_ref[0]                                              # (C, Ts)
    x_vit = vit_ref[0]                                              # (Ts, vit_dim) channels-last
    mid_e = _dot(ew1[...], x_img)                                   # (4*C4, Ts)
    mid_c = _dot(cw1[...], x_vit, dims=((1,), (1,)))                # (4*C,  Ts)
    b2 = b2t[...]                                                   # (4*C8, 1) summed biases
    for d1 in range(4):
        ye = _gelu(_ln_channels(mid_e[d1 * c4:(d1 + 1) * c4] + eb1[...],
                                elnw[...], elnb[...]))
        yc = _gelu(_ln_channels(mid_c[d1 * c:(d1 + 1) * c] + cb1[...],
                                clnw[...], clnb[...]))
        z = _dot(ew2[...], ye) + _dot(cw2[...], yc) + b2            # (4*C8, Ts)
        o_ref[0, d1] = z.astype(o_ref.dtype)


def _upscale_fused_kernel(c4, src_ref, w1, b1, lnw, lnb, w2, b2t, o_ref):
    """output_upscaling: ConvT + LN + GELU + ConvT + GELU, fused; phase-major output."""
    mid = _dot(w1[...], src_ref[0])                                 # (4*C4, Ts)
    b2 = b2t[...]
    for d1 in range(4):
        y = _gelu(_ln_channels(mid[d1 * c4:(d1 + 1) * c4] + b1[...], lnw[...], lnb[...]))
        z = _gelu(_dot(w2[...], y) + b2)                            # (4*C8, Ts)
        o_ref[0, d1] = z.astype(o_ref.dtype)


def _transformer_kernel(scale, tok_ref, img_ref, dense_ref, pos_ref,
                        tw, tbr, tbc, w1, b1, w2, hs_ref, src_ref):
    """Fused deterministic single-head two-way cross-attention stand-in (one batch).
    TODO(synk): the real TwoWayTransformer is an injected nn.Module in the reference."""
    tok = tok_ref[0].astype(_F32)                                   # (Nt, C)
    src = img_ref[0].astype(_F32) + dense_ref[0].astype(_F32)       # (C, S)
    pe = (src + pos_ref[0].astype(_F32)).astype(_BF16)              # (C, S) bf16
    src_b = src.astype(_BF16)

    bq, bk2, bv2, b2 = tbr[0:1, :], tbr[1:2, :], tbr[2:3, :], tbr[3:4, :]
    bk, bv, bq2 = tbc[:, 0:1], tbc[:, 1:2], tbc[:, 2:3]

    # tokens attend to the image
    q = _dot(tok, tw[0]) + bq                                       # (Nt, C)
    k = _dot(tw[1], pe) + bk                                        # (C, S)
    s = _dot(q, k) * scale                                          # (Nt, S)
    s = s - jnp.max(s, axis=1, keepdims=True)
    p = jnp.exp(s)
    p = p / jnp.sum(p, axis=1, keepdims=True)                       # exact softmax
    v = _dot(tw[2], src_b) + bv                                     # (C, S)
    tok2 = tok + _dot(p, v, dims=((1,), (1,)))                      # (Nt, C)

    # token MLP block
    h1 = jnp.maximum(_dot(tok2, w1[...]) + b1[...], 0.0)
    tok3 = tok2 + _dot(h1, w2[...]) + b2
    hs_ref[0] = tok3.astype(hs_ref.dtype)

    # the image attends to the tokens
    q2 = _dot(tw[3], pe) + bq2                                      # (C, S)
    k2 = _dot(tok3, tw[4]) + bk2                                    # (Nt, C)
    v2 = _dot(tok3, tw[5]) + bv2                                    # (Nt, C)
    s2 = _dot(k2, q2) * scale                                       # (Nt, S)
    s2 = s2 - jnp.max(s2, axis=0, keepdims=True)
    p2 = jnp.exp(s2)
    p2 = p2 / jnp.sum(p2, axis=0, keepdims=True)
    src_ref[0] = (src + _dot(v2.T, p2)).astype(src_ref.dtype)       # (C, S)


def _token_heads_kernel(n_tok, hs_ref, hw1, hb1, hw2, hb2, hw3, hb3,
                        iw1, ib1, iw2, ib2, iw3, ib3, hyper_ref, iou_ref):
    """All hypernetwork MLPs (4 SAM + HF, stacked weights) and the IoU head, fused."""
    for i in range(n_tok):
        x = hs_ref[1 + i]                                           # (B, C)
        h = jnp.maximum(_dot(x, hw1[i]) + hb1[i], 0.0)
        h = jnp.maximum(_dot(h, hw2[i]) + hb2[i], 0.0)
        hyper_ref[i] = _dot(h, hw3[i]) + hb3[i]                     # (B, C//8)
    x = hs_ref[0]                                                   # IoU token
    h = jnp.maximum(_dot(x, iw1[...]) + ib1[...], 0.0)
    h = jnp.maximum(_dot(h, iw2[...]) + ib2[...], 0.0)
    iou_ref[...] = _dot(h, iw3[...]) + ib3[...]


def _maskfeature_masks_kernel(hq_only, ww, hyper_ref, sam_ref, hq_ref,
                              w1, b1, lnw, lnb, w2, b2, o_ref):
    """embedding_maskfeature_hf (two 3x3 convs via in-kernel shifted taps) + hq residual,
    then only the selected SAM mask row + the HQ mask row, combined.  One batch element."""
    sam = sam_ref[0]                                                # (C8, 16S) bf16
    acc1 = None
    for t in range(9):
        xs = _shift_tap(sam, t // 3 - 1, t % 3 - 1, ww)
        r = _dot(w1[t], xs)
        acc1 = r if acc1 is None else acc1 + r
    y = _gelu(_ln_channels(acc1 + b1[...], lnw[...], lnb[...])).astype(_BF16)   # (C4, 16S)
    acc2 = None
    for t in range(9):
        xs = _shift_tap(y, t // 3 - 1, t % 3 - 1, ww)
        r = _dot(w2[t], xs)
        acc2 = r if acc2 is None else acc2 + r
    up_hq = acc2 + b2[...] + hq_ref[0].astype(_F32)                 # (C8, 16S)
    hyp = hyper_ref[0]                                              # (n_rows, C8)
    if hq_only:
        m = _dot(hyp[0:1, :], up_hq)                                # (1, 16S)
    else:
        m = _dot(hyp[1:2, :], up_hq) + _dot(hyp[0:1, :], sam)
    o_ref[0] = m.astype(o_ref.dtype)


# ------------------------------ pallas wrappers -------------------------------


def _run_token_heads(p, hs_t, n_tok):
    _, B, _ = hs_t.shape
    C8 = p["hyper_w3"].shape[-1]
    n_iou = p["iou_w3"].shape[-1]
    args = (hs_t, p["hyper_w1"], p["hyper_b1"], p["hyper_w2"], p["hyper_b2"],
            p["hyper_w3"], p["hyper_b3"], p["iou_w1"], p["iou_b1"],
            p["iou_w2"], p["iou_b2"], p["iou_w3"], p["iou_b3"])
    vspec = pl.BlockSpec(memory_space=pltpu.MemorySpace.VMEM)
    return pl.pallas_call(
        functools.partial(_token_heads_kernel, n_tok),
        in_specs=[vspec] * len(args),
        out_specs=(vspec, vspec),
        out_shape=(jax.ShapeDtypeStruct((n_tok, B, C8), _F32),
                   jax.ShapeDtypeStruct((B, n_iou), _F32)),
        compiler_params=pltpu.CompilerParams(vmem_limit_bytes=_VMEM_LIMIT),
    )(*args)


# --------------------------------- forward ------------------------------------


def mask_decoder_hq_forward(p, image_embeddings, image_pe, sparse_prompt_embeddings,
                            dense_prompt_embeddings, multimask_output, hq_token_only,
                            interm_embeddings, out_embeddings, trans_token):
    B, C, H, W = image_embeddings.shape
    S = H * W
    C4, C8 = C // 4, C // 8
    n_tok = p["hyper_w1"].shape[0]                     # num_mask_tokens (incl. HQ)
    n_sam = n_tok - 1
    vit_dim = interm_embeddings.shape[-1]

    img_cf = image_embeddings.reshape(B, C, S)
    oe_cf = out_embeddings.reshape(B, C // 2, S)
    dense_cf = dense_prompt_embeddings.reshape(B, C, S)
    pos_cf = image_pe.reshape(1, C, S)                 # broadcast via index_map
    vit_cl = interm_embeddings.reshape(B, S, vit_dim)  # channels-last: no HBM transpose

    Ts, n_s = _pick_spatial_tile(S)
    grid_bs = (B, n_s)

    # (1) image_embeddings = image_embeddings + output_mlp(out_embeddings)   [fused, bf16]
    wargs = [p["om_w1"], p["om_b1"], p["om_w2"], p["om_b2"], p["om_w3"], p["om_b3"]]
    img_upd = _pcall(
        _outmlp_kernel, grid_bs,
        [pl.BlockSpec((1, C // 2, Ts), lambda b, s: (b, 0, s)),
         pl.BlockSpec((1, C, Ts), lambda b, s: (b, 0, s))] + [_wspec(a) for a in wargs],
        pl.BlockSpec((1, C, Ts), lambda b, s: (b, 0, s)),
        jax.ShapeDtypeStruct((B, C, S), _BF16),
        [oe_cf, img_cf] + wargs)

    # (2) hq_features = embedding_encoder_hf(img_upd) + compress_vit_feat_hf(vit)  [one kernel]
    hq_b2t = jnp.tile(p["enc2_b"], (4, 1)) + jnp.tile(p["cvf2_b"], (4, 1))
    wargs = [p["enc1_w"], p["enc1_b"], p["enc1_lnw"], p["enc1_lnb"], p["enc2_w"],
             p["cvf1_w"], p["cvf1_b"], p["cvf1_lnw"], p["cvf1_lnb"], p["cvf2_w"], hq_b2t]
    hq_ph = _pcall(
        functools.partial(_hq_fused_kernel, C4, C), grid_bs,
        [pl.BlockSpec((1, C, Ts), lambda b, s: (b, 0, s)),
         pl.BlockSpec((1, Ts, vit_dim), lambda b, s: (b, s, 0))] + [_wspec(a) for a in wargs],
        pl.BlockSpec((1, 4, 4 * C8, Ts), lambda b, s: (b, 0, 0, s)),
        jax.ShapeDtypeStruct((B, 4, 4 * C8, S), _BF16),
        [img_upd, vit_cl] + wargs)
    hq_cf = _unphase(hq_ph, H, W).reshape(B, C8, 16 * S)

    # (3) tokens = [trans_token ; hf_token ; sparse prompts]
    output_tokens = jnp.concatenate([trans_token[0].astype(_F32), p["hf_token"]], axis=0)
    tokens = jnp.concatenate(
        [jnp.broadcast_to(output_tokens[None], (B,) + output_tokens.shape),
         sparse_prompt_embeddings.astype(_F32)], axis=1)            # (B, Nt, C)
    Nt = tokens.shape[1]

    # (4) two-way transformer (stand-in), fully fused, packed weights, grid over batch
    t = p["trans"]
    wargs = [t["w"], t["b_row"], t["b_col"], t["w1"], t["b1"], t["w2"]]
    hs, src_cf = _pcall(
        functools.partial(_transformer_kernel, 1.0 / float(C) ** 0.5), (B,),
        [pl.BlockSpec((1, Nt, C), lambda b: (b, 0, 0)),
         pl.BlockSpec((1, C, S), lambda b: (b, 0, 0)),
         pl.BlockSpec((1, C, S), lambda b: (b, 0, 0)),
         pl.BlockSpec((1, C, S), lambda b: (0, 0, 0))] + [_wspec(a) for a in wargs],
        (pl.BlockSpec((1, Nt, C), lambda b: (b, 0, 0)),
         pl.BlockSpec((1, C, S), lambda b: (b, 0, 0))),
        (jax.ShapeDtypeStruct((B, Nt, C), _F32),
         jax.ShapeDtypeStruct((B, C, S), _BF16)),
        [tokens, img_upd, dense_cf, pos_cf] + wargs)

    # (5) output_upscaling(src)  [one fused kernel]
    up_b2t = jnp.tile(p["up2_b"], (4, 1))
    wargs = [p["up1_w"], p["up1_b"], p["up1_lnw"], p["up1_lnb"], p["up2_w"], up_b2t]
    up_ph = _pcall(
        functools.partial(_upscale_fused_kernel, C4), grid_bs,
        [pl.BlockSpec((1, C, Ts), lambda b, s: (b, 0, s))] + [_wspec(a) for a in wargs],
        pl.BlockSpec((1, 4, 4 * C8, Ts), lambda b, s: (b, 0, 0, s)),
        jax.ShapeDtypeStruct((B, 4, 4 * C8, S), _BF16),
        [src_cf] + wargs)
    up_sam_cf = _unphase(up_ph, H, W).reshape(B, C8, 16 * S)

    # (6) hypernetwork MLPs (stacked) + IoU head in one kernel
    hs_t = jnp.transpose(hs, (1, 0, 2))                             # (Nt, B, C)
    hyper_t, iou_pred = _run_token_heads(p, hs_t, n_tok)
    hyper_in = jnp.transpose(hyper_t, (1, 0, 2))                    # (B, n_tok, C//8)

    # (7) SAM / HQ token selection happens BEFORE the big mask matmul (skip dead rows)
    if multimask_output:
        iou_sel = iou_pred[:, 1:n_sam]
        iou_out = jnp.max(iou_sel, axis=1, keepdims=True)
        sam_idx = jnp.argmax(iou_sel, axis=1).astype(jnp.int32) + 1
    else:
        iou_out = iou_pred[:, 0:1]
        sam_idx = jnp.zeros((B,), jnp.int32)
    hyper_hq = hyper_in[:, n_sam:n_tok]                             # (B, 1, C//8)
    if hq_token_only:
        hyper_sel = hyper_hq
    else:
        hyper_sam = jnp.take_along_axis(hyper_in, sam_idx[:, None, None], axis=1)
        hyper_sel = jnp.concatenate([hyper_sam, hyper_hq], axis=1)  # (B, 2, C//8)
    nr = hyper_sel.shape[1]

    # (8) maskfeature 3x3 convs (in-kernel taps) + hq residual + mask matmuls, fused
    wargs = [p["mf1_w"], p["mf1_b"], p["mf1_lnw"], p["mf1_lnb"], p["mf2_w"], p["mf2_b"]]
    masks_flat = _pcall(
        functools.partial(_maskfeature_masks_kernel, bool(hq_token_only), 4 * W), (B,),
        [pl.BlockSpec((1, nr, C8), lambda b: (b, 0, 0)),
         pl.BlockSpec((1, C8, 16 * S), lambda b: (b, 0, 0)),
         pl.BlockSpec((1, C8, 16 * S), lambda b: (b, 0, 0))] + [_wspec(a) for a in wargs],
        pl.BlockSpec((1, 1, 16 * S), lambda b: (b, 0, 0)),
        jax.ShapeDtypeStruct((B, 1, 16 * S), _F32),
        [hyper_sel, up_sam_cf, hq_cf] + wargs)

    return masks_flat.reshape(B, 1, 4 * H, 4 * W), iou_out


# ------------------------------- params init ----------------------------------


def init_params(key, C, vit_dim, num_mask_tokens, iou_hidden, iou_out):
    C4, C8, C16 = C // 4, C // 8, C // 16
    keys = iter(jax.random.split(key, 40))
    nk = lambda: next(keys)
    w = lambda shape: (0.02 * jax.random.normal(nk(), shape)).astype(_F32)
    zeros = lambda shape: jnp.zeros(shape, _F32)
    ones = lambda shape: jnp.ones(shape, _F32)
    p = {}
    p["hf_token"] = w((1, C))
    # output_mlp: MLP(C//2, C//16, C, 3), channels-first (out, in) weights
    p["om_w1"] = w((C16, C // 2)); p["om_b1"] = zeros((C16, 1))
    p["om_w2"] = w((C16, C16));    p["om_b2"] = zeros((C16, 1))
    p["om_w3"] = w((C, C16));      p["om_b3"] = zeros((C, 1))
    # transformer stand-in (packed)
    p["trans"] = {
        "w": w((6, C, C)),                 # wq, wk, wv, wq2, wk2, wv2
        "b_row": zeros((4, C)),            # bq, bk2, bv2, b2
        "b_col": zeros((C, 3)),            # bk, bv, bq2
        "w1": w((C, 2 * C)), "b1": zeros((1, 2 * C)), "w2": w((2 * C, C)),
    }
    # output_upscaling: ConvT(C->C/4, fused 4-phase weight) + LN + GELU + ConvT(C/4->C/8) + GELU
    p["up1_w"] = w((4 * C4, C));   p["up1_b"] = zeros((C4, 1))
    p["up1_lnw"] = ones((C4, 1));  p["up1_lnb"] = zeros((C4, 1))
    p["up2_w"] = w((4 * C8, C4));  p["up2_b"] = zeros((C8, 1))
    # embedding_encoder_hf: ConvT(C->C/4) + LN + GELU + ConvT(C/4->C/8)
    p["enc1_w"] = w((4 * C4, C));  p["enc1_b"] = zeros((C4, 1))
    p["enc1_lnw"] = ones((C4, 1)); p["enc1_lnb"] = zeros((C4, 1))
    p["enc2_w"] = w((4 * C8, C4)); p["enc2_b"] = zeros((C8, 1))
    # compress_vit_feat_hf: ConvT(vit->C) + LN + GELU + ConvT(C->C/8)
    p["cvf1_w"] = w((4 * C, vit_dim)); p["cvf1_b"] = zeros((C, 1))
    p["cvf1_lnw"] = ones((C, 1));      p["cvf1_lnb"] = zeros((C, 1))
    p["cvf2_w"] = w((4 * C8, C));      p["cvf2_b"] = zeros((C8, 1))
    # embedding_maskfeature_hf: Conv3x3(C/8->C/4) + LN + GELU + Conv3x3(C/4->C/8), per-tap weights
    p["mf1_w"] = w((9, C4, C8));  p["mf1_b"] = zeros((C4, 1))
    p["mf1_lnw"] = ones((C4, 1)); p["mf1_lnb"] = zeros((C4, 1))
    p["mf2_w"] = w((9, C8, C4));  p["mf2_b"] = zeros((C8, 1))
    # hypernetwork MLPs, stacked (0..n-2 = SAM hyper MLPs, n-1 = hf_mlp)
    p["hyper_w1"] = w((num_mask_tokens, C, C));  p["hyper_b1"] = zeros((num_mask_tokens, 1, C))
    p["hyper_w2"] = w((num_mask_tokens, C, C));  p["hyper_b2"] = zeros((num_mask_tokens, 1, C))
    p["hyper_w3"] = w((num_mask_tokens, C, C8)); p["hyper_b3"] = zeros((num_mask_tokens, 1, C8))
    # IoU prediction head: MLP(C, iou_hidden, num_multimask+1, 3)
    p["iou_w1"] = w((C, iou_hidden));          p["iou_b1"] = zeros((1, iou_hidden))
    p["iou_w2"] = w((iou_hidden, iou_hidden)); p["iou_b2"] = zeros((1, iou_hidden))
    p["iou_w3"] = w((iou_hidden, iou_out));    p["iou_b3"] = zeros((1, iou_out))
    return p


# ----------------------------------- main --------------------------------------

if __name__ == "__main__":
    C = 32            # transformer_dim
    H = W = 8         # image-embedding spatial size
    B = 2             # batch
    NS = 3            # sparse prompt tokens
    VIT_DIM = 48      # small stand-in for the 768-dim ViT features
    NUM_MULTIMASK = 3
    NUM_MASK_TOKENS = NUM_MULTIMASK + 2      # 4 SAM mask tokens + 1 HQ token
    IOU_OUT = NUM_MULTIMASK + 1              # IoU head was built before the HQ token
    IOU_HIDDEN = 256

    key = jax.random.PRNGKey(0)
    ks = jax.random.split(key, 8)
    image_embeddings = jax.random.normal(ks[0], (B, C, H, W), jnp.float32)
    image_pe = jax.random.normal(ks[1], (1, C, H, W), jnp.float32)
    sparse_prompt = jax.random.normal(ks[2], (B, NS, C), jnp.float32)
    dense_prompt = jax.random.normal(ks[3], (B, C, H, W), jnp.float32)
    interm_embeddings = jax.random.normal(ks[4], (B, H, W, VIT_DIM), jnp.float32)
    out_embeddings = jax.random.normal(ks[5], (B, C // 2, H, W), jnp.float32)
    # iou token + 4 SAM mask tokens coming from the base decoder of the cascade
    trans_token = jax.random.normal(ks[6], (1, NUM_MULTIMASK + 2, C), jnp.float32)

    params = init_params(ks[7], C, VIT_DIM, NUM_MASK_TOKENS, IOU_HIDDEN, IOU_OUT)

    fwd = jax.jit(mask_decoder_hq_forward,
                  static_argnames=("multimask_output", "hq_token_only"))
    masks, iou_preds = fwd(params, image_embeddings, image_pe, sparse_prompt,
                           dense_prompt, multimask_output=True, hq_token_only=False,
                           interm_embeddings=interm_embeddings,
                           out_embeddings=out_embeddings, trans_token=trans_token)
    jax.block_until_ready((masks, iou_preds))

    assert masks.shape == (B, 1, 4 * H, 4 * W), masks.shape
    assert iou_preds.shape == (B, 1), iou_preds.shape
    assert bool(jnp.all(jnp.isfinite(masks))) and bool(jnp.all(jnp.isfinite(iou_preds)))
    print("KERNEL_OK")
</pallas_src>

<mosaic_0001>
module attributes {stable_mosaic.version = 11 : i64} {
  func.func @_outmlp_kernel(%arg0: i32, %arg1: i32, %arg2: memref<1x16x64xf32, #tpu.memory_space<vmem>>, %arg3: memref<1x32x64xf32, #tpu.memory_space<vmem>>, %arg4: memref<2x16xf32, #tpu.memory_space<vmem>>, %arg5: memref<2x1xf32, #tpu.memory_space<vmem>>, %arg6: memref<2x2xf32, #tpu.memory_space<vmem>>, %arg7: memref<2x1xf32, #tpu.memory_space<vmem>>, %arg8: memref<32x2xf32, #tpu.memory_space<vmem>>, %arg9: memref<32x1xf32, #tpu.memory_space<vmem>>, %arg10: memref<1x32x64xbf16, #tpu.memory_space<vmem>>) attributes {dimension_semantics = [#tpu.dimension_semantics<parallel>, #tpu.dimension_semantics<parallel>], iteration_bounds = array<i64: 2, 1>, scalar_prefetch = 0 : i64, scratch_operands = 0 : i64, tpu.core_type = #tpu.core_type<tc>, window_params = [{transform_indices = @transform_0, window_bounds = array<i64: 1, 16, 64>}, {transform_indices = @transform_1, window_bounds = array<i64: 1, 32, 64>}, {pipeline_mode = #tpu.pipeline_mode<synchronous>, transform_indices = @transform_2, window_bounds = array<i64: 2, 16>}, {pipeline_mode = #tpu.pipeline_mode<synchronous>, transform_indices = @transform_3, window_bounds = array<i64: 2, 1>}, {pipeline_mode = #tpu.pipeline_mode<synchronous>, transform_indices = @transform_4, window_bounds = array<i64: 2, 2>}, {pipeline_mode = #tpu.pipeline_mode<synchronous>, transform_indices = @transform_5, window_bounds = array<i64: 2, 1>}, {pipeline_mode = #tpu.pipeline_mode<synchronous>, transform_indices = @transform_6, window_bounds = array<i64: 32, 2>}, {pipeline_mode = #tpu.pipeline_mode<synchronous>, transform_indices = @transform_7, window_bounds = array<i64: 32, 1>}, {transform_indices = @transform_8, window_bounds = array<i64: 1, 32, 64>}]} {
    %c0 = arith.constant 0 : index
    %c0_0 = arith.constant 0 : index
    %c0_1 = arith.constant 0 : index
    %0 = vector.load %arg2[%c0, %c0_0, %c0_1] : memref<1x16x64xf32, #tpu.memory_space<vmem>>, vector<1x16x64xf32>
    %1 = vector.shape_cast %0 : vector<1x16x64xf32> to vector<16x64xf32>
    %c0_2 = arith.constant 0 : index
    %c0_3 = arith.constant 0 : index
    %2 = vector.load %arg4[%c0_2, %c0_3] : memref<2x16xf32, #tpu.memory_space<vmem>>, vector<2x16xf32>
    %3 = arith.truncf %2 : vector<2x16xf32> to vector<2x16xbf16>
    %4 = arith.truncf %1 : vector<16x64xf32> to vector<16x64xbf16>
    %cst = arith.constant dense<0.000000e+00> : vector<2x64xf32>
    %5 = tpu.matmul %3, %4, %cst {dimension_numbers = #tpu.dot_dimension_numbers<[1], [0], [0], [1], [0, 0, 1, 1], [], []>} : vector<2x16xbf16>, vector<16x64xbf16>, vector<2x64xf32> -> vector<2x64xf32>
    %c0_4 = arith.constant 0 : index
    %c0_5 = arith.constant 0 : index
    %6 = vector.load %arg5[%c0_4, %c0_5] : memref<2x1xf32, #tpu.memory_space<vmem>>, vector<2x1xf32>
    %7 = vector.broadcast %6 : vector<2x1xf32> to vector<2x64xf32>
    %8 = arith.addf %5, %7 : vector<2x64xf32>
    %cst_6 = arith.constant 0.000000e+00 : f32
    %9 = vector.broadcast %cst_6 : f32 to vector<2x64xf32>
    %10 = arith.maximumf %8, %9 : vector<2x64xf32>
    %c0_7 = arith.constant 0 : index
    %c0_8 = arith.constant 0 : index
    %11 = vector.load %arg6[%c0_7, %c0_8] : memref<2x2xf32, #tpu.memory_space<vmem>>, vector<2x2xf32>
    %12 = arith.truncf %11 : vector<2x2xf32> to vector<2x2xbf16>
    %13 = arith.truncf %10 : vector<2x64xf32> to vector<2x64xbf16>
    %cst_9 = arith.constant dense<0.000000e+00> : vector<2x64xf32>
    %14 = tpu.matmul %12, %13, %cst_9 {dimension_numbers = #tpu.dot_dimension_numbers<[1], [0], [0], [1], [0, 0, 1, 1], [], []>} : vector<2x2xbf16>, vector<2x64xbf16>, vector<2x64xf32> -> vector<2x64xf32>
    %c0_10 = arith.constant 0 : index
    %c0_11 = arith.constant 0 : index
    %15 = vector.load %arg7[%c0_10, %c0_11] : memref<2x1xf32, #tpu.memory_space<vmem>>, vector<2x1xf32>
    %16 = vector.broadcast %15 : vector<2x1xf32> to vector<2x64xf32>
    %17 = arith.addf %14, %16 : vector<2x64xf32>
    %cst_12 = arith.constant 0.000000e+00 : f32
    %18 = vector.broadcast %cst_12 : f32 to vector<2x64xf32>
    %19 = arith.maximumf %17, %18 : vector<2x64xf32>
    %c0_13 = arith.constant 0 : index
    %c0_14 = arith.constant 0 : index
    %c0_15 = arith.constant 0 : index
    %20 = vector.load %arg3[%c0_13, %c0_14, %c0_15] : memref<1x32x64xf32, #tpu.memory_space<vmem>>, vector<1x32x64xf32>
    %21 = vector.shape_cast %20 : vector<1x32x64xf32> to vector<32x64xf32>
    %c0_16 = arith.constant 0 : index
    %c0_17 = arith.constant 0 : index
    %22 = vector.load %arg8[%c0_16, %c0_17] : memref<32x2xf32, #tpu.memory_space<vmem>>, vector<32x2xf32>
    %23 = arith.truncf %22 : vector<32x2xf32> to vector<32x2xbf16>
    %24 = arith.truncf %19 : vector<2x64xf32> to vector<2x64xbf16>
    %cst_18 = arith.constant dense<0.000000e+00> : vector<32x64xf32>
    %25 = tpu.matmul %23, %24, %cst_18 {dimension_numbers = #tpu.dot_dimension_numbers<[1], [0], [0], [1], [0, 0, 1, 1], [], []>} : vector<32x2xbf16>, vector<2x64xbf16>, vector<32x64xf32> -> vector<32x64xf32>
    %26 = arith.addf %21, %25 : vector<32x64xf32>
    %c0_19 = arith.constant 0 : index
    %c0_20 = arith.constant 0 : index
    %27 = vector.load %arg9[%c0_19, %c0_20] : memref<32x1xf32, #tpu.memory_space<vmem>>, vector<32x1xf32>
    %28 = vector.broadcast %27 : vector<32x1xf32> to vector<32x64xf32>
    %29 = arith.addf %26, %28 : vector<32x64xf32>
    %30 = arith.truncf %29 : vector<32x64xf32> to vector<32x64xbf16>
    %c0_21 = arith.constant 0 : index
    %c0_22 = arith.constant 0 : index
    %c0_23 = arith.constant 0 : index
    %31 = vector.load %arg10[%c0_21, %c0_22, %c0_23] : memref<1x32x64xbf16, #tpu.memory_space<vmem>>, vector<1x32x64xbf16>
    %32 = vector.shape_cast %31 : vector<1x32x64xbf16> to vector<32x64xbf16>
    %33 = vector.shape_cast %30 : vector<32x64xbf16> to vector<1x32x64xbf16>
    tpu.vector_store %arg10[%c0_21, %c0_22, %c0_23], %33 {strides = array<i32>} : memref<1x32x64xbf16, #tpu.memory_space<vmem>>, vector<1x32x64xbf16>,
    return
  }
  func.func @transform_0(%arg0: i32, %arg1: i32) -> (i32, i32, i32) {
    %c0_i32 = arith.constant 0 : i32
    %c0_i32_0 = arith.constant 0 : i32
    return %arg0, %c0_i32, %arg1 : i32, i32, i32
  }
  func.func @transform_1(%arg0: i32, %arg1: i32) -> (i32, i32, i32) {
    %c0_i32 = arith.constant 0 : i32
    %c0_i32_0 = arith.constant 0 : i32
    return %arg0, %c0_i32, %arg1 : i32, i32, i32
  }
  func.func @transform_2(%arg0: i32, %arg1: i32) -> (i32, i32) {
    %c0_i32 = arith.constant 0 : i32
    %c0_i32_0 = arith.constant 0 : i32
    %c0_i32_1 = arith.constant 0 : i32
    return %c0_i32, %c0_i32_0 : i32, i32
  }
  func.func @transform_3(%arg0: i32, %arg1: i32) -> (i32, i32) {
    %c0_i32 = arith.constant 0 : i32
    %c0_i32_0 = arith.constant 0 : i32
    %c0_i32_1 = arith.constant 0 : i32
    return %c0_i32, %c0_i32_0 : i32, i32
  }
  func.func @transform_4(%arg0: i32, %arg1: i32) -> (i32, i32) {
    %c0_i32 = arith.constant 0 : i32
    %c0_i32_0 = arith.constant 0 : i32
    %c0_i32_1 = arith.constant 0 : i32
    return %c0_i32, %c0_i32_0 : i32, i32
  }
  func.func @transform_5(%arg0: i32, %arg1: i32) -> (i32, i32) {
    %c0_i32 = arith.constant 0 : i32
    %c0_i32_0 = arith.constant 0 : i32
    %c0_i32_1 = arith.constant 0 : i32
    return %c0_i32, %c0_i32_0 : i32, i32
  }
  func.func @transform_6(%arg0: i32, %arg1: i32) -> (i32, i32) {
    %c0_i32 = arith.constant 0 : i32
    %c0_i32_0 = arith.constant 0 : i32
    %c0_i32_1 = arith.constant 0 : i32
    return %c0_i32, %c0_i32_0 : i32, i32
  }
  func.func @transform_7(%arg0: i32, %arg1: i32) -> (i32, i32) {
    %c0_i32 = arith.constant 0 : i32
    %c0_i32_0 = arith.constant 0 : i32
    %c0_i32_1 = arith.constant 0 : i32
    return %c0_i32, %c0_i32_0 : i32, i32
  }
  func.func @transform_8(%arg0: i32, %arg1: i32) -> (i32, i32, i32) {
    %c0_i32 = arith.constant 0 : i32
    %c0_i32_0 = arith.constant 0 : i32
    return %arg0, %c0_i32, %arg1 : i32, i32, i32
  }
}

module attributes {stable_mosaic.version = 11 : i64} {
  func.func @_transformer_kernel(%arg0: i32, %arg1: memref<1x9x32xf32, #tpu.memory_space<vmem>>, %arg2: memref<1x32x64xbf16, #tpu.memory_space<vmem>>, %arg3: memref<1x32x64xf32, #tpu.memory_space<vmem>>, %arg4: memref<1x32x64xf32, #tpu.memory_space<vmem>>, %arg5: memref<6x32x32xf32, #tpu.memory_space<vmem>>, %arg6: memref<4x32xf32, #tpu.memory_space<vmem>>, %arg7: memref<32x3xf32, #tpu.memory_space<vmem>>, %arg8: memref<32x64xf32, #tpu.memory_space<vmem>>, %arg9: memref<1x64xf32, #tpu.memory_space<vmem>>, %arg10: memref<64x32xf32, #tpu.memory_space<vmem>>, %arg11: memref<1x9x32xf32, #tpu.memory_space<vmem>>, %arg12: memref<1x32x64xbf16, #tpu.memory_space<vmem>>) attributes {dimension_semantics = [#tpu.dimension_semantics<parallel>], iteration_bounds = array<i64: 2>, scalar_prefetch = 0 : i64, scratch_operands = 0 : i64, tpu.core_type = #tpu.core_type<tc>, window_params = [{transform_indices = @transform_0, window_bounds = array<i64: 1, 9, 32>}, {transform_indices = @transform_1, window_bounds = array<i64: 1, 32, 64>}, {transform_indices = @transform_2, window_bounds = array<i64: 1, 32, 64>}, {pipeline_mode = #tpu.pipeline_mode<synchronous>, transform_indices = @transform_3, window_bounds = array<i64: 1, 32, 64>}, {pipeline_mode = #tpu.pipeline_mode<synchronous>, transform_indices = @transform_4, window_bounds = array<i64: 6, 32, 32>}, {pipeline_mode = #tpu.pipeline_mode<synchronous>, transform_indices = @transform_5, window_bounds = array<i64: 4, 32>}, {pipeline_mode = #tpu.pipeline_mode<synchronous>, transform_indices = @transform_6, window_bounds = array<i64: 32, 3>}, {pipeline_mode = #tpu.pipeline_mode<synchronous>, transform_indices = @transform_7, window_bounds = array<i64: 32, 64>}, {pipeline_mode = #tpu.pipeline_mode<synchronous>, transform_indices = @transform_8, window_bounds = array<i64: 1, 64>}, {pipeline_mode = #tpu.pipeline_mode<synchronous>, transform_indices = @transform_9, window_bounds = array<i64: 64, 32>}, {transform_indices = @transform_10, window_bounds = array<i64: 1, 9, 32>}, {transform_indices = @transform_11, window_bounds = array<i64: 1, 32, 64>}]} {
    %c0 = arith.constant 0 : index
    %c0_0 = arith.constant 0 : index
    %c0_1 = arith.constant 0 : index
    %0 = vector.load %arg1[%c0, %c0_0, %c0_1] : memref<1x9x32xf32, #tpu.memory_space<vmem>>, vector<1x9x32xf32>
    %1 = vector.shape_cast %0 : vector<1x9x32xf32> to vector<9x32xf32>
    %c0_2 = arith.constant 0 : index
    %c0_3 = arith.constant 0 : index
    %c0_4 = arith.constant 0 : index
    %2 = vector.load %arg2[%c0_2, %c0_3, %c0_4] : memref<1x32x64xbf16, #tpu.memory_space<vmem>>, vector<1x32x64xbf16>
    %3 = vector.shape_cast %2 : vector<1x32x64xbf16> to vector<32x64xbf16>
    %4 = arith.extf %3 : vector<32x64xbf16> to vector<32x64xf32>
    %c0_5 = arith.constant 0 : index
    %c0_6 = arith.constant 0 : index
    %c0_7 = arith.constant 0 : index
    %5 = vector.load %arg3[%c0_5, %c0_6, %c0_7] : memref<1x32x64xf32, #tpu.memory_space<vmem>>, vector<1x32x64xf32>
    %6 = vector.shape_cast %5 : vector<1x32x64xf32> to vector<32x64xf32>
    %7 = arith.addf %4, %6 : vector<32x64xf32>
    %c0_8 = arith.constant 0 : index
    %c0_9 = arith.constant 0 : index
    %c0_10 = arith.constant 0 : index
    %8 = vector.load %arg4[%c0_8, %c0_9, %c0_10] : memref<1x32x64xf32, #tpu.memory_space<vmem>>, vector<1x32x64xf32>
    %9 = vector.shape_cast %8 : vector<1x32x64xf32> to vector<32x64xf32>
    %10 = arith.addf %7, %9 : vector<32x64xf32>
    %11 = arith.truncf %10 : vector<32x64xf32> to vector<32x64xbf16>
    %12 = arith.truncf %7 : vector<32x64xf32> to vector<32x64xbf16>
    %c0_11 = arith.constant 0 : index
    %c0_12 = arith.constant 0 : index
    %13 = vector.load %arg6[%c0_11, %c0_12] : memref<4x32xf32, #tpu.memory_space<vmem>>, vector<1x32xf32>
    %c1 = arith.constant 1 : index
    %c0_13 = arith.constant 0 : index
    %14 = vector.load %arg6[%c1, %c0_13] : memref<4x32xf32, #tpu.memory_space<vmem>>, vector<1x32xf32>
    %c2 = arith.constant 2 : index
    %c0_14 = arith.constant 0 : index
    %15 = vector.load %arg6[%c2, %c0_14] : memref<4x32xf32, #tpu.memory_space<vmem>>, vector<1x32xf32>
    %c3 = arith.constant 3 : index
    %c0_15 = arith.constant 0 : index
    %16 = vector.load %arg6[%c3, %c0_15] : memref<4x32xf32, #tpu.memory_space<vmem>>, vector<1x32xf32>
    %c0_16 = arith.constant 0 : index
    %c0_17 = arith.constant 0 : index
    %17 = vector.load %arg7[%c0_16, %c0_17] : memref<32x3xf32, #tpu.memory_space<vmem>>, vector<32x1xf32>
    %c0_18 = arith.constant 0 : index
    %c1_19 = arith.constant 1 : index
    %18 = vector.load %arg7[%c0_18, %c1_19] : memref<32x3xf32, #tpu.memory_space<vmem>>, vector<32x1xf32>
    %c0_20 = arith.constant 0 : index
    %c2_21 = arith.constant 2 : index
    %19 = vector.load %arg7[%c0_20, %c2_21] : memref<32x3xf32, #tpu.memory_space<vmem>>, vector<32x1xf32>
    %c0_22 = arith.constant 0 : index
    %c0_23 = arith.constant 0 : index
    %c0_24 = arith.constant 0 : index
    %20 = vector.load %arg5[%c0_22, %c0_23, %c0_24] : memref<6x32x32xf32, #tpu.memory_space<vmem>>, vector<1x32x32xf32>
    %21 = vector.shape_cast %20 : vector<1x32x32xf32> to vector<32x32xf32>
    %22 = arith.truncf %1 : vector<9x32xf32> to vector<9x32xbf16>
    %23 = arith.truncf %21 : vector<32x32xf32> to vector<32x32xbf16>
    %cst = arith.constant dense<0.000000e+00> : vector<9x32xf32>
    %24 = tpu.matmul %22, %23, %cst {dimension_numbers = #tpu.dot_dimension_numbers<[1], [0], [0], [1], [0, 0, 1, 1], [], []>} : vector<9x32xbf16>, vector<32x32xbf16>, vector<9x32xf32> -> vector<9x32xf32>
    %25 = vector.broadcast %13 : vector<1x32xf32> to vector<9x32xf32>
    %26 = arith.addf %24, %25 : vector<9x32xf32>
    %c1_25 = arith.constant 1 : index
    %c0_26 = arith.constant 0 : index
    %c0_27 = arith.constant 0 : index
    %27 = vector.load %arg5[%c1_25, %c0_26, %c0_27] : memref<6x32x32xf32, #tpu.memory_space<vmem>>, vector<1x32x32xf32>
    %28 = vector.shape_cast %27 : vector<1x32x32xf32> to vector<32x32xf32>
    %29 = arith.truncf %28 : vector<32x32xf32> to vector<32x32xbf16>
    %cst_28 = arith.constant dense<0.000000e+00> : vector<32x64xf32>
    %30 = tpu.matmul %29, %11, %cst_28 {dimension_numbers = #tpu.dot_dimension_numbers<[1], [0], [0], [1], [0, 0, 1, 1], [], []>} : vector<32x32xbf16>, vector<32x64xbf16>, vector<32x64xf32> -> vector<32x64xf32>
    %31 = vector.broadcast %17 : vector<32x1xf32> to vector<32x64xf32>
    %32 = arith.addf %30, %31 : vector<32x64xf32>
    %33 = arith.truncf %26 : vector<9x32xf32> to vector<9x32xbf16>
    %34 = arith.truncf %32 : vector<32x64xf32> to vector<32x64xbf16>
    %cst_29 = arith.constant dense<0.000000e+00> : vector<9x64xf32>
    %35 = tpu.matmul %33, %34, %cst_29 {dimension_numbers = #tpu.dot_dimension_numbers<[1], [0], [0], [1], [0, 0, 1, 1], [], []>} : vector<9x32xbf16>, vector<32x64xbf16>, vector<9x64xf32> -> vector<9x64xf32>
    %cst_30 = arith.constant 0.176776692 : f32
    %36 = vector.broadcast %cst_30 : f32 to vector<9x64xf32>
    %37 = arith.mulf %35, %36 : vector<9x64xf32>
    %cst_31 = arith.constant dense<0xFF800000> : vector<9xf32>
    %38 = vector.multi_reduction <maximumf>, %37, %cst_31 [1] : vector<9x64xf32> to vector<9xf32>
    %39 = vector.shape_cast %38 : vector<9xf32> to vector<9x1xf32>
    %40 = vector.broadcast %39 : vector<9x1xf32> to vector<9x64xf32>
    %41 = arith.subf %37, %40 : vector<9x64xf32>
    %42 = math.exp %41 : vector<9x64xf32>
    %cst_32 = arith.constant dense<0.000000e+00> : vector<9xf32>
    %43 = vector.multi_reduction <add>, %42, %cst_32 [1] : vector<9x64xf32> to vector<9xf32>
    %44 = vector.shape_cast %43 : vector<9xf32> to vector<9x1xf32>
    %45 = vector.broadcast %44 : vector<9x1xf32> to vector<9x64xf32>
    %46 = arith.divf %42, %45 : vector<9x64xf32>
    %c2_33 = arith.constant 2 : index
    %c0_34 = arith.constant 0 : index
    %c0_35 = arith.constant 0 : index
    %47 = vector.load %arg5[%c2_33, %c0_34, %c0_35] : memref<6x32x32xf32, #tpu.memory_space<vmem>>, vector<1x32x32xf32>
    %48 = vector.shape_cast %47 : vector<1x32x32xf32> to vector<32x32xf32>
    %49 = arith.truncf %48 : vector<32x32xf32> to vector<32x32xbf16>
    %cst_36 = arith.constant dense<0.000000e+00> : vector<32x64xf32>
    %50 = tpu.matmul %49, %12, %cst_36 {dimension_numbers = #tpu.dot_dimension_numbers<[1], [0], [0], [1], [0, 0, 1, 1], [], []>} : vector<32x32xbf16>, vector<32x64xbf16>, vector<32x64xf32> -> vector<32x64xf32>
    %51 = vector.broadcast %18 : vector<32x1xf32> to vector<32x64xf32>
    %52 = arith.addf %50, %51 : vector<32x64xf32>
    %53 = arith.truncf %46 : vector<9x64xf32> to vector<9x64xbf16>
    %54 = arith.truncf %52 : vector<32x64xf32> to vector<32x64xbf16>
    %cst_37 = arith.constant dense<0.000000e+00> : vector<9x32xf32>
    %55 = tpu.matmul %53, %54, %cst_37 {dimension_numbers = #tpu.dot_dimension_numbers<[1], [1], [0], [0], [0, 0, 1, 0], [], []>} : vector<9x64xbf16>, vector<32x64xbf16>, vector<9x32xf32> -> vector<9x32xf32>
    %56 = arith.addf %1, %55 : vector<9x32xf32>
    %c0_38 = arith.constant 0 : index
    %c0_39 = arith.constant 0 : index
    %57 = vector.load %arg8[%c0_38, %c0_39] : memref<32x64xf32, #tpu.memory_space<vmem>>, vector<32x64xf32>
    %58 = arith.truncf %56 : vector<9x32xf32> to vector<9x32xbf16>
    %59 = arith.truncf %57 : vector<32x64xf32> to vector<32x64xbf16>
    %cst_40 = arith.constant dense<0.000000e+00> : vector<9x64xf32>
    %60 = tpu.matmul %58, %59, %cst_40 {dimension_numbers = #tpu.dot_dimension_numbers<[1], [0], [0], [1], [0, 0, 1, 1], [], []>} : vector<9x32xbf16>, vector<32x64xbf16>, vector<9x64xf32> -> vector<9x64xf32>
    %c0_41 = arith.constant 0 : index
    %c0_42 = arith.constant 0 : index
    %61 = vector.load %arg9[%c0_41, %c0_42] : memref<1x64xf32, #tpu.memory_space<vmem>>, vector<1x64xf32>
    %62 = vector.broadcast %61 : vector<1x64xf32> to vector<9x64xf32>
    %63 = arith.addf %60, %62 : vector<9x64xf32>
    %cst_43 = arith.constant 0.000000e+00 : f32
    %64 = vector.broadcast %cst_43 : f32 to vector<9x64xf32>
    %65 = arith.maximumf %63, %64 : vector<9x64xf32>
    %c0_44 = arith.constant 0 : index
    %c0_45 = arith.constant 0 : index
    %66 = vector.load %arg10[%c0_44, %c0_45] : memref<64x32xf32, #tpu.memory_space<vmem>>, vector<64x32xf32>
    %67 = arith.truncf %65 : vector<9x64xf32> to vector<9x64xbf16>
    %68 = arith.truncf %66 : vector<64x32xf32> to vector<64x32xbf16>
    %cst_46 = arith.constant dense<0.000000e+00> : vector<9x32xf32>
    %69 = tpu.matmul %67, %68, %cst_46 {dimension_numbers = #tpu.dot_dimension_numbers<[1], [0], [0], [1], [0, 0, 1, 1], [], []>} : vector<9x64xbf16>, vector<64x32xbf16>, vector<9x32xf32> -> vector<9x32xf32>
    %70 = arith.addf %56, %69 : vector<9x32xf32>
    %71 = vector.broadcast %16 : vector<1x32xf32> to vector<9x32xf32>
    %72 = arith.addf %70, %71 : vector<9x32xf32>
    %c0_47 = arith.constant 0 : index
    %c0_48 = arith.constant 0 : index
    %c0_49 = arith.constant 0 : index
    %73 = vector.load %arg11[%c0_47, %c0_48, %c0_49] : memref<1x9x32xf32, #tpu.memory_space<vmem>>, vector<1x9x32xf32>
    %74 = vector.shape_cast %73 : vector<1x9x32xf32> to vector<9x32xf32>
    %75 = vector.shape_cast %72 : vector<9x32xf32> to vector<1x9x32xf32>
    tpu.vector_store %arg11[%c0_47, %c0_48, %c0_49], %75 {strides = array<i32>} : memref<1x9x32xf32, #tpu.memory_space<vmem>>, vector<1x9x32xf32>,
    %c3_50 = arith.constant 3 : index
    %c0_51 = arith.constant 0 : index
    %c0_52 = arith.constant 0 : index
    %76 = vector.load %arg5[%c3_50, %c0_51, %c0_52] : memref<6x32x32xf32, #tpu.memory_space<vmem>>, vector<1x32x32xf32>
    %77 = vector.shape_cast %76 : vector<1x32x32xf32> to vector<32x32xf32>
    %78 = arith.truncf %77 : vector<32x32xf32> to vector<32x32xbf16>
    %cst_53 = arith.constant dense<0.000000e+00> : vector<32x64xf32>
    %79 = tpu.matmul %78, %11, %cst_53 {dimension_numbers = #tpu.dot_dimension_numbers<[1], [0], [0], [1], [0, 0, 1, 1], [], []>} : vector<32x32xbf16>, vector<32x64xbf16>, vector<32x64xf32> -> vector<32x64xf32>
    %80 = vector.broadcast %19 : vector<32x1xf32> to vector<32x64xf32>
    %81 = arith.addf %79, %80 : vector<32x64xf32>
    %c4 = arith.constant 4 : index
    %c0_54 = arith.constant 0 : index
    %c0_55 = arith.constant 0 : index
    %82 = vector.load %arg5[%c4, %c0_54, %c0_55] : memref<6x32x32xf32, #tpu.memory_space<vmem>>, vector<1x32x32xf32>
    %83 = vector.shape_cast %82 : vector<1x32x32xf32> to vector<32x32xf32>
    %84 = arith.truncf %72 : vector<9x32xf32> to vector<9x32xbf16>
    %85 = arith.truncf %83 : vector<32x32xf32> to vector<32x32xbf16>
    %cst_56 = arith.constant dense<0.000000e+00> : vector<9x32xf32>
    %86 = tpu.matmul %84, %85, %cst_56 {dimension_numbers = #tpu.dot_dimension_numbers<[1], [0], [0], [1], [0, 0, 1, 1], [], []>} : vector<9x32xbf16>, vector<32x32xbf16>, vector<9x32xf32> -> vector<9x32xf32>
    %87 = vector.broadcast %14 : vector<1x32xf32> to vector<9x32xf32>
    %88 = arith.addf %86, %87 : vector<9x32xf32>
    %c5 = arith.constant 5 : index
    %c0_57 = arith.constant 0 : index
    %c0_58 = arith.constant 0 : index
    %89 = vector.load %arg5[%c5, %c0_57, %c0_58] : memref<6x32x32xf32, #tpu.memory_space<vmem>>, vector<1x32x32xf32>
    %90 = vector.shape_cast %89 : vector<1x32x32xf32> to vector<32x32xf32>
    %91 = arith.truncf %72 : vector<9x32xf32> to vector<9x32xbf16>
    %92 = arith.truncf %90 : vector<32x32xf32> to vector<32x32xbf16>
    %cst_59 = arith.constant dense<0.000000e+00> : vector<9x32xf32>
    %93 = tpu.matmul %91, %92, %cst_59 {dimension_numbers = #tpu.dot_dimension_numbers<[1], [0], [0], [1], [0, 0, 1, 1], [], []>} : vector<9x32xbf16>, vector<32x32xbf16>, vector<9x32xf32> -> vector<9x32xf32>
    %94 = vector.broadcast %15 : vector<1x32xf32> to vector<9x32xf32>
    %95 = arith.addf %93, %94 : vector<9x32xf32>
    %96 = arith.truncf %88 : vector<9x32xf32> to vector<9x32xbf16>
    %97 = arith.truncf %81 : vector<32x64xf32> to vector<32x64xbf16>
    %cst_60 = arith.constant dense<0.000000e+00> : vector<9x64xf32>
    %98 = tpu.matmul %96, %97, %cst_60 {dimension_numbers = #tpu.dot_dimension_numbers<[1], [0], [0], [1], [0, 0, 1, 1], [], []>} : vector<9x32xbf16>, vector<32x64xbf16>, vector<9x64xf32> -> vector<9x64xf32>
    %cst_61 = arith.constant 0.176776692 : f32
    %99 = vector.broadcast %cst_61 : f32 to vector<9x64xf32>
    %100 = arith.mulf %98, %99 : vector<9x64xf32>
    %cst_62 = arith.constant dense<0xFF800000> : vector<64xf32>
    %101 = vector.multi_reduction <maximumf>, %100, %cst_62 [0] : vector<9x64xf32> to vector<64xf32>
    %102 = vector.shape_cast %101 : vector<64xf32> to vector<1x64xf32>
    %103 = vector.broadcast %102 : vector<1x64xf32> to vector<9x64xf32>
    %104 = arith.subf %100, %103 : vector<9x64xf32>
    %105 = math.exp %104 : vector<9x64xf32>
    %cst_63 = arith.constant dense<0.000000e+00> : vector<64xf32>
    %106 = vector.multi_reduction <add>, %105, %cst_63 [0] : vector<9x64xf32> to vector<64xf32>
    %107 = vector.shape_cast %106 : vector<64xf32> to vector<1x64xf32>
    %108 = vector.broadcast %107 : vector<1x64xf32> to vector<9x64xf32>
    %109 = arith.divf %105, %108 : vector<9x64xf32>
    %110 = tpu.transpose %95, [1, 0] : vector<9x32xf32> -> vector<32x9xf32>
    %111 = arith.truncf %110 : vector<32x9xf32> to vector<32x9xbf16>
    %112 = arith.truncf %109 : vector<9x64xf32> to vector<9x64xbf16>
    %cst_64 = arith.constant dense<0.000000e+00> : vector<32x64xf32>
    %113 = tpu.matmul %111, %112, %cst_64 {dimension_numbers = #tpu.dot_dimension_numbers<[1], [0], [0], [1], [0, 0, 1, 1], [], []>} : vector<32x9xbf16>, vector<9x64xbf16>, vector<32x64xf32> -> vector<32x64xf32>
    %114 = arith.addf %7, %113 : vector<32x64xf32>
    %115 = arith.truncf %114 : vector<32x64xf32> to vector<32x64xbf16>
    %c0_65 = arith.constant 0 : index
    %c0_66 = arith.constant 0 : index
    %c0_67 = arith.constant 0 : index
    %116 = vector.load %arg12[%c0_65, %c0_66, %c0_67] : memref<1x32x64xbf16, #tpu.memory_space<vmem>>, vector<1x32x64xbf16>
    %117 = vector.shape_cast %116 : vector<1x32x64xbf16> to vector<32x64xbf16>
    %118 = vector.shape_cast %115 : vector<32x64xbf16> to vector<1x32x64xbf16>
    tpu.vector_store %arg12[%c0_65, %c0_66, %c0_67], %118 {strides = array<i32>} : memref<1x32x64xbf16, #tpu.memory_space<vmem>>, vector<1x32x64xbf16>,
    return
  }
  func.func @transform_0(%arg0: i32) -> (i32, i32, i32) {
    %c0_i32 = arith.constant 0 : i32
    %c0_i32_0 = arith.constant 0 : i32
    %c0_i32_1 = arith.constant 0 : i32
    return %arg0, %c0_i32, %c0_i32_0 : i32, i32, i32
  }
  func.func @transform_1(%arg0: i32) -> (i32, i32, i32) {
    %c0_i32 = arith.constant 0 : i32
    %c0_i32_0 = arith.constant 0 : i32
    %c0_i32_1 = arith.constant 0 : i32
    return %arg0, %c0_i32, %c0_i32_0 : i32, i32, i32
  }
  func.func @transform_2(%arg0: i32) -> (i32, i32, i32) {
    %c0_i32 = arith.constant 0 : i32
    %c0_i32_0 = arith.constant 0 : i32
    %c0_i32_1 = arith.constant 0 : i32
    return %arg0, %c0_i32, %c0_i32_0 : i32, i32, i32
  }
  func.func @transform_3(%arg0: i32) -> (i32, i32, i32) {
    %c0_i32 = arith.constant 0 : i32
    %c0_i32_0 = arith.constant 0 : i32
    %c0_i32_1 = arith.constant 0 : i32
    %c0_i32_2 = arith.constant 0 : i32
    return %c0_i32, %c0_i32_0, %c0_i32_1 : i32, i32, i32
  }
  func.func @transform_4(%arg0: i32) -> (i32, i32, i32) {
    %c0_i32 = arith.constant 0 : i32
    %c0_i32_0 = arith.constant 0 : i32
    %c0_i32_1 = arith.constant 0 : i32
    %c0_i32_2 = arith.constant 0 : i32
    return %c0_i32, %c0_i32_0, %c0_i32_1 : i32, i32, i32
  }
  func.func @transform_5(%arg0: i32) -> (i32, i32) {
    %c0_i32 = arith.constant 0 : i32
    %c0_i32_0 = arith.constant 0 : i32
    %c0_i32_1 = arith.constant 0 : i32
    return %c0_i32, %c0_i32_0 : i32, i32
  }
  func.func @transform_6(%arg0: i32) -> (i32, i32) {
    %c0_i32 = arith.constant 0 : i32
    %c0_i32_0 = arith.constant 0 : i32
    %c0_i32_1 = arith.constant 0 : i32
    return %c0_i32, %c0_i32_0 : i32, i32
  }
  func.func @transform_7(%arg0: i32) -> (i32, i32) {
    %c0_i32 = arith.constant 0 : i32
    %c0_i32_0 = arith.constant 0 : i32
    %c0_i32_1 = arith.constant 0 : i32
    return %c0_i32, %c0_i32_0 : i32, i32
  }
  func.func @transform_8(%arg0: i32) -> (i32, i32) {
    %c0_i32 = arith.constant 0 : i32
    %c0_i32_0 = arith.constant 0 : i32
    %c0_i32_1 = arith.constant 0 : i32
    return %c0_i32, %c0_i32_0 : i32, i32
  }
  func.func @transform_9(%arg0: i32) -> (i32, i32) {
    %c0_i32 = arith.constant 0 : i32
    %c0_i32_0 = arith.constant 0 : i32
    %c0_i32_1 = arith.constant 0 : i32
    return %c0_i32, %c0_i32_0 : i32, i32
  }
  func.func @transform_10(%arg0: i32) -> (i32, i32, i32) {
    %c0_i32 = arith.constant 0 : i32
    %c0_i32_0 = arith.constant 0 : i32
    %c0_i32_1 = arith.constant 0 : i32
    return %arg0, %c0_i32, %c0_i32_0 : i32, i32, i32
  }
  func.func @transform_11(%arg0: i32) -> (i32, i32, i32) {
    %c0_i32 = arith.constant 0 : i32
    %c0_i32_0 = arith.constant 0 : i32
    %c0_i32_1 = arith.constant 0 : i32
    return %arg0, %c0_i32, %c0_i32_0 : i32, i32, i32
  }
}

module attributes {stable_mosaic.version = 11 : i64} {
  func.func @_token_heads_kernel(%arg0: memref<9x2x32xf32, #tpu.memory_space<vmem>>, %arg1: memref<5x32x32xf32, #tpu.memory_space<vmem>>, %arg2: memref<5x1x32xf32, #tpu.memory_space<vmem>>, %arg3: memref<5x32x32xf32, #tpu.memory_space<vmem>>, %arg4: memref<5x1x32xf32, #tpu.memory_space<vmem>>, %arg5: memref<5x32x4xf32, #tpu.memory_space<vmem>>, %arg6: memref<5x1x4xf32, #tpu.memory_space<vmem>>, %arg7: memref<32x256xf32, #tpu.memory_space<vmem>>, %arg8: memref<1x256xf32, #tpu.memory_space<vmem>>, %arg9: memref<256x256xf32, #tpu.memory_space<vmem>>, %arg10: memref<1x256xf32, #tpu.memory_space<vmem>>, %arg11: memref<256x4xf32, #tpu.memory_space<vmem>>, %arg12: memref<1x4xf32, #tpu.memory_space<vmem>>, %arg13: memref<5x2x4xf32, #tpu.memory_space<vmem>>, %arg14: memref<2x4xf32, #tpu.memory_space<vmem>>) attributes {dimension_semantics = [], scalar_prefetch = 0 : i64, scratch_operands = 0 : i64, tpu.core_type = #tpu.core_type<tc>} {
    %c1 = arith.constant 1 : index
    %c0 = arith.constant 0 : index
    %c0_0 = arith.constant 0 : index
    %0 = vector.load %arg0[%c1, %c0, %c0_0] : memref<9x2x32xf32, #tpu.memory_space<vmem>>, vector<1x2x32xf32>
    %1 = vector.shape_cast %0 : vector<1x2x32xf32> to vector<2x32xf32>
    %c0_1 = arith.constant 0 : index
    %c0_2 = arith.constant 0 : index
    %c0_3 = arith.constant 0 : index
    %2 = vector.load %arg1[%c0_1, %c0_2, %c0_3] : memref<5x32x32xf32, #tpu.memory_space<vmem>>, vector<1x32x32xf32>
    %3 = vector.shape_cast %2 : vector<1x32x32xf32> to vector<32x32xf32>
    %4 = arith.truncf %1 : vector<2x32xf32> to vector<2x32xbf16>
    %5 = arith.truncf %3 : vector<32x32xf32> to vector<32x32xbf16>
    %cst = arith.constant dense<0.000000e+00> : vector<2x32xf32>
    %6 = tpu.matmul %4, %5, %cst {dimension_numbers = #tpu.dot_dimension_numbers<[1], [0], [0], [1], [0, 0, 1, 1], [], []>} : vector<2x32xbf16>, vector<32x32xbf16>, vector<2x32xf32> -> vector<2x32xf32>
    %c0_4 = arith.constant 0 : index
    %c0_5 = arith.constant 0 : index
    %c0_6 = arith.constant 0 : index
    %7 = vector.load %arg2[%c0_4, %c0_5, %c0_6] : memref<5x1x32xf32, #tpu.memory_space<vmem>>, vector<1x1x32xf32>
    %8 = vector.shape_cast %7 : vector<1x1x32xf32> to vector<1x32xf32>
    %9 = vector.broadcast %8 : vector<1x32xf32> to vector<2x32xf32>
    %10 = arith.addf %6, %9 : vector<2x32xf32>
    %cst_7 = arith.constant 0.000000e+00 : f32
    %11 = vector.broadcast %cst_7 : f32 to vector<2x32xf32>
    %12 = arith.maximumf %10, %11 : vector<2x32xf32>
    %c0_8 = arith.constant 0 : index
    %c0_9 = arith.constant 0 : index
    %c0_10 = arith.constant 0 : index
    %13 = vector.load %arg3[%c0_8, %c0_9, %c0_10] : memref<5x32x32xf32, #tpu.memory_space<vmem>>, vector<1x32x32xf32>
    %14 = vector.shape_cast %13 : vector<1x32x32xf32> to vector<32x32xf32>
    %15 = arith.truncf %12 : vector<2x32xf32> to vector<2x32xbf16>
    %16 = arith.truncf %14 : vector<32x32xf32> to vector<32x32xbf16>
    %cst_11 = arith.constant dense<0.000000e+00> : vector<2x32xf32>
    %17 = tpu.matmul %15, %16, %cst_11 {dimension_numbers = #tpu.dot_dimension_numbers<[1], [0], [0], [1], [0, 0, 1, 1], [], []>} : vector<2x32xbf16>, vector<32x32xbf16>, vector<2x32xf32> -> vector<2x32xf32>
    %c0_12 = arith.constant 0 : index
    %c0_13 = arith.constant 0 : index
    %c0_14 = arith.constant 0 : index
    %18 = vector.load %arg4[%c0_12, %c0_13, %c0_14] : memref<5x1x32xf32, #tpu.memory_space<vmem>>, vector<1x1x32xf32>
    %19 = vector.shape_cast %18 : vector<1x1x32xf32> to vector<1x32xf32>
    %20 = vector.broadcast %19 : vector<1x32xf32> to vector<2x32xf32>
    %21 = arith.addf %17, %20 : vector<2x32xf32>
    %cst_15 = arith.constant 0.000000e+00 : f32
    %22 = vector.broadcast %cst_15 : f32 to vector<2x32xf32>
    %23 = arith.maximumf %21, %22 : vector<2x32xf32>
    %c0_16 = arith.constant 0 : index
    %c0_17 = arith.constant 0 : index
    %c0_18 = arith.constant 0 : index
    %24 = vector.load %arg5[%c0_16, %c0_17, %c0_18] : memref<5x32x4xf32, #tpu.memory_space<vmem>>, vector<1x32x4xf32>
    %25 = vector.shape_cast %24 : vector<1x32x4xf32> to vector<32x4xf32>
    %26 = arith.truncf %23 : vector<2x32xf32> to vector<2x32xbf16>
    %27 = arith.truncf %25 : vector<32x4xf32> to vector<32x4xbf16>
    %cst_19 = arith.constant dense<0.000000e+00> : vector<2x4xf32>
    %28 = tpu.matmul %26, %27, %cst_19 {dimension_numbers = #tpu.dot_dimension_numbers<[1], [0], [0], [1], [0, 0, 1, 1], [], []>} : vector<2x32xbf16>, vector<32x4xbf16>, vector<2x4xf32> -> vector<2x4xf32>
    %c0_20 = arith.constant 0 : index
    %c0_21 = arith.constant 0 : index
    %c0_22 = arith.constant 0 : index
    %29 = vector.load %arg6[%c0_20, %c0_21, %c0_22] : memref<5x1x4xf32, #tpu.memory_space<vmem>>, vector<1x1x4xf32>
    %30 = vector.shape_cast %29 : vector<1x1x4xf32> to vector<1x4xf32>
    %31 = vector.broadcast %30 : vector<1x4xf32> to vector<2x4xf32>
    %32 = arith.addf %28, %31 : vector<2x4xf32>
    %c0_23 = arith.constant 0 : index
    %c0_24 = arith.constant 0 : index
    %c0_25 = arith.constant 0 : index
    %33 = vector.load %arg13[%c0_23, %c0_24, %c0_25] : memref<5x2x4xf32, #tpu.memory_space<vmem>>, vector<1x2x4xf32>
    %34 = vector.shape_cast %33 : vector<1x2x4xf32> to vector<2x4xf32>
    %35 = vector.shape_cast %32 : vector<2x4xf32> to vector<1x2x4xf32>
    tpu.vector_store %arg13[%c0_23, %c0_24, %c0_25], %35 {strides = array<i32>} : memref<5x2x4xf32, #tpu.memory_space<vmem>>, vector<1x2x4xf32>,
    %c2 = arith.constant 2 : index
    %c0_26 = arith.constant 0 : index
    %c0_27 = arith.constant 0 : index
    %36 = vector.load %arg0[%c2, %c0_26, %c0_27] : memref<9x2x32xf32, #tpu.memory_space<vmem>>, vector<1x2x32xf32>
    %37 = vector.shape_cast %36 : vector<1x2x32xf32> to vector<2x32xf32>
    %c1_28 = arith.constant 1 : index
    %c0_29 = arith.constant 0 : index
    %c0_30 = arith.constant 0 : index
    %38 = vector.load %arg1[%c1_28, %c0_29, %c0_30] : memref<5x32x32xf32, #tpu.memory_space<vmem>>, vector<1x32x32xf32>
    %39 = vector.shape_cast %38 : vector<1x32x32xf32> to vector<32x32xf32>
    %40 = arith.truncf %37 : vector<2x32xf32> to vector<2x32xbf16>
    %41 = arith.truncf %39 : vector<32x32xf32> to vector<32x32xbf16>
    %cst_31 = arith.constant dense<0.000000e+00> : vector<2x32xf32>
    %42 = tpu.matmul %40, %41, %cst_31 {dimension_numbers = #tpu.dot_dimension_numbers<[1], [0], [0], [1], [0, 0, 1, 1], [], []>} : vector<2x32xbf16>, vector<32x32xbf16>, vector<2x32xf32> -> vector<2x32xf32>
    %c1_32 = arith.constant 1 : index
    %c0_33 = arith.constant 0 : index
    %c0_34 = arith.constant 0 : index
    %43 = vector.load %arg2[%c1_32, %c0_33, %c0_34] : memref<5x1x32xf32, #tpu.memory_space<vmem>>, vector<1x1x32xf32>
    %44 = vector.shape_cast %43 : vector<1x1x32xf32> to vector<1x32xf32>
    %45 = vector.broadcast %44 : vector<1x32xf32> to vector<2x32xf32>
    %46 = arith.addf %42, %45 : vector<2x32xf32>
    %cst_35 = arith.constant 0.000000e+00 : f32
    %47 = vector.broadcast %cst_35 : f32 to vector<2x32xf32>
    %48 = arith.maximumf %46, %47 : vector<2x32xf32>
    %c1_36 = arith.constant 1 : index
    %c0_37 = arith.constant 0 : index
    %c0_38 = arith.constant 0 : index
    %49 = vector.load %arg3[%c1_36, %c0_37, %c0_38] : memref<5x32x32xf32, #tpu.memory_space<vmem>>, vector<1x32x32xf32>
    %50 = vector.shape_cast %49 : vector<1x32x32xf32> to vector<32x32xf32>
    %51 = arith.truncf %48 : vector<2x32xf32> to vector<2x32xbf16>
    %52 = arith.truncf %50 : vector<32x32xf32> to vector<32x32xbf16>
    %cst_39 = arith.constant dense<0.000000e+00> : vector<2x32xf32>
    %53 = tpu.matmul %51, %52, %cst_39 {dimension_numbers = #tpu.dot_dimension_numbers<[1], [0], [0], [1], [0, 0, 1, 1], [], []>} : vector<2x32xbf16>, vector<32x32xbf16>, vector<2x32xf32> -> vector<2x32xf32>
    %c1_40 = arith.constant 1 : index
    %c0_41 = arith.constant 0 : index
    %c0_42 = arith.constant 0 : index
    %54 = vector.load %arg4[%c1_40, %c0_41, %c0_42] : memref<5x1x32xf32, #tpu.memory_space<vmem>>, vector<1x1x32xf32>
    %55 = vector.shape_cast %54 : vector<1x1x32xf32> to vector<1x32xf32>
    %56 = vector.broadcast %55 : vector<1x32xf32> to vector<2x32xf32>
    %57 = arith.addf %53, %56 : vector<2x32xf32>
    %cst_43 = arith.constant 0.000000e+00 : f32
    %58 = vector.broadcast %cst_43 : f32 to vector<2x32xf32>
    %59 = arith.maximumf %57, %58 : vector<2x32xf32>
    %c1_44 = arith.constant 1 : index
    %c0_45 = arith.constant 0 : index
    %c0_46 = arith.constant 0 : index
    %60 = vector.load %arg5[%c1_44, %c0_45, %c0_46] : memref<5x32x4xf32, #tpu.memory_space<vmem>>, vector<1x32x4xf32>
    %61 = vector.shape_cast %60 : vector<1x32x4xf32> to vector<32x4xf32>
    %62 = arith.truncf %59 : vector<2x32xf32> to vector<2x32xbf16>
    %63 = arith.truncf %61 : vector<32x4xf32> to vector<32x4xbf16>
    %cst_47 = arith.constant dense<0.000000e+00> : vector<2x4xf32>
    %64 = tpu.matmul %62, %63, %cst_47 {dimension_numbers = #tpu.dot_dimension_numbers<[1], [0], [0], [1], [0, 0, 1, 1], [], []>} : vector<2x32xbf16>, vector<32x4xbf16>, vector<2x4xf32> -> vector<2x4xf32>
    %c1_48 = arith.constant 1 : index
    %c0_49 = arith.constant 0 : index
    %c0_50 = arith.constant 0 : index
    %65 = vector.load %arg6[%c1_48, %c0_49, %c0_50] : memref<5x1x4xf32, #tpu.memory_space<vmem>>, vector<1x1x4xf32>
    %66 = vector.shape_cast %65 : vector<1x1x4xf32> to vector<1x4xf32>
    %67 = vector.broadcast %66 : vector<1x4xf32> to vector<2x4xf32>
    %68 = arith.addf %64, %67 : vector<2x4xf32>
    %c1_51 = arith.constant 1 : index
    %c0_52 = arith.constant 0 : index
    %c0_53 = arith.constant 0 : index
    %69 = vector.load %arg13[%c1_51, %c0_52, %c0_53] : memref<5x2x4xf32, #tpu.memory_space<vmem>>, vector<1x2x4xf32>
    %70 = vector.shape_cast %69 : vector<1x2x4xf32> to vector<2x4xf32>
    %71 = vector.shape_cast %68 : vector<2x4xf32> to vector<1x2x4xf32>
    tpu.vector_store %arg13[%c1_51, %c0_52, %c0_53], %71 {strides = array<i32>} : memref<5x2x4xf32, #tpu.memory_space<vmem>>, vector<1x2x4xf32>,
    %c3 = arith.constant 3 : index
    %c0_54 = arith.constant 0 : index
    %c0_55 = arith.constant 0 : index
    %72 = vector.load %arg0[%c3, %c0_54, %c0_55] : memref<9x2x32xf32, #tpu.memory_space<vmem>>, vector<1x2x32xf32>
    %73 = vector.shape_cast %72 : vector<1x2x32xf32> to vector<2x32xf32>
    %c2_56 = arith.constant 2 : index
    %c0_57 = arith.constant 0 : index
    %c0_58 = arith.constant 0 : index
    %74 = vector.load %arg1[%c2_56, %c0_57, %c0_58] : memref<5x32x32xf32, #tpu.memory_space<vmem>>, vector<1x32x32xf32>
    %75 = vector.shape_cast %74 : vector<1x32x32xf32> to vector<32x32xf32>
    %76 = arith.truncf %73 : vector<2x32xf32> to vector<2x32xbf16>
    %77 = arith.truncf %75 : vector<32x32xf32> to vector<32x32xbf16>
    %cst_59 = arith.constant dense<0.000000e+00> : vector<2x32xf32>
    %78 = tpu.matmul %76, %77, %cst_59 {dimension_numbers = #tpu.dot_dimension_numbers<[1], [0], [0], [1], [0, 0, 1, 1], [], []>} : vector<2x32xbf16>, vector<32x32xbf16>, vector<2x32xf32> -> vector<2x32xf32>
    %c2_60 = arith.constant 2 : index
    %c0_61 = arith.constant 0 : index
    %c0_62 = arith.constant 0 : index
    %79 = vector.load %arg2[%c2_60, %c0_61, %c0_62] : memref<5x1x32xf32, #tpu.memory_space<vmem>>, vector<1x1x32xf32>
    %80 = vector.shape_cast %79 : vector<1x1x32xf32> to vector<1x32xf32>
    %81 = vector.broadcast %80 : vector<1x32xf32> to vector<2x32xf32>
    %82 = arith.addf %78, %81 : vector<2x32xf32>
    %cst_63 = arith.constant 0.000000e+00 : f32
    %83 = vector.broadcast %cst_63 : f32 to vector<2x32xf32>
    %84 = arith.maximumf %82, %83 : vector<2x32xf32>
    %c2_64 = arith.constant 2 : index
    %c0_65 = arith.constant 0 : index
    %c0_66 = arith.constant 0 : index
    %85 = vector.load %arg3[%c2_64, %c0_65, %c0_66] : memref<5x32x32xf32, #tpu.memory_space<vmem>>, vector<1x32x32xf32>
    %86 = vector.shape_cast %85 : vector<1x32x32xf32> to vector<32x32xf32>
    %87 = arith.truncf %84 : vector<2x32xf32> to vector<2x32xbf16>
    %88 = arith.truncf %86 : vector<32x32xf32> to vector<32x32xbf16>
    %cst_67 = arith.constant dense<0.000000e+00> : vector<2x32xf32>
    %89 = tpu.matmul %87, %88, %cst_67 {dimension_numbers = #tpu.dot_dimension_numbers<[1], [0], [0], [1], [0, 0, 1, 1], [], []>} : vector<2x32xbf16>, vector<32x32xbf16>, vector<2x32xf32> -> vector<2x32xf32>
    %c2_68 = arith.constant 2 : index
    %c0_69 = arith.constant 0 : index
    %c0_70 = arith.constant 0 : index
    %90 = vector.load %arg4[%c2_68, %c0_69, %c0_70] : memref<5x1x32xf32, #tpu.memory_space<vmem>>, vector<1x1x32xf32>
    %91 = vector.shape_cast %90 : vector<1x1x32xf32> to vector<1x32xf32>
    %92 = vector.broadcast %91 : vector<1x32xf32> to vector<2x32xf32>
    %93 = arith.addf %89, %92 : vector<2x32xf32>
    %cst_71 = arith.constant 0.000000e+00 : f32
    %94 = vector.broadcast %cst_71 : f32 to vector<2x32xf32>
    %95 = arith.maximumf %93, %94 : vector<2x32xf32>
    %c2_72 = arith.constant 2 : index
    %c0_73 = arith.constant 0 : index
    %c0_74 = arith.constant 0 : index
    %96 = vector.load %arg5[%c2_72, %c0_73, %c0_74] : memref<5x32x4xf32, #tpu.memory_space<vmem>>, vector<1x32x4xf32>
    %97 = vector.shape_cast %96 : vector<1x32x4xf32> to vector<32x4xf32>
    %98 = arith.truncf %95 : vector<2x32xf32> to vector<2x32xbf16>
    %99 = arith.truncf %97 : vector<32x4xf32> to vector<32x4xbf16>
    %cst_75 = arith.constant dense<0.000000e+00> : vector<2x4xf32>
    %100 = tpu.matmul %98, %99, %cst_75 {dimension_numbers = #tpu.dot_dimension_numbers<[1], [0], [0], [1], [0, 0, 1, 1], [], []>} : vector<2x32xbf16>, vector<32x4xbf16>, vector<2x4xf32> -> vector<2x4xf32>
    %c2_76 = arith.constant 2 : index
    %c0_77 = arith.constant 0 : index
    %c0_78 = arith.constant 0 : index
    %101 = vector.load %arg6[%c2_76, %c0_77, %c0_78] : memref<5x1x4xf32, #tpu.memory_space<vmem>>, vector<1x1x4xf32>
    %102 = vector.shape_cast %101 : vector<1x1x4xf32> to vector<1x4xf32>
    %103 = vector.broadcast %102 : vector<1x4xf32> to vector<2x4xf32>
    %104 = arith.addf %100, %103 : vector<2x4xf32>
    %c2_79 = arith.constant 2 : index
    %c0_80 = arith.constant 0 : index
    %c0_81 = arith.constant 0 : index
    %105 = vector.load %arg13[%c2_79, %c0_80, %c0_81] : memref<5x2x4xf32, #tpu.memory_space<vmem>>, vector<1x2x4xf32>
    %106 = vector.shape_cast %105 : vector<1x2x4xf32> to vector<2x4xf32>
    %107 = vector.shape_cast %104 : vector<2x4xf32> to vector<1x2x4xf32>
    tpu.vector_store %arg13[%c2_79, %c0_80, %c0_81], %107 {strides = array<i32>} : memref<5x2x4xf32, #tpu.memory_space<vmem>>, vector<1x2x4xf32>,
    %c4 = arith.constant 4 : index
    %c0_82 = arith.constant 0 : index
    %c0_83 = arith.constant 0 : index
    %108 = vector.load %arg0[%c4, %c0_82, %c0_83] : memref<9x2x32xf32, #tpu.memory_space<vmem>>, vector<1x2x32xf32>
    %109 = vector.shape_cast %108 : vector<1x2x32xf32> to vector<2x32xf32>
    %c3_84 = arith.constant 3 : index
    %c0_85 = arith.constant 0 : index
    %c0_86 = arith.constant 0 : index
    %110 = vector.load %arg1[%c3_84, %c0_85, %c0_86] : memref<5x32x32xf32, #tpu.memory_space<vmem>>, vector<1x32x32xf32>
    %111 = vector.shape_cast %110 : vector<1x32x32xf32> to vector<32x32xf32>
    %112 = arith.truncf %109 : vector<2x32xf32> to vector<2x32xbf16>
    %113 = arith.truncf %111 : vector<32x32xf32> to vector<32x32xbf16>
    %cst_87 = arith.constant dense<0.000000e+00> : vector<2x32xf32>
    %114 = tpu.matmul %112, %113, %cst_87 {dimension_numbers = #tpu.dot_dimension_numbers<[1], [0], [0], [1], [0, 0, 1, 1], [], []>} : vector<2x32xbf16>, vector<32x32xbf16>, vector<2x32xf32> -> vector<2x32xf32>
    %c3_88 = arith.constant 3 : index
    %c0_89 = arith.constant 0 : index
    %c0_90 = arith.constant 0 : index
    %115 = vector.load %arg2[%c3_88, %c0_89, %c0_90] : memref<5x1x32xf32, #tpu.memory_space<vmem>>, vector<1x1x32xf32>
    %116 = vector.shape_cast %115 : vector<1x1x32xf32> to vector<1x32xf32>
    %117 = vector.broadcast %116 : vector<1x32xf32> to vector<2x32xf32>
    %118 = arith.addf %114, %117 : vector<2x32xf32>
    %cst_91 = arith.constant 0.000000e+00 : f32
    %119 = vector.broadcast %cst_91 : f32 to vector<2x32xf32>
    %120 = arith.maximumf %118, %119 : vector<2x32xf32>
    %c3_92 = arith.constant 3 : index
    %c0_93 = arith.constant 0 : index
    %c0_94 = arith.constant 0 : index
    %121 = vector.load %arg3[%c3_92, %c0_93, %c0_94] : memref<5x32x32xf32, #tpu.memory_space<vmem>>, vector<1x32x32xf32>
    %122 = vector.shape_cast %121 : vector<1x32x32xf32> to vector<32x32xf32>
    %123 = arith.truncf %120 : vector<2x32xf32> to vector<2x32xbf16>
    %124 = arith.truncf %122 : vector<32x32xf32> to vector<32x32xbf16>
    %cst_95 = arith.constant dense<0.000000e+00> : vector<2x32xf32>
    %125 = tpu.matmul %123, %124, %cst_95 {dimension_numbers = #tpu.dot_dimension_numbers<[1], [0], [0], [1], [0, 0, 1, 1], [], []>} : vector<2x32xbf16>, vector<32x32xbf16>, vector<2x32xf32> -> vector<2x32xf32>
    %c3_96 = arith.constant 3 : index
    %c0_97 = arith.constant 0 : index
    %c0_98 = arith.constant 0 : index
    %126 = vector.load %arg4[%c3_96, %c0_97, %c0_98] : memref<5x1x32xf32, #tpu.memory_space<vmem>>, vector<1x1x32xf32>
    %127 = vector.shape_cast %126 : vector<1x1x32xf32> to vector<1x32xf32>
    %128 = vector.broadcast %127 : vector<1x32xf32> to vector<2x32xf32>
    %129 = arith.addf %125, %128 : vector<2x32xf32>
    %cst_99 = arith.constant 0.000000e+00 : f32
    %130 = vector.broadcast %cst_99 : f32 to vector<2x32xf32>
    %131 = arith.maximumf %129, %130 : vector<2x32xf32>
    %c3_100 = arith.constant 3 : index
    %c0_101 = arith.constant 0 : index
    %c0_102 = arith.constant 0 : index
    %132 = vector.load %arg5[%c3_100, %c0_101, %c0_102] : memref<5x32x4xf32, #tpu.memory_space<vmem>>, vector<1x32x4xf32>
    %133 = vector.shape_cast %132 : vector<1x32x4xf32> to vector<32x4xf32>
    %134 = arith.truncf %131 : vector<2x32xf32> to vector<2x32xbf16>
    %135 = arith.truncf %133 : vector<32x4xf32> to vector<32x4xbf16>
    %cst_103 = arith.constant dense<0.000000e+00> : vector<2x4xf32>
    %136 = tpu.matmul %134, %135, %cst_103 {dimension_numbers = #tpu.dot_dimension_numbers<[1], [0], [0], [1], [0, 0, 1, 1], [], []>} : vector<2x32xbf16>, vector<32x4xbf16>, vector<2x4xf32> -> vector<2x4xf32>
    %c3_104 = arith.constant 3 : index
    %c0_105 = arith.constant 0 : index
    %c0_106 = arith.constant 0 : index
    %137 = vector.load %arg6[%c3_104, %c0_105, %c0_106] : memref<5x1x4xf32, #tpu.memory_space<vmem>>, vector<1x1x4xf32>
    %138 = vector.shape_cast %137 : vector<1x1x4xf32> to vector<1x4xf32>
    %139 = vector.broadcast %138 : vector<1x4xf32> to vector<2x4xf32>
    %140 = arith.addf %136, %139 : vector<2x4xf32>
    %c3_107 = arith.constant 3 : index
    %c0_108 = arith.constant 0 : index
    %c0_109 = arith.constant 0 : index
    %141 = vector.load %arg13[%c3_107, %c0_108, %c0_109] : memref<5x2x4xf32, #tpu.memory_space<vmem>>, vector<1x2x4xf32>
    %142 = vector.shape_cast %141 : vector<1x2x4xf32> to vector<2x4xf32>
    %143 = vector.shape_cast %140 : vector<2x4xf32> to vector<1x2x4xf32>
    tpu.vector_store %arg13[%c3_107, %c0_108, %c0_109], %143 {strides = array<i32>} : memref<5x2x4xf32, #tpu.memory_space<vmem>>, vector<1x2x4xf32>,
    %c5 = arith.constant 5 : index
    %c0_110 = arith.constant 0 : index
    %c0_111 = arith.constant 0 : index
    %144 = vector.load %arg0[%c5, %c0_110, %c0_111] : memref<9x2x32xf32, #tpu.memory_space<vmem>>, vector<1x2x32xf32>
    %145 = vector.shape_cast %144 : vector<1x2x32xf32> to vector<2x32xf32>
    %c4_112 = arith.constant 4 : index
    %c0_113 = arith.constant 0 : index
    %c0_114 = arith.constant 0 : index
    %146 = vector.load %arg1[%c4_112, %c0_113, %c0_114] : memref<5x32x32xf32, #tpu.memory_space<vmem>>, vector<1x32x32xf32>
    %147 = vector.shape_cast %146 : vector<1x32x32xf32> to vector<32x32xf32>
    %148 = arith.truncf %145 : vector<2x32xf32> to vector<2x32xbf16>
    %149 = arith.truncf %147 : vector<32x32xf32> to vector<32x32xbf16>
    %cst_115 = arith.constant dense<0.000000e+00> : vector<2x32xf32>
    %150 = tpu.matmul %148, %149, %cst_115 {dimension_numbers = #tpu.dot_dimension_numbers<[1], [0], [0], [1], [0, 0, 1, 1], [], []>} : vector<2x32xbf16>, vector<32x32xbf16>, vector<2x32xf32> -> vector<2x32xf32>
    %c4_116 = arith.constant 4 : index
    %c0_117 = arith.constant 0 : index
    %c0_118 = arith.constant 0 : index
    %151 = vector.load %arg2[%c4_116, %c0_117, %c0_118] : memref<5x1x32xf32, #tpu.memory_space<vmem>>, vector<1x1x32xf32>
    %152 = vector.shape_cast %151 : vector<1x1x32xf32> to vector<1x32xf32>
    %153 = vector.broadcast %152 : vector<1x32xf32> to vector<2x32xf32>
    %154 = arith.addf %150, %153 : vector<2x32xf32>
    %cst_119 = arith.constant 0.000000e+00 : f32
    %155 = vector.broadcast %cst_119 : f32 to vector<2x32xf32>
    %156 = arith.maximumf %154, %155 : vector<2x32xf32>
    %c4_120 = arith.constant 4 : index
    %c0_121 = arith.constant 0 : index
    %c0_122 = arith.constant 0 : index
    %157 = vector.load %arg3[%c4_120, %c0_121, %c0_122] : memref<5x32x32xf32, #tpu.memory_space<vmem>>, vector<1x32x32xf32>
    %158 = vector.shape_cast %157 : vector<1x32x32xf32> to vector<32x32xf32>
    %159 = arith.truncf %156 : vector<2x32xf32> to vector<2x32xbf16>
    %160 = arith.truncf %158 : vector<32x32xf32> to vector<32x32xbf16>
    %cst_123 = arith.constant dense<0.000000e+00> : vector<2x32xf32>
    %161 = tpu.matmul %159, %160, %cst_123 {dimension_numbers = #tpu.dot_dimension_numbers<[1], [0], [0], [1], [0, 0, 1, 1], [], []>} : vector<2x32xbf16>, vector<32x32xbf16>, vector<2x32xf32> -> vector<2x32xf32>
    %c4_124 = arith.constant 4 : index
    %c0_125 = arith.constant 0 : index
    %c0_126 = arith.constant 0 : index
    %162 = vector.load %arg4[%c4_124, %c0_125, %c0_126] : memref<5x1x32xf32, #tpu.memory_space<vmem>>, vector<1x1x32xf32>
    %163 = vector.shape_cast %162 : vector<1x1x32xf32> to vector<1x32xf32>
    %164 = vector.broadcast %163 : vector<1x32xf32> to vector<2x32xf32>
    %165 = arith.addf %161, %164 : vector<2x32xf32>
    %cst_127 = arith.constant 0.000000e+00 : f32
    %166 = vector.broadcast %cst_127 : f32 to vector<2x32xf32>
    %167 = arith.maximumf %165, %166 : vector<2x32xf32>
    %c4_128 = arith.constant 4 : index
    %c0_129 = arith.constant 0 : index
    %c0_130 = arith.constant 0 : index
    %168 = vector.load %arg5[%c4_128, %c0_129, %c0_130] : memref<5x32x4xf32, #tpu.memory_space<vmem>>, vector<1x32x4xf32>
    %169 = vector.shape_cast %168 : vector<1x32x4xf32> to vector<32x4xf32>
    %170 = arith.truncf %167 : vector<2x32xf32> to vector<2x32xbf16>
    %171 = arith.truncf %169 : vector<32x4xf32> to vector<32x4xbf16>
    %cst_131 = arith.constant dense<0.000000e+00> : vector<2x4xf32>
    %172 = tpu.matmul %170, %171, %cst_131 {dimension_numbers = #tpu.dot_dimension_numbers<[1], [0], [0], [1], [0, 0, 1, 1], [], []>} : vector<2x32xbf16>, vector<32x4xbf16>, vector<2x4xf32> -> vector<2x4xf32>
    %c4_132 = arith.constant 4 : index
    %c0_133 = arith.constant 0 : index
    %c0_134 = arith.constant 0 : index
    %173 = vector.load %arg6[%c4_132, %c0_133, %c0_134] : memref<5x1x4xf32, #tpu.memory_space<vmem>>, vector<1x1x4xf32>
    %174 = vector.shape_cast %173 : vector<1x1x4xf32> to vector<1x4xf32>
    %175 = vector.broadcast %174 : vector<1x4xf32> to vector<2x4xf32>
    %176 = arith.addf %172, %175 : vector<2x4xf32>
    %c4_135 = arith.constant 4 : index
    %c0_136 = arith.constant 0 : index
    %c0_137 = arith.constant 0 : index
    %177 = vector.load %arg13[%c4_135, %c0_136, %c0_137] : memref<5x2x4xf32, #tpu.memory_space<vmem>>, vector<1x2x4xf32>
    %178 = vector.shape_cast %177 : vector<1x2x4xf32> to vector<2x4xf32>
    %179 = vector.shape_cast %176 : vector<2x4xf32> to vector<1x2x4xf32>
    tpu.vector_store %arg13[%c4_135, %c0_136, %c0_137], %179 {strides = array<i32>} : memref<5x2x4xf32, #tpu.memory_space<vmem>>, vector<1x2x4xf32>,
    %c0_138 = arith.constant 0 : index
    %c0_139 = arith.constant 0 : index
    %c0_140 = arith.constant 0 : index
    %180 = vector.load %arg0[%c0_138, %c0_139, %c0_140] : memref<9x2x32xf32, #tpu.memory_space<vmem>>, vector<1x2x32xf32>
    %181 = vector.shape_cast %180 : vector<1x2x32xf32> to vector<2x32xf32>
    %c0_141 = arith.constant 0 : index
    %c0_142 = arith.constant 0 : index
    %182 = vector.load %arg7[%c0_141, %c0_142] : memref<32x256xf32, #tpu.memory_space<vmem>>, vector<32x256xf32>
    %183 = arith.truncf %181 : vector<2x32xf32> to vector<2x32xbf16>
    %184 = arith.truncf %182 : vector<32x256xf32> to vector<32x256xbf16>
    %cst_143 = arith.constant dense<0.000000e+00> : vector<2x256xf32>
    %185 = tpu.matmul %183, %184, %cst_143 {dimension_numbers = #tpu.dot_dimension_numbers<[1], [0], [0], [1], [0, 0, 1, 1], [], []>} : vector<2x32xbf16>, vector<32x256xbf16>, vector<2x256xf32> -> vector<2x256xf32>
    %c0_144 = arith.constant 0 : index
    %c0_145 = arith.constant 0 : index
    %186 = vector.load %arg8[%c0_144, %c0_145] : memref<1x256xf32, #tpu.memory_space<vmem>>, vector<1x256xf32>
    %187 = vector.broadcast %186 : vector<1x256xf32> to vector<2x256xf32>
    %188 = arith.addf %185, %187 : vector<2x256xf32>
    %cst_146 = arith.constant 0.000000e+00 : f32
    %189 = vector.broadcast %cst_146 : f32 to vector<2x256xf32>
    %190 = arith.maximumf %188, %189 : vector<2x256xf32>
    %c0_147 = arith.constant 0 : index
    %c0_148 = arith.constant 0 : index
    %191 = vector.load %arg9[%c0_147, %c0_148] : memref<256x256xf32, #tpu.memory_space<vmem>>, vector<256x256xf32>
    %192 = arith.truncf %190 : vector<2x256xf32> to vector<2x256xbf16>
    %193 = arith.truncf %191 : vector<256x256xf32> to vector<256x256xbf16>
    %cst_149 = arith.constant dense<0.000000e+00> : vector<2x256xf32>
    %194 = tpu.matmul %192, %193, %cst_149 {dimension_numbers = #tpu.dot_dimension_numbers<[1], [0], [0], [1], [0, 0, 1, 1], [], []>} : vector<2x256xbf16>, vector<256x256xbf16>, vector<2x256xf32> -> vector<2x256xf32>
    %c0_150 = arith.constant 0 : index
    %c0_151 = arith.constant 0 : index
    %195 = vector.load %arg10[%c0_150, %c0_151] : memref<1x256xf32, #tpu.memory_space<vmem>>, vector<1x256xf32>
    %196 = vector.broadcast %195 : vector<1x256xf32> to vector<2x256xf32>
    %197 = arith.addf %194, %196 : vector<2x256xf32>
    %cst_152 = arith.constant 0.000000e+00 : f32
    %198 = vector.broadcast %cst_152 : f32 to vector<2x256xf32>
    %199 = arith.maximumf %197, %198 : vector<2x256xf32>
    %c0_153 = arith.constant 0 : index
    %c0_154 = arith.constant 0 : index
    %200 = vector.load %arg11[%c0_153, %c0_154] : memref<256x4xf32, #tpu.memory_space<vmem>>, vector<256x4xf32>
    %201 = arith.truncf %199 : vector<2x256xf32> to vector<2x256xbf16>
    %202 = arith.truncf %200 : vector<256x4xf32> to vector<256x4xbf16>
    %cst_155 = arith.constant dense<0.000000e+00> : vector<2x4xf32>
    %203 = tpu.matmul %201, %202, %cst_155 {dimension_numbers = #tpu.dot_dimension_numbers<[1], [0], [0], [1], [0, 0, 1, 1], [], []>} : vector<2x256xbf16>, vector<256x4xbf16>, vector<2x4xf32> -> vector<2x4xf32>
    %c0_156 = arith.constant 0 : index
    %c0_157 = arith.constant 0 : index
    %204 = vector.load %arg12[%c0_156, %c0_157] : memref<1x4xf32, #tpu.memory_space<vmem>>, vector<1x4xf32>
    %205 = vector.broadcast %204 : vector<1x4xf32> to vector<2x4xf32>
    %206 = arith.addf %203, %205 : vector<2x4xf32>
    %c0_158 = arith.constant 0 : index
    %c0_159 = arith.constant 0 : index
    %207 = vector.load %arg14[%c0_158, %c0_159] : memref<2x4xf32, #tpu.memory_space<vmem>>, vector<2x4xf32>
    tpu.vector_store %arg14[%c0_158, %c0_159], %206 {strides = array<i32>} : memref<2x4xf32, #tpu.memory_space<vmem>>, vector<2x4xf32>,
    return
  }
}

module attributes {stable_mosaic.version = 11 : i64} {
  func.func @_upscale_fused_kernel(%arg0: i32, %arg1: i32, %arg2: memref<1x32x64xbf16, #tpu.memory_space<vmem>>, %arg3: memref<32x32xf32, #tpu.memory_space<vmem>>, %arg4: memref<8x1xf32, #tpu.memory_space<vmem>>, %arg5: memref<8x1xf32, #tpu.memory_space<vmem>>, %arg6: memref<8x1xf32, #tpu.memory_space<vmem>>, %arg7: memref<16x8xf32, #tpu.memory_space<vmem>>, %arg8: memref<16x1xf32, #tpu.memory_space<vmem>>, %arg9: memref<1x4x16x64xbf16, #tpu.memory_space<vmem>>) attributes {dimension_semantics = [#tpu.dimension_semantics<parallel>, #tpu.dimension_semantics<parallel>], iteration_bounds = array<i64: 2, 1>, scalar_prefetch = 0 : i64, scratch_operands = 0 : i64, tpu.core_type = #tpu.core_type<tc>, window_params = [{transform_indices = @transform_0, window_bounds = array<i64: 1, 32, 64>}, {pipeline_mode = #tpu.pipeline_mode<synchronous>, transform_indices = @transform_1, window_bounds = array<i64: 32, 32>}, {pipeline_mode = #tpu.pipeline_mode<synchronous>, transform_indices = @transform_2, window_bounds = array<i64: 8, 1>}, {pipeline_mode = #tpu.pipeline_mode<synchronous>, transform_indices = @transform_3, window_bounds = array<i64: 8, 1>}, {pipeline_mode = #tpu.pipeline_mode<synchronous>, transform_indices = @transform_4, window_bounds = array<i64: 8, 1>}, {pipeline_mode = #tpu.pipeline_mode<synchronous>, transform_indices = @transform_5, window_bounds = array<i64: 16, 8>}, {pipeline_mode = #tpu.pipeline_mode<synchronous>, transform_indices = @transform_6, window_bounds = array<i64: 16, 1>}, {transform_indices = @transform_7, window_bounds = array<i64: 1, 4, 16, 64>}]} {
    %c0 = arith.constant 0 : index
    %c0_0 = arith.constant 0 : index
    %0 = vector.load %arg3[%c0, %c0_0] : memref<32x32xf32, #tpu.memory_space<vmem>>, vector<32x32xf32>
    %c0_1 = arith.constant 0 : index
    %c0_2 = arith.constant 0 : index
    %c0_3 = arith.constant 0 : index
    %1 = vector.load %arg2[%c0_1, %c0_2, %c0_3] : memref<1x32x64xbf16, #tpu.memory_space<vmem>>, vector<1x32x64xbf16>
    %2 = vector.shape_cast %1 : vector<1x32x64xbf16> to vector<32x64xbf16>
    %3 = arith.truncf %0 : vector<32x32xf32> to vector<32x32xbf16>
    %cst = arith.constant dense<0.000000e+00> : vector<32x64xf32>
    %4 = tpu.matmul %3, %2, %cst {dimension_numbers = #tpu.dot_dimension_numbers<[1], [0], [0], [1], [0, 0, 1, 1], [], []>} : vector<32x32xbf16>, vector<32x64xbf16>, vector<32x64xf32> -> vector<32x64xf32>
    %c0_4 = arith.constant 0 : index
    %c0_5 = arith.constant 0 : index
    %5 = vector.load %arg8[%c0_4, %c0_5] : memref<16x1xf32, #tpu.memory_space<vmem>>, vector<16x1xf32>
    %6 = vector.extract_strided_slice %4 {offsets = [0, 0], sizes = [8, 64], strides = [1, 1]} : vector<32x64xf32> to vector<8x64xf32>
    %c0_6 = arith.constant 0 : index
    %c0_7 = arith.constant 0 : index
    %7 = vector.load %arg4[%c0_6, %c0_7] : memref<8x1xf32, #tpu.memory_space<vmem>>, vector<8x1xf32>
    %8 = vector.broadcast %7 : vector<8x1xf32> to vector<8x64xf32>
    %9 = arith.addf %6, %8 : vector<8x64xf32>
    %c0_8 = arith.constant 0 : index
    %c0_9 = arith.constant 0 : index
    %10 = vector.load %arg5[%c0_8, %c0_9] : memref<8x1xf32, #tpu.memory_space<vmem>>, vector<8x1xf32>
    %c0_10 = arith.constant 0 : index
    %c0_11 = arith.constant 0 : index
    %11 = vector.load %arg6[%c0_10, %c0_11] : memref<8x1xf32, #tpu.memory_space<vmem>>, vector<8x1xf32>
    %cst_12 = arith.constant dense<0.000000e+00> : vector<64xf32>
    %12 = vector.multi_reduction <add>, %9, %cst_12 [0] : vector<8x64xf32> to vector<64xf32>
    %13 = vector.shape_cast %12 : vector<64xf32> to vector<1x64xf32>
    %cst_13 = arith.constant 8.000000e+00 : f32
    %14 = vector.broadcast %cst_13 : f32 to vector<1x64xf32>
    %15 = arith.divf %13, %14 : vector<1x64xf32>
    %16 = vector.broadcast %15 : vector<1x64xf32> to vector<8x64xf32>
    %17 = arith.subf %9, %16 : vector<8x64xf32>
    %18 = arith.mulf %17, %17 : vector<8x64xf32>
    %cst_14 = arith.constant dense<0.000000e+00> : vector<64xf32>
    %19 = vector.multi_reduction <add>, %18, %cst_14 [0] : vector<8x64xf32> to vector<64xf32>
    %20 = vector.shape_cast %19 : vector<64xf32> to vector<1x64xf32>
    %cst_15 = arith.constant 8.000000e+00 : f32
    %21 = vector.broadcast %cst_15 : f32 to vector<1x64xf32>
    %22 = arith.divf %20, %21 : vector<1x64xf32>
    %cst_16 = arith.constant 9.99999997E-7 : f32
    %23 = vector.broadcast %cst_16 : f32 to vector<1x64xf32>
    %24 = arith.addf %22, %23 : vector<1x64xf32>
    %25 = math.rsqrt %24 : vector<1x64xf32>
    %26 = vector.broadcast %25 : vector<1x64xf32> to vector<8x64xf32>
    %27 = arith.mulf %17, %26 : vector<8x64xf32>
    %28 = vector.broadcast %10 : vector<8x1xf32> to vector<8x64xf32>
    %29 = arith.mulf %27, %28 : vector<8x64xf32>
    %30 = vector.broadcast %11 : vector<8x1xf32> to vector<8x64xf32>
    %31 = arith.addf %29, %30 : vector<8x64xf32>
    %cst_17 = arith.constant 5.000000e-01 : f32
    %32 = vector.broadcast %cst_17 : f32 to vector<8x64xf32>
    %33 = arith.mulf %32, %31 : vector<8x64xf32>
    %cst_18 = arith.constant 4.471500e-02 : f32
    %34 = vector.broadcast %cst_18 : f32 to vector<8x64xf32>
    %35 = arith.mulf %34, %31 : vector<8x64xf32>
    %36 = arith.mulf %35, %31 : vector<8x64xf32>
    %37 = arith.mulf %36, %31 : vector<8x64xf32>
    %38 = arith.addf %31, %37 : vector<8x64xf32>
    %cst_19 = arith.constant 0.797884583 : f32
    %39 = vector.broadcast %cst_19 : f32 to vector<8x64xf32>
    %40 = arith.mulf %39, %38 : vector<8x64xf32>
    %41 = math.tanh %40 : vector<8x64xf32>
    %cst_20 = arith.constant 1.000000e+00 : f32
    %42 = vector.broadcast %cst_20 : f32 to vector<8x64xf32>
    %43 = arith.addf %42, %41 : vector<8x64xf32>
    %44 = arith.mulf %33, %43 : vector<8x64xf32>
    %c0_21 = arith.constant 0 : index
    %c0_22 = arith.constant 0 : index
    %45 = vector.load %arg7[%c0_21, %c0_22] : memref<16x8xf32, #tpu.memory_space<vmem>>, vector<16x8xf32>
    %46 = arith.truncf %45 : vector<16x8xf32> to vector<16x8xbf16>
    %47 = arith.truncf %44 : vector<8x64xf32> to vector<8x64xbf16>
    %cst_23 = arith.constant dense<0.000000e+00> : vector<16x64xf32>
    %48 = tpu.matmul %46, %47, %cst_23 {dimension_numbers = #tpu.dot_dimension_numbers<[1], [0], [0], [1], [0, 0, 1, 1], [], []>} : vector<16x8xbf16>, vector<8x64xbf16>, vector<16x64xf32> -> vector<16x64xf32>
    %49 = vector.broadcast %5 : vector<16x1xf32> to vector<16x64xf32>
    %50 = arith.addf %48, %49 : vector<16x64xf32>
    %cst_24 = arith.constant 5.000000e-01 : f32
    %51 = vector.broadcast %cst_24 : f32 to vector<16x64xf32>
    %52 = arith.mulf %51, %50 : vector<16x64xf32>
    %cst_25 = arith.constant 4.471500e-02 : f32
    %53 = vector.broadcast %cst_25 : f32 to vector<16x64xf32>
    %54 = arith.mulf %53, %50 : vector<16x64xf32>
    %55 = arith.mulf %54, %50 : vector<16x64xf32>
    %56 = arith.mulf %55, %50 : vector<16x64xf32>
    %57 = arith.addf %50, %56 : vector<16x64xf32>
    %cst_26 = arith.constant 0.797884583 : f32
    %58 = vector.broadcast %cst_26 : f32 to vector<16x64xf32>
    %59 = arith.mulf %58, %57 : vector<16x64xf32>
    %60 = math.tanh %59 : vector<16x64xf32>
    %cst_27 = arith.constant 1.000000e+00 : f32
    %61 = vector.broadcast %cst_27 : f32 to vector<16x64xf32>
    %62 = arith.addf %61, %60 : vector<16x64xf32>
    %63 = arith.mulf %52, %62 : vector<16x64xf32>
    %64 = arith.truncf %63 : vector<16x64xf32> to vector<16x64xbf16>
    %c0_28 = arith.constant 0 : index
    %c0_29 = arith.constant 0 : index
    %c0_30 = arith.constant 0 : index
    %c0_31 = arith.constant 0 : index
    %65 = vector.load %arg9[%c0_28, %c0_29, %c0_30, %c0_31] : memref<1x4x16x64xbf16, #tpu.memory_space<vmem>>, vector<1x1x16x64xbf16>
    %66 = vector.shape_cast %65 : vector<1x1x16x64xbf16> to vector<16x64xbf16>
    %67 = vector.shape_cast %64 : vector<16x64xbf16> to vector<1x1x16x64xbf16>
    tpu.vector_store %arg9[%c0_28, %c0_29, %c0_30, %c0_31], %67 {strides = array<i32>} : memref<1x4x16x64xbf16, #tpu.memory_space<vmem>>, vector<1x1x16x64xbf16>,
    %68 = vector.extract_strided_slice %4 {offsets = [8, 0], sizes = [8, 64], strides = [1, 1]} : vector<32x64xf32> to vector<8x64xf32>
    %c0_32 = arith.constant 0 : index
    %c0_33 = arith.constant 0 : index
    %69 = vector.load %arg4[%c0_32, %c0_33] : memref<8x1xf32, #tpu.memory_space<vmem>>, vector<8x1xf32>
    %70 = vector.broadcast %69 : vector<8x1xf32> to vector<8x64xf32>
    %71 = arith.addf %68, %70 : vector<8x64xf32>
    %c0_34 = arith.constant 0 : index
    %c0_35 = arith.constant 0 : index
    %72 = vector.load %arg5[%c0_34, %c0_35] : memref<8x1xf32, #tpu.memory_space<vmem>>, vector<8x1xf32>
    %c0_36 = arith.constant 0 : index
    %c0_37 = arith.constant 0 : index
    %73 = vector.load %arg6[%c0_36, %c0_37] : memref<8x1xf32, #tpu.memory_space<vmem>>, vector<8x1xf32>
    %cst_38 = arith.constant dense<0.000000e+00> : vector<64xf32>
    %74 = vector.multi_reduction <add>, %71, %cst_38 [0] : vector<8x64xf32> to vector<64xf32>
    %75 = vector.shape_cast %74 : vector<64xf32> to vector<1x64xf32>
    %cst_39 = arith.constant 8.000000e+00 : f32
    %76 = vector.broadcast %cst_39 : f32 to vector<1x64xf32>
    %77 = arith.divf %75, %76 : vector<1x64xf32>
    %78 = vector.broadcast %77 : vector<1x64xf32> to vector<8x64xf32>
    %79 = arith.subf %71, %78 : vector<8x64xf32>
    %80 = arith.mulf %79, %79 : vector<8x64xf32>
    %cst_40 = arith.constant dense<0.000000e+00> : vector<64xf32>
    %81 = vector.multi_reduction <add>, %80, %cst_40 [0] : vector<8x64xf32> to vector<64xf32>
    %82 = vector.shape_cast %81 : vector<64xf32> to vector<1x64xf32>
    %cst_41 = arith.constant 8.000000e+00 : f32
    %83 = vector.broadcast %cst_41 : f32 to vector<1x64xf32>
    %84 = arith.divf %82, %83 : vector<1x64xf32>
    %cst_42 = arith.constant 9.99999997E-7 : f32
    %85 = vector.broadcast %cst_42 : f32 to vector<1x64xf32>
    %86 = arith.addf %84, %85 : vector<1x64xf32>
    %87 = math.rsqrt %86 : vector<1x64xf32>
    %88 = vector.broadcast %87 : vector<1x64xf32> to vector<8x64xf32>
    %89 = arith.mulf %79, %88 : vector<8x64xf32>
    %90 = vector.broadcast %72 : vector<8x1xf32> to vector<8x64xf32>
    %91 = arith.mulf %89, %90 : vector<8x64xf32>
    %92 = vector.broadcast %73 : vector<8x1xf32> to vector<8x64xf32>
    %93 = arith.addf %91, %92 : vector<8x64xf32>
    %cst_43 = arith.constant 5.000000e-01 : f32
    %94 = vector.broadcast %cst_43 : f32 to vector<8x64xf32>
    %95 = arith.mulf %94, %93 : vector<8x64xf32>
    %cst_44 = arith.constant 4.471500e-02 : f32
    %96 = vector.broadcast %cst_44 : f32 to vector<8x64xf32>
    %97 = arith.mulf %96, %93 : vector<8x64xf32>
    %98 = arith.mulf %97, %93 : vector<8x64xf32>
    %99 = arith.mulf %98, %93 : vector<8x64xf32>
    %100 = arith.addf %93, %99 : vector<8x64xf32>
    %cst_45 = arith.constant 0.797884583 : f32
    %101 = vector.broadcast %cst_45 : f32 to vector<8x64xf32>
    %102 = arith.mulf %101, %100 : vector<8x64xf32>
    %103 = math.tanh %102 : vector<8x64xf32>
    %cst_46 = arith.constant 1.000000e+00 : f32
    %104 = vector.broadcast %cst_46 : f32 to vector<8x64xf32>
    %105 = arith.addf %104, %103 : vector<8x64xf32>
    %106 = arith.mulf %95, %105 : vector<8x64xf32>
    %c0_47 = arith.constant 0 : index
    %c0_48 = arith.constant 0 : index
    %107 = vector.load %arg7[%c0_47, %c0_48] : memref<16x8xf32, #tpu.memory_space<vmem>>, vector<16x8xf32>
    %108 = arith.truncf %107 : vector<16x8xf32> to vector<16x8xbf16>
    %109 = arith.truncf %106 : vector<8x64xf32> to vector<8x64xbf16>
    %cst_49 = arith.constant dense<0.000000e+00> : vector<16x64xf32>
    %110 = tpu.matmul %108, %109, %cst_49 {dimension_numbers = #tpu.dot_dimension_numbers<[1], [0], [0], [1], [0, 0, 1, 1], [], []>} : vector<16x8xbf16>, vector<8x64xbf16>, vector<16x64xf32> -> vector<16x64xf32>
    %111 = vector.broadcast %5 : vector<16x1xf32> to vector<16x64xf32>
    %112 = arith.addf %110, %111 : vector<16x64xf32>
    %cst_50 = arith.constant 5.000000e-01 : f32
    %113 = vector.broadcast %cst_50 : f32 to vector<16x64xf32>
    %114 = arith.mulf %113, %112 : vector<16x64xf32>
    %cst_51 = arith.constant 4.471500e-02 : f32
    %115 = vector.broadcast %cst_51 : f32 to vector<16x64xf32>
    %116 = arith.mulf %115, %112 : vector<16x64xf32>
    %117 = arith.mulf %116, %112 : vector<16x64xf32>
    %118 = arith.mulf %117, %112 : vector<16x64xf32>
    %119 = arith.addf %112, %118 : vector<16x64xf32>
    %cst_52 = arith.constant 0.797884583 : f32
    %120 = vector.broadcast %cst_52 : f32 to vector<16x64xf32>
    %121 = arith.mulf %120, %119 : vector<16x64xf32>
    %122 = math.tanh %121 : vector<16x64xf32>
    %cst_53 = arith.constant 1.000000e+00 : f32
    %123 = vector.broadcast %cst_53 : f32 to vector<16x64xf32>
    %124 = arith.addf %123, %122 : vector<16x64xf32>
    %125 = arith.mulf %114, %124 : vector<16x64xf32>
    %126 = arith.truncf %125 : vector<16x64xf32> to vector<16x64xbf16>
    %c0_54 = arith.constant 0 : index
    %c1 = arith.constant 1 : index
    %c0_55 = arith.constant 0 : index
    %c0_56 = arith.constant 0 : index
    %127 = vector.load %arg9[%c0_54, %c1, %c0_55, %c0_56] : memref<1x4x16x64xbf16, #tpu.memory_space<vmem>>, vector<1x1x16x64xbf16>
    %128 = vector.shape_cast %127 : vector<1x1x16x64xbf16> to vector<16x64xbf16>
    %129 = vector.shape_cast %126 : vector<16x64xbf16> to vector<1x1x16x64xbf16>
    tpu.vector_store %arg9[%c0_54, %c1, %c0_55, %c0_56], %129 {strides = array<i32>} : memref<1x4x16x64xbf16, #tpu.memory_space<vmem>>, vector<1x1x16x64xbf16>,
    %130 = vector.extract_strided_slice %4 {offsets = [16, 0], sizes = [8, 64], strides = [1, 1]} : vector<32x64xf32> to vector<8x64xf32>
    %c0_57 = arith.constant 0 : index
    %c0_58 = arith.constant 0 : index
    %131 = vector.load %arg4[%c0_57, %c0_58] : memref<8x1xf32, #tpu.memory_space<vmem>>, vector<8x1xf32>
    %132 = vector.broadcast %131 : vector<8x1xf32> to vector<8x64xf32>
    %133 = arith.addf %130, %132 : vector<8x64xf32>
    %c0_59 = arith.constant 0 : index
    %c0_60 = arith.constant 0 : index
    %134 = vector.load %arg5[%c0_59, %c0_60] : memref<8x1xf32, #tpu.memory_space<vmem>>, vector<8x1xf32>
    %c0_61 = arith.constant 0 : index
    %c0_62 = arith.constant 0 : index
    %135 = vector.load %arg6[%c0_61, %c0_62] : memref<8x1xf32, #tpu.memory_space<vmem>>, vector<8x1xf32>
    %cst_63 = arith.constant dense<0.000000e+00> : vector<64xf32>
    %136 = vector.multi_reduction <add>, %133, %cst_63 [0] : vector<8x64xf32> to vector<64xf32>
    %137 = vector.shape_cast %136 : vector<64xf32> to vector<1x64xf32>
    %cst_64 = arith.constant 8.000000e+00 : f32
    %138 = vector.broadcast %cst_64 : f32 to vector<1x64xf32>
    %139 = arith.divf %137, %138 : vector<1x64xf32>
    %140 = vector.broadcast %139 : vector<1x64xf32> to vector<8x64xf32>
    %141 = arith.subf %133, %140 : vector<8x64xf32>
    %142 = arith.mulf %141, %141 : vector<8x64xf32>
    %cst_65 = arith.constant dense<0.000000e+00> : vector<64xf32>
    %143 = vector.multi_reduction <add>, %142, %cst_65 [0] : vector<8x64xf32> to vector<64xf32>
    %144 = vector.shape_cast %143 : vector<64xf32> to vector<1x64xf32>
    %cst_66 = arith.constant 8.000000e+00 : f32
    %145 = vector.broadcast %cst_66 : f32 to vector<1x64xf32>
    %146 = arith.divf %144, %145 : vector<1x64xf32>
    %cst_67 = arith.constant 9.99999997E-7 : f32
    %147 = vector.broadcast %cst_67 : f32 to vector<1x64xf32>
    %148 = arith.addf %146, %147 : vector<1x64xf32>
    %149 = math.rsqrt %148 : vector<1x64xf32>
    %150 = vector.broadcast %149 : vector<1x64xf32> to vector<8x64xf32>
    %151 = arith.mulf %141, %150 : vector<8x64xf32>
    %152 = vector.broadcast %134 : vector<8x1xf32> to vector<8x64xf32>
    %153 = arith.mulf %151, %152 : vector<8x64xf32>
    %154 = vector.broadcast %135 : vector<8x1xf32> to vector<8x64xf32>
    %155 = arith.addf %153, %154 : vector<8x64xf32>
    %cst_68 = arith.constant 5.000000e-01 : f32
    %156 = vector.broadcast %cst_68 : f32 to vector<8x64xf32>
    %157 = arith.mulf %156, %155 : vector<8x64xf32>
    %cst_69 = arith.constant 4.471500e-02 : f32
    %158 = vector.broadcast %cst_69 : f32 to vector<8x64xf32>
    %159 = arith.mulf %158, %155 : vector<8x64xf32>
    %160 = arith.mulf %159, %155 : vector<8x64xf32>
    %161 = arith.mulf %160, %155 : vector<8x64xf32>
    %162 = arith.addf %155, %161 : vector<8x64xf32>
    %cst_70 = arith.constant 0.797884583 : f32
    %163 = vector.broadcast %cst_70 : f32 to vector<8x64xf32>
    %164 = arith.mulf %163, %162 : vector<8x64xf32>
    %165 = math.tanh %164 : vector<8x64xf32>
    %cst_71 = arith.constant 1.000000e+00 : f32
    %166 = vector.broadcast %cst_71 : f32 to vector<8x64xf32>
    %167 = arith.addf %166, %165 : vector<8x64xf32>
    %168 = arith.mulf %157, %167 : vector<8x64xf32>
    %c0_72 = arith.constant 0 : index
    %c0_73 = arith.constant 0 : index
    %169 = vector.load %arg7[%c0_72, %c0_73] : memref<16x8xf32, #tpu.memory_space<vmem>>, vector<16x8xf32>
    %170 = arith.truncf %169 : vector<16x8xf32> to vector<16x8xbf16>
    %171 = arith.truncf %168 : vector<8x64xf32> to vector<8x64xbf16>
    %cst_74 = arith.constant dense<0.000000e+00> : vector<16x64xf32>
    %172 = tpu.matmul %170, %171, %cst_74 {dimension_numbers = #tpu.dot_dimension_numbers<[1], [0], [0], [1], [0, 0, 1, 1], [], []>} : vector<16x8xbf16>, vector<8x64xbf16>, vector<16x64xf32> -> vector<16x64xf32>
    %173 = vector.broadcast %5 : vector<16x1xf32> to vector<16x64xf32>
    %174 = arith.addf %172, %173 : vector<16x64xf32>
    %cst_75 = arith.constant 5.000000e-01 : f32
    %175 = vector.broadcast %cst_75 : f32 to vector<16x64xf32>
    %176 = arith.mulf %175, %174 : vector<16x64xf32>
    %cst_76 = arith.constant 4.471500e-02 : f32
    %177 = vector.broadcast %cst_76 : f32 to vector<16x64xf32>
    %178 = arith.mulf %177, %174 : vector<16x64xf32>
    %179 = arith.mulf %178, %174 : vector<16x64xf32>
    %180 = arith.mulf %179, %174 : vector<16x64xf32>
    %181 = arith.addf %174, %180 : vector<16x64xf32>
    %cst_77 = arith.constant 0.797884583 : f32
    %182 = vector.broadcast %cst_77 : f32 to vector<16x64xf32>
    %183 = arith.mulf %182, %181 : vector<16x64xf32>
    %184 = math.tanh %183 : vector<16x64xf32>
    %cst_78 = arith.constant 1.000000e+00 : f32
    %185 = vector.broadcast %cst_78 : f32 to vector<16x64xf32>
    %186 = arith.addf %185, %184 : vector<16x64xf32>
    %187 = arith.mulf %176, %186 : vector<16x64xf32>
    %188 = arith.truncf %187 : vector<16x64xf32> to vector<16x64xbf16>
    %c0_79 = arith.constant 0 : index
    %c2 = arith.constant 2 : index
    %c0_80 = arith.constant 0 : index
    %c0_81 = arith.constant 0 : index
    %189 = vector.load %arg9[%c0_79, %c2, %c0_80, %c0_81] : memref<1x4x16x64xbf16, #tpu.memory_space<vmem>>, vector<1x1x16x64xbf16>
    %190 = vector.shape_cast %189 : vector<1x1x16x64xbf16> to vector<16x64xbf16>
    %191 = vector.shape_cast %188 : vector<16x64xbf16> to vector<1x1x16x64xbf16>
    tpu.vector_store %arg9[%c0_79, %c2, %c0_80, %c0_81], %191 {strides = array<i32>} : memref<1x4x16x64xbf16, #tpu.memory_space<vmem>>, vector<1x1x16x64xbf16>,
    %192 = vector.extract_strided_slice %4 {offsets = [24, 0], sizes = [8, 64], strides = [1, 1]} : vector<32x64xf32> to vector<8x64xf32>
    %c0_82 = arith.constant 0 : index
    %c0_83 = arith.constant 0 : index
    %193 = vector.load %arg4[%c0_82, %c0_83] : memref<8x1xf32, #tpu.memory_space<vmem>>, vector<8x1xf32>
    %194 = vector.broadcast %193 : vector<8x1xf32> to vector<8x64xf32>
    %195 = arith.addf %192, %194 : vector<8x64xf32>
    %c0_84 = arith.constant 0 : index
    %c0_85 = arith.constant 0 : index
    %196 = vector.load %arg5[%c0_84, %c0_85] : memref<8x1xf32, #tpu.memory_space<vmem>>, vector<8x1xf32>
    %c0_86 = arith.constant 0 : index
    %c0_87 = arith.constant 0 : index
    %197 = vector.load %arg6[%c0_86, %c0_87] : memref<8x1xf32, #tpu.memory_space<vmem>>, vector<8x1xf32>
    %cst_88 = arith.constant dense<0.000000e+00> : vector<64xf32>
    %198 = vector.multi_reduction <add>, %195, %cst_88 [0] : vector<8x64xf32> to vector<64xf32>
    %199 = vector.shape_cast %198 : vector<64xf32> to vector<1x64xf32>
    %cst_89 = arith.constant 8.000000e+00 : f32
    %200 = vector.broadcast %cst_89 : f32 to vector<1x64xf32>
    %201 = arith.divf %199, %200 : vector<1x64xf32>
    %202 = vector.broadcast %201 : vector<1x64xf32> to vector<8x64xf32>
    %203 = arith.subf %195, %202 : vector<8x64xf32>
    %204 = arith.mulf %203, %203 : vector<8x64xf32>
    %cst_90 = arith.constant dense<0.000000e+00> : vector<64xf32>
    %205 = vector.multi_reduction <add>, %204, %cst_90 [0] : vector<8x64xf32> to vector<64xf32>
    %206 = vector.shape_cast %205 : vector<64xf32> to vector<1x64xf32>
    %cst_91 = arith.constant 8.000000e+00 : f32
    %207 = vector.broadcast %cst_91 : f32 to vector<1x64xf32>
    %208 = arith.divf %206, %207 : vector<1x64xf32>
    %cst_92 = arith.constant 9.99999997E-7 : f32
    %209 = vector.broadcast %cst_92 : f32 to vector<1x64xf32>
    %210 = arith.addf %208, %209 : vector<1x64xf32>
    %211 = math.rsqrt %210 : vector<1x64xf32>
    %212 = vector.broadcast %211 : vector<1x64xf32> to vector<8x64xf32>
    %213 = arith.mulf %203, %212 : vector<8x64xf32>
    %214 = vector.broadcast %196 : vector<8x1xf32> to vector<8x64xf32>
    %215 = arith.mulf %213, %214 : vector<8x64xf32>
    %216 = vector.broadcast %197 : vector<8x1xf32> to vector<8x64xf32>
    %217 = arith.addf %215, %216 : vector<8x64xf32>
    %cst_93 = arith.constant 5.000000e-01 : f32
    %218 = vector.broadcast %cst_93 : f32 to vector<8x64xf32>
    %219 = arith.mulf %218, %217 : vector<8x64xf32>
    %cst_94 = arith.constant 4.471500e-02 : f32
    %220 = vector.broadcast %cst_94 : f32 to vector<8x64xf32>
    %221 = arith.mulf %220, %217 : vector<8x64xf32>
    %222 = arith.mulf %221, %217 : vector<8x64xf32>
    %223 = arith.mulf %222, %217 : vector<8x64xf32>
    %224 = arith.addf %217, %223 : vector<8x64xf32>
    %cst_95 = arith.constant 0.797884583 : f32
    %225 = vector.broadcast %cst_95 : f32 to vector<8x64xf32>
    %226 = arith.mulf %225, %224 : vector<8x64xf32>
    %227 = math.tanh %226 : vector<8x64xf32>
    %cst_96 = arith.constant 1.000000e+00 : f32
    %228 = vector.broadcast %cst_96 : f32 to vector<8x64xf32>
    %229 = arith.addf %228, %227 : vector<8x64xf32>
    %230 = arith.mulf %219, %229 : vector<8x64xf32>
    %c0_97 = arith.constant 0 : index
    %c0_98 = arith.constant 0 : index
    %231 = vector.load %arg7[%c0_97, %c0_98] : memref<16x8xf32, #tpu.memory_space<vmem>>, vector<16x8xf32>
    %232 = arith.truncf %231 : vector<16x8xf32> to vector<16x8xbf16>
    %233 = arith.truncf %230 : vector<8x64xf32> to vector<8x64xbf16>
    %cst_99 = arith.constant dense<0.000000e+00> : vector<16x64xf32>
    %234 = tpu.matmul %232, %233, %cst_99 {dimension_numbers = #tpu.dot_dimension_numbers<[1], [0], [0], [1], [0, 0, 1, 1], [], []>} : vector<16x8xbf16>, vector<8x64xbf16>, vector<16x64xf32> -> vector<16x64xf32>
    %235 = vector.broadcast %5 : vector<16x1xf32> to vector<16x64xf32>
    %236 = arith.addf %234, %235 : vector<16x64xf32>
    %cst_100 = arith.constant 5.000000e-01 : f32
    %237 = vector.broadcast %cst_100 : f32 to vector<16x64xf32>
    %238 = arith.mulf %237, %236 : vector<16x64xf32>
    %cst_101 = arith.constant 4.471500e-02 : f32
    %239 = vector.broadcast %cst_101 : f32 to vector<16x64xf32>
    %240 = arith.mulf %239, %236 : vector<16x64xf32>
    %241 = arith.mulf %240, %236 : vector<16x64xf32>
    %242 = arith.mulf %241, %236 : vector<16x64xf32>
    %243 = arith.addf %236, %242 : vector<16x64xf32>
    %cst_102 = arith.constant 0.797884583 : f32
    %244 = vector.broadcast %cst_102 : f32 to vector<16x64xf32>
    %245 = arith.mulf %244, %243 : vector<16x64xf32>
    %246 = math.tanh %245 : vector<16x64xf32>
    %cst_103 = arith.constant 1.000000e+00 : f32
    %247 = vector.broadcast %cst_103 : f32 to vector<16x64xf32>
    %248 = arith.addf %247, %246 : vector<16x64xf32>
    %249 = arith.mulf %238, %248 : vector<16x64xf32>
    %250 = arith.truncf %249 : vector<16x64xf32> to vector<16x64xbf16>
    %c0_104 = arith.constant 0 : index
    %c3 = arith.constant 3 : index
    %c0_105 = arith.constant 0 : index
    %c0_106 = arith.constant 0 : index
    %251 = vector.load %arg9[%c0_104, %c3, %c0_105, %c0_106] : memref<1x4x16x64xbf16, #tpu.memory_space<vmem>>, vector<1x1x16x64xbf16>
    %252 = vector.shape_cast %251 : vector<1x1x16x64xbf16> to vector<16x64xbf16>
    %253 = vector.shape_cast %250 : vector<16x64xbf16> to vector<1x1x16x64xbf16>
    tpu.vector_store %arg9[%c0_104, %c3, %c0_105, %c0_106], %253 {strides = array<i32>} : memref<1x4x16x64xbf16, #tpu.memory_space<vmem>>, vector<1x1x16x64xbf16>,
    return
  }
  func.func @transform_0(%arg0: i32, %arg1: i32) -> (i32, i32, i32) {
    %c0_i32 = arith.constant 0 : i32
    %c0_i32_0 = arith.constant 0 : i32
    return %arg0, %c0_i32, %arg1 : i32, i32, i32
  }
  func.func @transform_1(%arg0: i32, %arg1: i32) -> (i32, i32) {
    %c0_i32 = arith.constant 0 : i32
    %c0_i32_0 = arith.constant 0 : i32
    %c0_i32_1 = arith.constant 0 : i32
    return %c0_i32, %c0_i32_0 : i32, i32
  }
  func.func @transform_2(%arg0: i32, %arg1: i32) -> (i32, i32) {
    %c0_i32 = arith.constant 0 : i32
    %c0_i32_0 = arith.constant 0 : i32
    %c0_i32_1 = arith.constant 0 : i32
    return %c0_i32, %c0_i32_0 : i32, i32
  }
  func.func @transform_3(%arg0: i32, %arg1: i32) -> (i32, i32) {
    %c0_i32 = arith.constant 0 : i32
    %c0_i32_0 = arith.constant 0 : i32
    %c0_i32_1 = arith.constant 0 : i32
    return %c0_i32, %c0_i32_0 : i32, i32
  }
  func.func @transform_4(%arg0: i32, %arg1: i32) -> (i32, i32) {
    %c0_i32 = arith.constant 0 : i32
    %c0_i32_0 = arith.constant 0 : i32
    %c0_i32_1 = arith.constant 0 : i32
    return %c0_i32, %c0_i32_0 : i32, i32
  }
  func.func @transform_5(%arg0: i32, %arg1: i32) -> (i32, i32) {
    %c0_i32 = arith.constant 0 : i32
    %c0_i32_0 = arith.constant 0 : i32
    %c0_i32_1 = arith.constant 0 : i32
    return %c0_i32, %c0_i32_0 : i32, i32
  }
  func.func @transform_6(%arg0: i32, %arg1: i32) -> (i32, i32) {
    %c0_i32 = arith.constant 0 : i32
    %c0_i32_0 = arith.constant 0 : i32
    %c0_i32_1 = arith.constant 0 : i32
    return %c0_i32, %c0_i32_0 : i32, i32
  }
  func.func @transform_7(%arg0: i32, %arg1: i32) -> (i32, i32, i32, i32) {
    %c0_i32 = arith.constant 0 : i32
    %c0_i32_0 = arith.constant 0 : i32
    %c0_i32_1 = arith.constant 0 : i32
    return %arg0, %c0_i32, %c0_i32_0, %arg1 : i32, i32, i32, i32
  }
}

module attributes {stable_mosaic.version = 11 : i64} {
  func.func @_hq_fused_kernel(%arg0: i32, %arg1: i32, %arg2: memref<1x32x64xbf16, #tpu.memory_space<vmem>>, %arg3: memref<1x64x48xf32, #tpu.memory_space<vmem>>, %arg4: memref<32x32xf32, #tpu.memory_space<vmem>>, %arg5: memref<8x1xf32, #tpu.memory_space<vmem>>, %arg6: memref<8x1xf32, #tpu.memory_space<vmem>>, %arg7: memref<8x1xf32, #tpu.memory_space<vmem>>, %arg8: memref<16x8xf32, #tpu.memory_space<vmem>>, %arg9: memref<128x48xf32, #tpu.memory_space<vmem>>, %arg10: memref<32x1xf32, #tpu.memory_space<vmem>>, %arg11: memref<32x1xf32, #tpu.memory_space<vmem>>, %arg12: memref<32x1xf32, #tpu.memory_space<vmem>>, %arg13: memref<16x32xf32, #tpu.memory_space<vmem>>, %arg14: memref<16x1xf32, #tpu.memory_space<vmem>>, %arg15: memref<1x4x16x64xbf16, #tpu.memory_space<vmem>>) attributes {dimension_semantics = [#tpu.dimension_semantics<parallel>, #tpu.dimension_semantics<parallel>], iteration_bounds = array<i64: 2, 1>, scalar_prefetch = 0 : i64, scratch_operands = 0 : i64, tpu.core_type = #tpu.core_type<tc>, window_params = [{transform_indices = @transform_0, window_bounds = array<i64: 1, 32, 64>}, {transform_indices = @transform_1, window_bounds = array<i64: 1, 64, 48>}, {pipeline_mode = #tpu.pipeline_mode<synchronous>, transform_indices = @transform_2, window_bounds = array<i64: 32, 32>}, {pipeline_mode = #tpu.pipeline_mode<synchronous>, transform_indices = @transform_3, window_bounds = array<i64: 8, 1>}, {pipeline_mode = #tpu.pipeline_mode<synchronous>, transform_indices = @transform_4, window_bounds = array<i64: 8, 1>}, {pipeline_mode = #tpu.pipeline_mode<synchronous>, transform_indices = @transform_5, window_bounds = array<i64: 8, 1>}, {pipeline_mode = #tpu.pipeline_mode<synchronous>, transform_indices = @transform_6, window_bounds = array<i64: 16, 8>}, {pipeline_mode = #tpu.pipeline_mode<synchronous>, transform_indices = @transform_7, window_bounds = array<i64: 128, 48>}, {pipeline_mode = #tpu.pipeline_mode<synchronous>, transform_indices = @transform_8, window_bounds = array<i64: 32, 1>}, {pipeline_mode = #tpu.pipeline_mode<synchronous>, transform_indices = @transform_9, window_bounds = array<i64: 32, 1>}, {pipeline_mode = #tpu.pipeline_mode<synchronous>, transform_indices = @transform_10, window_bounds = array<i64: 32, 1>}, {pipeline_mode = #tpu.pipeline_mode<synchronous>, transform_indices = @transform_11, window_bounds = array<i64: 16, 32>}, {pipeline_mode = #tpu.pipeline_mode<synchronous>, transform_indices = @transform_12, window_bounds = array<i64: 16, 1>}, {transform_indices = @transform_13, window_bounds = array<i64: 1, 4, 16, 64>}]} {
    %c0 = arith.constant 0 : index
    %c0_0 = arith.constant 0 : index
    %c0_1 = arith.constant 0 : index
    %0 = vector.load %arg2[%c0, %c0_0, %c0_1] : memref<1x32x64xbf16, #tpu.memory_space<vmem>>, vector<1x32x64xbf16>
    %1 = vector.shape_cast %0 : vector<1x32x64xbf16> to vector<32x64xbf16>
    %c0_2 = arith.constant 0 : index
    %c0_3 = arith.constant 0 : index
    %c0_4 = arith.constant 0 : index
    %2 = vector.load %arg3[%c0_2, %c0_3, %c0_4] : memref<1x64x48xf32, #tpu.memory_space<vmem>>, vector<1x64x48xf32>
    %3 = vector.shape_cast %2 : vector<1x64x48xf32> to vector<64x48xf32>
    %c0_5 = arith.constant 0 : index
    %c0_6 = arith.constant 0 : index
    %4 = vector.load %arg4[%c0_5, %c0_6] : memref<32x32xf32, #tpu.memory_space<vmem>>, vector<32x32xf32>
    %5 = arith.truncf %4 : vector<32x32xf32> to vector<32x32xbf16>
    %cst = arith.constant dense<0.000000e+00> : vector<32x64xf32>
    %6 = tpu.matmul %5, %1, %cst {dimension_numbers = #tpu.dot_dimension_numbers<[1], [0], [0], [1], [0, 0, 1, 1], [], []>} : vector<32x32xbf16>, vector<32x64xbf16>, vector<32x64xf32> -> vector<32x64xf32>
    %c0_7 = arith.constant 0 : index
    %c0_8 = arith.constant 0 : index
    %7 = vector.load %arg9[%c0_7, %c0_8] : memref<128x48xf32, #tpu.memory_space<vmem>>, vector<128x48xf32>
    %8 = arith.truncf %7 : vector<128x48xf32> to vector<128x48xbf16>
    %9 = arith.truncf %3 : vector<64x48xf32> to vector<64x48xbf16>
    %cst_9 = arith.constant dense<0.000000e+00> : vector<128x64xf32>
    %10 = tpu.matmul %8, %9, %cst_9 {dimension_numbers = #tpu.dot_dimension_numbers<[1], [1], [0], [0], [0, 0, 1, 0], [], []>} : vector<128x48xbf16>, vector<64x48xbf16>, vector<128x64xf32> -> vector<128x64xf32>
    %c0_10 = arith.constant 0 : index
    %c0_11 = arith.constant 0 : index
    %11 = vector.load %arg14[%c0_10, %c0_11] : memref<16x1xf32, #tpu.memory_space<vmem>>, vector<16x1xf32>
    %12 = vector.extract_strided_slice %6 {offsets = [0, 0], sizes = [8, 64], strides = [1, 1]} : vector<32x64xf32> to vector<8x64xf32>
    %c0_12 = arith.constant 0 : index
    %c0_13 = arith.constant 0 : index
    %13 = vector.load %arg5[%c0_12, %c0_13] : memref<8x1xf32, #tpu.memory_space<vmem>>, vector<8x1xf32>
    %14 = vector.broadcast %13 : vector<8x1xf32> to vector<8x64xf32>
    %15 = arith.addf %12, %14 : vector<8x64xf32>
    %c0_14 = arith.constant 0 : index
    %c0_15 = arith.constant 0 : index
    %16 = vector.load %arg6[%c0_14, %c0_15] : memref<8x1xf32, #tpu.memory_space<vmem>>, vector<8x1xf32>
    %c0_16 = arith.constant 0 : index
    %c0_17 = arith.constant 0 : index
    %17 = vector.load %arg7[%c0_16, %c0_17] : memref<8x1xf32, #tpu.memory_space<vmem>>, vector<8x1xf32>
    %cst_18 = arith.constant dense<0.000000e+00> : vector<64xf32>
    %18 = vector.multi_reduction <add>, %15, %cst_18 [0] : vector<8x64xf32> to vector<64xf32>
    %19 = vector.shape_cast %18 : vector<64xf32> to vector<1x64xf32>
    %cst_19 = arith.constant 8.000000e+00 : f32
    %20 = vector.broadcast %cst_19 : f32 to vector<1x64xf32>
    %21 = arith.divf %19, %20 : vector<1x64xf32>
    %22 = vector.broadcast %21 : vector<1x64xf32> to vector<8x64xf32>
    %23 = arith.subf %15, %22 : vector<8x64xf32>
    %24 = arith.mulf %23, %23 : vector<8x64xf32>
    %cst_20 = arith.constant dense<0.000000e+00> : vector<64xf32>
    %25 = vector.multi_reduction <add>, %24, %cst_20 [0] : vector<8x64xf32> to vector<64xf32>
    %26 = vector.shape_cast %25 : vector<64xf32> to vector<1x64xf32>
    %cst_21 = arith.constant 8.000000e+00 : f32
    %27 = vector.broadcast %cst_21 : f32 to vector<1x64xf32>
    %28 = arith.divf %26, %27 : vector<1x64xf32>
    %cst_22 = arith.constant 9.99999997E-7 : f32
    %29 = vector.broadcast %cst_22 : f32 to vector<1x64xf32>
    %30 = arith.addf %28, %29 : vector<1x64xf32>
    %31 = math.rsqrt %30 : vector<1x64xf32>
    %32 = vector.broadcast %31 : vector<1x64xf32> to vector<8x64xf32>
    %33 = arith.mulf %23, %32 : vector<8x64xf32>
    %34 = vector.broadcast %16 : vector<8x1xf32> to vector<8x64xf32>
    %35 = arith.mulf %33, %34 : vector<8x64xf32>
    %36 = vector.broadcast %17 : vector<8x1xf32> to vector<8x64xf32>
    %37 = arith.addf %35, %36 : vector<8x64xf32>
    %cst_23 = arith.constant 5.000000e-01 : f32
    %38 = vector.broadcast %cst_23 : f32 to vector<8x64xf32>
    %39 = arith.mulf %38, %37 : vector<8x64xf32>
    %cst_24 = arith.constant 4.471500e-02 : f32
    %40 = vector.broadcast %cst_24 : f32 to vector<8x64xf32>
    %41 = arith.mulf %40, %37 : vector<8x64xf32>
    %42 = arith.mulf %41, %37 : vector<8x64xf32>
    %43 = arith.mulf %42, %37 : vector<8x64xf32>
    %44 = arith.addf %37, %43 : vector<8x64xf32>
    %cst_25 = arith.constant 0.797884583 : f32
    %45 = vector.broadcast %cst_25 : f32 to vector<8x64xf32>
    %46 = arith.mulf %45, %44 : vector<8x64xf32>
    %47 = math.tanh %46 : vector<8x64xf32>
    %cst_26 = arith.constant 1.000000e+00 : f32
    %48 = vector.broadcast %cst_26 : f32 to vector<8x64xf32>
    %49 = arith.addf %48, %47 : vector<8x64xf32>
    %50 = arith.mulf %39, %49 : vector<8x64xf32>
    %51 = vector.extract_strided_slice %10 {offsets = [0, 0], sizes = [32, 64], strides = [1, 1]} : vector<128x64xf32> to vector<32x64xf32>
    %c0_27 = arith.constant 0 : index
    %c0_28 = arith.constant 0 : index
    %52 = vector.load %arg10[%c0_27, %c0_28] : memref<32x1xf32, #tpu.memory_space<vmem>>, vector<32x1xf32>
    %53 = vector.broadcast %52 : vector<32x1xf32> to vector<32x64xf32>
    %54 = arith.addf %51, %53 : vector<32x64xf32>
    %c0_29 = arith.constant 0 : index
    %c0_30 = arith.constant 0 : index
    %55 = vector.load %arg11[%c0_29, %c0_30] : memref<32x1xf32, #tpu.memory_space<vmem>>, vector<32x1xf32>
    %c0_31 = arith.constant 0 : index
    %c0_32 = arith.constant 0 : index
    %56 = vector.load %arg12[%c0_31, %c0_32] : memref<32x1xf32, #tpu.memory_space<vmem>>, vector<32x1xf32>
    %cst_33 = arith.constant dense<0.000000e+00> : vector<64xf32>
    %57 = vector.multi_reduction <add>, %54, %cst_33 [0] : vector<32x64xf32> to vector<64xf32>
    %58 = vector.shape_cast %57 : vector<64xf32> to vector<1x64xf32>
    %cst_34 = arith.constant 3.200000e+01 : f32
    %59 = vector.broadcast %cst_34 : f32 to vector<1x64xf32>
    %60 = arith.divf %58, %59 : vector<1x64xf32>
    %61 = vector.broadcast %60 : vector<1x64xf32> to vector<32x64xf32>
    %62 = arith.subf %54, %61 : vector<32x64xf32>
    %63 = arith.mulf %62, %62 : vector<32x64xf32>
    %cst_35 = arith.constant dense<0.000000e+00> : vector<64xf32>
    %64 = vector.multi_reduction <add>, %63, %cst_35 [0] : vector<32x64xf32> to vector<64xf32>
    %65 = vector.shape_cast %64 : vector<64xf32> to vector<1x64xf32>
    %cst_36 = arith.constant 3.200000e+01 : f32
    %66 = vector.broadcast %cst_36 : f32 to vector<1x64xf32>
    %67 = arith.divf %65, %66 : vector<1x64xf32>
    %cst_37 = arith.constant 9.99999997E-7 : f32
    %68 = vector.broadcast %cst_37 : f32 to vector<1x64xf32>
    %69 = arith.addf %67, %68 : vector<1x64xf32>
    %70 = math.rsqrt %69 : vector<1x64xf32>
    %71 = vector.broadcast %70 : vector<1x64xf32> to vector<32x64xf32>
    %72 = arith.mulf %62, %71 : vector<32x64xf32>
    %73 = vector.broadcast %55 : vector<32x1xf32> to vector<32x64xf32>
    %74 = arith.mulf %72, %73 : vector<32x64xf32>
    %75 = vector.broadcast %56 : vector<32x1xf32> to vector<32x64xf32>
    %76 = arith.addf %74, %75 : vector<32x64xf32>
    %cst_38 = arith.constant 5.000000e-01 : f32
    %77 = vector.broadcast %cst_38 : f32 to vector<32x64xf32>
    %78 = arith.mulf %77, %76 : vector<32x64xf32>
    %cst_39 = arith.constant 4.471500e-02 : f32
    %79 = vector.broadcast %cst_39 : f32 to vector<32x64xf32>
    %80 = arith.mulf %79, %76 : vector<32x64xf32>
    %81 = arith.mulf %80, %76 : vector<32x64xf32>
    %82 = arith.mulf %81, %76 : vector<32x64xf32>
    %83 = arith.addf %76, %82 : vector<32x64xf32>
    %cst_40 = arith.constant 0.797884583 : f32
    %84 = vector.broadcast %cst_40 : f32 to vector<32x64xf32>
    %85 = arith.mulf %84, %83 : vector<32x64xf32>
    %86 = math.tanh %85 : vector<32x64xf32>
    %cst_41 = arith.constant 1.000000e+00 : f32
    %87 = vector.broadcast %cst_41 : f32 to vector<32x64xf32>
    %88 = arith.addf %87, %86 : vector<32x64xf32>
    %89 = arith.mulf %78, %88 : vector<32x64xf32>
    %c0_42 = arith.constant 0 : index
    %c0_43 = arith.constant 0 : index
    %90 = vector.load %arg8[%c0_42, %c0_43] : memref<16x8xf32, #tpu.memory_space<vmem>>, vector<16x8xf32>
    %91 = arith.truncf %90 : vector<16x8xf32> to vector<16x8xbf16>
    %92 = arith.truncf %50 : vector<8x64xf32> to vector<8x64xbf16>
    %cst_44 = arith.constant dense<0.000000e+00> : vector<16x64xf32>
    %93 = tpu.matmul %91, %92, %cst_44 {dimension_numbers = #tpu.dot_dimension_numbers<[1], [0], [0], [1], [0, 0, 1, 1], [], []>} : vector<16x8xbf16>, vector<8x64xbf16>, vector<16x64xf32> -> vector<16x64xf32>
    %c0_45 = arith.constant 0 : index
    %c0_46 = arith.constant 0 : index
    %94 = vector.load %arg13[%c0_45, %c0_46] : memref<16x32xf32, #tpu.memory_space<vmem>>, vector<16x32xf32>
    %95 = arith.truncf %94 : vector<16x32xf32> to vector<16x32xbf16>
    %96 = arith.truncf %89 : vector<32x64xf32> to vector<32x64xbf16>
    %cst_47 = arith.constant dense<0.000000e+00> : vector<16x64xf32>
    %97 = tpu.matmul %95, %96, %cst_47 {dimension_numbers = #tpu.dot_dimension_numbers<[1], [0], [0], [1], [0, 0, 1, 1], [], []>} : vector<16x32xbf16>, vector<32x64xbf16>, vector<16x64xf32> -> vector<16x64xf32>
    %98 = arith.addf %93, %97 : vector<16x64xf32>
    %99 = vector.broadcast %11 : vector<16x1xf32> to vector<16x64xf32>
    %100 = arith.addf %98, %99 : vector<16x64xf32>
    %101 = arith.truncf %100 : vector<16x64xf32> to vector<16x64xbf16>
    %c0_48 = arith.constant 0 : index
    %c0_49 = arith.constant 0 : index
    %c0_50 = arith.constant 0 : index
    %c0_51 = arith.constant 0 : index
    %102 = vector.load %arg15[%c0_48, %c0_49, %c0_50, %c0_51] : memref<1x4x16x64xbf16, #tpu.memory_space<vmem>>, vector<1x1x16x64xbf16>
    %103 = vector.shape_cast %102 : vector<1x1x16x64xbf16> to vector<16x64xbf16>
    %104 = vector.shape_cast %101 : vector<16x64xbf16> to vector<1x1x16x64xbf16>
    tpu.vector_store %arg15[%c0_48, %c0_49, %c0_50, %c0_51], %104 {strides = array<i32>} : memref<1x4x16x64xbf16, #tpu.memory_space<vmem>>, vector<1x1x16x64xbf16>,
    %105 = vector.extract_strided_slice %6 {offsets = [8, 0], sizes = [8, 64], strides = [1, 1]} : vector<32x64xf32> to vector<8x64xf32>
    %c0_52 = arith.constant 0 : index
    %c0_53 = arith.constant 0 : index
    %106 = vector.load %arg5[%c0_52, %c0_53] : memref<8x1xf32, #tpu.memory_space<vmem>>, vector<8x1xf32>
    %107 = vector.broadcast %106 : vector<8x1xf32> to vector<8x64xf32>
    %108 = arith.addf %105, %107 : vector<8x64xf32>
    %c0_54 = arith.constant 0 : index
    %c0_55 = arith.constant 0 : index
    %109 = vector.load %arg6[%c0_54, %c0_55] : memref<8x1xf32, #tpu.memory_space<vmem>>, vector<8x1xf32>
    %c0_56 = arith.constant 0 : index
    %c0_57 = arith.constant 0 : index
    %110 = vector.load %arg7[%c0_56, %c0_57] : memref<8x1xf32, #tpu.memory_space<vmem>>, vector<8x1xf32>
    %cst_58 = arith.constant dense<0.000000e+00> : vector<64xf32>
    %111 = vector.multi_reduction <add>, %108, %cst_58 [0] : vector<8x64xf32> to vector<64xf32>
    %112 = vector.shape_cast %111 : vector<64xf32> to vector<1x64xf32>
    %cst_59 = arith.constant 8.000000e+00 : f32
    %113 = vector.broadcast %cst_59 : f32 to vector<1x64xf32>
    %114 = arith.divf %112, %113 : vector<1x64xf32>
    %115 = vector.broadcast %114 : vector<1x64xf32> to vector<8x64xf32>
    %116 = arith.subf %108, %115 : vector<8x64xf32>
    %117 = arith.mulf %116, %116 : vector<8x64xf32>
    %cst_60 = arith.constant dense<0.000000e+00> : vector<64xf32>
    %118 = vector.multi_reduction <add>, %117, %cst_60 [0] : vector<8x64xf32> to vector<64xf32>
    %119 = vector.shape_cast %118 : vector<64xf32> to vector<1x64xf32>
    %cst_61 = arith.constant 8.000000e+00 : f32
    %120 = vector.broadcast %cst_61 : f32 to vector<1x64xf32>
    %121 = arith.divf %119, %120 : vector<1x64xf32>
    %cst_62 = arith.constant 9.99999997E-7 : f32
    %122 = vector.broadcast %cst_62 : f32 to vector<1x64xf32>
    %123 = arith.addf %121, %122 : vector<1x64xf32>
    %124 = math.rsqrt %123 : vector<1x64xf32>
    %125 = vector.broadcast %124 : vector<1x64xf32> to vector<8x64xf32>
    %126 = arith.mulf %116, %125 : vector<8x64xf32>
    %127 = vector.broadcast %109 : vector<8x1xf32> to vector<8x64xf32>
    %128 = arith.mulf %126, %127 : vector<8x64xf32>
    %129 = vector.broadcast %110 : vector<8x1xf32> to vector<8x64xf32>
    %130 = arith.addf %128, %129 : vector<8x64xf32>
    %cst_63 = arith.constant 5.000000e-01 : f32
    %131 = vector.broadcast %cst_63 : f32 to vector<8x64xf32>
    %132 = arith.mulf %131, %130 : vector<8x64xf32>
    %cst_64 = arith.constant 4.471500e-02 : f32
    %133 = vector.broadcast %cst_64 : f32 to vector<8x64xf32>
    %134 = arith.mulf %133, %130 : vector<8x64xf32>
    %135 = arith.mulf %134, %130 : vector<8x64xf32>
    %136 = arith.mulf %135, %130 : vector<8x64xf32>
    %137 = arith.addf %130, %136 : vector<8x64xf32>
    %cst_65 = arith.constant 0.797884583 : f32
    %138 = vector.broadcast %cst_65 : f32 to vector<8x64xf32>
    %139 = arith.mulf %138, %137 : vector<8x64xf32>
    %140 = math.tanh %139 : vector<8x64xf32>
    %cst_66 = arith.constant 1.000000e+00 : f32
    %141 = vector.broadcast %cst_66 : f32 to vector<8x64xf32>
    %142 = arith.addf %141, %140 : vector<8x64xf32>
    %143 = arith.mulf %132, %142 : vector<8x64xf32>
    %144 = vector.extract_strided_slice %10 {offsets = [32, 0], sizes = [32, 64], strides = [1, 1]} : vector<128x64xf32> to vector<32x64xf32>
    %c0_67 = arith.constant 0 : index
    %c0_68 = arith.constant 0 : index
    %145 = vector.load %arg10[%c0_67, %c0_68] : memref<32x1xf32, #tpu.memory_space<vmem>>, vector<32x1xf32>
    %146 = vector.broadcast %145 : vector<32x1xf32> to vector<32x64xf32>
    %147 = arith.addf %144, %146 : vector<32x64xf32>
    %c0_69 = arith.constant 0 : index
    %c0_70 = arith.constant 0 : index
    %148 = vector.load %arg11[%c0_69, %c0_70] : memref<32x1xf32, #tpu.memory_space<vmem>>, vector<32x1xf32>
    %c0_71 = arith.constant 0 : index
    %c0_72 = arith.constant 0 : index
    %149 = vector.load %arg12[%c0_71, %c0_72] : memref<32x1xf32, #tpu.memory_space<vmem>>, vector<32x1xf32>
    %cst_73 = arith.constant dense<0.000000e+00> : vector<64xf32>
    %150 = vector.multi_reduction <add>, %147, %cst_73 [0] : vector<32x64xf32> to vector<64xf32>
    %151 = vector.shape_cast %150 : vector<64xf32> to vector<1x64xf32>
    %cst_74 = arith.constant 3.200000e+01 : f32
    %152 = vector.broadcast %cst_74 : f32 to vector<1x64xf32>
    %153 = arith.divf %151, %152 : vector<1x64xf32>
    %154 = vector.broadcast %153 : vector<1x64xf32> to vector<32x64xf32>
    %155 = arith.subf %147, %154 : vector<32x64xf32>
    %156 = arith.mulf %155, %155 : vector<32x64xf32>
    %cst_75 = arith.constant dense<0.000000e+00> : vector<64xf32>
    %157 = vector.multi_reduction <add>, %156, %cst_75 [0] : vector<32x64xf32> to vector<64xf32>
    %158 = vector.shape_cast %157 : vector<64xf32> to vector<1x64xf32>
    %cst_76 = arith.constant 3.200000e+01 : f32
    %159 = vector.broadcast %cst_76 : f32 to vector<1x64xf32>
    %160 = arith.divf %158, %159 : vector<1x64xf32>
    %cst_77 = arith.constant 9.99999997E-7 : f32
    %161 = vector.broadcast %cst_77 : f32 to vector<1x64xf32>
    %162 = arith.addf %160, %161 : vector<1x64xf32>
    %163 = math.rsqrt %162 : vector<1x64xf32>
    %164 = vector.broadcast %163 : vector<1x64xf32> to vector<32x64xf32>
    %165 = arith.mulf %155, %164 : vector<32x64xf32>
    %166 = vector.broadcast %148 : vector<32x1xf32> to vector<32x64xf32>
    %167 = arith.mulf %165, %166 : vector<32x64xf32>
    %168 = vector.broadcast %149 : vector<32x1xf32> to vector<32x64xf32>
    %169 = arith.addf %167, %168 : vector<32x64xf32>
    %cst_78 = arith.constant 5.000000e-01 : f32
    %170 = vector.broadcast %cst_78 : f32 to vector<32x64xf32>
    %171 = arith.mulf %170, %169 : vector<32x64xf32>
    %cst_79 = arith.constant 4.471500e-02 : f32
    %172 = vector.broadcast %cst_79 : f32 to vector<32x64xf32>
    %173 = arith.mulf %172, %169 : vector<32x64xf32>
    %174 = arith.mulf %173, %169 : vector<32x64xf32>
    %175 = arith.mulf %174, %169 : vector<32x64xf32>
    %176 = arith.addf %169, %175 : vector<32x64xf32>
    %cst_80 = arith.constant 0.797884583 : f32
    %177 = vector.broadcast %cst_80 : f32 to vector<32x64xf32>
    %178 = arith.mulf %177, %176 : vector<32x64xf32>
    %179 = math.tanh %178 : vector<32x64xf32>
    %cst_81 = arith.constant 1.000000e+00 : f32
    %180 = vector.broadcast %cst_81 : f32 to vector<32x64xf32>
    %181 = arith.addf %180, %179 : vector<32x64xf32>
    %182 = arith.mulf %171, %181 : vector<32x64xf32>
    %c0_82 = arith.constant 0 : index
    %c0_83 = arith.constant 0 : index
    %183 = vector.load %arg8[%c0_82, %c0_83] : memref<16x8xf32, #tpu.memory_space<vmem>>, vector<16x8xf32>
    %184 = arith.truncf %183 : vector<16x8xf32> to vector<16x8xbf16>
    %185 = arith.truncf %143 : vector<8x64xf32> to vector<8x64xbf16>
    %cst_84 = arith.constant dense<0.000000e+00> : vector<16x64xf32>
    %186 = tpu.matmul %184, %185, %cst_84 {dimension_numbers = #tpu.dot_dimension_numbers<[1], [0], [0], [1], [0, 0, 1, 1], [], []>} : vector<16x8xbf16>, vector<8x64xbf16>, vector<16x64xf32> -> vector<16x64xf32>
    %c0_85 = arith.constant 0 : index
    %c0_86 = arith.constant 0 : index
    %187 = vector.load %arg13[%c0_85, %c0_86] : memref<16x32xf32, #tpu.memory_space<vmem>>, vector<16x32xf32>
    %188 = arith.truncf %187 : vector<16x32xf32> to vector<16x32xbf16>
    %189 = arith.truncf %182 : vector<32x64xf32> to vector<32x64xbf16>
    %cst_87 = arith.constant dense<0.000000e+00> : vector<16x64xf32>
    %190 = tpu.matmul %188, %189, %cst_87 {dimension_numbers = #tpu.dot_dimension_numbers<[1], [0], [0], [1], [0, 0, 1, 1], [], []>} : vector<16x32xbf16>, vector<32x64xbf16>, vector<16x64xf32> -> vector<16x64xf32>
    %191 = arith.addf %186, %190 : vector<16x64xf32>
    %192 = vector.broadcast %11 : vector<16x1xf32> to vector<16x64xf32>
    %193 = arith.addf %191, %192 : vector<16x64xf32>
    %194 = arith.truncf %193 : vector<16x64xf32> to vector<16x64xbf16>
    %c0_88 = arith.constant 0 : index
    %c1 = arith.constant 1 : index
    %c0_89 = arith.constant 0 : index
    %c0_90 = arith.constant 0 : index
    %195 = vector.load %arg15[%c0_88, %c1, %c0_89, %c0_90] : memref<1x4x16x64xbf16, #tpu.memory_space<vmem>>, vector<1x1x16x64xbf16>
    %196 = vector.shape_cast %195 : vector<1x1x16x64xbf16> to vector<16x64xbf16>
    %197 = vector.shape_cast %194 : vector<16x64xbf16> to vector<1x1x16x64xbf16>
    tpu.vector_store %arg15[%c0_88, %c1, %c0_89, %c0_90], %197 {strides = array<i32>} : memref<1x4x16x64xbf16, #tpu.memory_space<vmem>>, vector<1x1x16x64xbf16>,
    %198 = vector.extract_strided_slice %6 {offsets = [16, 0], sizes = [8, 64], strides = [1, 1]} : vector<32x64xf32> to vector<8x64xf32>
    %c0_91 = arith.constant 0 : index
    %c0_92 = arith.constant 0 : index
    %199 = vector.load %arg5[%c0_91, %c0_92] : memref<8x1xf32, #tpu.memory_space<vmem>>, vector<8x1xf32>
    %200 = vector.broadcast %199 : vector<8x1xf32> to vector<8x64xf32>
    %201 = arith.addf %198, %200 : vector<8x64xf32>
    %c0_93 = arith.constant 0 : index
    %c0_94 = arith.constant 0 : index
    %202 = vector.load %arg6[%c0_93, %c0_94] : memref<8x1xf32, #tpu.memory_space<vmem>>, vector<8x1xf32>
    %c0_95 = arith.constant 0 : index
    %c0_96 = arith.constant 0 : index
    %203 = vector.load %arg7[%c0_95, %c0_96] : memref<8x1xf32, #tpu.memory_space<vmem>>, vector<8x1xf32>
    %cst_97 = arith.constant dense<0.000000e+00> : vector<64xf32>
    %204 = vector.multi_reduction <add>, %201, %cst_97 [0] : vector<8x64xf32> to vector<64xf32>
    %205 = vector.shape_cast %204 : vector<64xf32> to vector<1x64xf32>
    %cst_98 = arith.constant 8.000000e+00 : f32
    %206 = vector.broadcast %cst_98 : f32 to vector<1x64xf32>
    %207 = arith.divf %205, %206 : vector<1x64xf32>
    %208 = vector.broadcast %207 : vector<1x64xf32> to vector<8x64xf32>
    %209 = arith.subf %201, %208 : vector<8x64xf32>
    %210 = arith.mulf %209, %209 : vector<8x64xf32>
    %cst_99 = arith.constant dense<0.000000e+00> : vector<64xf32>
    %211 = vector.multi_reduction <add>, %210, %cst_99 [0] : vector<8x64xf32> to vector<64xf32>
    %212 = vector.shape_cast %211 : vector<64xf32> to vector<1x64xf32>
    %cst_100 = arith.constant 8.000000e+00 : f32
    %213 = vector.broadcast %cst_100 : f32 to vector<1x64xf32>
    %214 = arith.divf %212, %213 : vector<1x64xf32>
    %cst_101 = arith.constant 9.99999997E-7 : f32
    %215 = vector.broadcast %cst_101 : f32 to vector<1x64xf32>
    %216 = arith.addf %214, %215 : vector<1x64xf32>
    %217 = math.rsqrt %216 : vector<1x64xf32>
    %218 = vector.broadcast %217 : vector<1x64xf32> to vector<8x64xf32>
    %219 = arith.mulf %209, %218 : vector<8x64xf32>
    %220 = vector.broadcast %202 : vector<8x1xf32> to vector<8x64xf32>
    %221 = arith.mulf %219, %220 : vector<8x64xf32>
    %222 = vector.broadcast %203 : vector<8x1xf32> to vector<8x64xf32>
    %223 = arith.addf %221, %222 : vector<8x64xf32>
    %cst_102 = arith.constant 5.000000e-01 : f32
    %224 = vector.broadcast %cst_102 : f32 to vector<8x64xf32>
    %225 = arith.mulf %224, %223 : vector<8x64xf32>
    %cst_103 = arith.constant 4.471500e-02 : f32
    %226 = vector.broadcast %cst_103 : f32 to vector<8x64xf32>
    %227 = arith.mulf %226, %223 : vector<8x64xf32>
    %228 = arith.mulf %227, %223 : vector<8x64xf32>
    %229 = arith.mulf %228, %223 : vector<8x64xf32>
    %230 = arith.addf %223, %229 : vector<8x64xf32>
    %cst_104 = arith.constant 0.797884583 : f32
    %231 = vector.broadcast %cst_104 : f32 to vector<8x64xf32>
    %232 = arith.mulf %231, %230 : vector<8x64xf32>
    %233 = math.tanh %232 : vector<8x64xf32>
    %cst_105 = arith.constant 1.000000e+00 : f32
    %234 = vector.broadcast %cst_105 : f32 to vector<8x64xf32>
    %235 = arith.addf %234, %233 : vector<8x64xf32>
    %236 = arith.mulf %225, %235 : vector<8x64xf32>
    %237 = vector.extract_strided_slice %10 {offsets = [64, 0], sizes = [32, 64], strides = [1, 1]} : vector<128x64xf32> to vector<32x64xf32>
    %c0_106 = arith.constant 0 : index
    %c0_107 = arith.constant 0 : index
    %238 = vector.load %arg10[%c0_106, %c0_107] : memref<32x1xf32, #tpu.memory_space<vmem>>, vector<32x1xf32>
    %239 = vector.broadcast %238 : vector<32x1xf32> to vector<32x64xf32>
    %240 = arith.addf %237, %239 : vector<32x64xf32>
    %c0_108 = arith.constant 0 : index
    %c0_109 = arith.constant 0 : index
    %241 = vector.load %arg11[%c0_108, %c0_109] : memref<32x1xf32, #tpu.memory_space<vmem>>, vector<32x1xf32>
    %c0_110 = arith.constant 0 : index
    %c0_111 = arith.constant 0 : index
    %242 = vector.load %arg12[%c0_110, %c0_111] : memref<32x1xf32, #tpu.memory_space<vmem>>, vector<32x1xf32>
    %cst_112 = arith.constant dense<0.000000e+00> : vector<64xf32>
    %243 = vector.multi_reduction <add>, %240, %cst_112 [0] : vector<32x64xf32> to vector<64xf32>
    %244 = vector.shape_cast %243 : vector<64xf32> to vector<1x64xf32>
    %cst_113 = arith.constant 3.200000e+01 : f32
    %245 = vector.broadcast %cst_113 : f32 to vector<1x64xf32>
    %246 = arith.divf %244, %245 : vector<1x64xf32>
    %247 = vector.broadcast %246 : vector<1x64xf32> to vector<32x64xf32>
    %248 = arith.subf %240, %247 : vector<32x64xf32>
    %249 = arith.mulf %248, %248 : vector<32x64xf32>
    %cst_114 = arith.constant dense<0.000000e+00> : vector<64xf32>
    %250 = vector.multi_reduction <add>, %249, %cst_114 [0] : vector<32x64xf32> to vector<64xf32>
    %251 = vector.shape_cast %250 : vector<64xf32> to vector<1x64xf32>
    %cst_115 = arith.constant 3.200000e+01 : f32
    %252 = vector.broadcast %cst_115 : f32 to vector<1x64xf32>
    %253 = arith.divf %251, %252 : vector<1x64xf32>
    %cst_116 = arith.constant 9.99999997E-7 : f32
    %254 = vector.broadcast %cst_116 : f32 to vector<1x64xf32>
    %255 = arith.addf %253, %254 : vector<1x64xf32>
    %256 = math.rsqrt %255 : vector<1x64xf32>
    %257 = vector.broadcast %256 : vector<1x64xf32> to vector<32x64xf32>
    %258 = arith.mulf %248, %257 : vector<32x64xf32>
    %259 = vector.broadcast %241 : vector<32x1xf32> to vector<32x64xf32>
    %260 = arith.mulf %258, %259 : vector<32x64xf32>
    %261 = vector.broadcast %242 : vector<32x1xf32> to vector<32x64xf32>
    %262 = arith.addf %260, %261 : vector<32x64xf32>
    %cst_117 = arith.constant 5.000000e-01 : f32
    %263 = vector.broadcast %cst_117 : f32 to vector<32x64xf32>
    %264 = arith.mulf %263, %262 : vector<32x64xf32>
    %cst_118 = arith.constant 4.471500e-02 : f32
    %265 = vector.broadcast %cst_118 : f32 to vector<32x64xf32>
    %266 = arith.mulf %265, %262 : vector<32x64xf32>
    %267 = arith.mulf %266, %262 : vector<32x64xf32>
    %268 = arith.mulf %267, %262 : vector<32x64xf32>
    %269 = arith.addf %262, %268 : vector<32x64xf32>
    %cst_119 = arith.constant 0.797884583 : f32
    %270 = vector.broadcast %cst_119 : f32 to vector<32x64xf32>
    %271 = arith.mulf %270, %269 : vector<32x64xf32>
    %272 = math.tanh %271 : vector<32x64xf32>
    %cst_120 = arith.constant 1.000000e+00 : f32
    %273 = vector.broadcast %cst_120 : f32 to vector<32x64xf32>
    %274 = arith.addf %273, %272 : vector<32x64xf32>
    %275 = arith.mulf %264, %274 : vector<32x64xf32>
    %c0_121 = arith.constant 0 : index
    %c0_122 = arith.constant 0 : index
    %276 = vector.load %arg8[%c0_121, %c0_122] : memref<16x8xf32, #tpu.memory_space<vmem>>, vector<16x8xf32>
    %277 = arith.truncf %276 : vector<16x8xf32> to vector<16x8xbf16>
    %278 = arith.truncf %236 : vector<8x64xf32> to vector<8x64xbf16>
    %cst_123 = arith.constant dense<0.000000e+00> : vector<16x64xf32>
    %279 = tpu.matmul %277, %278, %cst_123 {dimension_numbers = #tpu.dot_dimension_numbers<[1], [0], [0], [1], [0, 0, 1, 1], [], []>} : vector<16x8xbf16>, vector<8x64xbf16>, vector<16x64xf32> -> vector<16x64xf32>
    %c0_124 = arith.constant 0 : index
    %c0_125 = arith.constant 0 : index
    %280 = vector.load %arg13[%c0_124, %c0_125] : memref<16x32xf32, #tpu.memory_space<vmem>>, vector<16x32xf32>
    %281 = arith.truncf %280 : vector<16x32xf32> to vector<16x32xbf16>
    %282 = arith.truncf %275 : vector<32x64xf32> to vector<32x64xbf16>
    %cst_126 = arith.constant dense<0.000000e+00> : vector<16x64xf32>
    %283 = tpu.matmul %281, %282, %cst_126 {dimension_numbers = #tpu.dot_dimension_numbers<[1], [0], [0], [1], [0, 0, 1, 1], [], []>} : vector<16x32xbf16>, vector<32x64xbf16>, vector<16x64xf32> -> vector<16x64xf32>
    %284 = arith.addf %279, %283 : vector<16x64xf32>
    %285 = vector.broadcast %11 : vector<16x1xf32> to vector<16x64xf32>
    %286 = arith.addf %284, %285 : vector<16x64xf32>
    %287 = arith.truncf %286 : vector<16x64xf32> to vector<16x64xbf16>
    %c0_127 = arith.constant 0 : index
    %c2 = arith.constant 2 : index
    %c0_128 = arith.constant 0 : index
    %c0_129 = arith.constant 0 : index
    %288 = vector.load %arg15[%c0_127, %c2, %c0_128, %c0_129] : memref<1x4x16x64xbf16, #tpu.memory_space<vmem>>, vector<1x1x16x64xbf16>
    %289 = vector.shape_cast %288 : vector<1x1x16x64xbf16> to vector<16x64xbf16>
    %290 = vector.shape_cast %287 : vector<16x64xbf16> to vector<1x1x16x64xbf16>
    tpu.vector_store %arg15[%c0_127, %c2, %c0_128, %c0_129], %290 {strides = array<i32>} : memref<1x4x16x64xbf16, #tpu.memory_space<vmem>>, vector<1x1x16x64xbf16>,
    %291 = vector.extract_strided_slice %6 {offsets = [24, 0], sizes = [8, 64], strides = [1, 1]} : vector<32x64xf32> to vector<8x64xf32>
    %c0_130 = arith.constant 0 : index
    %c0_131 = arith.constant 0 : index
    %292 = vector.load %arg5[%c0_130, %c0_131] : memref<8x1xf32, #tpu.memory_space<vmem>>, vector<8x1xf32>
    %293 = vector.broadcast %292 : vector<8x1xf32> to vector<8x64xf32>
    %294 = arith.addf %291, %293 : vector<8x64xf32>
    %c0_132 = arith.constant 0 : index
    %c0_133 = arith.constant 0 : index
    %295 = vector.load %arg6[%c0_132, %c0_133] : memref<8x1xf32, #tpu.memory_space<vmem>>, vector<8x1xf32>
    %c0_134 = arith.constant 0 : index
    %c0_135 = arith.constant 0 : index
    %296 = vector.load %arg7[%c0_134, %c0_135] : memref<8x1xf32, #tpu.memory_space<vmem>>, vector<8x1xf32>
    %cst_136 = arith.constant dense<0.000000e+00> : vector<64xf32>
    %297 = vector.multi_reduction <add>, %294, %cst_136 [0] : vector<8x64xf32> to vector<64xf32>
    %298 = vector.shape_cast %297 : vector<64xf32> to vector<1x64xf32>
    %cst_137 = arith.constant 8.000000e+00 : f32
    %299 = vector.broadcast %cst_137 : f32 to vector<1x64xf32>
    %300 = arith.divf %298, %299 : vector<1x64xf32>
    %301 = vector.broadcast %300 : vector<1x64xf32> to vector<8x64xf32>
    %302 = arith.subf %294, %301 : vector<8x64xf32>
    %303 = arith.mulf %302, %302 : vector<8x64xf32>
    %cst_138 = arith.constant dense<0.000000e+00> : vector<64xf32>
    %304 = vector.multi_reduction <add>, %303, %cst_138 [0] : vector<8x64xf32> to vector<64xf32>
    %305 = vector.shape_cast %304 : vector<64xf32> to vector<1x64xf32>
    %cst_139 = arith.constant 8.000000e+00 : f32
    %306 = vector.broadcast %cst_139 : f32 to vector<1x64xf32>
    %307 = arith.divf %305, %306 : vector<1x64xf32>
    %cst_140 = arith.constant 9.99999997E-7 : f32
    %308 = vector.broadcast %cst_140 : f32 to vector<1x64xf32>
    %309 = arith.addf %307, %308 : vector<1x64xf32>
    %310 = math.rsqrt %309 : vector<1x64xf32>
    %311 = vector.broadcast %310 : vector<1x64xf32> to vector<8x64xf32>
    %312 = arith.mulf %302, %311 : vector<8x64xf32>
    %313 = vector.broadcast %295 : vector<8x1xf32> to vector<8x64xf32>
    %314 = arith.mulf %312, %313 : vector<8x64xf32>
    %315 = vector.broadcast %296 : vector<8x1xf32> to vector<8x64xf32>
    %316 = arith.addf %314, %315 : vector<8x64xf32>
    %cst_141 = arith.constant 5.000000e-01 : f32
    %317 = vector.broadcast %cst_141 : f32 to vector<8x64xf32>
    %318 = arith.mulf %317, %316 : vector<8x64xf32>
    %cst_142 = arith.constant 4.471500e-02 : f32
    %319 = vector.broadcast %cst_142 : f32 to vector<8x64xf32>
    %320 = arith.mulf %319, %316 : vector<8x64xf32>
    %321 = arith.mulf %320, %316 : vector<8x64xf32>
    %322 = arith.mulf %321, %316 : vector<8x64xf32>
    %323 = arith.addf %316, %322 : vector<8x64xf32>
    %cst_143 = arith.constant 0.797884583 : f32
    %324 = vector.broadcast %cst_143 : f32 to vector<8x64xf32>
    %325 = arith.mulf %324, %323 : vector<8x64xf32>
    %326 = math.tanh %325 : vector<8x64xf32>
    %cst_144 = arith.constant 1.000000e+00 : f32
    %327 = vector.broadcast %cst_144 : f32 to vector<8x64xf32>
    %328 = arith.addf %327, %326 : vector<8x64xf32>
    %329 = arith.mulf %318, %328 : vector<8x64xf32>
    %330 = vector.extract_strided_slice %10 {offsets = [96, 0], sizes = [32, 64], strides = [1, 1]} : vector<128x64xf32> to vector<32x64xf32>
    %c0_145 = arith.constant 0 : index
    %c0_146 = arith.constant 0 : index
    %331 = vector.load %arg10[%c0_145, %c0_146] : memref<32x1xf32, #tpu.memory_space<vmem>>, vector<32x1xf32>
    %332 = vector.broadcast %331 : vector<32x1xf32> to vector<32x64xf32>
    %333 = arith.addf %330, %332 : vector<32x64xf32>
    %c0_147 = arith.constant 0 : index
    %c0_148 = arith.constant 0 : index
    %334 = vector.load %arg11[%c0_147, %c0_148] : memref<32x1xf32, #tpu.memory_space<vmem>>, vector<32x1xf32>
    %c0_149 = arith.constant 0 : index
    %c0_150 = arith.constant 0 : index
    %335 = vector.load %arg12[%c0_149, %c0_150] : memref<32x1xf32, #tpu.memory_space<vmem>>, vector<32x1xf32>
    %cst_151 = arith.constant dense<0.000000e+00> : vector<64xf32>
    %336 = vector.multi_reduction <add>, %333, %cst_151 [0] : vector<32x64xf32> to vector<64xf32>
    %337 = vector.shape_cast %336 : vector<64xf32> to vector<1x64xf32>
    %cst_152 = arith.constant 3.200000e+01 : f32
    %338 = vector.broadcast %cst_152 : f32 to vector<1x64xf32>
    %339 = arith.divf %337, %338 : vector<1x64xf32>
    %340 = vector.broadcast %339 : vector<1x64xf32> to vector<32x64xf32>
    %341 = arith.subf %333, %340 : vector<32x64xf32>
    %342 = arith.mulf %341, %341 : vector<32x64xf32>
    %cst_153 = arith.constant dense<0.000000e+00> : vector<64xf32>
    %343 = vector.multi_reduction <add>, %342, %cst_153 [0] : vector<32x64xf32> to vector<64xf32>
    %344 = vector.shape_cast %343 : vector<64xf32> to vector<1x64xf32>
    %cst_154 = arith.constant 3.200000e+01 : f32
    %345 = vector.broadcast %cst_154 : f32 to vector<1x64xf32>
    %346 = arith.divf %344, %345 : vector<1x64xf32>
    %cst_155 = arith.constant 9.99999997E-7 : f32
    %347 = vector.broadcast %cst_155 : f32 to vector<1x64xf32>
    %348 = arith.addf %346, %347 : vector<1x64xf32>
    %349 = math.rsqrt %348 : vector<1x64xf32>
    %350 = vector.broadcast %349 : vector<1x64xf32> to vector<32x64xf32>
    %351 = arith.mulf %341, %350 : vector<32x64xf32>
    %352 = vector.broadcast %334 : vector<32x1xf32> to vector<32x64xf32>
    %353 = arith.mulf %351, %352 : vector<32x64xf32>
    %354 = vector.broadcast %335 : vector<32x1xf32> to vector<32x64xf32>
    %355 = arith.addf %353, %354 : vector<32x64xf32>
    %cst_156 = arith.constant 5.000000e-01 : f32
    %356 = vector.broadcast %cst_156 : f32 to vector<32x64xf32>
    %357 = arith.mulf %356, %355 : vector<32x64xf32>
    %cst_157 = arith.constant 4.471500e-02 : f32
    %358 = vector.broadcast %cst_157 : f32 to vector<32x64xf32>
    %359 = arith.mulf %358, %355 : vector<32x64xf32>
    %360 = arith.mulf %359, %355 : vector<32x64xf32>
    %361 = arith.mulf %360, %355 : vector<32x64xf32>
    %362 = arith.addf %355, %361 : vector<32x64xf32>
    %cst_158 = arith.constant 0.797884583 : f32
    %363 = vector.broadcast %cst_158 : f32 to vector<32x64xf32>
    %364 = arith.mulf %363, %362 : vector<32x64xf32>
    %365 = math.tanh %364 : vector<32x64xf32>
    %cst_159 = arith.constant 1.000000e+00 : f32
    %366 = vector.broadcast %cst_159 : f32 to vector<32x64xf32>
    %367 = arith.addf %366, %365 : vector<32x64xf32>
    %368 = arith.mulf %357, %367 : vector<32x64xf32>
    %c0_160 = arith.constant 0 : index
    %c0_161 = arith.constant 0 : index
    %369 = vector.load %arg8[%c0_160, %c0_161] : memref<16x8xf32, #tpu.memory_space<vmem>>, vector<16x8xf32>
    %370 = arith.truncf %369 : vector<16x8xf32> to vector<16x8xbf16>
    %371 = arith.truncf %329 : vector<8x64xf32> to vector<8x64xbf16>
    %cst_162 = arith.constant dense<0.000000e+00> : vector<16x64xf32>
    %372 = tpu.matmul %370, %371, %cst_162 {dimension_numbers = #tpu.dot_dimension_numbers<[1], [0], [0], [1], [0, 0, 1, 1], [], []>} : vector<16x8xbf16>, vector<8x64xbf16>, vector<16x64xf32> -> vector<16x64xf32>
    %c0_163 = arith.constant 0 : index
    %c0_164 = arith.constant 0 : index
    %373 = vector.load %arg13[%c0_163, %c0_164] : memref<16x32xf32, #tpu.memory_space<vmem>>, vector<16x32xf32>
    %374 = arith.truncf %373 : vector<16x32xf32> to vector<16x32xbf16>
    %375 = arith.truncf %368 : vector<32x64xf32> to vector<32x64xbf16>
    %cst_165 = arith.constant dense<0.000000e+00> : vector<16x64xf32>
    %376 = tpu.matmul %374, %375, %cst_165 {dimension_numbers = #tpu.dot_dimension_numbers<[1], [0], [0], [1], [0, 0, 1, 1], [], []>} : vector<16x32xbf16>, vector<32x64xbf16>, vector<16x64xf32> -> vector<16x64xf32>
    %377 = arith.addf %372, %376 : vector<16x64xf32>
    %378 = vector.broadcast %11 : vector<16x1xf32> to vector<16x64xf32>
    %379 = arith.addf %377, %378 : vector<16x64xf32>
    %380 = arith.truncf %379 : vector<16x64xf32> to vector<16x64xbf16>
    %c0_166 = arith.constant 0 : index
    %c3 = arith.constant 3 : index
    %c0_167 = arith.constant 0 : index
    %c0_168 = arith.constant 0 : index
    %381 = vector.load %arg15[%c0_166, %c3, %c0_167, %c0_168] : memref<1x4x16x64xbf16, #tpu.memory_space<vmem>>, vector<1x1x16x64xbf16>
    %382 = vector.shape_cast %381 : vector<1x1x16x64xbf16> to vector<16x64xbf16>
    %383 = vector.shape_cast %380 : vector<16x64xbf16> to vector<1x1x16x64xbf16>
    tpu.vector_store %arg15[%c0_166, %c3, %c0_167, %c0_168], %383 {strides = array<i32>} : memref<1x4x16x64xbf16, #tpu.memory_space<vmem>>, vector<1x1x16x64xbf16>,
    return
  }
  func.func @transform_0(%arg0: i32, %arg1: i32) -> (i32, i32, i32) {
    %c0_i32 = arith.constant 0 : i32
    %c0_i32_0 = arith.constant 0 : i32
    return %arg0, %c0_i32, %arg1 : i32, i32, i32
  }
  func.func @transform_1(%arg0: i32, %arg1: i32) -> (i32, i32, i32) {
    %c0_i32 = arith.constant 0 : i32
    %c0_i32_0 = arith.constant 0 : i32
    return %arg0, %arg1, %c0_i32 : i32, i32, i32
  }
  func.func @transform_2(%arg0: i32, %arg1: i32) -> (i32, i32) {
    %c0_i32 = arith.constant 0 : i32
    %c0_i32_0 = arith.constant 0 : i32
    %c0_i32_1 = arith.constant 0 : i32
    return %c0_i32, %c0_i32_0 : i32, i32
  }
  func.func @transform_3(%arg0: i32, %arg1: i32) -> (i32, i32) {
    %c0_i32 = arith.constant 0 : i32
    %c0_i32_0 = arith.constant 0 : i32
    %c0_i32_1 = arith.constant 0 : i32
    return %c0_i32, %c0_i32_0 : i32, i32
  }
  func.func @transform_4(%arg0: i32, %arg1: i32) -> (i32, i32) {
    %c0_i32 = arith.constant 0 : i32
    %c0_i32_0 = arith.constant 0 : i32
    %c0_i32_1 = arith.constant 0 : i32
    return %c0_i32, %c0_i32_0 : i32, i32
  }
  func.func @transform_5(%arg0: i32, %arg1: i32) -> (i32, i32) {
    %c0_i32 = arith.constant 0 : i32
    %c0_i32_0 = arith.constant 0 : i32
    %c0_i32_1 = arith.constant 0 : i32
    return %c0_i32, %c0_i32_0 : i32, i32
  }
  func.func @transform_6(%arg0: i32, %arg1: i32) -> (i32, i32) {
    %c0_i32 = arith.constant 0 : i32
    %c0_i32_0 = arith.constant 0 : i32
    %c0_i32_1 = arith.constant 0 : i32
    return %c0_i32, %c0_i32_0 : i32, i32
  }
  func.func @transform_7(%arg0: i32, %arg1: i32) -> (i32, i32) {
    %c0_i32 = arith.constant 0 : i32
    %c0_i32_0 = arith.constant 0 : i32
    %c0_i32_1 = arith.constant 0 : i32
    return %c0_i32, %c0_i32_0 : i32, i32
  }
  func.func @transform_8(%arg0: i32, %arg1: i32) -> (i32, i32) {
    %c0_i32 = arith.constant 0 : i32
    %c0_i32_0 = arith.constant 0 : i32
    %c0_i32_1 = arith.constant 0 : i32
    return %c0_i32, %c0_i32_0 : i32, i32
  }
  func.func @transform_9(%arg0: i32, %arg1: i32) -> (i32, i32) {
    %c0_i32 = arith.constant 0 : i32
    %c0_i32_0 = arith.constant 0 : i32
    %c0_i32_1 = arith.constant 0 : i32
    return %c0_i32, %c0_i32_0 : i32, i32
  }
  func.func @transform_10(%arg0: i32, %arg1: i32) -> (i32, i32) {
    %c0_i32 = arith.constant 0 : i32
    %c0_i32_0 = arith.constant 0 : i32
    %c0_i32_1 = arith.constant 0 : i32
    return %c0_i32, %c0_i32_0 : i32, i32
  }
  func.func @transform_11(%arg0: i32, %arg1: i32) -> (i32, i32) {
    %c0_i32 = arith.constant 0 : i32
    %c0_i32_0 = arith.constant 0 : i32
    %c0_i32_1 = arith.constant 0 : i32
    return %c0_i32, %c0_i32_0 : i32, i32
  }
  func.func @transform_12(%arg0: i32, %arg1: i32) -> (i32, i32) {
    %c0_i32 = arith.constant 0 : i32
    %c0_i32_0 = arith.constant 0 : i32
    %c0_i32_1 = arith.constant 0 : i32
    return %c0_i32, %c0_i32_0 : i32, i32
  }
  func.func @transform_13(%arg0: i32, %arg1: i32) -> (i32, i32, i32, i32) {
    %c0_i32 = arith.constant 0 : i32
    %c0_i32_0 = arith.constant 0 : i32
    %c0_i32_1 = arith.constant 0 : i32
    return %arg0, %c0_i32, %c0_i32_0, %arg1 : i32, i32, i32, i32
  }
}

module attributes {stable_mosaic.version = 11 : i64} {
  func.func @_maskfeature_masks_kernel(%arg0: i32, %arg1: memref<1x2x4xf32, #tpu.memory_space<vmem>>, %arg2: memref<1x4x1024xbf16, #tpu.memory_space<vmem>>, %arg3: memref<1x4x1024xbf16, #tpu.memory_space<vmem>>, %arg4: memref<9x8x4xf32, #tpu.memory_space<vmem>>, %arg5: memref<8x1xf32, #tpu.memory_space<vmem>>, %arg6: memref<8x1xf32, #tpu.memory_space<vmem>>, %arg7: memref<8x1xf32, #tpu.memory_space<vmem>>, %arg8: memref<9x4x8xf32, #tpu.memory_space<vmem>>, %arg9: memref<4x1xf32, #tpu.memory_space<vmem>>, %arg10: memref<1x1x1024xf32, #tpu.memory_space<vmem>>) attributes {dimension_semantics = [#tpu.dimension_semantics<parallel>], iteration_bounds = array<i64: 2>, scalar_prefetch = 0 : i64, scratch_operands = 0 : i64, tpu.core_type = #tpu.core_type<tc>, window_params = [{transform_indices = @transform_0, window_bounds = array<i64: 1, 2, 4>}, {transform_indices = @transform_1, window_bounds = array<i64: 1, 4, 1024>}, {transform_indices = @transform_2, window_bounds = array<i64: 1, 4, 1024>}, {pipeline_mode = #tpu.pipeline_mode<synchronous>, transform_indices = @transform_3, window_bounds = array<i64: 9, 8, 4>}, {pipeline_mode = #tpu.pipeline_mode<synchronous>, transform_indices = @transform_4, window_bounds = array<i64: 8, 1>}, {pipeline_mode = #tpu.pipeline_mode<synchronous>, transform_indices = @transform_5, window_bounds = array<i64: 8, 1>}, {pipeline_mode = #tpu.pipeline_mode<synchronous>, transform_indices = @transform_6, window_bounds = array<i64: 8, 1>}, {pipeline_mode = #tpu.pipeline_mode<synchronous>, transform_indices = @transform_7, window_bounds = array<i64: 9, 4, 8>}, {pipeline_mode = #tpu.pipeline_mode<synchronous>, transform_indices = @transform_8, window_bounds = array<i64: 4, 1>}, {transform_indices = @transform_9, window_bounds = array<i64: 1, 1, 1024>}]} {
    %c0 = arith.constant 0 : index
    %c0_0 = arith.constant 0 : index
    %c0_1 = arith.constant 0 : index
    %0 = vector.load %arg2[%c0, %c0_0, %c0_1] : memref<1x4x1024xbf16, #tpu.memory_space<vmem>>, vector<1x4x1024xbf16>
    %1 = vector.shape_cast %0 : vector<1x4x1024xbf16> to vector<4x1024xbf16>
    %cst = arith.constant 0.000000e+00 : bf16
    %2 = vector.broadcast %cst : bf16 to vector<4x33xbf16>
    %3 = vector.extract_strided_slice %1 {offsets = [0, 0], sizes = [4, 991], strides = [1, 1]} : vector<4x1024xbf16> to vector<4x991xbf16>
    %4 = tpu.concatenate %2, %3 in 1 : vector<4x33xbf16>, vector<4x991xbf16> -> vector<4x1024xbf16>
    %5 = tpu.iota {dimensions = array<i32: 1>} : vector<1x1024xi32>
    %c32_i32 = arith.constant 32 : i32
    %c0_i32 = arith.constant 0 : i32
    %6 = arith.cmpi eq, %c32_i32, %c0_i32 : i32
    %c1_i32 = arith.constant 1 : i32
    %7 = arith.select %6, %c1_i32, %c32_i32 : i32
    %8 = vector.broadcast %7 : i32 to vector<1x1024xi32>
    %9 = arith.remsi %5, %8 : vector<1x1024xi32>
    %c0_i32_2 = arith.constant 0 : i32
    %10 = vector.broadcast %c0_i32_2 : i32 to vector<1x1024xi32>
    %11 = arith.cmpi ne, %9, %10 : vector<1x1024xi32>
    %c0_i32_3 = arith.constant 0 : i32
    %12 = vector.broadcast %c0_i32_3 : i32 to vector<1x1024xi32>
    %13 = arith.cmpi slt, %9, %12 : vector<1x1024xi32>
    %c0_i32_4 = arith.constant 0 : i32
    %14 = arith.cmpi slt, %7, %c0_i32_4 : i32
    %15 = vector.broadcast %14 : i1 to vector<1x1024xi1>
    %16 = vector.broadcast %15 : vector<1x1024xi1> to vector<1x1024xi1>
    %17 = arith.xori %13, %16 : vector<1x1024xi1>
    %18 = arith.andi %17, %11 : vector<1x1024xi1>
    %19 = vector.broadcast %7 : i32 to vector<1x1024xi32>
    %20 = arith.addi %9, %19 : vector<1x1024xi32>
    %21 = arith.select %18, %20, %9 : vector<1x1024xi1>, vector<1x1024xi32>
    %c-1_i32 = arith.constant -1 : i32
    %22 = vector.broadcast %c-1_i32 : i32 to vector<1x1024xi32>
    %23 = arith.addi %21, %22 : vector<1x1024xi32>
    %c0_i32_5 = arith.constant 0 : i32
    %24 = vector.broadcast %c0_i32_5 : i32 to vector<1x1024xi32>
    %25 = arith.cmpi sge, %23, %24 : vector<1x1024xi32>
    %c-1_i32_6 = arith.constant -1 : i32
    %26 = vector.broadcast %c-1_i32_6 : i32 to vector<1x1024xi32>
    %27 = arith.addi %21, %26 : vector<1x1024xi32>
    %c32_i32_7 = arith.constant 32 : i32
    %28 = vector.broadcast %c32_i32_7 : i32 to vector<1x1024xi32>
    %29 = arith.cmpi slt, %27, %28 : vector<1x1024xi32>
    %30 = arith.andi %25, %29 : vector<1x1024xi1>
    %cst_8 = arith.constant 0.000000e+00 : bf16
    %31 = vector.broadcast %cst_8 : bf16 to vector<4x1024xbf16>
    %32 = vector.shape_cast %30 : vector<1x1024xi1> to vector<1x1024xi1>
    %33 = vector.broadcast %32 : vector<1x1024xi1> to vector<4x1024xi1>
    %34 = arith.select %33, %4, %31 : vector<4x1024xi1>, vector<4x1024xbf16>
    %c0_9 = arith.constant 0 : index
    %c0_10 = arith.constant 0 : index
    %c0_11 = arith.constant 0 : index
    %35 = vector.load %arg4[%c0_9, %c0_10, %c0_11] : memref<9x8x4xf32, #tpu.memory_space<vmem>>, vector<1x8x4xf32>
    %36 = vector.shape_cast %35 : vector<1x8x4xf32> to vector<8x4xf32>
    %37 = arith.truncf %36 : vector<8x4xf32> to vector<8x4xbf16>
    %cst_12 = arith.constant dense<0.000000e+00> : vector<8x1024xf32>
    %38 = tpu.matmul %37, %34, %cst_12 {dimension_numbers = #tpu.dot_dimension_numbers<[1], [0], [0], [1], [0, 0, 1, 1], [], []>} : vector<8x4xbf16>, vector<4x1024xbf16>, vector<8x1024xf32> -> vector<8x1024xf32>
    %cst_13 = arith.constant 0.000000e+00 : bf16
    %39 = vector.broadcast %cst_13 : bf16 to vector<4x32xbf16>
    %40 = vector.extract_strided_slice %1 {offsets = [0, 0], sizes = [4, 992], strides = [1, 1]} : vector<4x1024xbf16> to vector<4x992xbf16>
    %41 = tpu.concatenate %39, %40 in 1 : vector<4x32xbf16>, vector<4x992xbf16> -> vector<4x1024xbf16>
    %c1 = arith.constant 1 : index
    %c0_14 = arith.constant 0 : index
    %c0_15 = arith.constant 0 : index
    %42 = vector.load %arg4[%c1, %c0_14, %c0_15] : memref<9x8x4xf32, #tpu.memory_space<vmem>>, vector<1x8x4xf32>
    %43 = vector.shape_cast %42 : vector<1x8x4xf32> to vector<8x4xf32>
    %44 = arith.truncf %43 : vector<8x4xf32> to vector<8x4xbf16>
    %cst_16 = arith.constant dense<0.000000e+00> : vector<8x1024xf32>
    %45 = tpu.matmul %44, %41, %cst_16 {dimension_numbers = #tpu.dot_dimension_numbers<[1], [0], [0], [1], [0, 0, 1, 1], [], []>} : vector<8x4xbf16>, vector<4x1024xbf16>, vector<8x1024xf32> -> vector<8x1024xf32>
    %46 = arith.addf %38, %45 : vector<8x1024xf32>
    %cst_17 = arith.constant 0.000000e+00 : bf16
    %47 = vector.broadcast %cst_17 : bf16 to vector<4x31xbf16>
    %48 = vector.extract_strided_slice %1 {offsets = [0, 0], sizes = [4, 993], strides = [1, 1]} : vector<4x1024xbf16> to vector<4x993xbf16>
    %49 = tpu.concatenate %47, %48 in 1 : vector<4x31xbf16>, vector<4x993xbf16> -> vector<4x1024xbf16>
    %50 = tpu.iota {dimensions = array<i32: 1>} : vector<1x1024xi32>
    %c32_i32_18 = arith.constant 32 : i32
    %c0_i32_19 = arith.constant 0 : i32
    %51 = arith.cmpi eq, %c32_i32_18, %c0_i32_19 : i32
    %c1_i32_20 = arith.constant 1 : i32
    %52 = arith.select %51, %c1_i32_20, %c32_i32_18 : i32
    %53 = vector.broadcast %52 : i32 to vector<1x1024xi32>
    %54 = arith.remsi %50, %53 : vector<1x1024xi32>
    %c0_i32_21 = arith.constant 0 : i32
    %55 = vector.broadcast %c0_i32_21 : i32 to vector<1x1024xi32>
    %56 = arith.cmpi ne, %54, %55 : vector<1x1024xi32>
    %c0_i32_22 = arith.constant 0 : i32
    %57 = vector.broadcast %c0_i32_22 : i32 to vector<1x1024xi32>
    %58 = arith.cmpi slt, %54, %57 : vector<1x1024xi32>
    %c0_i32_23 = arith.constant 0 : i32
    %59 = arith.cmpi slt, %52, %c0_i32_23 : i32
    %60 = vector.broadcast %59 : i1 to vector<1x1024xi1>
    %61 = vector.broadcast %60 : vector<1x1024xi1> to vector<1x1024xi1>
    %62 = arith.xori %58, %61 : vector<1x1024xi1>
    %63 = arith.andi %62, %56 : vector<1x1024xi1>
    %64 = vector.broadcast %52 : i32 to vector<1x1024xi32>
    %65 = arith.addi %54, %64 : vector<1x1024xi32>
    %66 = arith.select %63, %65, %54 : vector<1x1024xi1>, vector<1x1024xi32>
    %c1_i32_24 = arith.constant 1 : i32
    %67 = vector.broadcast %c1_i32_24 : i32 to vector<1x1024xi32>
    %68 = arith.addi %66, %67 : vector<1x1024xi32>
    %c0_i32_25 = arith.constant 0 : i32
    %69 = vector.broadcast %c0_i32_25 : i32 to vector<1x1024xi32>
    %70 = arith.cmpi sge, %68, %69 : vector<1x1024xi32>
    %c1_i32_26 = arith.constant 1 : i32
    %71 = vector.broadcast %c1_i32_26 : i32 to vector<1x1024xi32>
    %72 = arith.addi %66, %71 : vector<1x1024xi32>
    %c32_i32_27 = arith.constant 32 : i32
    %73 = vector.broadcast %c32_i32_27 : i32 to vector<1x1024xi32>
    %74 = arith.cmpi slt, %72, %73 : vector<1x1024xi32>
    %75 = arith.andi %70, %74 : vector<1x1024xi1>
    %cst_28 = arith.constant 0.000000e+00 : bf16
    %76 = vector.broadcast %cst_28 : bf16 to vector<4x1024xbf16>
    %77 = vector.shape_cast %75 : vector<1x1024xi1> to vector<1x1024xi1>
    %78 = vector.broadcast %77 : vector<1x1024xi1> to vector<4x1024xi1>
    %79 = arith.select %78, %49, %76 : vector<4x1024xi1>, vector<4x1024xbf16>
    %c2 = arith.constant 2 : index
    %c0_29 = arith.constant 0 : index
    %c0_30 = arith.constant 0 : index
    %80 = vector.load %arg4[%c2, %c0_29, %c0_30] : memref<9x8x4xf32, #tpu.memory_space<vmem>>, vector<1x8x4xf32>
    %81 = vector.shape_cast %80 : vector<1x8x4xf32> to vector<8x4xf32>
    %82 = arith.truncf %81 : vector<8x4xf32> to vector<8x4xbf16>
    %cst_31 = arith.constant dense<0.000000e+00> : vector<8x1024xf32>
    %83 = tpu.matmul %82, %79, %cst_31 {dimension_numbers = #tpu.dot_dimension_numbers<[1], [0], [0], [1], [0, 0, 1, 1], [], []>} : vector<8x4xbf16>, vector<4x1024xbf16>, vector<8x1024xf32> -> vector<8x1024xf32>
    %84 = arith.addf %46, %83 : vector<8x1024xf32>
    %cst_32 = arith.constant 0.000000e+00 : bf16
    %85 = vector.broadcast %cst_32 : bf16 to vector<4x1xbf16>
    %86 = vector.extract_strided_slice %1 {offsets = [0, 0], sizes = [4, 1023], strides = [1, 1]} : vector<4x1024xbf16> to vector<4x1023xbf16>
    %87 = tpu.concatenate %85, %86 in 1 : vector<4x1xbf16>, vector<4x1023xbf16> -> vector<4x1024xbf16>
    %88 = tpu.iota {dimensions = array<i32: 1>} : vector<1x1024xi32>
    %c32_i32_33 = arith.constant 32 : i32
    %c0_i32_34 = arith.constant 0 : i32
    %89 = arith.cmpi eq, %c32_i32_33, %c0_i32_34 : i32
    %c1_i32_35 = arith.constant 1 : i32
    %90 = arith.select %89, %c1_i32_35, %c32_i32_33 : i32
    %91 = vector.broadcast %90 : i32 to vector<1x1024xi32>
    %92 = arith.remsi %88, %91 : vector<1x1024xi32>
    %c0_i32_36 = arith.constant 0 : i32
    %93 = vector.broadcast %c0_i32_36 : i32 to vector<1x1024xi32>
    %94 = arith.cmpi ne, %92, %93 : vector<1x1024xi32>
    %c0_i32_37 = arith.constant 0 : i32
    %95 = vector.broadcast %c0_i32_37 : i32 to vector<1x1024xi32>
    %96 = arith.cmpi slt, %92, %95 : vector<1x1024xi32>
    %c0_i32_38 = arith.constant 0 : i32
    %97 = arith.cmpi slt, %90, %c0_i32_38 : i32
    %98 = vector.broadcast %97 : i1 to vector<1x1024xi1>
    %99 = vector.broadcast %98 : vector<1x1024xi1> to vector<1x1024xi1>
    %100 = arith.xori %96, %99 : vector<1x1024xi1>
    %101 = arith.andi %100, %94 : vector<1x1024xi1>
    %102 = vector.broadcast %90 : i32 to vector<1x1024xi32>
    %103 = arith.addi %92, %102 : vector<1x1024xi32>
    %104 = arith.select %101, %103, %92 : vector<1x1024xi1>, vector<1x1024xi32>
    %c-1_i32_39 = arith.constant -1 : i32
    %105 = vector.broadcast %c-1_i32_39 : i32 to vector<1x1024xi32>
    %106 = arith.addi %104, %105 : vector<1x1024xi32>
    %c0_i32_40 = arith.constant 0 : i32
    %107 = vector.broadcast %c0_i32_40 : i32 to vector<1x1024xi32>
    %108 = arith.cmpi sge, %106, %107 : vector<1x1024xi32>
    %c-1_i32_41 = arith.constant -1 : i32
    %109 = vector.broadcast %c-1_i32_41 : i32 to vector<1x1024xi32>
    %110 = arith.addi %104, %109 : vector<1x1024xi32>
    %c32_i32_42 = arith.constant 32 : i32
    %111 = vector.broadcast %c32_i32_42 : i32 to vector<1x1024xi32>
    %112 = arith.cmpi slt, %110, %111 : vector<1x1024xi32>
    %113 = arith.andi %108, %112 : vector<1x1024xi1>
    %cst_43 = arith.constant 0.000000e+00 : bf16
    %114 = vector.broadcast %cst_43 : bf16 to vector<4x1024xbf16>
    %115 = vector.shape_cast %113 : vector<1x1024xi1> to vector<1x1024xi1>
    %116 = vector.broadcast %115 : vector<1x1024xi1> to vector<4x1024xi1>
    %117 = arith.select %116, %87, %114 : vector<4x1024xi1>, vector<4x1024xbf16>
    %c3 = arith.constant 3 : index
    %c0_44 = arith.constant 0 : index
    %c0_45 = arith.constant 0 : index
    %118 = vector.load %arg4[%c3, %c0_44, %c0_45] : memref<9x8x4xf32, #tpu.memory_space<vmem>>, vector<1x8x4xf32>
    %119 = vector.shape_cast %118 : vector<1x8x4xf32> to vector<8x4xf32>
    %120 = arith.truncf %119 : vector<8x4xf32> to vector<8x4xbf16>
    %cst_46 = arith.constant dense<0.000000e+00> : vector<8x1024xf32>
    %121 = tpu.matmul %120, %117, %cst_46 {dimension_numbers = #tpu.dot_dimension_numbers<[1], [0], [0], [1], [0, 0, 1, 1], [], []>} : vector<8x4xbf16>, vector<4x1024xbf16>, vector<8x1024xf32> -> vector<8x1024xf32>
    %122 = arith.addf %84, %121 : vector<8x1024xf32>
    %c4 = arith.constant 4 : index
    %c0_47 = arith.constant 0 : index
    %c0_48 = arith.constant 0 : index
    %123 = vector.load %arg4[%c4, %c0_47, %c0_48] : memref<9x8x4xf32, #tpu.memory_space<vmem>>, vector<1x8x4xf32>
    %124 = vector.shape_cast %123 : vector<1x8x4xf32> to vector<8x4xf32>
    %125 = arith.truncf %124 : vector<8x4xf32> to vector<8x4xbf16>
    %cst_49 = arith.constant dense<0.000000e+00> : vector<8x1024xf32>
    %126 = tpu.matmul %125, %1, %cst_49 {dimension_numbers = #tpu.dot_dimension_numbers<[1], [0], [0], [1], [0, 0, 1, 1], [], []>} : vector<8x4xbf16>, vector<4x1024xbf16>, vector<8x1024xf32> -> vector<8x1024xf32>
    %127 = arith.addf %122, %126 : vector<8x1024xf32>
    %128 = vector.extract_strided_slice %1 {offsets = [0, 1], sizes = [4, 1023], strides = [1, 1]} : vector<4x1024xbf16> to vector<4x1023xbf16>
    %cst_50 = arith.constant 0.000000e+00 : bf16
    %129 = vector.broadcast %cst_50 : bf16 to vector<4x1xbf16>
    %130 = tpu.concatenate %128, %129 in 1 : vector<4x1023xbf16>, vector<4x1xbf16> -> vector<4x1024xbf16>
    %131 = tpu.iota {dimensions = array<i32: 1>} : vector<1x1024xi32>
    %c32_i32_51 = arith.constant 32 : i32
    %c0_i32_52 = arith.constant 0 : i32
    %132 = arith.cmpi eq, %c32_i32_51, %c0_i32_52 : i32
    %c1_i32_53 = arith.constant 1 : i32
    %133 = arith.select %132, %c1_i32_53, %c32_i32_51 : i32
    %134 = vector.broadcast %133 : i32 to vector<1x1024xi32>
    %135 = arith.remsi %131, %134 : vector<1x1024xi32>
    %c0_i32_54 = arith.constant 0 : i32
    %136 = vector.broadcast %c0_i32_54 : i32 to vector<1x1024xi32>
    %137 = arith.cmpi ne, %135, %136 : vector<1x1024xi32>
    %c0_i32_55 = arith.constant 0 : i32
    %138 = vector.broadcast %c0_i32_55 : i32 to vector<1x1024xi32>
    %139 = arith.cmpi slt, %135, %138 : vector<1x1024xi32>
    %c0_i32_56 = arith.constant 0 : i32
    %140 = arith.cmpi slt, %133, %c0_i32_56 : i32
    %141 = vector.broadcast %140 : i1 to vector<1x1024xi1>
    %142 = vector.broadcast %141 : vector<1x1024xi1> to vector<1x1024xi1>
    %143 = arith.xori %139, %142 : vector<1x1024xi1>
    %144 = arith.andi %143, %137 : vector<1x1024xi1>
    %145 = vector.broadcast %133 : i32 to vector<1x1024xi32>
    %146 = arith.addi %135, %145 : vector<1x1024xi32>
    %147 = arith.select %144, %146, %135 : vector<1x1024xi1>, vector<1x1024xi32>
    %c1_i32_57 = arith.constant 1 : i32
    %148 = vector.broadcast %c1_i32_57 : i32 to vector<1x1024xi32>
    %149 = arith.addi %147, %148 : vector<1x1024xi32>
    %c0_i32_58 = arith.constant 0 : i32
    %150 = vector.broadcast %c0_i32_58 : i32 to vector<1x1024xi32>
    %151 = arith.cmpi sge, %149, %150 : vector<1x1024xi32>
    %c1_i32_59 = arith.constant 1 : i32
    %152 = vector.broadcast %c1_i32_59 : i32 to vector<1x1024xi32>
    %153 = arith.addi %147, %152 : vector<1x1024xi32>
    %c32_i32_60 = arith.constant 32 : i32
    %154 = vector.broadcast %c32_i32_60 : i32 to vector<1x1024xi32>
    %155 = arith.cmpi slt, %153, %154 : vector<1x1024xi32>
    %156 = arith.andi %151, %155 : vector<1x1024xi1>
    %cst_61 = arith.constant 0.000000e+00 : bf16
    %157 = vector.broadcast %cst_61 : bf16 to vector<4x1024xbf16>
    %158 = vector.shape_cast %156 : vector<1x1024xi1> to vector<1x1024xi1>
    %159 = vector.broadcast %158 : vector<1x1024xi1> to vector<4x1024xi1>
    %160 = arith.select %159, %130, %157 : vector<4x1024xi1>, vector<4x1024xbf16>
    %c5 = arith.constant 5 : index
    %c0_62 = arith.constant 0 : index
    %c0_63 = arith.constant 0 : index
    %161 = vector.load %arg4[%c5, %c0_62, %c0_63] : memref<9x8x4xf32, #tpu.memory_space<vmem>>, vector<1x8x4xf32>
    %162 = vector.shape_cast %161 : vector<1x8x4xf32> to vector<8x4xf32>
    %163 = arith.truncf %162 : vector<8x4xf32> to vector<8x4xbf16>
    %cst_64 = arith.constant dense<0.000000e+00> : vector<8x1024xf32>
    %164 = tpu.matmul %163, %160, %cst_64 {dimension_numbers = #tpu.dot_dimension_numbers<[1], [0], [0], [1], [0, 0, 1, 1], [], []>} : vector<8x4xbf16>, vector<4x1024xbf16>, vector<8x1024xf32> -> vector<8x1024xf32>
    %165 = arith.addf %127, %164 : vector<8x1024xf32>
    %166 = vector.extract_strided_slice %1 {offsets = [0, 31], sizes = [4, 993], strides = [1, 1]} : vector<4x1024xbf16> to vector<4x993xbf16>
    %cst_65 = arith.constant 0.000000e+00 : bf16
    %167 = vector.broadcast %cst_65 : bf16 to vector<4x31xbf16>
    %168 = tpu.concatenate %166, %167 in 1 : vector<4x993xbf16>, vector<4x31xbf16> -> vector<4x1024xbf16>
    %169 = tpu.iota {dimensions = array<i32: 1>} : vector<1x1024xi32>
    %c32_i32_66 = arith.constant 32 : i32
    %c0_i32_67 = arith.constant 0 : i32
    %170 = arith.cmpi eq, %c32_i32_66, %c0_i32_67 : i32
    %c1_i32_68 = arith.constant 1 : i32
    %171 = arith.select %170, %c1_i32_68, %c32_i32_66 : i32
    %172 = vector.broadcast %171 : i32 to vector<1x1024xi32>
    %173 = arith.remsi %169, %172 : vector<1x1024xi32>
    %c0_i32_69 = arith.constant 0 : i32
    %174 = vector.broadcast %c0_i32_69 : i32 to vector<1x1024xi32>
    %175 = arith.cmpi ne, %173, %174 : vector<1x1024xi32>
    %c0_i32_70 = arith.constant 0 : i32
    %176 = vector.broadcast %c0_i32_70 : i32 to vector<1x1024xi32>
    %177 = arith.cmpi slt, %173, %176 : vector<1x1024xi32>
    %c0_i32_71 = arith.constant 0 : i32
    %178 = arith.cmpi slt, %171, %c0_i32_71 : i32
    %179 = vector.broadcast %178 : i1 to vector<1x1024xi1>
    %180 = vector.broadcast %179 : vector<1x1024xi1> to vector<1x1024xi1>
    %181 = arith.xori %177, %180 : vector<1x1024xi1>
    %182 = arith.andi %181, %175 : vector<1x1024xi1>
    %183 = vector.broadcast %171 : i32 to vector<1x1024xi32>
    %184 = arith.addi %173, %183 : vector<1x1024xi32>
    %185 = arith.select %182, %184, %173 : vector<1x1024xi1>, vector<1x1024xi32>
    %c-1_i32_72 = arith.constant -1 : i32
    %186 = vector.broadcast %c-1_i32_72 : i32 to vector<1x1024xi32>
    %187 = arith.addi %185, %186 : vector<1x1024xi32>
    %c0_i32_73 = arith.constant 0 : i32
    %188 = vector.broadcast %c0_i32_73 : i32 to vector<1x1024xi32>
    %189 = arith.cmpi sge, %187, %188 : vector<1x1024xi32>
    %c-1_i32_74 = arith.constant -1 : i32
    %190 = vector.broadcast %c-1_i32_74 : i32 to vector<1x1024xi32>
    %191 = arith.addi %185, %190 : vector<1x1024xi32>
    %c32_i32_75 = arith.constant 32 : i32
    %192 = vector.broadcast %c32_i32_75 : i32 to vector<1x1024xi32>
    %193 = arith.cmpi slt, %191, %192 : vector<1x1024xi32>
    %194 = arith.andi %189, %193 : vector<1x1024xi1>
    %cst_76 = arith.constant 0.000000e+00 : bf16
    %195 = vector.broadcast %cst_76 : bf16 to vector<4x1024xbf16>
    %196 = vector.shape_cast %194 : vector<1x1024xi1> to vector<1x1024xi1>
    %197 = vector.broadcast %196 : vector<1x1024xi1> to vector<4x1024xi1>
    %198 = arith.select %197, %168, %195 : vector<4x1024xi1>, vector<4x1024xbf16>
    %c6 = arith.constant 6 : index
    %c0_77 = arith.constant 0 : index
    %c0_78 = arith.constant 0 : index
    %199 = vector.load %arg4[%c6, %c0_77, %c0_78] : memref<9x8x4xf32, #tpu.memory_space<vmem>>, vector<1x8x4xf32>
    %200 = vector.shape_cast %199 : vector<1x8x4xf32> to vector<8x4xf32>
    %201 = arith.truncf %200 : vector<8x4xf32> to vector<8x4xbf16>
    %cst_79 = arith.constant dense<0.000000e+00> : vector<8x1024xf32>
    %202 = tpu.matmul %201, %198, %cst_79 {dimension_numbers = #tpu.dot_dimension_numbers<[1], [0], [0], [1], [0, 0, 1, 1], [], []>} : vector<8x4xbf16>, vector<4x1024xbf16>, vector<8x1024xf32> -> vector<8x1024xf32>
    %203 = arith.addf %165, %202 : vector<8x1024xf32>
    %204 = vector.extract_strided_slice %1 {offsets = [0, 32], sizes = [4, 992], strides = [1, 1]} : vector<4x1024xbf16> to vector<4x992xbf16>
    %cst_80 = arith.constant 0.000000e+00 : bf16
    %205 = vector.broadcast %cst_80 : bf16 to vector<4x32xbf16>
    %206 = tpu.concatenate %204, %205 in 1 : vector<4x992xbf16>, vector<4x32xbf16> -> vector<4x1024xbf16>
    %c7 = arith.constant 7 : index
    %c0_81 = arith.constant 0 : index
    %c0_82 = arith.constant 0 : index
    %207 = vector.load %arg4[%c7, %c0_81, %c0_82] : memref<9x8x4xf32, #tpu.memory_space<vmem>>, vector<1x8x4xf32>
    %208 = vector.shape_cast %207 : vector<1x8x4xf32> to vector<8x4xf32>
    %209 = arith.truncf %208 : vector<8x4xf32> to vector<8x4xbf16>
    %cst_83 = arith.constant dense<0.000000e+00> : vector<8x1024xf32>
    %210 = tpu.matmul %209, %206, %cst_83 {dimension_numbers = #tpu.dot_dimension_numbers<[1], [0], [0], [1], [0, 0, 1, 1], [], []>} : vector<8x4xbf16>, vector<4x1024xbf16>, vector<8x1024xf32> -> vector<8x1024xf32>
    %211 = arith.addf %203, %210 : vector<8x1024xf32>
    %212 = vector.extract_strided_slice %1 {offsets = [0, 33], sizes = [4, 991], strides = [1, 1]} : vector<4x1024xbf16> to vector<4x991xbf16>
    %cst_84 = arith.constant 0.000000e+00 : bf16
    %213 = vector.broadcast %cst_84 : bf16 to vector<4x33xbf16>
    %214 = tpu.concatenate %212, %213 in 1 : vector<4x991xbf16>, vector<4x33xbf16> -> vector<4x1024xbf16>
    %215 = tpu.iota {dimensions = array<i32: 1>} : vector<1x1024xi32>
    %c32_i32_85 = arith.constant 32 : i32
    %c0_i32_86 = arith.constant 0 : i32
    %216 = arith.cmpi eq, %c32_i32_85, %c0_i32_86 : i32
    %c1_i32_87 = arith.constant 1 : i32
    %217 = arith.select %216, %c1_i32_87, %c32_i32_85 : i32
    %218 = vector.broadcast %217 : i32 to vector<1x1024xi32>
    %219 = arith.remsi %215, %218 : vector<1x1024xi32>
    %c0_i32_88 = arith.constant 0 : i32
    %220 = vector.broadcast %c0_i32_88 : i32 to vector<1x1024xi32>
    %221 = arith.cmpi ne, %219, %220 : vector<1x1024xi32>
    %c0_i32_89 = arith.constant 0 : i32
    %222 = vector.broadcast %c0_i32_89 : i32 to vector<1x1024xi32>
    %223 = arith.cmpi slt, %219, %222 : vector<1x1024xi32>
    %c0_i32_90 = arith.constant 0 : i32
    %224 = arith.cmpi slt, %217, %c0_i32_90 : i32
    %225 = vector.broadcast %224 : i1 to vector<1x1024xi1>
    %226 = vector.broadcast %225 : vector<1x1024xi1> to vector<1x1024xi1>
    %227 = arith.xori %223, %226 : vector<1x1024xi1>
    %228 = arith.andi %227, %221 : vector<1x1024xi1>
    %229 = vector.broadcast %217 : i32 to vector<1x1024xi32>
    %230 = arith.addi %219, %229 : vector<1x1024xi32>
    %231 = arith.select %228, %230, %219 : vector<1x1024xi1>, vector<1x1024xi32>
    %c1_i32_91 = arith.constant 1 : i32
    %232 = vector.broadcast %c1_i32_91 : i32 to vector<1x1024xi32>
    %233 = arith.addi %231, %232 : vector<1x1024xi32>
    %c0_i32_92 = arith.constant 0 : i32
    %234 = vector.broadcast %c0_i32_92 : i32 to vector<1x1024xi32>
    %235 = arith.cmpi sge, %233, %234 : vector<1x1024xi32>
    %c1_i32_93 = arith.constant 1 : i32
    %236 = vector.broadcast %c1_i32_93 : i32 to vector<1x1024xi32>
    %237 = arith.addi %231, %236 : vector<1x1024xi32>
    %c32_i32_94 = arith.constant 32 : i32
    %238 = vector.broadcast %c32_i32_94 : i32 to vector<1x1024xi32>
    %239 = arith.cmpi slt, %237, %238 : vector<1x1024xi32>
    %240 = arith.andi %235, %239 : vector<1x1024xi1>
    %cst_95 = arith.constant 0.000000e+00 : bf16
    %241 = vector.broadcast %cst_95 : bf16 to vector<4x1024xbf16>
    %242 = vector.shape_cast %240 : vector<1x1024xi1> to vector<1x1024xi1>
    %243 = vector.broadcast %242 : vector<1x1024xi1> to vector<4x1024xi1>
    %244 = arith.select %243, %214, %241 : vector<4x1024xi1>, vector<4x1024xbf16>
    %c8 = arith.constant 8 : index
    %c0_96 = arith.constant 0 : index
    %c0_97 = arith.constant 0 : index
    %245 = vector.load %arg4[%c8, %c0_96, %c0_97] : memref<9x8x4xf32, #tpu.memory_space<vmem>>, vector<1x8x4xf32>
    %246 = vector.shape_cast %245 : vector<1x8x4xf32> to vector<8x4xf32>
    %247 = arith.truncf %246 : vector<8x4xf32> to vector<8x4xbf16>
    %cst_98 = arith.constant dense<0.000000e+00> : vector<8x1024xf32>
    %248 = tpu.matmul %247, %244, %cst_98 {dimension_numbers = #tpu.dot_dimension_numbers<[1], [0], [0], [1], [0, 0, 1, 1], [], []>} : vector<8x4xbf16>, vector<4x1024xbf16>, vector<8x1024xf32> -> vector<8x1024xf32>
    %249 = arith.addf %211, %248 : vector<8x1024xf32>
    %c0_99 = arith.constant 0 : index
    %c0_100 = arith.constant 0 : index
    %250 = vector.load %arg5[%c0_99, %c0_100] : memref<8x1xf32, #tpu.memory_space<vmem>>, vector<8x1xf32>
    %251 = vector.broadcast %250 : vector<8x1xf32> to vector<8x1024xf32>
    %252 = arith.addf %249, %251 : vector<8x1024xf32>
    %c0_101 = arith.constant 0 : index
    %c0_102 = arith.constant 0 : index
    %253 = vector.load %arg6[%c0_101, %c0_102] : memref<8x1xf32, #tpu.memory_space<vmem>>, vector<8x1xf32>
    %c0_103 = arith.constant 0 : index
    %c0_104 = arith.constant 0 : index
    %254 = vector.load %arg7[%c0_103, %c0_104] : memref<8x1xf32, #tpu.memory_space<vmem>>, vector<8x1xf32>
    %cst_105 = arith.constant dense<0.000000e+00> : vector<1024xf32>
    %255 = vector.multi_reduction <add>, %252, %cst_105 [0] : vector<8x1024xf32> to vector<1024xf32>
    %256 = vector.shape_cast %255 : vector<1024xf32> to vector<1x1024xf32>
    %cst_106 = arith.constant 8.000000e+00 : f32
    %257 = vector.broadcast %cst_106 : f32 to vector<1x1024xf32>
    %258 = arith.divf %256, %257 : vector<1x1024xf32>
    %259 = vector.broadcast %258 : vector<1x1024xf32> to vector<8x1024xf32>
    %260 = arith.subf %252, %259 : vector<8x1024xf32>
    %261 = arith.mulf %260, %260 : vector<8x1024xf32>
    %cst_107 = arith.constant dense<0.000000e+00> : vector<1024xf32>
    %262 = vector.multi_reduction <add>, %261, %cst_107 [0] : vector<8x1024xf32> to vector<1024xf32>
    %263 = vector.shape_cast %262 : vector<1024xf32> to vector<1x1024xf32>
    %cst_108 = arith.constant 8.000000e+00 : f32
    %264 = vector.broadcast %cst_108 : f32 to vector<1x1024xf32>
    %265 = arith.divf %263, %264 : vector<1x1024xf32>
    %cst_109 = arith.constant 9.99999997E-7 : f32
    %266 = vector.broadcast %cst_109 : f32 to vector<1x1024xf32>
    %267 = arith.addf %265, %266 : vector<1x1024xf32>
    %268 = math.rsqrt %267 : vector<1x1024xf32>
    %269 = vector.broadcast %268 : vector<1x1024xf32> to vector<8x1024xf32>
    %270 = arith.mulf %260, %269 : vector<8x1024xf32>
    %271 = vector.broadcast %253 : vector<8x1xf32> to vector<8x1024xf32>
    %272 = arith.mulf %270, %271 : vector<8x1024xf32>
    %273 = vector.broadcast %254 : vector<8x1xf32> to vector<8x1024xf32>
    %274 = arith.addf %272, %273 : vector<8x1024xf32>
    %cst_110 = arith.constant 5.000000e-01 : f32
    %275 = vector.broadcast %cst_110 : f32 to vector<8x1024xf32>
    %276 = arith.mulf %275, %274 : vector<8x1024xf32>
    %cst_111 = arith.constant 4.471500e-02 : f32
    %277 = vector.broadcast %cst_111 : f32 to vector<8x1024xf32>
    %278 = arith.mulf %277, %274 : vector<8x1024xf32>
    %279 = arith.mulf %278, %274 : vector<8x1024xf32>
    %280 = arith.mulf %279, %274 : vector<8x1024xf32>
    %281 = arith.addf %274, %280 : vector<8x1024xf32>
    %cst_112 = arith.constant 0.797884583 : f32
    %282 = vector.broadcast %cst_112 : f32 to vector<8x1024xf32>
    %283 = arith.mulf %282, %281 : vector<8x1024xf32>
    %284 = math.tanh %283 : vector<8x1024xf32>
    %cst_113 = arith.constant 1.000000e+00 : f32
    %285 = vector.broadcast %cst_113 : f32 to vector<8x1024xf32>
    %286 = arith.addf %285, %284 : vector<8x1024xf32>
    %287 = arith.mulf %276, %286 : vector<8x1024xf32>
    %288 = arith.truncf %287 : vector<8x1024xf32> to vector<8x1024xbf16>
    %cst_114 = arith.constant 0.000000e+00 : bf16
    %289 = vector.broadcast %cst_114 : bf16 to vector<8x33xbf16>
    %290 = vector.extract_strided_slice %288 {offsets = [0, 0], sizes = [8, 991], strides = [1, 1]} : vector<8x1024xbf16> to vector<8x991xbf16>
    %291 = tpu.concatenate %289, %290 in 1 : vector<8x33xbf16>, vector<8x991xbf16> -> vector<8x1024xbf16>
    %292 = tpu.iota {dimensions = array<i32: 1>} : vector<1x1024xi32>
    %c32_i32_115 = arith.constant 32 : i32
    %c0_i32_116 = arith.constant 0 : i32
    %293 = arith.cmpi eq, %c32_i32_115, %c0_i32_116 : i32
    %c1_i32_117 = arith.constant 1 : i32
    %294 = arith.select %293, %c1_i32_117, %c32_i32_115 : i32
    %295 = vector.broadcast %294 : i32 to vector<1x1024xi32>
    %296 = arith.remsi %292, %295 : vector<1x1024xi32>
    %c0_i32_118 = arith.constant 0 : i32
    %297 = vector.broadcast %c0_i32_118 : i32 to vector<1x1024xi32>
    %298 = arith.cmpi ne, %296, %297 : vector<1x1024xi32>
    %c0_i32_119 = arith.constant 0 : i32
    %299 = vector.broadcast %c0_i32_119 : i32 to vector<1x1024xi32>
    %300 = arith.cmpi slt, %296, %299 : vector<1x1024xi32>
    %c0_i32_120 = arith.constant 0 : i32
    %301 = arith.cmpi slt, %294, %c0_i32_120 : i32
    %302 = vector.broadcast %301 : i1 to vector<1x1024xi1>
    %303 = vector.broadcast %302 : vector<1x1024xi1> to vector<1x1024xi1>
    %304 = arith.xori %300, %303 : vector<1x1024xi1>
    %305 = arith.andi %304, %298 : vector<1x1024xi1>
    %306 = vector.broadcast %294 : i32 to vector<1x1024xi32>
    %307 = arith.addi %296, %306 : vector<1x1024xi32>
    %308 = arith.select %305, %307, %296 : vector<1x1024xi1>, vector<1x1024xi32>
    %c-1_i32_121 = arith.constant -1 : i32
    %309 = vector.broadcast %c-1_i32_121 : i32 to vector<1x1024xi32>
    %310 = arith.addi %308, %309 : vector<1x1024xi32>
    %c0_i32_122 = arith.constant 0 : i32
    %311 = vector.broadcast %c0_i32_122 : i32 to vector<1x1024xi32>
    %312 = arith.cmpi sge, %310, %311 : vector<1x1024xi32>
    %c-1_i32_123 = arith.constant -1 : i32
    %313 = vector.broadcast %c-1_i32_123 : i32 to vector<1x1024xi32>
    %314 = arith.addi %308, %313 : vector<1x1024xi32>
    %c32_i32_124 = arith.constant 32 : i32
    %315 = vector.broadcast %c32_i32_124 : i32 to vector<1x1024xi32>
    %316 = arith.cmpi slt, %314, %315 : vector<1x1024xi32>
    %317 = arith.andi %312, %316 : vector<1x1024xi1>
    %cst_125 = arith.constant 0.000000e+00 : bf16
    %318 = vector.broadcast %cst_125 : bf16 to vector<8x1024xbf16>
    %319 = vector.shape_cast %317 : vector<1x1024xi1> to vector<1x1024xi1>
    %320 = vector.broadcast %319 : vector<1x1024xi1> to vector<8x1024xi1>
    %321 = arith.select %320, %291, %318 : vector<8x1024xi1>, vector<8x1024xbf16>
    %c0_126 = arith.constant 0 : index
    %c0_127 = arith.constant 0 : index
    %c0_128 = arith.constant 0 : index
    %322 = vector.load %arg8[%c0_126, %c0_127, %c0_128] : memref<9x4x8xf32, #tpu.memory_space<vmem>>, vector<1x4x8xf32>
    %323 = vector.shape_cast %322 : vector<1x4x8xf32> to vector<4x8xf32>
    %324 = arith.truncf %323 : vector<4x8xf32> to vector<4x8xbf16>
    %cst_129 = arith.constant dense<0.000000e+00> : vector<4x1024xf32>
    %325 = tpu.matmul %324, %321, %cst_129 {dimension_numbers = #tpu.dot_dimension_numbers<[1], [0], [0], [1], [0, 0, 1, 1], [], []>} : vector<4x8xbf16>, vector<8x1024xbf16>, vector<4x1024xf32> -> vector<4x1024xf32>
    %cst_130 = arith.constant 0.000000e+00 : bf16
    %326 = vector.broadcast %cst_130 : bf16 to vector<8x32xbf16>
    %327 = vector.extract_strided_slice %288 {offsets = [0, 0], sizes = [8, 992], strides = [1, 1]} : vector<8x1024xbf16> to vector<8x992xbf16>
    %328 = tpu.concatenate %326, %327 in 1 : vector<8x32xbf16>, vector<8x992xbf16> -> vector<8x1024xbf16>
    %c1_131 = arith.constant 1 : index
    %c0_132 = arith.constant 0 : index
    %c0_133 = arith.constant 0 : index
    %329 = vector.load %arg8[%c1_131, %c0_132, %c0_133] : memref<9x4x8xf32, #tpu.memory_space<vmem>>, vector<1x4x8xf32>
    %330 = vector.shape_cast %329 : vector<1x4x8xf32> to vector<4x8xf32>
    %331 = arith.truncf %330 : vector<4x8xf32> to vector<4x8xbf16>
    %cst_134 = arith.constant dense<0.000000e+00> : vector<4x1024xf32>
    %332 = tpu.matmul %331, %328, %cst_134 {dimension_numbers = #tpu.dot_dimension_numbers<[1], [0], [0], [1], [0, 0, 1, 1], [], []>} : vector<4x8xbf16>, vector<8x1024xbf16>, vector<4x1024xf32> -> vector<4x1024xf32>
    %333 = arith.addf %325, %332 : vector<4x1024xf32>
    %cst_135 = arith.constant 0.000000e+00 : bf16
    %334 = vector.broadcast %cst_135 : bf16 to vector<8x31xbf16>
    %335 = vector.extract_strided_slice %288 {offsets = [0, 0], sizes = [8, 993], strides = [1, 1]} : vector<8x1024xbf16> to vector<8x993xbf16>
    %336 = tpu.concatenate %334, %335 in 1 : vector<8x31xbf16>, vector<8x993xbf16> -> vector<8x1024xbf16>
    %337 = tpu.iota {dimensions = array<i32: 1>} : vector<1x1024xi32>
    %c32_i32_136 = arith.constant 32 : i32
    %c0_i32_137 = arith.constant 0 : i32
    %338 = arith.cmpi eq, %c32_i32_136, %c0_i32_137 : i32
    %c1_i32_138 = arith.constant 1 : i32
    %339 = arith.select %338, %c1_i32_138, %c32_i32_136 : i32
    %340 = vector.broadcast %339 : i32 to vector<1x1024xi32>
    %341 = arith.remsi %337, %340 : vector<1x1024xi32>
    %c0_i32_139 = arith.constant 0 : i32
    %342 = vector.broadcast %c0_i32_139 : i32 to vector<1x1024xi32>
    %343 = arith.cmpi ne, %341, %342 : vector<1x1024xi32>
    %c0_i32_140 = arith.constant 0 : i32
    %344 = vector.broadcast %c0_i32_140 : i32 to vector<1x1024xi32>
    %345 = arith.cmpi slt, %341, %344 : vector<1x1024xi32>
    %c0_i32_141 = arith.constant 0 : i32
    %346 = arith.cmpi slt, %339, %c0_i32_141 : i32
    %347 = vector.broadcast %346 : i1 to vector<1x1024xi1>
    %348 = vector.broadcast %347 : vector<1x1024xi1> to vector<1x1024xi1>
    %349 = arith.xori %345, %348 : vector<1x1024xi1>
    %350 = arith.andi %349, %343 : vector<1x1024xi1>
    %351 = vector.broadcast %339 : i32 to vector<1x1024xi32>
    %352 = arith.addi %341, %351 : vector<1x1024xi32>
    %353 = arith.select %350, %352, %341 : vector<1x1024xi1>, vector<1x1024xi32>
    %c1_i32_142 = arith.constant 1 : i32
    %354 = vector.broadcast %c1_i32_142 : i32 to vector<1x1024xi32>
    %355 = arith.addi %353, %354 : vector<1x1024xi32>
    %c0_i32_143 = arith.constant 0 : i32
    %356 = vector.broadcast %c0_i32_143 : i32 to vector<1x1024xi32>
    %357 = arith.cmpi sge, %355, %356 : vector<1x1024xi32>
    %c1_i32_144 = arith.constant 1 : i32
    %358 = vector.broadcast %c1_i32_144 : i32 to vector<1x1024xi32>
    %359 = arith.addi %353, %358 : vector<1x1024xi32>
    %c32_i32_145 = arith.constant 32 : i32
    %360 = vector.broadcast %c32_i32_145 : i32 to vector<1x1024xi32>
    %361 = arith.cmpi slt, %359, %360 : vector<1x1024xi32>
    %362 = arith.andi %357, %361 : vector<1x1024xi1>
    %cst_146 = arith.constant 0.000000e+00 : bf16
    %363 = vector.broadcast %cst_146 : bf16 to vector<8x1024xbf16>
    %364 = vector.shape_cast %362 : vector<1x1024xi1> to vector<1x1024xi1>
    %365 = vector.broadcast %364 : vector<1x1024xi1> to vector<8x1024xi1>
    %366 = arith.select %365, %336, %363 : vector<8x1024xi1>, vector<8x1024xbf16>
    %c2_147 = arith.constant 2 : index
    %c0_148 = arith.constant 0 : index
    %c0_149 = arith.constant 0 : index
    %367 = vector.load %arg8[%c2_147, %c0_148, %c0_149] : memref<9x4x8xf32, #tpu.memory_space<vmem>>, vector<1x4x8xf32>
    %368 = vector.shape_cast %367 : vector<1x4x8xf32> to vector<4x8xf32>
    %369 = arith.truncf %368 : vector<4x8xf32> to vector<4x8xbf16>
    %cst_150 = arith.constant dense<0.000000e+00> : vector<4x1024xf32>
    %370 = tpu.matmul %369, %366, %cst_150 {dimension_numbers = #tpu.dot_dimension_numbers<[1], [0], [0], [1], [0, 0, 1, 1], [], []>} : vector<4x8xbf16>, vector<8x1024xbf16>, vector<4x1024xf32> -> vector<4x1024xf32>
    %371 = arith.addf %333, %370 : vector<4x1024xf32>
    %cst_151 = arith.constant 0.000000e+00 : bf16
    %372 = vector.broadcast %cst_151 : bf16 to vector<8x1xbf16>
    %373 = vector.extract_strided_slice %288 {offsets = [0, 0], sizes = [8, 1023], strides = [1, 1]} : vector<8x1024xbf16> to vector<8x1023xbf16>
    %374 = tpu.concatenate %372, %373 in 1 : vector<8x1xbf16>, vector<8x1023xbf16> -> vector<8x1024xbf16>
    %375 = tpu.iota {dimensions = array<i32: 1>} : vector<1x1024xi32>
    %c32_i32_152 = arith.constant 32 : i32
    %c0_i32_153 = arith.constant 0 : i32
    %376 = arith.cmpi eq, %c32_i32_152, %c0_i32_153 : i32
    %c1_i32_154 = arith.constant 1 : i32
    %377 = arith.select %376, %c1_i32_154, %c32_i32_152 : i32
    %378 = vector.broadcast %377 : i32 to vector<1x1024xi32>
    %379 = arith.remsi %375, %378 : vector<1x1024xi32>
    %c0_i32_155 = arith.constant 0 : i32
    %380 = vector.broadcast %c0_i32_155 : i32 to vector<1x1024xi32>
    %381 = arith.cmpi ne, %379, %380 : vector<1x1024xi32>
    %c0_i32_156 = arith.constant 0 : i32
    %382 = vector.broadcast %c0_i32_156 : i32 to vector<1x1024xi32>
    %383 = arith.cmpi slt, %379, %382 : vector<1x1024xi32>
    %c0_i32_157 = arith.constant 0 : i32
    %384 = arith.cmpi slt, %377, %c0_i32_157 : i32
    %385 = vector.broadcast %384 : i1 to vector<1x1024xi1>
    %386 = vector.broadcast %385 : vector<1x1024xi1> to vector<1x1024xi1>
    %387 = arith.xori %383, %386 : vector<1x1024xi1>
    %388 = arith.andi %387, %381 : vector<1x1024xi1>
    %389 = vector.broadcast %377 : i32 to vector<1x1024xi32>
    %390 = arith.addi %379, %389 : vector<1x1024xi32>
    %391 = arith.select %388, %390, %379 : vector<1x1024xi1>, vector<1x1024xi32>
    %c-1_i32_158 = arith.constant -1 : i32
    %392 = vector.broadcast %c-1_i32_158 : i32 to vector<1x1024xi32>
    %393 = arith.addi %391, %392 : vector<1x1024xi32>
    %c0_i32_159 = arith.constant 0 : i32
    %394 = vector.broadcast %c0_i32_159 : i32 to vector<1x1024xi32>
    %395 = arith.cmpi sge, %393, %394 : vector<1x1024xi32>
    %c-1_i32_160 = arith.constant -1 : i32
    %396 = vector.broadcast %c-1_i32_160 : i32 to vector<1x1024xi32>
    %397 = arith.addi %391, %396 : vector<1x1024xi32>
    %c32_i32_161 = arith.constant 32 : i32
    %398 = vector.broadcast %c32_i32_161 : i32 to vector<1x1024xi32>
    %399 = arith.cmpi slt, %397, %398 : vector<1x1024xi32>
    %400 = arith.andi %395, %399 : vector<1x1024xi1>
    %cst_162 = arith.constant 0.000000e+00 : bf16
    %401 = vector.broadcast %cst_162 : bf16 to vector<8x1024xbf16>
    %402 = vector.shape_cast %400 : vector<1x1024xi1> to vector<1x1024xi1>
    %403 = vector.broadcast %402 : vector<1x1024xi1> to vector<8x1024xi1>
    %404 = arith.select %403, %374, %401 : vector<8x1024xi1>, vector<8x1024xbf16>
    %c3_163 = arith.constant 3 : index
    %c0_164 = arith.constant 0 : index
    %c0_165 = arith.constant 0 : index
    %405 = vector.load %arg8[%c3_163, %c0_164, %c0_165] : memref<9x4x8xf32, #tpu.memory_space<vmem>>, vector<1x4x8xf32>
    %406 = vector.shape_cast %405 : vector<1x4x8xf32> to vector<4x8xf32>
    %407 = arith.truncf %406 : vector<4x8xf32> to vector<4x8xbf16>
    %cst_166 = arith.constant dense<0.000000e+00> : vector<4x1024xf32>
    %408 = tpu.matmul %407, %404, %cst_166 {dimension_numbers = #tpu.dot_dimension_numbers<[1], [0], [0], [1], [0, 0, 1, 1], [], []>} : vector<4x8xbf16>, vector<8x1024xbf16>, vector<4x1024xf32> -> vector<4x1024xf32>
    %409 = arith.addf %371, %408 : vector<4x1024xf32>
    %c4_167 = arith.constant 4 : index
    %c0_168 = arith.constant 0 : index
    %c0_169 = arith.constant 0 : index
    %410 = vector.load %arg8[%c4_167, %c0_168, %c0_169] : memref<9x4x8xf32, #tpu.memory_space<vmem>>, vector<1x4x8xf32>
    %411 = vector.shape_cast %410 : vector<1x4x8xf32> to vector<4x8xf32>
    %412 = arith.truncf %411 : vector<4x8xf32> to vector<4x8xbf16>
    %cst_170 = arith.constant dense<0.000000e+00> : vector<4x1024xf32>
    %413 = tpu.matmul %412, %288, %cst_170 {dimension_numbers = #tpu.dot_dimension_numbers<[1], [0], [0], [1], [0, 0, 1, 1], [], []>} : vector<4x8xbf16>, vector<8x1024xbf16>, vector<4x1024xf32> -> vector<4x1024xf32>
    %414 = arith.addf %409, %413 : vector<4x1024xf32>
    %415 = vector.extract_strided_slice %288 {offsets = [0, 1], sizes = [8, 1023], strides = [1, 1]} : vector<8x1024xbf16> to vector<8x1023xbf16>
    %cst_171 = arith.constant 0.000000e+00 : bf16
    %416 = vector.broadcast %cst_171 : bf16 to vector<8x1xbf16>
    %417 = tpu.concatenate %415, %416 in 1 : vector<8x1023xbf16>, vector<8x1xbf16> -> vector<8x1024xbf16>
    %418 = tpu.iota {dimensions = array<i32: 1>} : vector<1x1024xi32>
    %c32_i32_172 = arith.constant 32 : i32
    %c0_i32_173 = arith.constant 0 : i32
    %419 = arith.cmpi eq, %c32_i32_172, %c0_i32_173 : i32
    %c1_i32_174 = arith.constant 1 : i32
    %420 = arith.select %419, %c1_i32_174, %c32_i32_172 : i32
    %421 = vector.broadcast %420 : i32 to vector<1x1024xi32>
    %422 = arith.remsi %418, %421 : vector<1x1024xi32>
    %c0_i32_175 = arith.constant 0 : i32
    %423 = vector.broadcast %c0_i32_175 : i32 to vector<1x1024xi32>
    %424 = arith.cmpi ne, %422, %423 : vector<1x1024xi32>
    %c0_i32_176 = arith.constant 0 : i32
    %425 = vector.broadcast %c0_i32_176 : i32 to vector<1x1024xi32>
    %426 = arith.cmpi slt, %422, %425 : vector<1x1024xi32>
    %c0_i32_177 = arith.constant 0 : i32
    %427 = arith.cmpi slt, %420, %c0_i32_177 : i32
    %428 = vector.broadcast %427 : i1 to vector<1x1024xi1>
    %429 = vector.broadcast %428 : vector<1x1024xi1> to vector<1x1024xi1>
    %430 = arith.xori %426, %429 : vector<1x1024xi1>
    %431 = arith.andi %430, %424 : vector<1x1024xi1>
    %432 = vector.broadcast %420 : i32 to vector<1x1024xi32>
    %433 = arith.addi %422, %432 : vector<1x1024xi32>
    %434 = arith.select %431, %433, %422 : vector<1x1024xi1>, vector<1x1024xi32>
    %c1_i32_178 = arith.constant 1 : i32
    %435 = vector.broadcast %c1_i32_178 : i32 to vector<1x1024xi32>
    %436 = arith.addi %434, %435 : vector<1x1024xi32>
    %c0_i32_179 = arith.constant 0 : i32
    %437 = vector.broadcast %c0_i32_179 : i32 to vector<1x1024xi32>
    %438 = arith.cmpi sge, %436, %437 : vector<1x1024xi32>
    %c1_i32_180 = arith.constant 1 : i32
    %439 = vector.broadcast %c1_i32_180 : i32 to vector<1x1024xi32>
    %440 = arith.addi %434, %439 : vector<1x1024xi32>
    %c32_i32_181 = arith.constant 32 : i32
    %441 = vector.broadcast %c32_i32_181 : i32 to vector<1x1024xi32>
    %442 = arith.cmpi slt, %440, %441 : vector<1x1024xi32>
    %443 = arith.andi %438, %442 : vector<1x1024xi1>
    %cst_182 = arith.constant 0.000000e+00 : bf16
    %444 = vector.broadcast %cst_182 : bf16 to vector<8x1024xbf16>
    %445 = vector.shape_cast %443 : vector<1x1024xi1> to vector<1x1024xi1>
    %446 = vector.broadcast %445 : vector<1x1024xi1> to vector<8x1024xi1>
    %447 = arith.select %446, %417, %444 : vector<8x1024xi1>, vector<8x1024xbf16>
    %c5_183 = arith.constant 5 : index
    %c0_184 = arith.constant 0 : index
    %c0_185 = arith.constant 0 : index
    %448 = vector.load %arg8[%c5_183, %c0_184, %c0_185] : memref<9x4x8xf32, #tpu.memory_space<vmem>>, vector<1x4x8xf32>
    %449 = vector.shape_cast %448 : vector<1x4x8xf32> to vector<4x8xf32>
    %450 = arith.truncf %449 : vector<4x8xf32> to vector<4x8xbf16>
    %cst_186 = arith.constant dense<0.000000e+00> : vector<4x1024xf32>
    %451 = tpu.matmul %450, %447, %cst_186 {dimension_numbers = #tpu.dot_dimension_numbers<[1], [0], [0], [1], [0, 0, 1, 1], [], []>} : vector<4x8xbf16>, vector<8x1024xbf16>, vector<4x1024xf32> -> vector<4x1024xf32>
    %452 = arith.addf %414, %451 : vector<4x1024xf32>
    %453 = vector.extract_strided_slice %288 {offsets = [0, 31], sizes = [8, 993], strides = [1, 1]} : vector<8x1024xbf16> to vector<8x993xbf16>
    %cst_187 = arith.constant 0.000000e+00 : bf16
    %454 = vector.broadcast %cst_187 : bf16 to vector<8x31xbf16>
    %455 = tpu.concatenate %453, %454 in 1 : vector<8x993xbf16>, vector<8x31xbf16> -> vector<8x1024xbf16>
    %456 = tpu.iota {dimensions = array<i32: 1>} : vector<1x1024xi32>
    %c32_i32_188 = arith.constant 32 : i32
    %c0_i32_189 = arith.constant 0 : i32
    %457 = arith.cmpi eq, %c32_i32_188, %c0_i32_189 : i32
    %c1_i32_190 = arith.constant 1 : i32
    %458 = arith.select %457, %c1_i32_190, %c32_i32_188 : i32
    %459 = vector.broadcast %458 : i32 to vector<1x1024xi32>
    %460 = arith.remsi %456, %459 : vector<1x1024xi32>
    %c0_i32_191 = arith.constant 0 : i32
    %461 = vector.broadcast %c0_i32_191 : i32 to vector<1x1024xi32>
    %462 = arith.cmpi ne, %460, %461 : vector<1x1024xi32>
    %c0_i32_192 = arith.constant 0 : i32
    %463 = vector.broadcast %c0_i32_192 : i32 to vector<1x1024xi32>
    %464 = arith.cmpi slt, %460, %463 : vector<1x1024xi32>
    %c0_i32_193 = arith.constant 0 : i32
    %465 = arith.cmpi slt, %458, %c0_i32_193 : i32
    %466 = vector.broadcast %465 : i1 to vector<1x1024xi1>
    %467 = vector.broadcast %466 : vector<1x1024xi1> to vector<1x1024xi1>
    %468 = arith.xori %464, %467 : vector<1x1024xi1>
    %469 = arith.andi %468, %462 : vector<1x1024xi1>
    %470 = vector.broadcast %458 : i32 to vector<1x1024xi32>
    %471 = arith.addi %460, %470 : vector<1x1024xi32>
    %472 = arith.select %469, %471, %460 : vector<1x1024xi1>, vector<1x1024xi32>
    %c-1_i32_194 = arith.constant -1 : i32
    %473 = vector.broadcast %c-1_i32_194 : i32 to vector<1x1024xi32>
    %474 = arith.addi %472, %473 : vector<1x1024xi32>
    %c0_i32_195 = arith.constant 0 : i32
    %475 = vector.broadcast %c0_i32_195 : i32 to vector<1x1024xi32>
    %476 = arith.cmpi sge, %474, %475 : vector<1x1024xi32>
    %c-1_i32_196 = arith.constant -1 : i32
    %477 = vector.broadcast %c-1_i32_196 : i32 to vector<1x1024xi32>
    %478 = arith.addi %472, %477 : vector<1x1024xi32>
    %c32_i32_197 = arith.constant 32 : i32
    %479 = vector.broadcast %c32_i32_197 : i32 to vector<1x1024xi32>
    %480 = arith.cmpi slt, %478, %479 : vector<1x1024xi32>
    %481 = arith.andi %476, %480 : vector<1x1024xi1>
    %cst_198 = arith.constant 0.000000e+00 : bf16
    %482 = vector.broadcast %cst_198 : bf16 to vector<8x1024xbf16>
    %483 = vector.shape_cast %481 : vector<1x1024xi1> to vector<1x1024xi1>
    %484 = vector.broadcast %483 : vector<1x1024xi1> to vector<8x1024xi1>
    %485 = arith.select %484, %455, %482 : vector<8x1024xi1>, vector<8x1024xbf16>
    %c6_199 = arith.constant 6 : index
    %c0_200 = arith.constant 0 : index
    %c0_201 = arith.constant 0 : index
    %486 = vector.load %arg8[%c6_199, %c0_200, %c0_201] : memref<9x4x8xf32, #tpu.memory_space<vmem>>, vector<1x4x8xf32>
    %487 = vector.shape_cast %486 : vector<1x4x8xf32> to vector<4x8xf32>
    %488 = arith.truncf %487 : vector<4x8xf32> to vector<4x8xbf16>
    %cst_202 = arith.constant dense<0.000000e+00> : vector<4x1024xf32>
    %489 = tpu.matmul %488, %485, %cst_202 {dimension_numbers = #tpu.dot_dimension_numbers<[1], [0], [0], [1], [0, 0, 1, 1], [], []>} : vector<4x8xbf16>, vector<8x1024xbf16>, vector<4x1024xf32> -> vector<4x1024xf32>
    %490 = arith.addf %452, %489 : vector<4x1024xf32>
    %491 = vector.extract_strided_slice %288 {offsets = [0, 32], sizes = [8, 992], strides = [1, 1]} : vector<8x1024xbf16> to vector<8x992xbf16>
    %cst_203 = arith.constant 0.000000e+00 : bf16
    %492 = vector.broadcast %cst_203 : bf16 to vector<8x32xbf16>
    %493 = tpu.concatenate %491, %492 in 1 : vector<8x992xbf16>, vector<8x32xbf16> -> vector<8x1024xbf16>
    %c7_204 = arith.constant 7 : index
    %c0_205 = arith.constant 0 : index
    %c0_206 = arith.constant 0 : index
    %494 = vector.load %arg8[%c7_204, %c0_205, %c0_206] : memref<9x4x8xf32, #tpu.memory_space<vmem>>, vector<1x4x8xf32>
    %495 = vector.shape_cast %494 : vector<1x4x8xf32> to vector<4x8xf32>
    %496 = arith.truncf %495 : vector<4x8xf32> to vector<4x8xbf16>
    %cst_207 = arith.constant dense<0.000000e+00> : vector<4x1024xf32>
    %497 = tpu.matmul %496, %493, %cst_207 {dimension_numbers = #tpu.dot_dimension_numbers<[1], [0], [0], [1], [0, 0, 1, 1], [], []>} : vector<4x8xbf16>, vector<8x1024xbf16>, vector<4x1024xf32> -> vector<4x1024xf32>
    %498 = arith.addf %490, %497 : vector<4x1024xf32>
    %499 = vector.extract_strided_slice %288 {offsets = [0, 33], sizes = [8, 991], strides = [1, 1]} : vector<8x1024xbf16> to vector<8x991xbf16>
    %cst_208 = arith.constant 0.000000e+00 : bf16
    %500 = vector.broadcast %cst_208 : bf16 to vector<8x33xbf16>
    %501 = tpu.concatenate %499, %500 in 1 : vector<8x991xbf16>, vector<8x33xbf16> -> vector<8x1024xbf16>
    %502 = tpu.iota {dimensions = array<i32: 1>} : vector<1x1024xi32>
    %c32_i32_209 = arith.constant 32 : i32
    %c0_i32_210 = arith.constant 0 : i32
    %503 = arith.cmpi eq, %c32_i32_209, %c0_i32_210 : i32
    %c1_i32_211 = arith.constant 1 : i32
    %504 = arith.select %503, %c1_i32_211, %c32_i32_209 : i32
    %505 = vector.broadcast %504 : i32 to vector<1x1024xi32>
    %506 = arith.remsi %502, %505 : vector<1x1024xi32>
    %c0_i32_212 = arith.constant 0 : i32
    %507 = vector.broadcast %c0_i32_212 : i32 to vector<1x1024xi32>
    %508 = arith.cmpi ne, %506, %507 : vector<1x1024xi32>
    %c0_i32_213 = arith.constant 0 : i32
    %509 = vector.broadcast %c0_i32_213 : i32 to vector<1x1024xi32>
    %510 = arith.cmpi slt, %506, %509 : vector<1x1024xi32>
    %c0_i32_214 = arith.constant 0 : i32
    %511 = arith.cmpi slt, %504, %c0_i32_214 : i32
    %512 = vector.broadcast %511 : i1 to vector<1x1024xi1>
    %513 = vector.broadcast %512 : vector<1x1024xi1> to vector<1x1024xi1>
    %514 = arith.xori %510, %513 : vector<1x1024xi1>
    %515 = arith.andi %514, %508 : vector<1x1024xi1>
    %516 = vector.broadcast %504 : i32 to vector<1x1024xi32>
    %517 = arith.addi %506, %516 : vector<1x1024xi32>
    %518 = arith.select %515, %517, %506 : vector<1x1024xi1>, vector<1x1024xi32>
    %c1_i32_215 = arith.constant 1 : i32
    %519 = vector.broadcast %c1_i32_215 : i32 to vector<1x1024xi32>
    %520 = arith.addi %518, %519 : vector<1x1024xi32>
    %c0_i32_216 = arith.constant 0 : i32
    %521 = vector.broadcast %c0_i32_216 : i32 to vector<1x1024xi32>
    %522 = arith.cmpi sge, %520, %521 : vector<1x1024xi32>
    %c1_i32_217 = arith.constant 1 : i32
    %523 = vector.broadcast %c1_i32_217 : i32 to vector<1x1024xi32>
    %524 = arith.addi %518, %523 : vector<1x1024xi32>
    %c32_i32_218 = arith.constant 32 : i32
    %525 = vector.broadcast %c32_i32_218 : i32 to vector<1x1024xi32>
    %526 = arith.cmpi slt, %524, %525 : vector<1x1024xi32>
    %527 = arith.andi %522, %526 : vector<1x1024xi1>
    %cst_219 = arith.constant 0.000000e+00 : bf16
    %528 = vector.broadcast %cst_219 : bf16 to vector<8x1024xbf16>
    %529 = vector.shape_cast %527 : vector<1x1024xi1> to vector<1x1024xi1>
    %530 = vector.broadcast %529 : vector<1x1024xi1> to vector<8x1024xi1>
    %531 = arith.select %530, %501, %528 : vector<8x1024xi1>, vector<8x1024xbf16>
    %c8_220 = arith.constant 8 : index
    %c0_221 = arith.constant 0 : index
    %c0_222 = arith.constant 0 : index
    %532 = vector.load %arg8[%c8_220, %c0_221, %c0_222] : memref<9x4x8xf32, #tpu.memory_space<vmem>>, vector<1x4x8xf32>
    %533 = vector.shape_cast %532 : vector<1x4x8xf32> to vector<4x8xf32>
    %534 = arith.truncf %533 : vector<4x8xf32> to vector<4x8xbf16>
    %cst_223 = arith.constant dense<0.000000e+00> : vector<4x1024xf32>
    %535 = tpu.matmul %534, %531, %cst_223 {dimension_numbers = #tpu.dot_dimension_numbers<[1], [0], [0], [1], [0, 0, 1, 1], [], []>} : vector<4x8xbf16>, vector<8x1024xbf16>, vector<4x1024xf32> -> vector<4x1024xf32>
    %536 = arith.addf %498, %535 : vector<4x1024xf32>
    %c0_224 = arith.constant 0 : index
    %c0_225 = arith.constant 0 : index
    %537 = vector.load %arg9[%c0_224, %c0_225] : memref<4x1xf32, #tpu.memory_space<vmem>>, vector<4x1xf32>
    %538 = vector.broadcast %537 : vector<4x1xf32> to vector<4x1024xf32>
    %539 = arith.addf %536, %538 : vector<4x1024xf32>
    %c0_226 = arith.constant 0 : index
    %c0_227 = arith.constant 0 : index
    %c0_228 = arith.constant 0 : index
    %540 = vector.load %arg3[%c0_226, %c0_227, %c0_228] : memref<1x4x1024xbf16, #tpu.memory_space<vmem>>, vector<1x4x1024xbf16>
    %541 = vector.shape_cast %540 : vector<1x4x1024xbf16> to vector<4x1024xbf16>
    %542 = arith.extf %541 : vector<4x1024xbf16> to vector<4x1024xf32>
    %543 = arith.addf %539, %542 : vector<4x1024xf32>
    %c0_229 = arith.constant 0 : index
    %c0_230 = arith.constant 0 : index
    %c0_231 = arith.constant 0 : index
    %544 = vector.load %arg1[%c0_229, %c0_230, %c0_231] : memref<1x2x4xf32, #tpu.memory_space<vmem>>, vector<1x2x4xf32>
    %545 = vector.shape_cast %544 : vector<1x2x4xf32> to vector<2x4xf32>
    %546 = vector.extract_strided_slice %545 {offsets = [1, 0], sizes = [1, 4], strides = [1, 1]} : vector<2x4xf32> to vector<1x4xf32>
    %547 = arith.truncf %546 : vector<1x4xf32> to vector<1x4xbf16>
    %548 = arith.truncf %543 : vector<4x1024xf32> to vector<4x1024xbf16>
    %cst_232 = arith.constant dense<0.000000e+00> : vector<1x1024xf32>
    %549 = tpu.matmul %547, %548, %cst_232 {dimension_numbers = #tpu.dot_dimension_numbers<[1], [0], [0], [1], [0, 0, 1, 1], [], []>} : vector<1x4xbf16>, vector<4x1024xbf16>, vector<1x1024xf32> -> vector<1x1024xf32>
    %550 = vector.extract_strided_slice %545 {offsets = [0, 0], sizes = [1, 4], strides = [1, 1]} : vector<2x4xf32> to vector<1x4xf32>
    %551 = arith.truncf %550 : vector<1x4xf32> to vector<1x4xbf16>
    %cst_233 = arith.constant dense<0.000000e+00> : vector<1x1024xf32>
    %552 = tpu.matmul %551, %1, %cst_233 {dimension_numbers = #tpu.dot_dimension_numbers<[1], [0], [0], [1], [0, 0, 1, 1], [], []>} : vector<1x4xbf16>, vector<4x1024xbf16>, vector<1x1024xf32> -> vector<1x1024xf32>
    %553 = arith.addf %549, %552 : vector<1x1024xf32>
    %c0_234 = arith.constant 0 : index
    %c0_235 = arith.constant 0 : index
    %c0_236 = arith.constant 0 : index
    %554 = vector.load %arg10[%c0_234, %c0_235, %c0_236] : memref<1x1x1024xf32, #tpu.memory_space<vmem>>, vector<1x1x1024xf32>
    %555 = vector.shape_cast %554 : vector<1x1x1024xf32> to vector<1x1024xf32>
    %556 = vector.shape_cast %553 : vector<1x1024xf32> to vector<1x1x1024xf32>
    tpu.vector_store %arg10[%c0_234, %c0_235, %c0_236], %556 {strides = array<i32>} : memref<1x1x1024xf32, #tpu.memory_space<vmem>>, vector<1x1x1024xf32>,
    return
  }
  func.func @transform_0(%arg0: i32) -> (i32, i32, i32) {
    %c0_i32 = arith.constant 0 : i32
    %c0_i32_0 = arith.constant 0 : i32
    %c0_i32_1 = arith.constant 0 : i32
    return %arg0, %c0_i32, %c0_i32_0 : i32, i32, i32
  }
  func.func @transform_1(%arg0: i32) -> (i32, i32, i32) {
    %c0_i32 = arith.constant 0 : i32
    %c0_i32_0 = arith.constant 0 : i32
    %c0_i32_1 = arith.constant 0 : i32
    return %arg0, %c0_i32, %c0_i32_0 : i32, i32, i32
  }
  func.func @transform_2(%arg0: i32) -> (i32, i32, i32) {
    %c0_i32 = arith.constant 0 : i32
    %c0_i32_0 = arith.constant 0 : i32
    %c0_i32_1 = arith.constant 0 : i32
    return %arg0, %c0_i32, %c0_i32_0 : i32, i32, i32
  }
  func.func @transform_3(%arg0: i32) -> (i32, i32, i32) {
    %c0_i32 = arith.constant 0 : i32
    %c0_i32_0 = arith.constant 0 : i32
    %c0_i32_1 = arith.constant 0 : i32
    %c0_i32_2 = arith.constant 0 : i32
    return %c0_i32, %c0_i32_0, %c0_i32_1 : i32, i32, i32
  }
  func.func @transform_4(%arg0: i32) -> (i32, i32) {
    %c0_i32 = arith.constant 0 : i32
    %c0_i32_0 = arith.constant 0 : i32
    %c0_i32_1 = arith.constant 0 : i32
    return %c0_i32, %c0_i32_0 : i32, i32
  }
  func.func @transform_5(%arg0: i32) -> (i32, i32) {
    %c0_i32 = arith.constant 0 : i32
    %c0_i32_0 = arith.constant 0 : i32
    %c0_i32_1 = arith.constant 0 : i32
    return %c0_i32, %c0_i32_0 : i32, i32
  }
  func.func @transform_6(%arg0: i32) -> (i32, i32) {
    %c0_i32 = arith.constant 0 : i32
    %c0_i32_0 = arith.constant 0 : i32
    %c0_i32_1 = arith.constant 0 : i32
    return %c0_i32, %c0_i32_0 : i32, i32
  }
  func.func @transform_7(%arg0: i32) -> (i32, i32, i32) {
    %c0_i32 = arith.constant 0 : i32
    %c0_i32_0 = arith.constant 0 : i32
    %c0_i32_1 = arith.constant 0 : i32
    %c0_i32_2 = arith.constant 0 : i32
    return %c0_i32, %c0_i32_0, %c0_i32_1 : i32, i32, i32
  }
  func.func @transform_8(%arg0: i32) -> (i32, i32) {
    %c0_i32 = arith.constant 0 : i32
    %c0_i32_0 = arith.constant 0 : i32
    %c0_i32_1 = arith.constant 0 : i32
    return %c0_i32, %c0_i32_0 : i32, i32
  }
  func.func @transform_9(%arg0: i32) -> (i32, i32, i32) {
    %c0_i32 = arith.constant 0 : i32
    %c0_i32_0 = arith.constant 0 : i32
    %c0_i32_1 = arith.constant 0 : i32
    return %arg0, %c0_i32, %c0_i32_0 : i32, i32, i32
  }
}

</mosaic_0001>

<bundles_post_ra>
// kernel: mask_decoder_hq_forward.6
= control target key start
LH: loop header
LB: loop body
LE: loop exit
PB: predicated region body
PF: predicated region fallthrough
CT: control target
= control target key end

     0   :  { %s861_s27 = smov 0   ;;  %s863_s28 = smov 0   ;;  %s947_s0 = inlined_call_operand.vmem [shape: f32[2,16,64], index: 0, kind: input, shape index: {}]   ;;  %s948_s1 = inlined_call_operand.vmem [shape: f32[2,32,64], index: 1, kind: input, shape index: {}]   ;;  %s949_s2 = inlined_call_operand.vmem [shape: f32[2,16], index: 2, kind: input, shape index: {}]   ;;  %s950_s3 = inlined_call_operand.vmem [shape: f32[2,1], index: 3, kind: input, shape index: {}]   ;;  %s951_s4 = inlined_call_operand.vmem [shape: f32[2,2], index: 4, kind: input, shape index: {}]   ;;  %s952_s5 = inlined_call_operand.vmem [shape: f32[2,1], index: 5, kind: input, shape index: {}]   ;;  %s953_s6 = inlined_call_operand.vmem [shape: f32[32,2], index: 6, kind: input, shape index: {}]   ;;  %s954_s7 = inlined_call_operand.vmem [shape: f32[32,1], index: 7, kind: input, shape index: {}]   ;;  %s955_s8 = inlined_call_operand.vmem [shape: bf16[2,32,64], index: 8, kind: output, shape index: {}]  }
   0x1   :  { %s865_s29 = smov 0  }
   0x2 LB: > { %s30_s30 = sadd.s32 1, %s807_s28  ;;  %p710_p0 = scmp.ge.s32.totalorder %s811_s29, 1  ;;  %s811_s29 = sphi %s865_s29, %s18_s29   ;;  %s807_s28 = sphi %s863_s28, %s957_s28   ;;  %s803_s27 = sphi %s861_s27, %s956_s27  }
   0x3   : > { %p32_p1 = scmp.ge.s32.totalorder %s30_s30, 2  ;;  %p296_p2 = scmp.lt.s32.totalorder %s811_s29, 3 }
   0x5   : > { %s959_s30 = smov (%p32_p1, %s30_s30), 0  ;;  %p297_p3 = pnand %p710_p0, %p296_p2 }
   0x6   : > { %p344_p4 = scmp.lt.s32.totalorder (!%p297_p3), %s803_s27, 1  ;;  %v813_v0 = vmov (!%p297_p3), 0.0   ;;  %vm814_vm0 = vmmov (!%p297_p3), 0   ;;  %v374_v1 = vld [vmem:[%s950_s3] sm:$0x3] (!%p297_p3)  ;;  %v815_v2 = vmov (!%p297_p3), 0  }
   0x7   : > { %300 = sbr.rel (%p297_p3) target bundleno = 689 (0x2b1), region = 52  ;;  %741 = vmatprep.subr.bf16.mxu0 (!%p297_p3), %v813_v0  ;;  %743 = vmatprep.mubr.msk.bf16.mxu0 (!%p297_p3), %vm814_vm0, %v813_v0  ;;  %v428_v3 = vld [vmem:[%s952_s5] sm:$0x3] (!%p297_p3)  ;;  %v558_v9 = vld [vmem:[%s954_s7 + $0x10] sm:$0xff] (!%p297_p3)  ;;  %vm380_vm1 = vcmask (!%p297_p3), 130048   ;;  %vm438_vm2 = vcmask (!%p297_p3), 1040384  }
   0x8   : > { %787 = vset.pattern.permute.xlu0 (!%p297_p3), %v815_v2  ;;  %747 = vmatprep.subr.bf16.mxu1 (!%p297_p3), %v813_v0  ;;  %v371_v4 = vld [vmem:[%s949_s2] sm:$0x3] (!%p297_p3)  ;;  %vm434_vm3 = vcmask (!%p297_p3), 15360   ;;  %v488_v22 = vld [vmem:[%s953_s6 + $0x8] sm:$0xff] (!%p297_p3)  ;;  %v559_v26 = vld [vmem:[%s954_s7 + $0x18] sm:$0xff] (!%p297_p3)  ;;  %vm600_vm4 = vcmask (!%p297_p3), 519168  }
   0x9   : > { %377 = vperm.xlu0 (!%p297_p3), %787, %v374_v1   ;;  %749 = vmatprep.mubr.msk.bf16.mxu1 (!%p297_p3), %vm814_vm0, %v813_v0  ;;  %v372_v8 = vpack.c.bf16 (!%p297_p3), %v371_v4, %v371_v4  ;;  %v425_v17 = vld [vmem:[%s951_s4] sm:$0x3] (!%p297_p3)  ;;  %v557_v25 = vld [vmem:[%s954_s7 + $0x8] sm:$0xff] (!%p297_p3)  ;;  %v489_v34 = vld [vmem:[%s953_s6 + $0x10] sm:$0xff] (!%p297_p3) }
   0xa   : > { %788 = vset.pattern.permute.xlu1 (!%p297_p3), %v815_v2  ;;  %v426_v20 = vpack.c.bf16 (!%p297_p3), %v425_v17, %v425_v17  ;;  %v487_v21 = vld [vmem:[%s953_s6] sm:$0xff] (!%p297_p3)  ;;  %v490_v35 = vld [vmem:[%s953_s6 + $0x18] sm:$0xff] (!%p297_p3) }
   0xb   : > { %v491_v23 = vpack.c.bf16 (!%p297_p3), %v488_v22, %v487_v21  ;;  %v556_v24 = vld [vmem:[%s954_s7] sm:$0xff] (!%p297_p3)  ;;  %v492_v38 = vpack.c.bf16 (!%p297_p3), %v490_v35, %v489_v34 }
   0xc   : > { %562 = vperm.xlu1 (!%p297_p3), %788, %v556_v24  }
   0xd   : > { %431 = vperm.xlu0 (!%p297_p3), %787, %v428_v3  }
   0xe   : > { %s961_s27 = smov (!%p344_p4, %s803_s27), 1 }
   0xf   : > { %s727_s11 = sshll.u32 %s961_s27, 4  ;;  %s728_s20 = sshll.u32 %s961_s27, 5 }
  0x10   : > { %s351_s16 = scalar_lea.vmem %s947_s0, %s727_s11  ;;  %567 = vperm.xlu1 %788, %v557_v25   ;;  %s359_s23 = scalar_lea.vmem %s948_s1, %s728_s20 }
  0x11   : > { %v369_v5 = vld [vmem:[%s351_s16] sm:$0xff]  ;;  %v370_v6 = vld [vmem:[%s351_s16 + $0x8] sm:$0xff]  ;;  %572 = vperm.xlu0 %787, %v558_v9   ;;  %v485_v41 = vld [vmem:[%s359_s23 + $0x10] sm:$0xff]  ;;  %s367_s26 = scalar_lea.vmem %s955_s8, %s727_s11 }
  0x12   : > { %v373_v7 = vpack.c.bf16 %v370_v6, %v369_v5  ;;  %v483_v42 = vld [vmem:[%s359_s23] sm:$0xff]  ;;  %v486_v44 = vld [vmem:[%s359_s23 + $0x18] sm:$0xff]  ;;  %v484_v47 = vld [vmem:[%s359_s23 + $0x8] sm:$0xff] }
  0x14   : > { %742 = vmatpush3.bf16.msra.mxu0 %v373_v7  ;;  %577 = vperm.xlu1 %788, %v559_v26  }
  0x17   : > { %744 = vmatmul.mubr.msk.bf16.vlgmr.msra.gmra.mrb[0].mxu0 %vm380_vm1, %v372_v8 }
  0x18   : > { %755 = vmatprep.mubr.msk.bf16.mxu0 %vm434_vm3, %v491_v23 }
  0x88   : > { %v378_v10 = vpop.permute.xlu0 %377 }
  0x8b   : > { %v563_v39 = vpop.permute.xlu1 %562 }
  0x8c   : > { %v432_v27 = vpop.permute.xlu0 %431 }
  0x8f   : > { %v568_v40 = vpop.permute.xlu1 %567 }
  0x90   : > { %v573_v48 = vpop.permute.xlu0 %572 }
  0x93   : > { %v578_v55 = vpop.permute.xlu1 %577 }
  0xea   : > { %v418_v11 = vpop.f32.mrb[0].mxu0 }
  0xeb   : > { %v419_v12 = vadd.f32 %v418_v11, %v378_v10  ;;  %v745_v13 = vpop.f32.mrb[1].mxu0 }
  0xec   : > { %v421_v14 = vpop.f32.mrb[2].mxu0 }
  0xed   : > { %v424_v15 = vmax.f32 %v419_v12, 0.0  ;;  %v746_v16 = vpop.f32.mrb[3].mxu0 }
  0xef   : > { %v427_v18 = vpack.c.bf16 %v424_v15, %v424_v15 }
  0xf1   : > { %v440_v19 = vsel %vm438_vm2, %v427_v18, 0 }
  0xf2   : > { %748 = vmatpush3.bf16.msra.mxu1 %v440_v19 }
  0xf5   : > { %750 = vmatmul.mubr.msk.bf16.vlgmr.msra.gmra.mrb[0].mxu1 %vm434_vm3, %v426_v20 }
 0x1c8   : > { %v476_v28 = vpop.f32.mrb[0].mxu1 }
 0x1c9   : > { %v477_v29 = vadd.f32 %v476_v28, %v432_v27  ;;  %v751_v30 = vpop.f32.mrb[1].mxu1 }
 0x1ca   : > { %v479_v31 = vpop.f32.mrb[2].mxu1 }
 0x1cb   : > { %v482_v32 = vmax.f32 %v477_v29, 0.0  ;;  %v752_v33 = vpop.f32.mrb[3].mxu1 }
 0x1cd   : > { %v493_v36 = vpack.c.bf16 %v482_v32, %v482_v32 }
 0x1cf   : > { %759 = vmatprep.subr.msk.bf16.mxu0 %vm438_vm2, %v493_v36  ;;  %v501_v37 = vsel %vm438_vm2, %v493_v36, 0 }
 0x1d0   : > { %754 = vmatpush3.bf16.msra.mxu0 %v501_v37 }
 0x1d3   : > { %756 = vmatmul.mubr.msk.bf16.vlgmr.msra.gmra.mrb[4].mxu0 %vm434_vm3, %v492_v38 }
 0x2a6   : > { %v757_v43 = vpop.f32.mrb[4].mxu0 }
 0x2a7   : > { %v554_v45 = vadd.f32 %v757_v43, %v485_v41  ;;  %v537_v46 = vpop.f32.mrb[5].mxu0 }
 0x2a8   : > { %v552_v49 = vadd.f32 %v537_v46, %v483_v42  ;;  %v758_v50 = vpop.f32.mrb[6].mxu0 }
 0x2a9   : > { %v582_v51 = vadd.f32 %v573_v48, %v554_v45  ;;  %v555_v52 = vadd.f32 %v758_v50, %v486_v44  ;;  %v540_v53 = vpop.f32.mrb[7].mxu0 }
 0x2aa   : > { %v580_v54 = vadd.f32 %v563_v39, %v552_v49  ;;  %v553_v56 = vadd.f32 %v540_v53, %v484_v47 }
 0x2ab   : > { %v732_v57 = vpack.c.bf16 %v582_v51, %v582_v51  ;;  %v583_v58 = vadd.f32 %v578_v55, %v555_v52 }
 0x2ac   : > { %v730_v59 = vpack.c.bf16 %v580_v54, %v580_v54  ;;  %v581_v60 = vadd.f32 %v568_v40, %v553_v56 }
 0x2ad   : > { %603 = vst.msk [vmem:[%s367_s26 + $0x8] sm:$0xf] %vm600_vm4, %v732_v57  ;;  %v733_v61 = vpack.c.bf16 %v583_v58, %v583_v58 }
 0x2ae   : > { %601 = vst.msk [vmem:[%s367_s26] sm:$0xf] %vm600_vm4, %v730_v59  ;;  %v731_v62 = vpack.c.bf16 %v581_v60, %v581_v60 }
 0x2af   : > { %604 = vst.msk [vmem:[%s367_s26 + $0xc] sm:$0xf] %vm600_vm4, %v733_v61 }
 0x2b0   : > { %602 = vst.msk [vmem:[%s367_s26 + $0x4] sm:$0xf] %vm600_vm4, %v731_v62 }
 0x2b1 PF: > { %s18_s29 = sadd.s32 1, %s811_s29   ;;  %s956_s27 = smov %s807_s28 }
 0x2b2   : > { %p15_p5 = scmp.ge.s32.totalorder %s18_s29, 4   ;;  %s957_s28 = smov %s959_s30 }
 0x2b4   :  { %17 = sbr.rel (!%p15_p5) target bundleno = 2 (0x2), region = 85 }

// kernel: mask_decoder_hq_forward.10
= control target key start
LH: loop header
LB: loop body
LE: loop exit
PB: predicated region body
PF: predicated region fallthrough
CT: control target
= control target key end

     0   :  { %v1579_v0 = vmov 0.0   ;;  %vm1580_vm0 = vmmov 0   ;;  %vm63_vm1 = vcmask 261120   ;;  %vm223_vm2 = vcmask 25600   ;;  %s2340_s1 = inlined_call_operand.vmem [shape: f32[5,32,32], index: 1, kind: input, shape index: {}]   ;;  %s2341_s0 = inlined_call_operand.vmem [shape: f32[9,2,32], index: 0, kind: input, shape index: {}]   ;;  %s2342_s3 = inlined_call_operand.vmem [shape: f32[5,32,32], index: 3, kind: input, shape index: {}]   ;;  %s2343_s2 = inlined_call_operand.vmem [shape: f32[5,1,32], index: 2, kind: input, shape index: {}]   ;;  %s2344_s5 = inlined_call_operand.vmem [shape: f32[5,32,4], index: 5, kind: input, shape index: {}]   ;;  %s2345_s4 = inlined_call_operand.vmem [shape: f32[5,1,32], index: 4, kind: input, shape index: {}]   ;;  %s2346_s6 = inlined_call_operand.vmem [shape: f32[5,1,4], index: 6, kind: input, shape index: {}]   ;;  %s2347_s13 = inlined_call_operand.vmem [shape: f32[5,2,4], index: 13, kind: output, shape index: {0}]   ;;  %s2348_s7 = inlined_call_operand.vmem [shape: f32[32,256], index: 7, kind: input, shape index: {}]   ;;  %s2349_s9 = inlined_call_operand.vmem [shape: f32[256,256], index: 9, kind: input, shape index: {}]   ;;  %s2350_s8 = inlined_call_operand.vmem [shape: f32[1,256], index: 8, kind: input, shape index: {}]   ;;  %s2351_s11 = inlined_call_operand.vmem [shape: f32[256,4], index: 11, kind: input, shape index: {}]   ;;  %s2352_s10 = inlined_call_operand.vmem [shape: f32[1,256], index: 10, kind: input, shape index: {}]   ;;  %s2353_s12 = inlined_call_operand.vmem [shape: f32[1,4], index: 12, kind: input, shape index: {}]   ;;  %s2354_s14 = inlined_call_operand.vmem [shape: f32[2,4], index: 14, kind: output, shape index: {1}]  }
   0x1   :  { %1456 = vmatprep.subr.bf16.mxu1 %v1579_v0  ;;  %v49_v1 = vld [vmem:[%s2340_s1] sm:$0xff]  ;;  %v50_v2 = vld [vmem:[%s2340_s1 + $0x8] sm:$0xff]  ;;  %v51_v3 = vld [vmem:[%s2340_s1 + $0x10] sm:$0xff]  ;;  %1460 = vmatprep.mubr.msk.bf16.mxu1 %vm1580_vm0, %v1579_v0 }
   0x2   :  { %v54_v4 = vpack.c.bf16 %v50_v2, %v49_v1  ;;  %v52_v5 = vld [vmem:[%s2340_s1 + $0x18] sm:$0xff]  ;;  %1488 = vmatprep.subr.bf16.mxu0 %v1579_v0  ;;  %1492 = vmatprep.mubr.msk.bf16.mxu0 %vm1580_vm0, %v1579_v0  ;;  %v1288_v7 = vld [vmem:[%s2341_s0 + $0x2] sm:$0x3]  ;;  %v109_v9 = vld [vmem:[%s2342_s3 + $0x8] sm:$0xff] }
   0x3   :  { %v55_v6 = vpack.c.bf16 %v52_v5, %v51_v3  ;;  %v108_v8 = vld [vmem:[%s2342_s3] sm:$0xff]  ;;  %v53_v10 = vpack.c.bf16 %v1288_v7, %v1288_v7  ;;  %v110_v12 = vld [vmem:[%s2342_s3 + $0x10] sm:$0xff]  ;;  %v111_v13 = vld [vmem:[%s2342_s3 + $0x18] sm:$0xff] }
   0x4   :  { %1457 = vmatpush3.bf16.msra.mxu1 %v54_v4  ;;  %v113_v11 = vpack.c.bf16 %v109_v9, %v108_v8  ;;  %v114_v14 = vpack.c.bf16 %v111_v13, %v110_v12  ;;  %v1289_v15 = vld [vmem:[%s2343_s2] ss:$0 sm:$0xff]  ;;  %v167_v20 = vld [vmem:[%s2344_s5 + $0x8] sm:$0xff]  ;;  %v168_v26 = vld [vmem:[%s2344_s5 + $0x10] sm:$0xff] }
   0x5   :  { %1458 = vmatprep.subr.bf16.mxu1 %v1579_v0  ;;  %v166_v19 = vld [vmem:[%s2344_s5] sm:$0xff]  ;;  %v169_v27 = vld [vmem:[%s2344_s5 + $0x18] sm:$0xff]  ;;  %v1297_v34 = vld [vmem:[%s2340_s1 + $0x28] sm:$0xff] }
   0x6   :  { %v171_v24 = vpack.c.bf16 %v167_v20, %v166_v19  ;;  %v172_v28 = vpack.c.bf16 %v169_v27, %v168_v26  ;;  %v1291_v29 = vld [vmem:[%s2345_s4] ss:$0 sm:$0xff]  ;;  %v1298_v40 = vld [vmem:[%s2340_s1 + $0x30] sm:$0xff]  ;;  %v1299_v41 = vld [vmem:[%s2340_s1 + $0x38] sm:$0xff] }
   0x7   :  { %v1296_v33 = vld [vmem:[%s2340_s1 + $0x20] sm:$0xff]  ;;  %v234_v42 = vpack.c.bf16 %v1299_v41, %v1298_v40  ;;  %v1304_v46 = vld [vmem:[%s2342_s3 + $0x28] sm:$0xff]  ;;  %v1305_v48 = vld [vmem:[%s2342_s3 + $0x30] sm:$0xff] }
   0x8   :  { %1459 = vmatpush3.bf16.msra.mxu1 %v55_v6  ;;  %v233_v38 = vpack.c.bf16 %v1297_v34, %v1296_v33  ;;  %v1295_v43 = vld [vmem:[%s2341_s0 + $0x4] sm:$0x3]  ;;  %v1306_v49 = vld [vmem:[%s2342_s3 + $0x38] sm:$0xff]  ;;  %v1311_v52 = vld [vmem:[%s2344_s5 + $0x28] sm:$0xff] }
   0x9   :  { %1464 = vmatprep.subr.bf16.mxu1 %v1579_v0  ;;  %v232_v44 = vpack.c.bf16 %v1295_v43, %v1295_v43  ;;  %v1303_v45 = vld [vmem:[%s2342_s3 + $0x20] sm:$0xff]  ;;  %v294_v50 = vpack.c.bf16 %v1306_v49, %v1305_v48  ;;  %v1320_v2 = vld [vmem:[%s2340_s1 + $0x48] sm:$0xff]  ;;  %v1321_v8 = vld [vmem:[%s2340_s1 + $0x50] sm:$0xff] }
   0xa   :  { %v293_v47 = vpack.c.bf16 %v1304_v46, %v1303_v45  ;;  %v1310_v51 = vld [vmem:[%s2344_s5 + $0x20] sm:$0xff]  ;;  %v1322_v9 = vld [vmem:[%s2340_s1 + $0x58] sm:$0xff]  ;;  %v1312_v13 = vld [vmem:[%s2344_s5 + $0x30] sm:$0xff] }
   0xb   :  { %1461 = vmatmul.mubr.msk.bf16.vlgmr.msra.gmra.mrb[0].mxu1 %vm63_vm1, %v53_v10  ;;  %v353_v53 = vpack.c.bf16 %v1311_v52, %v1310_v51  ;;  %v1293_v54 = vld [vmem:[%s2346_s6] ss:$0 sm:$0xff]  ;;  %v1301_v60 = vld [vmem:[%s2343_s2 + $0x1] ss:$0 sm:$0xff]  ;;  %v417_v10 = vpack.c.bf16 %v1322_v9, %v1321_v8  ;;  %v1328_v27 = vld [vmem:[%s2342_s3 + $0x50] sm:$0xff] }
   0xc   :  { %1465 = vmatpush3.bf16.msra.mxu1 %v113_v11  ;;  %1468 = vmatprep.mubr.msk.bf16.mxu1 %vm1580_vm0, %v1579_v0  ;;  %v1319_v1 = vld [vmem:[%s2340_s1 + $0x40] sm:$0xff]  ;;  %v1344_v41 = vld [vmem:[%s2340_s1 + $0x70] sm:$0xff] }
   0xd   :  { %1466 = vmatprep.subr.bf16.mxu1 %v1579_v0  ;;  %1489 = vmatpush3.bf16.msra.mxu0 %v293_v47  ;;  %v416_v6 = vpack.c.bf16 %v1320_v2, %v1319_v1  ;;  %v1318_v11 = vld [vmem:[%s2341_s0 + $0x6] sm:$0x3]  ;;  %v1334_v47 = vld [vmem:[%s2344_s5 + $0x48] sm:$0xff]  ;;  %v1335_v49 = vld [vmem:[%s2344_s5 + $0x50] sm:$0xff] }
   0xe   :  { %1490 = vmatprep.subr.bf16.mxu0 %v1579_v0  ;;  %v415_v12 = vpack.c.bf16 %v1318_v11, %v1318_v11  ;;  %v1326_v20 = vld [vmem:[%s2342_s3 + $0x40] sm:$0xff] }
   0xf   :  { %v1342_v34 = vld [vmem:[%s2340_s1 + $0x60] sm:$0xff] }
  0x10   :  { %1467 = vmatpush3.bf16.msra.mxu1 %v114_v14  ;;  %v1313_v14 = vld [vmem:[%s2344_s5 + $0x38] sm:$0xff]  ;;  %v1333_v46 = vld [vmem:[%s2344_s5 + $0x40] sm:$0xff] }
  0x11   :  { %1472 = vmatprep.subr.bf16.mxu1 %v1579_v0  ;;  %1491 = vmatpush3.bf16.msra.mxu0 %v294_v50  ;;  %v536_v48 = vpack.c.bf16 %v1334_v47, %v1333_v46  ;;  %v1336_v50 = vld [vmem:[%s2344_s5 + $0x58] sm:$0xff]  ;;  %v1315_v52 = vld [vmem:[%s2346_s6 + $0x1] ss:$0 sm:$0xff]  ;;  %v1347_v8 = vld [vmem:[%s2343_s2 + $0x3] ss:$0 sm:$0xff] }
  0x12   :  { %1504 = vmatprep.subr.bf16.mxu0 %v1579_v0  ;;  %v537_v51 = vpack.c.bf16 %v1336_v50, %v1335_v49  ;;  %v1375_v49 = vld [vmem:[%s2342_s3 + $0x98] sm:$0xff]  ;;  %v1370_v50 = vld [vmem:[%s2343_s2 + $0x4] ss:$0 sm:$0xff] }
  0xde   :  { %v101_v16 = vpop.f32.mrb[0].mxu1 }
  0xdf   :  { %v102_v17 = vadd.f32 %v1289_v15, %v101_v16  ;;  %v1462_v18 = vpop.f32.mrb[1].mxu1  ;;  %v354_v15 = vpack.c.bf16 %v1313_v14, %v1312_v13  ;;  %v1308_v16 = vld [vmem:[%s2345_s4 + $0x1] ss:$0 sm:$0xff]  ;;  %v1366_v14 = vld [vmem:[%s2340_s1 + $0x88] sm:$0xff] }
  0xe0   :  { %v104_v21 = vpop.f32.mrb[2].mxu1  ;;  %v1365_v13 = vld [vmem:[%s2340_s1 + $0x80] sm:$0xff] }
  0xe1   :  { %v107_v22 = vmax.f32 %v102_v17, 0.0  ;;  %v1463_v23 = vpop.f32.mrb[3].mxu1  ;;  %v1327_v21 = vld [vmem:[%s2342_s3 + $0x48] sm:$0xff] }
  0xe3   :  { %v112_v25 = vpack.c.bf16 %v107_v22, %v107_v22 }
  0xe5   :  { %1469 = vmatmul.mubr.msk.bf16.vlgmr.msra.gmra.mrb[4].mxu1 %vm63_vm1, %v112_v25  ;;  %v476_v25 = vpack.c.bf16 %v1327_v21, %v1326_v20  ;;  %v1367_v20 = vld [vmem:[%s2340_s1 + $0x90] sm:$0xff]  ;;  %v1368_v21 = vld [vmem:[%s2340_s1 + $0x98] sm:$0xff] }
  0xe6   :  { %1473 = vmatpush3.bf16.msra.mxu1 %v171_v24  ;;  %1476 = vmatprep.mubr.msk.bf16.mxu1 %vm1580_vm0, %v1579_v0 }
  0xe7   :  { %1474 = vmatprep.subr.bf16.mxu1 %v1579_v0 }
  0xea   :  { %1475 = vmatpush3.bf16.msra.mxu1 %v172_v28  ;;  %v1329_v28 = vld [vmem:[%s2342_s3 + $0x58] sm:$0xff] }
  0xeb   :  { %1480 = vmatprep.subr.bf16.mxu1 %v1579_v0 }
 0x1b8   :  { %v159_v30 = vpop.f32.mrb[4].mxu1 }
 0x1b9   :  { %v160_v31 = vadd.f32 %v1291_v29, %v159_v30  ;;  %v1470_v32 = vpop.f32.mrb[5].mxu1  ;;  %v1324_v29 = vld [vmem:[%s2343_s2 + $0x2] ss:$0 sm:$0xff] }
 0x1ba   :  { %v162_v35 = vpop.f32.mrb[6].mxu1 }
 0x1bb   :  { %v165_v36 = vmax.f32 %v160_v31, 0.0  ;;  %v1471_v37 = vpop.f32.mrb[7].mxu1  ;;  %v477_v31 = vpack.c.bf16 %v1329_v28, %v1328_v27  ;;  %v1343_v35 = vld [vmem:[%s2340_s1 + $0x68] sm:$0xff]  ;;  %v1358_v28 = vld [vmem:[%s2344_s5 + $0x70] sm:$0xff] }
 0x1bd   :  { %v170_v39 = vpack.c.bf16 %v165_v36, %v165_v36 }
 0x1bf   :  { %1477 = vmatmul.mubr.msk.bf16.vlgmr.msra.gmra.mrb[8].mxu1 %vm63_vm1, %v170_v39  ;;  %v599_v39 = vpack.c.bf16 %v1343_v35, %v1342_v34 }
 0x1c0   :  { %1481 = vmatpush3.bf16.msra.mxu1 %v233_v38  ;;  %1484 = vmatprep.mubr.msk.bf16.mxu1 %vm1580_vm0, %v1579_v0 }
 0x1c1   :  { %1482 = vmatprep.subr.bf16.mxu1 %v1579_v0 }
 0x1c4   :  { %1483 = vmatpush3.bf16.msra.mxu1 %v234_v42  ;;  %v1345_v42 = vld [vmem:[%s2340_s1 + $0x78] sm:$0xff] }
 0x1c5   :  { %1496 = vmatprep.subr.bf16.mxu1 %v1579_v0  ;;  %v600_v43 = vpack.c.bf16 %v1345_v42, %v1344_v41  ;;  %v1372_v41 = vld [vmem:[%s2342_s3 + $0x80] sm:$0xff]  ;;  %v1373_v42 = vld [vmem:[%s2342_s3 + $0x88] sm:$0xff] }
 0x1c6   :  { %v842_v46 = vpack.c.bf16 %v1373_v42, %v1372_v41 }
 0x1c7   :  { %1485 = vmatmul.mubr.msk.bf16.vlgmr.msra.gmra.mrb[12].mxu1 %vm63_vm1, %v232_v44  ;;  %v1341_v44 = vld [vmem:[%s2341_s0 + $0x8] sm:$0x3] }
 0x1c8   :  { %1500 = vmatprep.mubr.msk.bf16.mxu1 %vm1580_vm0, %v1579_v0  ;;  %1497 = vmatpush3.bf16.msra.mxu1 %v353_v53  ;;  %v598_v45 = vpack.c.bf16 %v1341_v44, %v1341_v44 }
 0x1c9   :  { %1498 = vmatprep.subr.bf16.mxu1 %v1579_v0 }
 0x1cc   :  { %1499 = vmatpush3.bf16.msra.mxu1 %v354_v15 }
 0x1cd   :  { %1512 = vmatprep.subr.bf16.mxu1 %v1579_v0 }
 0x292   :  { %v217_v55 = vpop.f32.mrb[8].mxu1 }
 0x293   :  { %v218_v56 = vadd.f32 %v1293_v54, %v217_v55  ;;  %v1478_v57 = vpop.f32.mrb[9].mxu1 }
 0x294   :  { %v220_v58 = vpop.f32.mrb[10].mxu1 }
 0x295   :  { %224 = vst.msk [vmem:[%s2347_s13] sm:$0x3] %vm223_vm2, %v218_v56  ;;  %v1479_v59 = vpop.f32.mrb[11].mxu1  ;;  %v1331_v58 = vld [vmem:[%s2345_s4 + $0x2] ss:$0 sm:$0xff] }
 0x29a   :  { %v280_v61 = vpop.f32.mrb[12].mxu1 }
 0x29b   :  { %v281_v62 = vadd.f32 %v1301_v60, %v280_v61  ;;  %v1486_v63 = vpop.f32.mrb[13].mxu1 }
 0x29c   :  { %v283_v3 = vpop.f32.mrb[14].mxu1  ;;  %v1350_v63 = vld [vmem:[%s2342_s3 + $0x68] sm:$0xff] }
 0x29d   :  { %v286_v4 = vmax.f32 %v281_v62, 0.0  ;;  %v1487_v5 = vpop.f32.mrb[15].mxu1  ;;  %v1349_v62 = vld [vmem:[%s2342_s3 + $0x60] sm:$0xff] }
 0x29f   :  { %v292_v7 = vpack.c.bf16 %v286_v4, %v286_v4  ;;  %v659_v4 = vpack.c.bf16 %v1350_v63, %v1349_v62  ;;  %v965_v62 = vld [vmem:[%s2348_s7 + $0x38] sm:$0xff] }
 0x2a1   :  { %1493 = vmatmul.mubr.msk.bf16.vlgmr.msra.gmra.mrb[0].mxu0 %vm63_vm1, %v292_v7  ;;  %v1352_v7 = vld [vmem:[%s2342_s3 + $0x78] sm:$0xff] }
 0x2a2   :  { %1505 = vmatpush3.bf16.msra.mxu0 %v416_v6  ;;  %1508 = vmatprep.mubr.msk.bf16.mxu0 %vm1580_vm0, %v1579_v0  ;;  %v1351_v6 = vld [vmem:[%s2342_s3 + $0x70] sm:$0xff] }
 0x2a3   :  { %1506 = vmatprep.subr.bf16.mxu0 %v1579_v0 }
 0x2a6   :  { %1507 = vmatpush3.bf16.msra.mxu0 %v417_v10  ;;  %v660_v10 = vpack.c.bf16 %v1352_v7, %v1351_v6  ;;  %v964_v6 = vld [vmem:[%s2348_s7 + $0x30] sm:$0xff] }
 0x2a7   :  { %1520 = vmatprep.subr.bf16.mxu0 %v1579_v0 }
 0x2a9   :  { %1509 = vmatmul.mubr.msk.bf16.vlgmr.msra.gmra.mrb[4].mxu0 %vm63_vm1, %v415_v12 }
 0x2aa   :  { %1524 = vmatprep.mubr.msk.bf16.mxu0 %vm1580_vm0, %v1579_v0  ;;  %1521 = vmatpush3.bf16.msra.mxu0 %v536_v48  ;;  %v1374_v48 = vld [vmem:[%s2342_s3 + $0x90] sm:$0xff] }
 0x2ab   :  { %1522 = vmatprep.subr.bf16.mxu0 %v1579_v0 }
 0x2ae   :  { %1523 = vmatpush3.bf16.msra.mxu0 %v537_v51  ;;  %v959_v51 = vld [vmem:[%s2348_s7 + $0x8] sm:$0xff] }
 0x2af   :  { %1536 = vmatprep.subr.bf16.mxu0 %v1579_v0 }
 0x374   :  { %v340_v17 = vpop.f32.mrb[0].mxu0 }
 0x375   :  { %v341_v18 = vadd.f32 %v1308_v16, %v340_v17  ;;  %v1494_v19 = vpop.f32.mrb[1].mxu0 }
 0x376   :  { %v343_v22 = vpop.f32.mrb[2].mxu0 }
 0x377   :  { %v346_v23 = vmax.f32 %v341_v18, 0.0  ;;  %v1495_v24 = vpop.f32.mrb[3].mxu0  ;;  %v782_v18 = vpack.c.bf16 %v1366_v14, %v1365_v13  ;;  %v783_v22 = vpack.c.bf16 %v1368_v21, %v1367_v20  ;;  %v1381_v14 = vld [vmem:[%s2344_s5 + $0x90] sm:$0xff] }
 0x379   :  { %v352_v26 = vpack.c.bf16 %v346_v23, %v346_v23  ;;  %v1364_v23 = vld [vmem:[%s2341_s0 + $0xa] sm:$0x3] }
 0x37a   :  { %v781_v24 = vpack.c.bf16 %v1364_v23, %v1364_v23 }
 0x37b   :  { %1501 = vmatmul.mubr.msk.bf16.vlgmr.msra.gmra.mrb[16].mxu1 %vm63_vm1, %v352_v26  ;;  %v1357_v26 = vld [vmem:[%s2344_s5 + $0x68] sm:$0xff] }
 0x37c   :  { %1513 = vmatpush3.bf16.msra.mxu1 %v476_v25  ;;  %v463_v30 = vpop.f32.mrb[4].mxu0  ;;  %1516 = vmatprep.mubr.msk.bf16.mxu1 %vm1580_vm0, %v1579_v0  ;;  %v1356_v25 = vld [vmem:[%s2344_s5 + $0x60] sm:$0xff] }
 0x37d   :  { %v464_v32 = vadd.f32 %v1324_v29, %v463_v30  ;;  %v1510_v33 = vpop.f32.mrb[5].mxu0  ;;  %1514 = vmatprep.subr.bf16.mxu1 %v1579_v0  ;;  %v719_v27 = vpack.c.bf16 %v1357_v26, %v1356_v25  ;;  %v1359_v29 = vld [vmem:[%s2344_s5 + $0x78] sm:$0xff]  ;;  %v1377_v26 = vld [vmem:[%s2345_s4 + $0x4] ss:$0 sm:$0xff] }
 0x37e   :  { %v466_v36 = vpop.f32.mrb[6].mxu0  ;;  %v720_v30 = vpack.c.bf16 %v1359_v29, %v1358_v28 }
 0x37f   :  { %v469_v37 = vmax.f32 %v464_v32, 0.0  ;;  %v1511_v38 = vpop.f32.mrb[7].mxu0 }
 0x380   :  { %1515 = vmatpush3.bf16.msra.mxu1 %v477_v31  ;;  %v1338_v31 = vld [vmem:[%s2346_s6 + $0x2] ss:$0 sm:$0xff] }
 0x381   :  { %v475_v40 = vpack.c.bf16 %v469_v37, %v469_v37  ;;  %1528 = vmatprep.subr.bf16.mxu1 %v1579_v0  ;;  %v1354_v37 = vld [vmem:[%s2345_s4 + $0x3] ss:$0 sm:$0xff] }
 0x383   :  { %1517 = vmatmul.mubr.msk.bf16.vlgmr.msra.gmra.mrb[20].mxu1 %vm63_vm1, %v475_v40 }
 0x384   :  { %1529 = vmatpush3.bf16.msra.mxu1 %v599_v39  ;;  %1532 = vmatprep.mubr.msk.bf16.mxu1 %vm1580_vm0, %v1579_v0 }
 0x385   :  { %1530 = vmatprep.subr.bf16.mxu1 %v1579_v0 }
 0x388   :  { %1531 = vmatpush3.bf16.msra.mxu1 %v600_v43 }
 0x389   :  { %1544 = vmatprep.subr.bf16.mxu1 %v1579_v0 }
 0x38b   :  { %1533 = vmatmul.mubr.msk.bf16.vlgmr.msra.gmra.mrb[24].mxu1 %vm63_vm1, %v598_v45 }
 0x38c   :  { %1548 = vmatprep.mubr.msk.bf16.mxu1 %vm1580_vm0, %v1579_v0  ;;  %1545 = vmatpush3.bf16.msra.mxu1 %v719_v27 }
 0x38d   :  { %1546 = vmatprep.subr.bf16.mxu1 %v1579_v0 }
 0x390   :  { %1547 = vmatpush3.bf16.msra.mxu1 %v720_v30 }
 0x391   :  { %1560 = vmatprep.subr.bf16.mxu1 %v1579_v0 }
 0x44e   :  { %v400_v53 = vpop.f32.mrb[16].mxu1 }
 0x44f   :  { %v401_v54 = vadd.f32 %v1315_v52, %v400_v53  ;;  %v1502_v55 = vpop.f32.mrb[17].mxu1  ;;  %v961_v52 = vld [vmem:[%s2348_s7 + $0x18] sm:$0xff] }
 0x450   :  { %v403_v56 = vpop.f32.mrb[18].mxu1 }
 0x451   :  { %1317 = vst.msk [vmem:[%s2347_s13 + $0x2] sm:$0x3] %vm223_vm2, %v401_v54  ;;  %v1503_v57 = vpop.f32.mrb[19].mxu1  ;;  %v843_v54 = vpack.c.bf16 %v1375_v49, %v1374_v48 }
 0x452   :  { %v968_v57 = vpack.c.bf16 %v961_v52, %v959_v51  ;;  %v1037_v51 = vld [vmem:[%s2349_s9 + $0x40] sm:$0xff]  ;;  %v1039_v52 = vld [vmem:[%s2349_s9 + $0x50] sm:$0xff] }
 0x456   :  { %v523_v59 = vpop.f32.mrb[20].mxu1 }
 0x457   :  { %v524_v60 = vadd.f32 %v1331_v58, %v523_v59  ;;  %v1518_v61 = vpop.f32.mrb[21].mxu1  ;;  %v958_v58 = vld [vmem:[%s2348_s7] sm:$0xff]  ;;  %v960_v59 = vld [vmem:[%s2348_s7 + $0x10] sm:$0xff] }
 0x458   :  { %v526_v1 = vpop.f32.mrb[22].mxu1  ;;  %v963_v61 = vld [vmem:[%s2348_s7 + $0x28] sm:$0xff] }
 0x459   :  { %v529_v2 = vmax.f32 %v524_v60, 0.0  ;;  %v1519_v3 = vpop.f32.mrb[23].mxu1 }
 0x45b   :  { %v535_v5 = vpack.c.bf16 %v529_v2, %v529_v2  ;;  %v967_v2 = vpack.c.bf16 %v960_v59, %v958_v58  ;;  %v1099_v59 = vpack.c.bf16 %v1039_v52, %v1037_v51  ;;  %v1073_v51 = vld [vmem:[%s2349_s9 + $0x160] sm:$0xff]  ;;  %v1075_v52 = vld [vmem:[%s2349_s9 + $0x170] sm:$0xff] }
 0x45d   :  { %1525 = vmatmul.mubr.msk.bf16.vlgmr.msra.gmra.mrb[8].mxu0 %vm63_vm1, %v535_v5  ;;  %v962_v5 = vld [vmem:[%s2348_s7 + $0x20] sm:$0xff] }
 0x45e   :  { %1537 = vmatpush3.bf16.msra.mxu0 %v659_v4  ;;  %v646_v9 = vpop.f32.mrb[24].mxu1  ;;  %1540 = vmatprep.mubr.msk.bf16.mxu0 %vm1580_vm0, %v1579_v0  ;;  %v970_v4 = vpack.c.bf16 %v965_v62, %v963_v61  ;;  %v969_v7 = vpack.c.bf16 %v964_v6, %v962_v5  ;;  %v1041_v62 = vld [vmem:[%s2349_s9 + $0x60] sm:$0xff] }
 0x45f   :  { %v647_v11 = vadd.f32 %v1347_v8, %v646_v9  ;;  %v1534_v12 = vpop.f32.mrb[25].mxu1  ;;  %1538 = vmatprep.subr.bf16.mxu0 %v1579_v0  ;;  %v1581_v8 = vmov 0   ;;  %v957_v9 = vld [vmem:[%s2341_s0] sm:$0x3] }
 0x460   :  { %v649_v15 = vpop.f32.mrb[26].mxu1  ;;  %v1380_v12 = vld [vmem:[%s2344_s5 + $0x88] sm:$0xff]  ;;  %v1045_v6 = vld [vmem:[%s2349_s9 + $0x80] sm:$0xff] }
 0x461   :  { %v652_v16 = vmax.f32 %v647_v11, 0.0  ;;  %v1535_v17 = vpop.f32.mrb[27].mxu1  ;;  %v1379_v11 = vld [vmem:[%s2344_s5 + $0x80] sm:$0xff]  ;;  %v1382_v15 = vld [vmem:[%s2344_s5 + $0x98] sm:$0xff] }
 0x462   :  { %1539 = vmatpush3.bf16.msra.mxu0 %v660_v10  ;;  %v966_v10 = vpack.c.bf16 %v957_v9, %v957_v9  ;;  %v902_v13 = vpack.c.bf16 %v1380_v12, %v1379_v11  ;;  %v1030_v17 = vld [vmem:[%s2349_s9 + $0x8] sm:$0xff]  ;;  %v1052_v9 = vld [vmem:[%s2349_s9 + $0xb8] sm:$0xff]  ;;  %v1049_v12 = vld [vmem:[%s2349_s9 + $0xa0] sm:$0xff] }
 0x463   :  { %v658_v19 = vpack.c.bf16 %v652_v16, %v652_v16  ;;  %1552 = vmatprep.subr.bf16.mxu0 %v1579_v0  ;;  %v903_v16 = vpack.c.bf16 %v1382_v15, %v1381_v14  ;;  %v1054_v14 = vld [vmem:[%s2349_s9 + $0xc8] sm:$0xff]  ;;  %v1056_v15 = vld [vmem:[%s2349_s9 + $0xd8] sm:$0xff] }
 0x465   :  { %1541 = vmatmul.mubr.msk.bf16.vlgmr.msra.gmra.mrb[12].mxu0 %vm63_vm1, %v658_v19 }
 0x466   :  { %1553 = vmatpush3.bf16.msra.mxu0 %v782_v18  ;;  %1556 = vmatprep.mubr.msk.bf16.mxu0 %vm1580_vm0, %v1579_v0  ;;  %v1032_v18 = vld [vmem:[%s2349_s9 + $0x18] sm:$0xff] }
 0x467   :  { %1554 = vmatprep.subr.bf16.mxu0 %v1579_v0  ;;  %v1096_v19 = vpack.c.bf16 %v1032_v18, %v1030_v17  ;;  %v1108_v17 = vpack.c.bf16 %v1056_v15, %v1054_v14  ;;  %v1053_v18 = vld [vmem:[%s2349_s9 + $0xc0] sm:$0xff]  ;;  %v1091_v15 = vld [vmem:[%s2349_s9 + $0x1f0] sm:$0xff] }
 0x468   :  { %v1089_v14 = vld [vmem:[%s2349_s9 + $0x1e0] sm:$0xff] }
 0x46a   :  { %1555 = vmatpush3.bf16.msra.mxu0 %v783_v22 }
 0x46b   :  { %1568 = vmatprep.subr.bf16.mxu0 %v1579_v0 }
 0x46d   :  { %1557 = vmatmul.mubr.msk.bf16.vlgmr.msra.gmra.mrb[16].mxu0 %vm63_vm1, %v781_v24  ;;  %v973_v24 = vlaneseq }
 0x46e   :  { %1572 = vmatprep.mubr.msk.bf16.mxu0 %vm1580_vm0, %v1579_v0  ;;  %1569 = vmatpush3.bf16.msra.mxu0 %v902_v13  ;;  %v1051_v13 = vld [vmem:[%s2349_s9 + $0xb0] sm:$0xff] }
 0x46f   :  { %1570 = vmatprep.subr.bf16.mxu0 %v1579_v0  ;;  %v2018_v27 = vshrl.u32 %v973_v24, 7  ;;  %v1059_v24 = vld [vmem:[%s2349_s9 + $0xf0] sm:$0xff] }
 0x472   :  { %1571 = vmatpush3.bf16.msra.mxu0 %v903_v16  ;;  %v1105_v16 = vpack.c.bf16 %v1051_v13, %v1049_v12 }
 0x473   :  { %1139 = vmatprep.subr.bf16.mxu0 %v1096_v19  ;;  %v1055_v19 = vld [vmem:[%s2349_s9 + $0xd0] sm:$0xff] }
 0x530   :  { %v583_v32 = vpop.f32.mrb[8].mxu0 }
 0x531   :  { %v584_v33 = vadd.f32 %v1338_v31, %v583_v32  ;;  %v1526_v34 = vpop.f32.mrb[9].mxu0  ;;  %v1029_v31 = vld [vmem:[%s2349_s9] sm:$0xff]  ;;  %v1031_v32 = vld [vmem:[%s2349_s9 + $0x10] sm:$0xff] }
 0x532   :  { %v586_v35 = vpop.f32.mrb[10].mxu0  ;;  %v1034_v34 = vld [vmem:[%s2349_s9 + $0x28] sm:$0xff] }
 0x533   :  { %1340 = vst.msk [vmem:[%s2347_s13 + $0x4] sm:$0x3] %vm223_vm2, %v584_v33  ;;  %v1527_v36 = vpop.f32.mrb[11].mxu0  ;;  %v1036_v35 = vld [vmem:[%s2349_s9 + $0x38] sm:$0xff] }
 0x534   :  { %v979_v36 = vsub.s32 1, %v2018_v27  ;;  %v1098_v42 = vpack.c.bf16 %v1036_v35, %v1034_v34 }
 0x538   :  { %v706_v38 = vpop.f32.mrb[12].mxu0 }
 0x539   :  { %v707_v39 = vadd.f32 %v1354_v37, %v706_v38  ;;  %v1542_v40 = vpop.f32.mrb[13].mxu0 }
 0x53a   :  { %v709_v43 = vpop.f32.mrb[14].mxu0  ;;  %v1095_v40 = vpack.c.bf16 %v1031_v32, %v1029_v31  ;;  %v1063_v31 = vld [vmem:[%s2349_s9 + $0x110] sm:$0xff]  ;;  %v1066_v32 = vld [vmem:[%s2349_s9 + $0x128] sm:$0xff] }
 0x53b   :  { %v712_v44 = vmax.f32 %v707_v39, 0.0  ;;  %v1543_v45 = vpop.f32.mrb[15].mxu0  ;;  %v2036_v39 = vld [vmem:[%s2350_s8] sm:$0x3] }
 0x53c   :  { %v1033_v43 = vld [vmem:[%s2349_s9 + $0x20] sm:$0xff]  ;;  %v1038_v45 = vld [vmem:[%s2349_s9 + $0x48] sm:$0xff] }
 0x53d   :  { %v718_v47 = vpack.c.bf16 %v712_v44, %v712_v44  ;;  %v1035_v44 = vld [vmem:[%s2349_s9 + $0x30] sm:$0xff] }
 0x53e   :  { %v1097_v48 = vpack.c.bf16 %v1035_v44, %v1033_v43  ;;  %v1069_v44 = vld [vmem:[%s2349_s9 + $0x140] sm:$0xff] }
 0x53f   :  { %1549 = vmatmul.mubr.msk.bf16.vlgmr.msra.gmra.mrb[28].mxu1 %vm63_vm1, %v718_v47  ;;  %v980_v47 = vrot.slane %v2036_v39, %v979_v36 }
 0x540   :  { %1561 = vmatpush3.bf16.msra.mxu1 %v842_v46  ;;  %v829_v53 = vpop.f32.mrb[16].mxu0  ;;  %1564 = vmatprep.mubr.msk.bf16.mxu1 %vm1580_vm0, %v1579_v0  ;;  %v1040_v46 = vld [vmem:[%s2349_s9 + $0x58] sm:$0xff] }
 0x541   :  { %v830_v55 = vadd.f32 %v1370_v50, %v829_v53  ;;  %v1558_v56 = vpop.f32.mrb[17].mxu0  ;;  %1562 = vmatprep.subr.bf16.mxu1 %v1579_v0  ;;  %v1361_v0 = vld [vmem:[%s2346_s6 + $0x3] ss:$0 sm:$0xff]  ;;  %v1100_v50 = vpack.c.bf16 %v1040_v46, %v1038_v45  ;;  %v1071_v45 = vld [vmem:[%s2349_s9 + $0x150] sm:$0xff]  ;;  %v1074_v46 = vld [vmem:[%s2349_s9 + $0x168] sm:$0xff] }
 0x542   :  { %v832_v60 = vpop.f32.mrb[18].mxu0 }
 0x543   :  { %v835_v63 = vmax.f32 %v830_v55, 0.0  ;;  %v1559_v1 = vpop.f32.mrb[19].mxu0  ;;  %v1044_v55 = vld [vmem:[%s2349_s9 + $0x78] sm:$0xff] }
 0x544   :  { %1563 = vmatpush3.bf16.msra.mxu1 %v843_v54  ;;  %v1042_v54 = vld [vmem:[%s2349_s9 + $0x68] sm:$0xff] }
 0x545   :  { %v841_v3 = vpack.c.bf16 %v835_v63, %v835_v63  ;;  %986 = vmatprep.subr.bf16.mxu1 %v968_v57  ;;  %v1102_v61 = vpack.c.bf16 %v1044_v55, %v1042_v54  ;;  %v1043_v63 = vld [vmem:[%s2349_s9 + $0x70] sm:$0xff]  ;;  %v1046_v1 = vld [vmem:[%s2349_s9 + $0x88] sm:$0xff]  ;;  %v1080_v54 = vld [vmem:[%s2349_s9 + $0x198] sm:$0xff]  ;;  %v1117_v55 = vpack.c.bf16 %v1075_v52, %v1073_v51 }
 0x546   :  { %v1209_v51 = vld [vmem:[%s2351_s11 + $0xd8] sm:$0xff] }
 0x547   :  { %1565 = vmatmul.mubr.msk.bf16.vlgmr.msra.gmra.mrb[32].mxu1 %vm63_vm1, %v841_v3 }
 0x548   :  { %987 = vmatpush1.bf16.msra.mxu1 %v967_v2  ;;  %1018 = vmatprep.mubr.bf16.mxu1 %v1581_v8  ;;  %v1048_v2 = vld [vmem:[%s2349_s9 + $0x98] sm:$0xff]  ;;  %v1050_v8 = vld [vmem:[%s2349_s9 + $0xa8] sm:$0xff] }
 0x549   :  { %988 = vmatprep.subr.bf16.mxu1 %v970_v4  ;;  %v1101_v4 = vpack.c.bf16 %v1043_v63, %v1041_v62  ;;  %v1104_v5 = vpack.c.bf16 %v1048_v2, %v1046_v1  ;;  %v1106_v11 = vpack.c.bf16 %v1052_v9, %v1050_v8  ;;  %v975_v62 = vsub.s32 0, %v2018_v27  ;;  %v1081_v1 = vld [vmem:[%s2349_s9 + $0x1a0] sm:$0xff]  ;;  %v1083_v2 = vld [vmem:[%s2349_s9 + $0x1b0] sm:$0xff] }
 0x54a   :  { %v1085_v8 = vld [vmem:[%s2349_s9 + $0x1c0] sm:$0xff]  ;;  %v1087_v9 = vld [vmem:[%s2349_s9 + $0x1d0] sm:$0xff] }
 0x54c   :  { %989 = vmatpush1.bf16.msra.mxu1 %v969_v7  ;;  %v1047_v7 = vld [vmem:[%s2349_s9 + $0x90] sm:$0xff] }
 0x54f   :  { %1387 = vmatmul.mubr.msk.bf16.vlgmr.msra.gmra.mrb[36].mxu1 %vm63_vm1, %v966_v10  ;;  %v1103_v10 = vpack.c.bf16 %v1047_v7, %v1045_v6  ;;  %v976_v6 = vrot.slane %v2036_v39, %v975_v62  ;;  %v1123_v39 = vpack.c.bf16 %v1087_v9, %v1085_v8 }
 0x612   :  { %v766_v20 = vpop.f32.mrb[28].mxu1 }
 0x613   :  { %v767_v21 = vadd.f32 %v1361_v0, %v766_v20  ;;  %v1550_v22 = vpop.f32.mrb[29].mxu1  ;;  %v1058_v0 = vld [vmem:[%s2349_s9 + $0xe8] sm:$0xff]  ;;  %v1060_v20 = vld [vmem:[%s2349_s9 + $0xf8] sm:$0xff] }
 0x614   :  { %v769_v23 = vpop.f32.mrb[30].mxu1  ;;  %v1110_v22 = vpack.c.bf16 %v1060_v20, %v1058_v0  ;;  %v1182_v0 = vld [vmem:[%s2351_s11] sm:$0xff] }
 0x615   :  { %1363 = vst.msk [vmem:[%s2347_s13 + $0x6] sm:$0x3] %vm223_vm2, %v767_v21  ;;  %v1551_v25 = vpop.f32.mrb[31].mxu1  ;;  %v1107_v21 = vpack.c.bf16 %v1055_v19, %v1053_v18  ;;  %v1057_v23 = vld [vmem:[%s2349_s9 + $0xe0] sm:$0xff]  ;;  %v1199_v19 = vld [vmem:[%s2351_s11 + $0x88] sm:$0xff] }
 0x616   :  { %v1062_v25 = vld [vmem:[%s2349_s9 + $0x108] sm:$0xff] }
 0x61a   :  { %v889_v28 = vpop.f32.mrb[32].mxu1 }
 0x61b   :  { %v890_v29 = vadd.f32 %v1377_v26, %v889_v28  ;;  %v1566_v30 = vpop.f32.mrb[33].mxu1  ;;  %v1064_v26 = vld [vmem:[%s2349_s9 + $0x118] sm:$0xff]  ;;  %v1109_v28 = vpack.c.bf16 %v1059_v24, %v1057_v23 }
 0x61c   :  { %v892_v33 = vpop.f32.mrb[34].mxu1  ;;  %v1061_v30 = vld [vmem:[%s2349_s9 + $0x100] sm:$0xff]  ;;  %v1201_v23 = vld [vmem:[%s2351_s11 + $0x98] sm:$0xff] }
 0x61d   :  { %v895_v37 = vmax.f32 %v890_v29, 0.0  ;;  %v1567_v38 = vpop.f32.mrb[35].mxu1  ;;  %v1112_v29 = vpack.c.bf16 %v1064_v26, %v1062_v25  ;;  %v1068_v33 = vld [vmem:[%s2349_s9 + $0x138] sm:$0xff]  ;;  %v1111_v34 = vpack.c.bf16 %v1063_v31, %v1061_v30  ;;  %v1184_v26 = vld [vmem:[%s2351_s11 + $0x10] sm:$0xff]  ;;  %v1203_v30 = vld [vmem:[%s2351_s11 + $0xa8] sm:$0xff] }
 0x61e   :  { %v1114_v35 = vpack.c.bf16 %v1068_v33, %v1066_v32  ;;  %v1067_v38 = vld [vmem:[%s2349_s9 + $0x130] sm:$0xff]  ;;  %v1186_v33 = vld [vmem:[%s2351_s11 + $0x20] sm:$0xff] }
 0x61f   :  { %v901_v41 = vpack.c.bf16 %v895_v37, %v895_v37  ;;  %v1065_v37 = vld [vmem:[%s2349_s9 + $0x120] sm:$0xff] }
 0x621   :  { %1573 = vmatmul.mubr.msk.bf16.vlgmr.msra.gmra.mrb[20].mxu0 %vm63_vm1, %v901_v41  ;;  %v1072_v41 = vld [vmem:[%s2349_s9 + $0x158] sm:$0xff] }
 0x622   :  { %1140 = vmatpush1.bf16.msra.mxu0 %v1095_v40  ;;  %v2054_v49 = vpop.f32.mrb[36].mxu1  ;;  %v1070_v40 = vld [vmem:[%s2349_s9 + $0x148] sm:$0xff] }
 0x623   :  { %1141 = vmatprep.subr.bf16.mxu0 %v1098_v42  ;;  %v1022_v53 = vpop.f32.mrb[37].mxu1  ;;  %v1113_v42 = vpack.c.bf16 %v1067_v38, %v1065_v37  ;;  %v1116_v43 = vpack.c.bf16 %v1072_v41, %v1070_v40  ;;  %v1021_v12 = vadd.f32 %v2054_v49, %v976_v6  ;;  %v1198_v49 = vld [vmem:[%s2351_s11 + $0x80] sm:$0xff]  ;;  %v1205_v37 = vld [vmem:[%s2351_s11 + $0xb8] sm:$0xff]  ;;  %v1188_v41 = vld [vmem:[%s2351_s11 + $0x30] sm:$0xff] }
 0x624   :  { %v1023_v56 = vadd.f32 %v1022_v53, %v980_v47  ;;  %v1024_v57 = vpop.f32.mrb[38].mxu1  ;;  %v1076_v47 = vld [vmem:[%s2349_s9 + $0x178] sm:$0xff]  ;;  %v1078_v53 = vld [vmem:[%s2349_s9 + $0x188] sm:$0xff]  ;;  %v1224_v20 = vpack.c.bf16 %v1199_v19, %v1198_v49 }
 0x625   :  { %v1025_v58 = vpop.f32.mrb[39].mxu1  ;;  %v1077_v57 = vld [vmem:[%s2349_s9 + $0x180] sm:$0xff] }
 0x626   :  { %1142 = vmatpush1.bf16.msra.mxu0 %v1097_v48  ;;  %v1028_v60 = vmax.f32 %v1023_v56, 0.0  ;;  %v1115_v48 = vpack.c.bf16 %v1071_v45, %v1069_v44  ;;  %v1120_v56 = vpack.c.bf16 %v1080_v54, %v1078_v53  ;;  %v1079_v58 = vld [vmem:[%s2349_s9 + $0x190] sm:$0xff]  ;;  %1434 = vmatprep.subr.bf16.mxu1 %v1224_v20  ;;  %v1207_v44 = vld [vmem:[%s2351_s11 + $0xc8] sm:$0xff] }
 0x627   :  { %1143 = vmatprep.subr.bf16.mxu0 %v1100_v50  ;;  %v1118_v50 = vpack.c.bf16 %v1076_v47, %v1074_v46  ;;  %v1190_v47 = vld [vmem:[%s2351_s11 + $0x40] sm:$0xff]  ;;  %v1192_v54 = vld [vmem:[%s2351_s11 + $0x50] sm:$0xff] }
 0x628   :  { %v1094_v3 = vpack.c.bf16 %v1028_v60, %v1028_v60  ;;  %v1084_v60 = vld [vmem:[%s2349_s9 + $0x1b8] sm:$0xff] }
 0x62a   :  { %1144 = vmatpush1.bf16.msra.mxu0 %v1099_v59  ;;  %1171 = vmatprep.mubr.bf16.mxu0 %v1094_v3  ;;  %v1082_v59 = vld [vmem:[%s2349_s9 + $0x1a8] sm:$0xff] }
 0x62b   :  { %1145 = vmatprep.subr.bf16.mxu0 %v1102_v61  ;;  %v1119_v61 = vpack.c.bf16 %v1079_v58, %v1077_v57  ;;  %v1122_v63 = vpack.c.bf16 %v1084_v60, %v1082_v59  ;;  %v1086_v3 = vld [vmem:[%s2349_s9 + $0x1c8] sm:$0xff]  ;;  %v1210_v57 = vld [vmem:[%s2351_s11 + $0xe0] sm:$0xff] }
 0x62c   :  { %v1211_v58 = vld [vmem:[%s2351_s11 + $0xe8] sm:$0xff]  ;;  %v1194_v60 = vld [vmem:[%s2351_s11 + $0x60] sm:$0xff] }
 0x62d   :  { %v1230_v59 = vpack.c.bf16 %v1211_v58, %v1210_v57 }
 0x62e   :  { %1146 = vmatpush1.bf16.msra.mxu0 %v1101_v4  ;;  %v1088_v4 = vld [vmem:[%s2349_s9 + $0x1d8] sm:$0xff] }
 0x62f   :  { %1147 = vmatprep.subr.bf16.mxu0 %v1104_v5  ;;  %v1121_v5 = vpack.c.bf16 %v1083_v2, %v1081_v1  ;;  %v1124_v7 = vpack.c.bf16 %v1088_v4, %v1086_v3  ;;  %v1212_v1 = vld [vmem:[%s2351_s11 + $0xf0] sm:$0xff]  ;;  %v1213_v2 = vld [vmem:[%s2351_s11 + $0xf8] sm:$0xff] }
 0x630   :  { %v1231_v3 = vpack.c.bf16 %v1213_v2, %v1212_v1  ;;  %v1196_v4 = vld [vmem:[%s2351_s11 + $0x70] sm:$0xff] }
 0x632   :  { %1148 = vmatpush1.bf16.msra.mxu0 %v1103_v10  ;;  %v1090_v10 = vld [vmem:[%s2349_s9 + $0x1e8] sm:$0xff] }
 0x633   :  { %1149 = vmatprep.subr.bf16.mxu0 %v1106_v11  ;;  %v1092_v11 = vld [vmem:[%s2349_s9 + $0x1f8] sm:$0xff] }
 0x634   :  { %v1126_v13 = vpack.c.bf16 %v1092_v11, %v1090_v10 }
 0x636   :  { %1150 = vmatpush1.bf16.msra.mxu0 %v1105_v16  ;;  %v1125_v16 = vpack.c.bf16 %v1091_v15, %v1089_v14 }
 0x637   :  { %1151 = vmatprep.subr.bf16.mxu0 %v1108_v17  ;;  %v1027_v17 = vmax.f32 %v1021_v12, 0.0  ;;  %v1127_v12 = vld [vmem:[%s2352_s10] sm:$0x3] }
 0x638   :  { %v1136_v14 = vrot.slane %v1127_v12, %v979_v36 }
 0x639   :  { %v1093_v18 = vpack.c.bf16 %v1027_v17, %v1027_v17 }
 0x63a   :  { %1152 = vmatpush1.bf16.msra.mxu0 %v1107_v21  ;;  %v1183_v21 = vld [vmem:[%s2351_s11 + $0x8] sm:$0xff] }
 0x63b   :  { %1153 = vmatprep.subr.bf16.mxu0 %v1110_v22  ;;  %v1200_v22 = vld [vmem:[%s2351_s11 + $0x90] sm:$0xff]  ;;  %v1216_v24 = vpack.c.bf16 %v1183_v21, %v1182_v0 }
 0x63c   :  { %v1225_v25 = vpack.c.bf16 %v1201_v23, %v1200_v22 }
 0x63d   :  { %1435 = vmatpush3.bf16.msra.mxu1 %v1216_v24 }
 0x63e   :  { %1154 = vmatpush1.bf16.msra.mxu0 %v1109_v28  ;;  %v1185_v28 = vld [vmem:[%s2351_s11 + $0x18] sm:$0xff]  ;;  %1436 = vmatprep.subr.bf16.mxu1 %v1225_v25 }
 0x63f   :  { %1155 = vmatprep.subr.bf16.mxu0 %v1112_v29  ;;  %v1202_v29 = vld [vmem:[%s2351_s11 + $0xa0] sm:$0xff]  ;;  %v1217_v31 = vpack.c.bf16 %v1185_v28, %v1184_v26 }
 0x640   :  { %v1226_v32 = vpack.c.bf16 %v1203_v30, %v1202_v29 }
 0x641   :  { %1437 = vmatpush3.bf16.msra.mxu1 %v1217_v31 }
 0x642   :  { %1156 = vmatpush1.bf16.msra.mxu0 %v1111_v34  ;;  %v1187_v34 = vld [vmem:[%s2351_s11 + $0x28] sm:$0xff]  ;;  %1438 = vmatprep.subr.bf16.mxu1 %v1226_v32 }
 0x643   :  { %1157 = vmatprep.subr.bf16.mxu0 %v1114_v35  ;;  %v1204_v35 = vld [vmem:[%s2351_s11 + $0xb0] sm:$0xff]  ;;  %v1218_v38 = vpack.c.bf16 %v1187_v34, %v1186_v33 }
 0x644   :  { %v1227_v40 = vpack.c.bf16 %v1205_v37, %v1204_v35 }
 0x645   :  { %1439 = vmatpush3.bf16.msra.mxu1 %v1218_v38 }
 0x646   :  { %1158 = vmatpush1.bf16.msra.mxu0 %v1113_v42  ;;  %v1189_v42 = vld [vmem:[%s2351_s11 + $0x38] sm:$0xff]  ;;  %1440 = vmatprep.subr.bf16.mxu1 %v1227_v40 }
 0x647   :  { %1159 = vmatprep.subr.bf16.mxu0 %v1116_v43  ;;  %v1206_v43 = vld [vmem:[%s2351_s11 + $0xc0] sm:$0xff]  ;;  %v1219_v45 = vpack.c.bf16 %v1189_v42, %v1188_v41 }
 0x648   :  { %v1228_v46 = vpack.c.bf16 %v1207_v44, %v1206_v43 }
 0x649   :  { %1441 = vmatpush3.bf16.msra.mxu1 %v1219_v45 }
 0x64a   :  { %1160 = vmatpush1.bf16.msra.mxu0 %v1115_v48  ;;  %v1191_v48 = vld [vmem:[%s2351_s11 + $0x48] sm:$0xff]  ;;  %1442 = vmatprep.subr.bf16.mxu1 %v1228_v46 }
 0x64b   :  { %1161 = vmatprep.subr.bf16.mxu0 %v1118_v50  ;;  %v1208_v50 = vld [vmem:[%s2351_s11 + $0xd0] sm:$0xff]  ;;  %v1220_v52 = vpack.c.bf16 %v1191_v48, %v1190_v47 }
 0x64c   :  { %v1229_v53 = vpack.c.bf16 %v1209_v51, %v1208_v50 }
 0x64d   :  { %1443 = vmatpush3.bf16.msra.mxu1 %v1220_v52 }
 0x64e   :  { %1162 = vmatpush1.bf16.msra.mxu0 %v1117_v55  ;;  %v1193_v55 = vld [vmem:[%s2351_s11 + $0x58] sm:$0xff]  ;;  %1444 = vmatprep.subr.bf16.mxu1 %v1229_v53 }
 0x64f   :  { %1163 = vmatprep.subr.bf16.mxu0 %v1120_v56  ;;  %v1221_v56 = vpack.c.bf16 %v1193_v55, %v1192_v54 }
 0x651   :  { %1445 = vmatpush3.bf16.msra.mxu1 %v1221_v56 }
 0x652   :  { %1164 = vmatpush1.bf16.msra.mxu0 %v1119_v61  ;;  %v1195_v61 = vld [vmem:[%s2351_s11 + $0x68] sm:$0xff]  ;;  %1446 = vmatprep.subr.bf16.mxu1 %v1230_v59 }
 0x653   :  { %1165 = vmatprep.subr.bf16.mxu0 %v1122_v63  ;;  %v1222_v63 = vpack.c.bf16 %v1195_v61, %v1194_v60 }
 0x655   :  { %1447 = vmatpush3.bf16.msra.mxu1 %v1222_v63 }
 0x656   :  { %1166 = vmatpush1.bf16.msra.mxu0 %v1121_v5  ;;  %v1197_v5 = vld [vmem:[%s2351_s11 + $0x78] sm:$0xff]  ;;  %1448 = vmatprep.subr.bf16.mxu1 %v1231_v3 }
 0x657   :  { %1167 = vmatprep.subr.bf16.mxu0 %v1124_v7  ;;  %v1223_v6 = vpack.c.bf16 %v1197_v5, %v1196_v4  ;;  %v1384_v7 = vld [vmem:[%s2346_s6 + $0x4] ss:$0 sm:$0xff] }
 0x659   :  { %1449 = vmatpush3.bf16.msra.mxu1 %v1223_v6 }
 0x65a   :  { %1168 = vmatpush1.bf16.msra.mxu0 %v1123_v39 }
 0x65b   :  { %1169 = vmatprep.subr.bf16.mxu0 %v1126_v13  ;;  %v1132_v13 = vrot.slane %v1127_v12, %v975_v62  ;;  %v1388_v62 = vld [vmem:[%s2353_s12] ss:$0 sm:$0xff] }
 0x65e   :  { %1170 = vmatpush1.bf16.msra.mxu0 %v1125_v16 }
 0x661   :  { %1172 = vmatmul.mubr.bf16.vlgmr.msra.gmra.mrb[24].mxu0 %v1093_v18 }
 0x6f4   :  { %v949_v8 = vpop.f32.mrb[20].mxu0 }
 0x6f5   :  { %v950_v9 = vadd.f32 %v1384_v7, %v949_v8  ;;  %v1574_v10 = vpop.f32.mrb[21].mxu0 }
 0x6f6   :  { %v952_v11 = vpop.f32.mrb[22].mxu0 }
 0x6f7   :  { %1386 = vst.msk [vmem:[%s2347_s13 + $0x8] sm:$0x3] %vm223_vm2, %v950_v9  ;;  %v1575_v39 = vpop.f32.mrb[23].mxu0 }
 0x734   :  { %v1173_v15 = vpop.f32.mrb[24].mxu0 }
 0x735   :  { %v1174_v16 = vadd.f32 %v1173_v15, %v1132_v13  ;;  %v1175_v17 = vpop.f32.mrb[25].mxu0 }
 0x736   :  { %v1176_v18 = vadd.f32 %v1175_v17, %v1136_v14  ;;  %v1177_v49 = vpop.f32.mrb[26].mxu0 }
 0x737   :  { %v1180_v19 = vmax.f32 %v1174_v16, 0.0  ;;  %v1178_v0 = vpop.f32.mrb[27].mxu0 }
 0x738   :  { %v1181_v20 = vmax.f32 %v1176_v18, 0.0 }
 0x739   :  { %v1214_v22 = vpack.c.bf16 %v1180_v19, %v1180_v19 }
 0x73a   :  { %v1215_v21 = vpack.c.bf16 %v1181_v20, %v1181_v20 }
 0x73c   :  { %1271 = vmatprep.mubr.bf16.mxu1 %v1215_v21 }
 0x73d   :  { %1272 = vmatmul.mubr.bf16.vlgmr.msra.gmra.mrb[40].mxu1 %v1214_v22 }
 0x810   :  { %v1450_v23 = vpop.f32.mrb[40].mxu1 }
 0x811   :  { %v1451_v24 = vpop.f32.mrb[41].mxu1 }
 0x812   :  { %v1452_v27 = vadd.f32 %v1451_v24, %v1450_v23  ;;  %v1453_v36 = vpop.f32.mrb[42].mxu1 }
 0x813   :  { %v1454_v25 = vpop.f32.mrb[43].mxu1 }
 0x814   :  { %v1274_v26 = vadd.f32 %v1452_v27, %v1388_v62 }
 0x816   :  { %1279 = vst.msk [vmem:[%s2354_s14] sm:$0x3] %vm223_vm2, %v1274_v26 }

// kernel: mask_decoder_hq_forward.8
= control target key start
LH: loop header
LB: loop body
LE: loop exit
PB: predicated region body
PF: predicated region fallthrough
CT: control target
= control target key end

     0   :  { %s1775_s17 = smov 0   ;;  %s2083_s0 = inlined_call_operand.vmem [shape: f32[2,9,32], index: 0, kind: input, shape index: {}]   ;;  %s2084_s1 = inlined_call_operand.vmem [shape: bf16[2,32,64], index: 1, kind: input, shape index: {}]   ;;  %s2085_s2 = inlined_call_operand.vmem [shape: f32[2,32,64], index: 2, kind: input, shape index: {}]   ;;  %s2086_s3 = inlined_call_operand.vmem [shape: f32[1,32,64], index: 3, kind: input, shape index: {}]   ;;  %s2087_s4 = inlined_call_operand.vmem [shape: f32[6,32,32], index: 4, kind: input, shape index: {}]   ;;  %s2088_s5 = inlined_call_operand.vmem [shape: f32[4,32], index: 5, kind: input, shape index: {}]   ;;  %s2089_s6 = inlined_call_operand.vmem [shape: f32[32,3], index: 6, kind: input, shape index: {}]   ;;  %s2090_s7 = inlined_call_operand.vmem [shape: f32[32,64], index: 7, kind: input, shape index: {}]   ;;  %s2091_s8 = inlined_call_operand.vmem [shape: f32[1,64], index: 8, kind: input, shape index: {}]   ;;  %s2092_s9 = inlined_call_operand.vmem [shape: f32[64,32], index: 9, kind: input, shape index: {}]   ;;  %s2093_s10 = inlined_call_operand.vmem [shape: f32[2,9,32], index: 10, kind: output, shape index: {0}]   ;;  %s2094_s11 = inlined_call_operand.vmem [shape: bf16[2,32,64], index: 11, kind: output, shape index: {1}]  }
   0x1 LB: > { %s1448_s18 = sadd.s32 4294967295, %s1707_s17   ;;  %p1452_p0 = scmp.ge.s32.totalorder %s1707_s17, 1  ;;  %s1707_s17 = sphi %s1775_s17, %s22_s17  }
   0x2   : > { %p360_p1 = scmp.lt.s32.totalorder %s1707_s17, 3 }
   0x4   : > { %p361_p2 = pnand %p1452_p0, %p360_p1 }
   0x5   : > { %p415_p3 = scmp.lt.s32.totalorder (!%p361_p2), %s1448_s18, 1  ;;  %v1709_v0 = vmov (!%p361_p2), 0.0   ;;  %v479_v1 = vld [vmem:[%s2087_s4] sm:$0xff] (!%p361_p2)  ;;  %v480_v2 = vld [vmem:[%s2087_s4 + $0x8] sm:$0xff] (!%p361_p2)  ;;  %vm490_vm0 = vcmask (!%p361_p2), 261120   ;;  %vm1710_vm1 = vmmov (!%p361_p2), 0  }
   0x6   : > { %364 = sbr.rel (%p361_p2) target bundleno = 2185 (0x889), region = 60  ;;  %1569 = vmatprep.subr.bf16.mxu0 (!%p361_p2), %v1709_v0  ;;  %v484_v3 = vpack.c.bf16 (!%p361_p2), %v480_v2, %v479_v1  ;;  %v1465_v4 = vld [vmem:[%s2087_s4 + $0x20] sm:$0xff] (!%p361_p2)  ;;  %v1466_v5 = vld [vmem:[%s2087_s4 + $0x28] sm:$0xff] (!%p361_p2)  ;;  %1573 = vmatprep.mubr.msk.bf16.mxu0 (!%p361_p2), %vm1710_vm1, %v1709_v0  ;;  %v1711_v6 = vmov (!%p361_p2), 0   ;;  %v481_v8 = vld [vmem:[%s2087_s4 + $0x10] sm:$0xff] (!%p361_p2)  ;;  %vm666_vm2 = vcmask (!%p361_p2), 523264  }
   0x7   : > { %1681 = vset.pattern.permute.xlu0 (!%p361_p2), %v1711_v6  ;;  %v540_v7 = vpack.c.bf16 (!%p361_p2), %v1466_v5, %v1465_v4  ;;  %v482_v9 = vld [vmem:[%s2087_s4 + $0x18] sm:$0xff] (!%p361_p2)  ;;  %1682 = vset.pattern.permute.xlu1 (!%p361_p2), %v1711_v6  ;;  %v1809_v11 = vld [vmem:[%s2089_s6] sm:$0xff] (!%p361_p2)  ;;  %v1814_v12 = vld [vmem:[%s2089_s6 + $0x10] sm:$0xff] (!%p361_p2)  ;;  %vm670_vm3 = vcmask (!%p361_p2), 516096   ;;  %vm949_vm4 = vcmask (!%p361_p2), 253952   ;;  %vm1248_vm5 = vcmask (!%p361_p2), 72704  }
   0x8   : > { %1570 = vmatpush3.bf16.msra.mxu0 (!%p361_p2), %v484_v3  ;;  %v485_v10 = vpack.c.bf16 (!%p361_p2), %v482_v9, %v481_v8  ;;  %v1828_v13 = vld [vmem:[%s2089_s6 + $0x8] sm:$0xff] (!%p361_p2)  ;;  %v1833_v14 = vld [vmem:[%s2089_s6 + $0x18] sm:$0xff] (!%p361_p2)  ;;  %v459_v18 = vld [vmem:[%s2086_s3] sm:$0xff] (!%p361_p2)  ;;  %544 = vperm.xlu0 (!%p361_p2), %1681, %v1809_v11   ;;  %vm1255_vm6 = vcmask (!%p361_p2), 1043456   ;;  %vm1256_vm7 = vcmask (!%p361_p2), 1044480   ;;  %vm1331_vm8 = vcmask (!%p361_p2), 519168  }
   0x9   : > { %1581 = vmatprep.mubr.msk.bf16.mxu1 (!%p361_p2), %vm490_vm0, %v540_v7  ;;  %1571 = vmatprep.subr.bf16.mxu0 (!%p361_p2), %v1709_v0  ;;  %v460_v24 = vld [vmem:[%s2086_s3 + $0x8] sm:$0xff] (!%p361_p2)  ;;  %v461_v31 = vld [vmem:[%s2086_s3 + $0x10] sm:$0xff] (!%p361_p2)  ;;  %v462_v32 = vld [vmem:[%s2086_s3 + $0x18] sm:$0xff] (!%p361_p2) }
   0xa   : > { %554 = vperm.xlu1 (!%p361_p2), %1682, %v1814_v12   ;;  %v1467_v42 = vld [vmem:[%s2087_s4 + $0x30] sm:$0xff] (!%p361_p2)  ;;  %v1468_v43 = vld [vmem:[%s2087_s4 + $0x38] sm:$0xff] (!%p361_p2)  ;;  %v1463_v45 = vld [vmem:[%s2088_s5] ss:$0 sm:$0xff] (!%p361_p2) }
   0xb   : > { %v541_v44 = vpack.c.bf16 (!%p361_p2), %v1468_v43, %v1467_v42  ;;  %v1472_v6 = vld [vmem:[%s2087_s4 + $0x40] sm:$0xff] (!%p361_p2)  ;;  %v1473_v7 = vld [vmem:[%s2087_s4 + $0x48] sm:$0xff] (!%p361_p2)  ;;  %v1474_v9 = vld [vmem:[%s2087_s4 + $0x50] sm:$0xff] (!%p361_p2) }
   0xc   : > { %1572 = vmatpush3.bf16.msra.mxu0 (!%p361_p2), %v485_v10  ;;  %549 = vperm.xlu0 (!%p361_p2), %1681, %v1828_v13   ;;  %v695_v8 = vpack.c.bf16 (!%p361_p2), %v1473_v7, %v1472_v6  ;;  %v1475_v10 = vld [vmem:[%s2087_s4 + $0x58] sm:$0xff] (!%p361_p2) }
   0xd   : > { %s2096_s18 = smov (!%p415_p3, %s1448_s18), 1  ;;  %1585 = vmatprep.subr.bf16.mxu0 %v1709_v0 }
   0xe   : > { %s1804_s12 = sshll.u32 %s2096_s18, 4  ;;  %s1512_s13 = sshll.u32 %s2096_s18, 5  ;;  %559 = vperm.xlu1 %1682, %v1833_v14  }
   0xf   : > { %s424_s22 = scalar_lea.vmem %s2084_s1, %s1804_s12  ;;  %s429_s18 = scalar_lea.vmem %s2085_s2, %s1512_s13 }
  0x10   : > { %v1520_v15 = vld [vmem:[%s424_s22] sm:$0xff]   ;;  %v452_v17 = vld [vmem:[%s429_s18 + $0x8] sm:$0xff]  ;;  %s419_s15 = scalar_lea.vmem %s2083_s0, %s1804_s12  ;;  %v453_v22 = vld [vmem:[%s429_s18 + $0x10] sm:$0xff]  ;;  %s434_s24 = scalar_lea.vmem %s2093_s10, %s1804_s12 }
  0x11   : > { %v451_v16 = vld [vmem:[%s429_s18] sm:$0xff]  ;;  %v1521_v19 = vunpack.c.l.bf16 %v1520_v15  ;;  %v1522_v20 = vunpack.c.h.bf16 %v1520_v15  ;;  %v1527_v21 = vld [vmem:[%s424_s22 + $0x8] sm:$0xff]   ;;  %v454_v23 = vld [vmem:[%s429_s18 + $0x18] sm:$0xff]  ;;  %v696_v15 = vpack.c.bf16 %v1475_v10, %v1474_v9  ;;  %s439_s30 = scalar_lea.vmem %s2094_s11, %s1804_s12 }
  0x12   : > { %v1525_v25 = vunpack.c.l.bf16 %v1527_v21  ;;  %v1526_v26 = vunpack.c.h.bf16 %v1527_v21  ;;  %v1847_v27 = vld [vmem:[%s419_s15] sm:$0xff]  ;;  %v1849_v28 = vld [vmem:[%s419_s15 + $0x8] sm:$0x1] }
  0x13   : > { %v1851_v29 = vadd.f32 %v1521_v19, %v451_v16  ;;  %v1853_v30 = vadd.f32 %v1522_v20, %v452_v17  ;;  %v483_v33 = vpack.c.bf16 %v1849_v28, %v1847_v27  ;;  %v883_v9 = vld [vmem:[%s2092_s9] sm:$0xff]  ;;  %v884_v10 = vld [vmem:[%s2092_s9 + $0x8] sm:$0xff] }
  0x14   : > { %v1864_v34 = vadd.f32 %v1525_v25, %v453_v22  ;;  %v1866_v35 = vadd.f32 %v1526_v26, %v454_v23 }
  0x15   : > { %v463_v36 = vadd.f32 %v459_v18, %v1851_v29  ;;  %v464_v37 = vadd.f32 %v460_v24, %v1853_v30  ;;  %1574 = vmatmul.mubr.msk.bf16.vlgmr.msra.gmra.mrb[0].mxu0 %vm490_vm0, %v483_v33  ;;  %v469_v4 = vpack.c.bf16 %v1853_v30, %v1851_v29  ;;  %v1712_v24 = vmov 1  }
  0x16   : > { %v465_v38 = vadd.f32 %v461_v31, %v1864_v34  ;;  %v466_v39 = vadd.f32 %v462_v32, %v1866_v35  ;;  %1589 = vmatprep.mubr.msk.bf16.mxu0 %vm1710_vm1, %v1709_v0  ;;  %v470_v5 = vpack.c.bf16 %v1866_v35, %v1864_v34  ;;  %1683 = vset.pattern.permute.xlu1 %v1712_v24 }
  0x17   : > { %v1877_v40 = vpack.c.bf16 %v464_v37, %v463_v36  ;;  %1684 = vset.pattern.permute.xlu0 %v1712_v24 }
  0x18   : > { %v1879_v41 = vpack.c.bf16 %v466_v39, %v465_v38 }
  0x19   : > { %1577 = vmatprep.subr.bf16.mxu1 %v1877_v40 }
  0x1a   : > { %1578 = vmatpush3.bf16.msra.mxu1 %v1877_v40 }
  0x1b   : > { %1579 = vmatprep.subr.bf16.mxu1 %v1879_v41 }
  0x1e   : > { %1580 = vmatpush3.bf16.msra.mxu1 %v1879_v41 }
  0x1f   : > { %1593 = vmatprep.subr.bf16.mxu1 %v469_v4 }
  0x21   : > { %1582 = vmatmul.mubr.msk.bf16.vlgmr.msra.gmra.mrb[0].mxu1 %vm490_vm0, %v541_v44 }
  0x22   : > { %1594 = vmatpush3.bf16.msra.mxu1 %v469_v4  ;;  %1597 = vmatprep.mubr.msk.bf16.mxu1 %vm490_vm0, %v695_v8  ;;  %v824_v4 = vld [vmem:[%s2090_s7 + $0x8] sm:$0xff] }
  0x23   : > { %1595 = vmatprep.subr.bf16.mxu1 %v470_v5 }
  0x26   : > { %1596 = vmatpush3.bf16.msra.mxu1 %v470_v5 }
  0x27   : > { %1609 = vmatprep.subr.bf16.mxu1 %v1709_v0 }
  0x29   : > { %1598 = vmatmul.mubr.msk.bf16.vlgmr.msra.gmra.mrb[4].mxu1 %vm490_vm0, %v696_v15 }
  0x2a   : > { %1613 = vmatprep.mubr.msk.bf16.mxu1 %vm1710_vm1, %v1709_v0 }
  0x87   : > { %v545_v54 = vpop.permute.xlu0 %544 }
  0x89   : > { %v555_v53 = vpop.permute.xlu1 %554 }
  0x8b   : > { %v550_v59 = vpop.permute.xlu0 %549 }
  0x8d   : > { %v560_v56 = vpop.permute.xlu1 %559 }
  0xe8   : > { %v528_v46 = vpop.f32.mrb[0].mxu0 }
  0xe9   : > { %v529_v47 = vadd.f32 %v1463_v45, %v528_v46  ;;  %v1575_v48 = vpop.f32.mrb[1].mxu0 }
  0xea   : > { %v531_v49 = vpop.f32.mrb[2].mxu0 }
  0xeb   : > { %v532_v50 = vadd.f32 %v1463_v45, %v531_v49  ;;  %v1576_v51 = vpop.f32.mrb[3].mxu0 }
  0xed   : > { %v617_v52 = vpack.c.bf16 %v532_v50, %v529_v47 }
  0xf4   : > { %v1583_v55 = vpop.f32.mrb[0].mxu1 }
  0xf5   : > { %v602_v57 = vpop.f32.mrb[1].mxu1  ;;  %v611_v60 = vadd.f32 %v1583_v55, %v555_v53 }
  0xf6   : > { %v1584_v58 = vpop.f32.mrb[2].mxu1  ;;  %v603_v63 = vadd.f32 %v602_v57, %v545_v54 }
  0xf7   : > { %v614_v61 = vadd.f32 %v1584_v58, %v560_v56  ;;  %v605_v62 = vpop.f32.mrb[3].mxu1 }
  0xf8   : > { %v606_v1 = vadd.f32 %v605_v62, %v550_v59 }
  0xf9   : > { %v619_v2 = vpack.c.bf16 %v614_v61, %v611_v60 }
  0xfa   : > { %v618_v3 = vpack.c.bf16 %v606_v1, %v603_v63 }
  0xfc   : > { %1586 = vmatpush3.bf16.msra.mxu0 %v618_v3  ;;  %v1599_v45 = vpop.f32.mrb[4].mxu1  ;;  %v823_v3 = vld [vmem:[%s2090_s7] sm:$0xff] }
  0xfd   : > { %1587 = vmatprep.subr.bf16.mxu0 %v1709_v0  ;;  %v753_v46 = vpop.f32.mrb[5].mxu1  ;;  %v828_v5 = vpack.c.bf16 %v824_v4, %v823_v3 }
  0xfe   : > { %v1600_v47 = vpop.f32.mrb[6].mxu1 }
  0xff   : > { %v756_v48 = vpop.f32.mrb[7].mxu1  ;;  %1610 = vmatpush3.bf16.msra.mxu1 %v828_v5 }
 0x100   : > { %1588 = vmatpush3.bf16.msra.mxu0 %v619_v2  ;;  %1611 = vmatprep.subr.bf16.mxu1 %v1709_v0 }
 0x101   : > { %1601 = vmatprep.subr.bf16.mxu0 %v1709_v0 }
 0x103   : > { %1590 = vmatmul.mubr.msk.bf16.vlgmr.msra.gmra.mrb[4].mxu0 %vm490_vm0, %v617_v52 }
 0x104   : > { %1605 = vmatprep.mubr.msk.bf16.mxu0 %vm1710_vm1, %v1709_v0 }
 0x1d6   : > { %v657_v16 = vpop.f32.mrb[4].mxu0 }
 0x1d7   : > { %v664_v17 = vmul.f32 0.17677669, %v657_v16  ;;  %v1591_v18 = vpop.f32.mrb[5].mxu0 }
 0x1d8   : > { %v660_v19 = vpop.f32.mrb[6].mxu0 }
 0x1d9   : > { %v665_v20 = vmul.f32 0.17677669, %v660_v19  ;;  %v1592_v21 = vpop.f32.mrb[7].mxu0  ;;  %v667_v22 = vsel %vm666_vm2, %v664_v17, -inf  ;;  %v892_v19 = vpack.c.bf16 %v884_v10, %v883_v9 }
 0x1da   : > { %668 = vmax.xlane.f32.xlu0 %v667_v22  ;;  %v885_v21 = vld [vmem:[%s2092_s9 + $0x10] sm:$0xff]  ;;  %v886_v22 = vld [vmem:[%s2092_s9 + $0x18] sm:$0xff] }
 0x1db   : > { %v671_v23 = vsel %vm670_vm3, %v665_v20, -inf }
 0x1dc   : > { %672 = vmax.xlane.f32.xlu1 %v671_v23  ;;  %v888_v23 = vld [vmem:[%s2092_s9 + $0x28] sm:$0xff] }
 0x1ed   : > { %698 = vperm.xlu1 %1683, %v1809_v11  }
 0x1f1   : > { %706 = vperm.xlu1 %1683, %v1814_v12  }
 0x1f5   : > { %710 = vperm.xlu1 %1683, %v1833_v14  }
 0x267   : > { %v669_v25 = vpop.xlane.xlu0 %668 }
 0x268   : > { %v674_v26 = vsub.f32 %v664_v17, %v669_v25  ;;  %v889_v25 = vld [vmem:[%s2092_s9 + $0x30] sm:$0xff] }
 0x269   : > { %v673_v31 = vpop.xlane.xlu1 %672 }
 0x26a   : > { %v676_v32 = vmul.f32 1.442695, %v674_v26  ;;  %v675_v33 = vsub.f32 %v665_v20, %v673_v31  ;;  %v890_v26 = vld [vmem:[%s2092_s9 + $0x38] sm:$0xff] }
 0x26b   : > { %v895_v31 = vpack.c.bf16 %v890_v26, %v889_v25 }
 0x26c   : > { %1687 = vpow2.f32 %v676_v32  ;;  %v678_v36 = vmul.f32 1.442695, %v675_v33  ;;  %v1483_v32 = vld [vmem:[%s2087_s4 + $0x60] sm:$0xff]  ;;  %v1484_v33 = vld [vmem:[%s2087_s4 + $0x68] sm:$0xff] }
 0x26d   : > { %v699_v43 = vpop.permute.xlu1 %698 }
 0x26e   : > { %1689 = vpow2.f32 %v678_v36  ;;  %v754_v56 = vadd.f32 %v753_v46, %v699_v43  ;;  %v1485_v36 = vld [vmem:[%s2087_s4 + $0x70] sm:$0xff] }
 0x271   : > { %v707_v44 = vpop.permute.xlu1 %706 }
 0x272   : > { %v762_v50 = vadd.f32 %v1599_v45, %v707_v44 }
 0x275   : > { %v711_v49 = vpop.permute.xlu1 %710 }
 0x276   : > { %v1688_v37 = vpop.eup %1687  ;;  %v765_v51 = vadd.f32 %v1600_v47, %v711_v49 }
 0x277   : > { %v680_v38 = vsel %vm666_vm2, %v1688_v37, 0.0 }
 0x278   : > { %v1690_v39 = vpop.eup %1689  ;;  %681 = vadd.xlane.f32.xlu0 %v680_v38  ;;  %v770_v52 = vpack.c.bf16 %v765_v51, %v762_v50  ;;  %v1486_v38 = vld [vmem:[%s2087_s4 + $0x78] sm:$0xff] }
 0x279   : > { %v683_v42 = vsel %vm670_vm3, %v1690_v39, 0.0 }
 0x27a   : > { %v778_v61 = vsel %vm666_vm2, %v770_v52, 0  ;;  %v1489_v52 = vld [vmem:[%s2087_s4 + $0x80] sm:$0xff] }
 0x27c   : > { %684 = vadd.xlane.f32.xlu0 %v683_v42  ;;  %v1479_v42 = vld [vmem:[%s2091_s8] ss:$0 sm:$0xff] }
 0x292   : > { %702 = vperm.xlu0 %1684, %v1828_v13  }
 0x305   : > { %v682_v53 = vpop.xlane.xlu0 %681 }
 0x309   : > { %v685_v54 = vpop.xlane.xlu0 %684 }
 0x30a   : > { %1691 = vrcp.f32 %v685_v54  ;;  %v1495_v54 = vld [vmem:[%s2087_s4 + $0xa0] sm:$0xff] }
 0x30b   : > { %1693 = vrcp.f32 %v682_v53  ;;  %v1490_v53 = vld [vmem:[%s2087_s4 + $0x88] sm:$0xff] }
 0x311   : > { %v703_v55 = vpop.permute.xlu0 %702 }
 0x312   : > { %v757_v57 = vadd.f32 %v756_v48, %v703_v55  ;;  %v1035_v55 = vpack.c.bf16 %v1490_v53, %v1489_v52 }
 0x314   : > { %v769_v58 = vpack.c.bf16 %v757_v57, %v754_v56  ;;  %v1692_v60 = vpop.eup %1691  ;;  %v1496_v56 = vld [vmem:[%s2087_s4 + $0xa8] sm:$0xff] }
 0x315   : > { %v1694_v62 = vpop.eup %1693  ;;  %v689_v63 = vmul.f32 %v1692_v60, %v1690_v39  ;;  %v957_v39 = vpack.c.bf16 %v1486_v38, %v1485_v36  ;;  %v1090_v57 = vpack.c.bf16 %v1496_v56, %v1495_v54  ;;  %v1497_v60 = vld [vmem:[%s2087_s4 + $0xb0] sm:$0xff] }
 0x316   : > { %v775_v59 = vsel %vm666_vm2, %v769_v58, 0  ;;  %v687_v1 = vmul.f32 %v1694_v62, %v1688_v37  ;;  %v956_v37 = vpack.c.bf16 %v1484_v33, %v1483_v32  ;;  %v1491_v58 = vld [vmem:[%s2087_s4 + $0x90] sm:$0xff]  ;;  %v1498_v62 = vld [vmem:[%s2087_s4 + $0xb8] sm:$0xff] }
 0x317   : > { %1602 = vmatpush3.bf16.xpose.msra.mxu0 %v775_v59  ;;  %v1492_v59 = vld [vmem:[%s2087_s4 + $0x98] sm:$0xff] }
 0x318   : > { %1603 = vmatprep.subr.bf16.mxu0 %v1709_v0  ;;  %v768_v2 = vpack.c.bf16 %v689_v63, %v687_v1  ;;  %v1091_v63 = vpack.c.bf16 %v1498_v62, %v1497_v60  ;;  %v1713_v1 = vmov 2  }
 0x319   : > { %1685 = vset.pattern.permute.xlu1 %v1713_v1  ;;  %1686 = vset.pattern.permute.xlu0 %v1713_v1 }
 0x31a   : > { %959 = vperm.xlu1 %1685, %v1809_v11  }
 0x31e   : > { %963 = vperm.xlu1 %1685, %v1828_v13  }
 0x31f   : > { %1604 = vmatpush3.bf16.xpose.msra.mxu0 %v778_v61  ;;  %v1036_v61 = vpack.c.bf16 %v1492_v59, %v1491_v58 }
 0x320   : > { %1629 = vmatprep.subr.bf16.mxu0 %v1877_v40 }
 0x322   : > { %967 = vperm.xlu1 %1685, %v1814_v12  }
 0x326   : > { %1606 = vmatmul.mubr.msk.bf16.vlgmr.msra.gmra.mrb[8].mxu0 %vm666_vm2, %v768_v2  ;;  %971 = vperm.xlu1 %1685, %v1833_v14  }
 0x327   : > { %1630 = vmatpush3.bf16.msra.mxu0 %v1877_v40  ;;  %v825_v40 = vld [vmem:[%s2090_s7 + $0x10] sm:$0xff]  ;;  %1633 = vmatprep.mubr.msk.bf16.mxu0 %vm490_vm0, %v956_v37 }
 0x328   : > { %1631 = vmatprep.subr.bf16.mxu0 %v1879_v41 }
 0x32b   : > { %1632 = vmatpush3.bf16.msra.mxu0 %v1879_v41  ;;  %v826_v41 = vld [vmem:[%s2090_s7 + $0x18] sm:$0xff] }
 0x32c   : > { %1637 = vmatprep.subr.bf16.mxu0 %v1709_v0  ;;  %v829_v6 = vpack.c.bf16 %v826_v41, %v825_v40  ;;  %v1482_v40 = vld [vmem:[%s2088_s5 + $0x3] ss:$0 sm:$0xff] }
 0x32e   : > { %1612 = vmatpush3.bf16.msra.mxu1 %v829_v6  ;;  %1634 = vmatmul.mubr.msk.bf16.vlgmr.msra.gmra.mrb[12].mxu0 %vm490_vm0, %v957_v39 }
 0x32f   : > { %1617 = vmatprep.subr.bf16.mxu1 %v1709_v0  ;;  %1641 = vmatprep.mubr.msk.bf16.mxu0 %vm1710_vm1, %v1709_v0 }
 0x330   : > { %1638 = vmatpush3.bf16.msra.mxu0 %v1035_v55 }
 0x331   : > { %1639 = vmatprep.subr.bf16.mxu0 %v1709_v0 }
 0x334   : > { %1640 = vmatpush3.bf16.msra.mxu0 %v1036_v61 }
 0x335   : > { %1653 = vmatprep.subr.bf16.mxu0 %v1709_v0 }
 0x399   : > { %v960_v10 = vpop.permute.xlu1 %959 }
 0x3f9   : > { %v814_v7 = vpop.f32.mrb[8].mxu0 }
 0x3fa   : > { %v1607_v8 = vpop.f32.mrb[9].mxu0  ;;  %v1959_v16 = vadd.f32 %v814_v7, %v1847_v27  ;;  %v893_v27 = vpack.c.bf16 %v886_v22, %v885_v21 }
 0x3fb   : > { %v817_v15 = vpop.f32.mrb[10].mxu0 }
 0x3fc   : > { %v1962_v17 = vadd.f32 %v817_v15, %v1849_v28  ;;  %v1608_v18 = vpop.f32.mrb[11].mxu0  ;;  %v887_v28 = vld [vmem:[%s2092_s9 + $0x20] sm:$0xff] }
 0x3fd   : > { %v894_v24 = vpack.c.bf16 %v888_v23, %v887_v28  ;;  %v1499_v28 = vld [vmem:[%s2088_s5 + $0x2] ss:$0 sm:$0xff]  ;;  %v1493_v23 = vld [vmem:[%s2088_s5 + $0x1] ss:$0 sm:$0xff] }
 0x3fe   : > { %v827_v20 = vpack.c.bf16 %v1962_v17, %v1959_v16 }
 0x400   : > { %1614 = vmatmul.mubr.msk.bf16.vlgmr.msra.gmra.mrb[8].mxu1 %vm490_vm0, %v827_v20 }
 0x401   : > { %1618 = vmatpush3.bf16.msra.mxu1 %v892_v19  ;;  %1625 = vmatprep.mubr.msk.bf16.mxu1 %vm1710_vm1, %v1709_v0  ;;  %v1635_v2 = vpop.f32.mrb[12].mxu0 }
 0x402   : > { %1619 = vmatprep.subr.bf16.mxu1 %v1709_v0  ;;  %v1014_v3 = vpop.f32.mrb[13].mxu0 }
 0x403   : > { %v1636_v4 = vpop.f32.mrb[14].mxu0  ;;  %v1015_v15 = vadd.f32 %v1014_v3, %v960_v10 }
 0x404   : > { %v1017_v5 = vpop.f32.mrb[15].mxu0 }
 0x405   : > { %1620 = vmatpush3.bf16.msra.mxu1 %v893_v27 }
 0x406   : > { %1621 = vmatprep.subr.bf16.mxu1 %v1709_v0 }
 0x409   : > { %1622 = vmatpush3.bf16.msra.mxu1 %v894_v24 }
 0x40a   : > { %1623 = vmatprep.subr.bf16.mxu1 %v1709_v0 }
 0x40d   : > { %1624 = vmatpush3.bf16.msra.mxu1 %v895_v31 }
 0x40e   : > { %1645 = vmatprep.subr.bf16.mxu1 %v1709_v0 }
 0x4d3   : > { %v874_v43 = vpop.f32.mrb[8].mxu1 }
 0x4d4   : > { %v875_v44 = vadd.f32 %v1479_v42, %v874_v43  ;;  %v1615_v45 = vpop.f32.mrb[9].mxu1 }
 0x4d5   : > { %v877_v46 = vpop.f32.mrb[10].mxu1 }
 0x4d6   : > { %v878_v47 = vadd.f32 %v1479_v42, %v877_v46  ;;  %v1616_v48 = vpop.f32.mrb[11].mxu1  ;;  %v881_v49 = vmax.f32 %v875_v44, 0.0 }
 0x4d8   : > { %v882_v50 = vmax.f32 %v878_v47, 0.0 }
 0x4da   : > { %v891_v51 = vpack.c.bf16 %v882_v50, %v881_v49 }
 0x4dc   : > { %1626 = vmatmul.mubr.msk.bf16.vlgmr.msra.gmra.mrb[12].mxu1 %vm666_vm2, %v891_v51 }
 0x4dd   : > { %1649 = vmatprep.mubr.msk.bf16.mxu1 %vm1710_vm1, %v1709_v0  ;;  %1646 = vmatpush3.bf16.msra.mxu1 %v1090_v57 }
 0x4de   : > { %1647 = vmatprep.subr.bf16.mxu1 %v1709_v0 }
 0x4e1   : > { %1648 = vmatpush3.bf16.msra.mxu1 %v1091_v63 }
 0x5af   : > { %v933_v41 = vpop.f32.mrb[12].mxu1 }
 0x5b0   : > { %v940_v6 = vadd.f32 %v933_v41, %v1959_v16  ;;  %v1627_v7 = vpop.f32.mrb[13].mxu1  ;;  %v964_v16 = vpop.permute.xlu1 %963 }
 0x5b1   : > { %v936_v11 = vpop.f32.mrb[14].mxu1  ;;  %v1018_v18 = vadd.f32 %v1017_v5, %v964_v16 }
 0x5b2   : > { %v946_v13 = vadd.f32 %v1482_v40, %v940_v6  ;;  %v941_v8 = vadd.f32 %v936_v11, %v1962_v17  ;;  %v1628_v12 = vpop.f32.mrb[15].mxu1 }
 0x5b3   : > { %v1138_v19 = vpack.c.bf16 %v1018_v18, %v1015_v15 }
 0x5b4   : > { %948 = vst.msk [vmem:[%s434_s24] sm:$0xff] %vm490_vm0, %v946_v13  ;;  %v947_v14 = vadd.f32 %v1482_v40, %v941_v8  ;;  %v968_v17 = vpop.permute.xlu1 %967 }
 0x5b5   : > { %v1023_v20 = vadd.f32 %v1635_v2, %v968_v17 }
 0x5b6   : > { %950 = vst.msk [vmem:[%s434_s24 + $0x8] sm:$0x1] %vm949_vm4, %v947_v14  ;;  %v1034_v9 = vpack.c.bf16 %v947_v14, %v946_v13  ;;  %v1714_v14 = vmov 65535  }
 0x5b8   : > { %1642 = vmatmul.mubr.msk.bf16.vlgmr.msra.gmra.mrb[16].mxu0 %vm490_vm0, %v1034_v9  ;;  %1650 = vmatmul.mubr.msk.bf16.vlgmr.msra.gmra.mrb[16].mxu1 %vm490_vm0, %v1034_v9  ;;  %v972_v21 = vpop.permute.xlu1 %971  ;;  %v1257_v9 = vsel %vm1255_vm6, 4294967295, %v1714_v14 }
 0x5b9   : > { %1657 = vmatprep.mubr.msk.bf16.mxu0 %vm1710_vm1, %v1709_v0  ;;  %1654 = vmatpush3.bf16.msra.mxu0 %v1138_v19  ;;  %v1026_v22 = vadd.f32 %v1636_v4, %v972_v21  ;;  %v1258_v19 = vsel %vm1256_vm7, %v1257_v9, 0 }
 0x5ba   : > { %1655 = vmatprep.subr.bf16.mxu0 %v1709_v0 }
 0x5bb   : > { %v1139_v27 = vpack.c.bf16 %v1026_v22, %v1023_v20 }
 0x5bd   : > { %1656 = vmatpush3.bf16.msra.mxu0 %v1139_v27 }
 0x68b   : > { %v1078_v24 = vpop.f32.mrb[16].mxu0  ;;  %v1130_v25 = vpop.f32.mrb[16].mxu1 }
 0x68c   : > { %v1131_v26 = vadd.f32 %v1499_v28, %v1130_v25  ;;  %v1643_v31 = vpop.f32.mrb[17].mxu0  ;;  %v1651_v32 = vpop.f32.mrb[17].mxu1  ;;  %v1079_v36 = vadd.f32 %v1493_v23, %v1078_v24 }
 0x68d   : > { %v1081_v33 = vpop.f32.mrb[18].mxu0  ;;  %v1133_v0 = vpop.f32.mrb[18].mxu1 }
 0x68e   : > { %v1082_v37 = vadd.f32 %v1493_v23, %v1081_v33  ;;  %1213 = vxpose.xlu1.b32.start [1/2] (short) (narrow) %v1131_v26, 32  ;;  %v1644_v38 = vpop.f32.mrb[19].mxu0  ;;  %v1652_v39 = vpop.f32.mrb[19].mxu1  ;;  %v1134_v43 = vadd.f32 %v1499_v28, %v1133_v0 }
 0x690   : > { %v1137_v42 = vpack.c.bf16 %v1082_v37, %v1079_v36 }
 0x692   : > { %1214 = vxpose.xlu1.b32.end [2/2] (short) (narrow) %v1134_v43, 32  ;;  %1658 = vmatmul.mubr.msk.bf16.vlgmr.msra.gmra.mrb[20].mxu0 %vm490_vm0, %v1137_v42 }
 0x70e   : > { %v1229_v44 = vpop.trf.xlu1 }
 0x712   : > { %v1230_v45 = vpop.trf.xlu1 }
 0x713   : > { %v1245_v46 = vpack.c.bf16 %v1230_v45, %v1229_v44 }
 0x715   : > { %1663 = vmatprep.mubr.msk.bf16.mxu1 %vm1248_vm5, %v1245_v46 }
 0x716   : > { %v1231_v15 = vpop.trf.xlu1 }
 0x71a   : > { %v1232_v21 = vpop.trf.xlu1 }
 0x71b   : > { %v1246_v22 = vpack.c.bf16 %v1232_v21, %v1231_v15 }
 0x765   : > { %v1177_v47 = vpop.f32.mrb[20].mxu0 }
 0x766   : > { %v1184_v48 = vmul.f32 0.17677669, %v1177_v47  ;;  %v1659_v49 = vpop.f32.mrb[21].mxu0 }
 0x767   : > { %v1180_v50 = vpop.f32.mrb[22].mxu0 }
 0x768   : > { %v1185_v51 = vmul.f32 0.17677669, %v1180_v50  ;;  %v1660_v52 = vpop.f32.mrb[23].mxu0  ;;  %v1186_v53 = vsel %vm666_vm2, %v1184_v48, -inf }
 0x76a   : > { %v1187_v54 = vsel %vm670_vm3, %v1185_v51, -inf }
 0x76b   : > { %v1188_v55 = vmax.f32 %v1186_v53, %v1187_v54 }
 0x76d   : > { %v1189_v56 = vrot.slane %v1188_v55, 4 }
 0x76f   : > { %v1190_v57 = vmax.f32 %v1188_v55, %v1189_v56 }
 0x771   : > { %v1191_v58 = vrot.slane %v1190_v57, 2 }
 0x773   : > { %v1192_v59 = vmax.f32 %v1190_v57, %v1191_v58 }
 0x775   : > { %v1193_v60 = vrot.slane %v1192_v59, 1 }
 0x777   : > { %v1194_v61 = vmax.f32 %v1192_v59, %v1193_v60 }
 0x779   : > { %v1195_v62 = vsub.f32 %v1184_v48, %v1194_v61  ;;  %v1196_v63 = vsub.f32 %v1185_v51, %v1194_v61 }
 0x77b   : > { %v1197_v1 = vmul.f32 1.442695, %v1195_v62  ;;  %v1199_v2 = vmul.f32 1.442695, %v1196_v63 }
 0x77d   : > { %1695 = vpow2.f32 %v1197_v1 }
 0x77e   : > { %1697 = vpow2.f32 %v1199_v2 }
 0x787   : > { %v1696_v3 = vpop.eup %1695 }
 0x788   : > { %v1698_v4 = vpop.eup %1697  ;;  %v1201_v5 = vsel %vm666_vm2, %v1696_v3, 0.0 }
 0x789   : > { %v1202_v40 = vsel %vm670_vm3, %v1698_v4, 0.0 }
 0x78a   : > { %v1203_v41 = vadd.f32 %v1202_v40, %v1201_v5 }
 0x78c   : > { %v1204_v6 = vrot.slane %v1203_v41, 4 }
 0x78e   : > { %v1205_v7 = vadd.f32 %v1204_v6, %v1203_v41 }
 0x790   : > { %v1206_v11 = vrot.slane %v1205_v7, 2 }
 0x792   : > { %v1207_v13 = vadd.f32 %v1206_v11, %v1205_v7 }
 0x794   : > { %v1208_v8 = vrot.slane %v1207_v13, 1 }
 0x796   : > { %v1209_v12 = vadd.f32 %v1208_v8, %v1207_v13 }
 0x798   : > { %1699 = vrcp.f32 %v1209_v12 }
 0x7a2   : > { %v1700_v10 = vpop.eup %1699 }
 0x7a3   : > { %v1211_v16 = vmul.f32 %v1700_v10, %v1696_v3  ;;  %v1212_v18 = vmul.f32 %v1700_v10, %v1698_v4 }
 0x7a5   : > { %v1247_v17 = vpack.c.bf16 %v1212_v18, %v1211_v16 }
 0x7a7   : > { %v1260_v20 = vand.u32 %v1258_v19, %v1247_v17 }
 0x7a9   : > { %1661 = vmatprep.subr.bf16.mxu1 %v1260_v20 }
 0x7aa   : > { %1662 = vmatpush3.bf16.msra.mxu1 %v1260_v20 }
 0x7ad   : > { %1664 = vmatmul.mubr.msk.bf16.vlgmr.msra.gmra.mrb[20].mxu1 %vm1248_vm5, %v1246_v22 }
 0x880   : > { %v1665_v27 = vpop.f32.mrb[20].mxu1 }
 0x881   : > { %v1313_v28 = vadd.f32 %v1665_v27, %v1864_v34  ;;  %v1296_v23 = vpop.f32.mrb[21].mxu1 }
 0x882   : > { %v1311_v24 = vadd.f32 %v1296_v23, %v1851_v29  ;;  %v1666_v25 = vpop.f32.mrb[22].mxu1 }
 0x883   : > { %v1517_v26 = vpack.c.bf16 %v1313_v28, %v1313_v28  ;;  %v1314_v31 = vadd.f32 %v1666_v25, %v1866_v35  ;;  %v1299_v32 = vpop.f32.mrb[23].mxu1 }
 0x884   : > { %v1515_v33 = vpack.c.bf16 %v1311_v24, %v1311_v24  ;;  %v1312_v0 = vadd.f32 %v1299_v32, %v1853_v30 }
 0x885   : > { %1334 = vst.msk [vmem:[%s439_s30 + $0x8] sm:$0xf] %vm1331_vm8, %v1517_v26  ;;  %v1518_v36 = vpack.c.bf16 %v1314_v31, %v1314_v31 }
 0x886   : > { %1332 = vst.msk [vmem:[%s439_s30] sm:$0xf] %vm1331_vm8, %v1515_v33  ;;  %v1516_v34 = vpack.c.bf16 %v1312_v0, %v1312_v0 }
 0x887   : > { %1335 = vst.msk [vmem:[%s439_s30 + $0xc] sm:$0xf] %vm1331_vm8, %v1518_v36 }
 0x888   : > { %1333 = vst.msk [vmem:[%s439_s30 + $0x4] sm:$0xf] %vm1331_vm8, %v1516_v34 }
 0x889 PF: > { %s22_s17 = sadd.s32 1, %s1707_s17  }
 0x88a   : > { %p19_p4 = scmp.ge.s32.totalorder %s22_s17, 4  }
 0x88c   :  { %21 = sbr.rel (!%p19_p4) target bundleno = 1 (0x1), region = 113 }

// kernel: mask_decoder_hq_forward.9
= control target key start
LH: loop header
LB: loop body
LE: loop exit
PB: predicated region body
PF: predicated region fallthrough
CT: control target
= control target key end

     0   :  { %s1229_s24 = smov 0   ;;  %s1231_s25 = smov 0   ;;  %s1389_s0 = inlined_call_operand.vmem [shape: bf16[2,32,64], index: 0, kind: input, shape index: {}]   ;;  %s1390_s1 = inlined_call_operand.vmem [shape: f32[32,32], index: 1, kind: input, shape index: {}]   ;;  %s1391_s2 = inlined_call_operand.vmem [shape: f32[8,1], index: 2, kind: input, shape index: {}]   ;;  %s1392_s3 = inlined_call_operand.vmem [shape: f32[8,1], index: 3, kind: input, shape index: {}]   ;;  %s1393_s4 = inlined_call_operand.vmem [shape: f32[8,1], index: 4, kind: input, shape index: {}]   ;;  %s1394_s5 = inlined_call_operand.vmem [shape: f32[16,8], index: 5, kind: input, shape index: {}]   ;;  %s1395_s6 = inlined_call_operand.vmem [shape: f32[16,1], index: 6, kind: input, shape index: {}]   ;;  %s1396_s7 = inlined_call_operand.vmem [shape: bf16[2,4,16,64], index: 7, kind: output, shape index: {}]  }
   0x1   :  { %s1233_s26 = smov 0  }
   0x2 LB: > { %s29_s27 = sadd.s32 1, %s1180_s25  ;;  %p1016_p0 = scmp.ge.s32.totalorder %s1184_s26, 1  ;;  %s1184_s26 = sphi %s1233_s26, %s17_s26   ;;  %s1180_s25 = sphi %s1231_s25, %s1398_s25   ;;  %s1176_s24 = sphi %s1229_s24, %s1397_s24  }
   0x3   : > { %p31_p1 = scmp.ge.s32.totalorder %s29_s27, 2  ;;  %p256_p2 = scmp.lt.s32.totalorder %s1184_s26, 3 }
   0x5   : > { %s1400_s27 = smov (%p31_p1, %s29_s27), 0  ;;  %p257_p3 = pnand %p1016_p0, %p256_p2 }
   0x6   : > { %p294_p4 = scmp.lt.s32.totalorder (!%p257_p3), %s1176_s24, 1  ;;  %v311_v0 = vld [vmem:[%s1390_s1] sm:$0xff] (!%p257_p3)  ;;  %v312_v1 = vld [vmem:[%s1390_s1 + $0x8] sm:$0xff] (!%p257_p3)  ;;  %vm333_vm0 = vcmask (!%p257_p3), 261120   ;;  %v1186_v3 = vmov (!%p257_p3), 0   ;;  %v313_v9 = vld [vmem:[%s1390_s1 + $0x10] sm:$0xff] (!%p257_p3) }
   0x7   : > { %260 = sbr.rel (%p257_p3) target bundleno = 585 (0x249), region = 48  ;;  %v319_v2 = vpack.c.bf16 (!%p257_p3), %v312_v1, %v311_v0  ;;  %1126 = vset.pattern.permute.xlu0 (!%p257_p3), %v1186_v3  ;;  %v391_v4 = vld [vmem:[%s1391_s2] sm:$0xff] (!%p257_p3)  ;;  %1127 = vset.pattern.permute.xlu1 (!%p257_p3), %v1186_v3  ;;  %v314_v10 = vld [vmem:[%s1390_s1 + $0x18] sm:$0xff] (!%p257_p3)  ;;  %v390_v13 = vld [vmem:[%s1395_s6 + $0x8] sm:$0xff] (!%p257_p3)  ;;  %v1187_v14 = vmov (!%p257_p3), 0.0   ;;  %vm1188_vm1 = vmmov (!%p257_p3), 0  }
   0x8   : > { %394 = vperm.xlu0 (!%p257_p3), %1126, %v391_v4   ;;  %670 = vperm.xlu1 (!%p257_p3), %1127, %v391_v4   ;;  %v398_v5 = vld [vmem:[%s1392_s3] sm:$0xff] (!%p257_p3)  ;;  %v320_v11 = vpack.c.bf16 (!%p257_p3), %v314_v10, %v313_v9  ;;  %vm400_vm2 = vcmask (!%p257_p3), 523264   ;;  %vm462_vm3 = vcmask (!%p257_p3), 1043456   ;;  %vm458_vm4 = vcmask (!%p257_p3), 64512  }
   0x9   : > { %1071 = vmatprep.mubr.msk.bf16.mxu0 (!%p257_p3), %vm333_vm0, %v319_v2  ;;  %v399_v8 = vld [vmem:[%s1393_s4] sm:$0xff] (!%p257_p3)  ;;  %1075 = vmatprep.subr.bf16.mxu1 (!%p257_p3), %v1187_v14  ;;  %vm533_vm5 = vcmask (!%p257_p3), 519168  }
   0xa   : > { %v389_v12 = vld [vmem:[%s1395_s6] sm:$0xff] (!%p257_p3)  ;;  %1077 = vmatprep.mubr.msk.bf16.mxu1 (!%p257_p3), %vm1188_vm1, %v1187_v14 }
   0xc   : > { %539 = vperm.xlu0 (!%p257_p3), %1126, %v391_v4   ;;  %801 = vperm.xlu1 (!%p257_p3), %1127, %v391_v4  }
   0xe   : > { %s1402_s24 = smov (!%p294_p4, %s1176_s24), 1 }
   0xf   : > { %s1045_s11 = sshll.u32 %s1402_s24, 4  ;;  %s1046_s12 = sshll.u32 %s1402_s24, 5 }
  0x10   : > { %s301_s14 = scalar_lea.vmem %s1389_s0, %s1045_s11  ;;  %425 = vperm.xlu0 %1126, %v398_v5   ;;  %431 = vperm.xlu1 %1127, %v399_v8   ;;  %s1359_s24 = scalar_lea.vmem %s1396_s7, %s1046_s12 }
  0x11   : > { %v1128_v6 = vld [vmem:[%s301_s14] sm:$0xff]   ;;  %v1129_v7 = vld [vmem:[%s301_s14 + $0x8] sm:$0xff]  }
  0x12   : > { %1067 = vmatprep.subr.bf16.mxu0 %v1128_v6 }
  0x13   : > { %1068 = vmatpush3.bf16.msra.mxu0 %v1128_v6 }
  0x14   : > { %1069 = vmatprep.subr.bf16.mxu0 %v1129_v7  ;;  %568 = vperm.xlu0 %1126, %v398_v5  }
  0x15   : > { %574 = vperm.xlu1 %1127, %v399_v8  }
  0x17   : > { %1070 = vmatpush3.bf16.msra.mxu0 %v1129_v7 }
  0x18   : > { %699 = vperm.xlu0 %1126, %v398_v5   ;;  %1087 = vmatprep.subr.bf16.mxu0 %v1187_v14 }
  0x19   : > { %830 = vperm.xlu1 %1127, %v398_v5  }
  0x1a   : > { %1072 = vmatmul.mubr.msk.bf16.vlgmr.msra.gmra.mrb[0].mxu0 %vm333_vm0, %v320_v11 }
  0x1b   : > { %1089 = vmatprep.mubr.msk.bf16.mxu0 %vm1188_vm1, %v1187_v14 }
  0x1c   : > { %705 = vperm.xlu0 %1126, %v399_v8  }
  0x1d   : > { %836 = vperm.xlu1 %1127, %v399_v8  }
  0x20   : > { %450 = vperm.xlu0 %1126, %v389_v12  }
  0x21   : > { %455 = vperm.xlu1 %1127, %v390_v13  }
  0x87   : > { %v671_v15 = vpop.permute.xlu1 %670  ;;  %v395_v16 = vpop.permute.xlu0 %394 }
  0x8b   : > { %v802_v20 = vpop.permute.xlu1 %801  ;;  %v540_v23 = vpop.permute.xlu0 %539 }
  0xed   : > { %v1073_v17 = vpop.f32.mrb[0].mxu0 }
  0xee   : > { %v673_v18 = vadd.f32 %v1073_v17, %v671_v15  ;;  %v374_v19 = vpop.f32.mrb[1].mxu0 }
  0xef   : > { %v397_v21 = vadd.f32 %v395_v16, %v374_v19  ;;  %v1074_v22 = vpop.f32.mrb[2].mxu0 }
  0xf0   : > { %v676_v24 = vsel %vm400_vm2, %v673_v18, 0.0  ;;  %v804_v25 = vadd.f32 %v1074_v22, %v802_v20  ;;  %v377_v26 = vpop.f32.mrb[3].mxu0 }
  0xf1   : > { %v677_v27 = vrot.slane %v676_v24, 4  ;;  %v401_v28 = vsel %vm400_vm2, %v397_v21, 0.0  ;;  %v542_v29 = vadd.f32 %v540_v23, %v377_v26 }
  0xf2   : > { %v402_v30 = vrot.slane %v401_v28, 4  ;;  %v807_v31 = vsel %vm400_vm2, %v804_v25, 0.0 }
  0xf3   : > { %v678_v32 = vadd.f32 %v677_v27, %v676_v24  ;;  %v808_v33 = vrot.slane %v807_v31, 4  ;;  %v545_v34 = vsel %vm400_vm2, %v542_v29, 0.0 }
  0xf4   : > { %v403_v35 = vadd.f32 %v402_v30, %v401_v28  ;;  %v546_v36 = vrot.slane %v545_v34, 4  ;;  %v426_v30 = vpop.permute.xlu0 %425 }
  0xf5   : > { %v679_v37 = vrot.slane %v678_v32, 2  ;;  %v809_v38 = vadd.f32 %v808_v33, %v807_v31 }
  0xf6   : > { %v404_v39 = vrot.slane %v403_v35, 2  ;;  %v547_v40 = vadd.f32 %v546_v36, %v545_v34 }
  0xf7   : > { %v680_v41 = vadd.f32 %v679_v37, %v678_v32  ;;  %v810_v42 = vrot.slane %v809_v38, 2 }
  0xf8   : > { %v405_v43 = vadd.f32 %v404_v39, %v403_v35  ;;  %v548_v44 = vrot.slane %v547_v40, 2  ;;  %v432_v35 = vpop.permute.xlu1 %431 }
  0xf9   : > { %v681_v45 = vrot.slane %v680_v41, 1  ;;  %v811_v46 = vadd.f32 %v810_v42, %v809_v38  ;;  %v569_v42 = vpop.permute.xlu0 %568 }
  0xfa   : > { %v406_v47 = vrot.slane %v405_v43, 1  ;;  %v549_v48 = vadd.f32 %v548_v44, %v547_v40 }
  0xfb   : > { %v682_v49 = vadd.f32 %v681_v45, %v680_v41  ;;  %v812_v50 = vrot.slane %v811_v46, 1 }
  0xfc   : > { %v407_v51 = vadd.f32 %v406_v47, %v405_v43  ;;  %v550_v52 = vrot.slane %v549_v48, 1  ;;  %v575_v43 = vpop.permute.xlu1 %574 }
  0xfd   : > { %v683_v53 = vmul.f32 0.125, %v682_v49  ;;  %v813_v54 = vadd.f32 %v812_v50, %v811_v46  ;;  %v700_v44 = vpop.permute.xlu0 %699 }
  0xfe   : > { %v409_v55 = vmul.f32 0.125, %v407_v51  ;;  %v551_v56 = vadd.f32 %v550_v52, %v549_v48 }
  0xff   : > { %v684_v57 = vsub.f32 %v673_v18, %v683_v53  ;;  %v814_v58 = vmul.f32 0.125, %v813_v54 }
 0x100   : > { %v410_v59 = vsub.f32 %v397_v21, %v409_v55  ;;  %v552_v60 = vmul.f32 0.125, %v551_v56  ;;  %v831_v46 = vpop.permute.xlu1 %830 }
 0x101   : > { %v685_v61 = vmul.f32 %v684_v57, %v684_v57  ;;  %v815_v62 = vsub.f32 %v804_v25, %v814_v58  ;;  %v706_v54 = vpop.permute.xlu0 %705 }
 0x102   : > { %v411_v63 = vmul.f32 %v410_v59, %v410_v59  ;;  %v553_v0 = vsub.f32 %v542_v29, %v552_v60 }
 0x103   : > { %v686_v1 = vsel %vm400_vm2, %v685_v61, 0.0  ;;  %v816_v2 = vmul.f32 %v815_v62, %v815_v62 }
 0x104   : > { %v687_v3 = vrot.slane %v686_v1, 4  ;;  %v412_v4 = vsel %vm400_vm2, %v411_v63, 0.0  ;;  %v554_v5 = vmul.f32 %v553_v0, %v553_v0 }
 0x105   : > { %v413_v6 = vrot.slane %v412_v4, 4  ;;  %v817_v7 = vsel %vm400_vm2, %v816_v2, 0.0 }
 0x106   : > { %v688_v8 = vadd.f32 %v687_v3, %v686_v1  ;;  %v818_v9 = vrot.slane %v817_v7, 4  ;;  %v555_v10 = vsel %vm400_vm2, %v554_v5, 0.0  ;;  %v837_v1 = vpop.permute.xlu1 %836 }
 0x107   : > { %v414_v11 = vadd.f32 %v413_v6, %v412_v4  ;;  %v556_v12 = vrot.slane %v555_v10, 4 }
 0x108   : > { %v689_v13 = vrot.slane %v688_v8, 2  ;;  %v819_v15 = vadd.f32 %v818_v9, %v817_v7 }
 0x109   : > { %v415_v16 = vrot.slane %v414_v11, 2  ;;  %v557_v17 = vadd.f32 %v556_v12, %v555_v10 }
 0x10a   : > { %v690_v18 = vadd.f32 %v689_v13, %v688_v8  ;;  %v820_v19 = vrot.slane %v819_v15, 2 }
 0x10b   : > { %v416_v20 = vadd.f32 %v415_v16, %v414_v11  ;;  %v558_v21 = vrot.slane %v557_v17, 2 }
 0x10c   : > { %v691_v22 = vrot.slane %v690_v18, 1  ;;  %v821_v23 = vadd.f32 %v820_v19, %v819_v15 }
 0x10d   : > { %v417_v24 = vrot.slane %v416_v20, 1  ;;  %v559_v25 = vadd.f32 %v558_v21, %v557_v17 }
 0x10e   : > { %v692_v26 = vadd.f32 %v691_v22, %v690_v18  ;;  %v822_v27 = vrot.slane %v821_v23, 1 }
 0x10f   : > { %v418_v28 = vadd.f32 %v417_v24, %v416_v20  ;;  %v560_v29 = vrot.slane %v559_v25, 1 }
 0x110   : > { %v693_v31 = vmul.f32 0.125, %v692_v26  ;;  %v823_v32 = vadd.f32 %v822_v27, %v821_v23 }
 0x111   : > { %v419_v33 = vmul.f32 0.125, %v418_v28  ;;  %v561_v34 = vadd.f32 %v560_v29, %v559_v25 }
 0x112   : > { %v694_v36 = vadd.f32 1e-06, %v693_v31  ;;  %v824_v37 = vmul.f32 0.125, %v823_v32  ;;  %v719_v31 = vld [vmem:[%s1394_s5 + $0x8] sm:$0xff] }
 0x113   : > { %v420_v38 = vadd.f32 1e-06, %v419_v33  ;;  %v562_v39 = vmul.f32 0.125, %v561_v34 }
 0x114   : > { %1130 = vrsqrt.f32 %v694_v36  ;;  %v825_v40 = vadd.f32 1e-06, %v824_v37 }
 0x115   : > { %1132 = vrsqrt.f32 %v420_v38  ;;  %v563_v41 = vadd.f32 1e-06, %v562_v39 }
 0x116   : > { %1134 = vrsqrt.f32 %v825_v40 }
 0x117   : > { %1136 = vrsqrt.f32 %v563_v41 }
 0x11e   : > { %v1131_v45 = vpop.eup %1130 }
 0x11f   : > { %v1133_v47 = vpop.eup %1132  ;;  %v696_v48 = vmul.f32 %v1131_v45, %v684_v57 }
 0x120   : > { %v1135_v49 = vpop.eup %1134  ;;  %v422_v50 = vmul.f32 %v1133_v47, %v410_v59 }
 0x121   : > { %v1137_v51 = vpop.eup %1136  ;;  %v702_v52 = vmul.f32 %v700_v44, %v696_v48  ;;  %v827_v53 = vmul.f32 %v1135_v49, %v815_v62  ;;  %v451_v48 = vpop.permute.xlu0 %450 }
 0x122   : > { %v428_v55 = vmul.f32 %v426_v30, %v422_v50  ;;  %v565_v56 = vmul.f32 %v1137_v51, %v553_v0  ;;  %v718_v30 = vld [vmem:[%s1394_s5] sm:$0xff]  ;;  %v456_v49 = vpop.permute.xlu1 %455 }
 0x123   : > { %v708_v58 = vadd.f32 %v706_v54, %v702_v52  ;;  %v833_v60 = vmul.f32 %v831_v46, %v827_v53  ;;  %v720_v39 = vpack.c.bf16 %v719_v31, %v718_v30 }
 0x124   : > { %v434_v61 = vadd.f32 %v432_v35, %v428_v55  ;;  %v571_v63 = vmul.f32 %v569_v42, %v565_v56 }
 0x125   : > { %v839_v2 = vadd.f32 %v837_v1, %v833_v60  ;;  %v710_v3 = vmul.f32 0.044715, %v708_v58  ;;  %v709_v23 = vmul.f32 0.5, %v708_v58 }
 0x126   : > { %v577_v4 = vadd.f32 %v575_v43, %v571_v63  ;;  %v436_v5 = vmul.f32 0.044715, %v434_v61  ;;  %v435_v25 = vmul.f32 0.5, %v434_v61 }
 0x127   : > { %v841_v6 = vmul.f32 0.044715, %v839_v2  ;;  %v711_v7 = vmul.f32 %v710_v3, %v708_v58  ;;  %v840_v43 = vmul.f32 0.5, %v839_v2 }
 0x128   : > { %v437_v57 = vmul.f32 %v436_v5, %v434_v61  ;;  %v579_v8 = vmul.f32 0.044715, %v577_v4  ;;  %v578_v32 = vmul.f32 0.5, %v577_v4 }
 0x129   : > { %v842_v59 = vmul.f32 %v841_v6, %v839_v2  ;;  %v712_v9 = vmul.f32 %v711_v7, %v708_v58 }
 0x12a   : > { %v438_v10 = vmul.f32 %v437_v57, %v434_v61  ;;  %v580_v62 = vmul.f32 %v579_v8, %v577_v4 }
 0x12b   : > { %v843_v11 = vmul.f32 %v842_v59, %v839_v2  ;;  %v713_v12 = vadd.f32 %v712_v9, %v708_v58 }
 0x12c   : > { %v439_v0 = vadd.f32 %v438_v10, %v434_v61  ;;  %v581_v13 = vmul.f32 %v580_v62, %v577_v4 }
 0x12d   : > { %v714_v15 = vmul.f32 0.7978846, %v713_v12  ;;  %v844_v16 = vadd.f32 %v843_v11, %v839_v2 }
 0x12e   : > { %v440_v17 = vmul.f32 0.7978846, %v439_v0  ;;  %v582_v18 = vadd.f32 %v581_v13, %v577_v4 }
 0x12f   : > { %1138 = vtanh.f32 %v714_v15  ;;  %v845_v20 = vmul.f32 0.7978846, %v844_v16 }
 0x130   : > { %1140 = vtanh.f32 %v440_v17  ;;  %v583_v19 = vmul.f32 0.7978846, %v582_v18 }
 0x132   : > { %1142 = vtanh.f32 %v583_v19 }
 0x133   : > { %1144 = vtanh.f32 %v845_v20 }
 0x139   : > { %v1139_v21 = vpop.eup %1138 }
 0x13a   : > { %v1141_v22 = vpop.eup %1140  ;;  %v716_v24 = vadd.f32 1.0, %v1139_v21 }
 0x13b   : > { %v442_v26 = vadd.f32 1.0, %v1141_v22 }
 0x13c   : > { %v1143_v27 = vpop.eup %1142  ;;  %v717_v28 = vmul.f32 %v716_v24, %v709_v23 }
 0x13d   : > { %v443_v29 = vmul.f32 %v442_v26, %v435_v25  ;;  %v585_v33 = vadd.f32 1.0, %v1143_v27  ;;  %v1145_v34 = vpop.eup %1144 }
 0x13e   : > { %v721_v35 = vpack.c.bf16 %v717_v28, %v717_v28  ;;  %v847_v42 = vadd.f32 1.0, %v1145_v34 }
 0x13f   : > { %v447_v36 = vpack.c.bf16 %v443_v29, %v443_v29  ;;  %v586_v37 = vmul.f32 %v585_v33, %v578_v32 }
 0x140   : > { %v726_v38 = vsel %vm462_vm3, %v721_v35, 0  ;;  %v848_v45 = vmul.f32 %v847_v42, %v840_v43 }
 0x141   : > { %1088 = vmatpush3.bf16.msra.mxu0 %v726_v38  ;;  %v464_v40 = vsel %vm462_vm3, %v447_v36, 0  ;;  %v590_v41 = vpack.c.bf16 %v586_v37, %v586_v37 }
 0x142   : > { %1076 = vmatpush3.bf16.msra.mxu1 %v464_v40  ;;  %v852_v46 = vpack.c.bf16 %v848_v45, %v848_v45 }
 0x143   : > { %1081 = vmatprep.subr.bf16.mxu1 %v1187_v14  ;;  %v595_v44 = vsel %vm462_vm3, %v590_v41, 0 }
 0x144   : > { %1090 = vmatmul.mubr.msk.bf16.vlgmr.msra.gmra.mrb[4].mxu0 %vm458_vm4, %v720_v39  ;;  %v857_v47 = vsel %vm462_vm3, %v852_v46, 0 }
 0x145   : > { %1078 = vmatmul.mubr.msk.bf16.vlgmr.msra.gmra.mrb[0].mxu1 %vm458_vm4, %v720_v39 }
 0x146   : > { %1082 = vmatpush3.bf16.msra.mxu1 %v595_v44  ;;  %1083 = vmatprep.mubr.msk.bf16.mxu1 %vm1188_vm1, %v1187_v14 }
 0x147   : > { %1093 = vmatprep.subr.bf16.mxu1 %v1187_v14 }
 0x14d   : > { %1084 = vmatmul.mubr.msk.bf16.vlgmr.msra.gmra.mrb[4].mxu1 %vm458_vm4, %v720_v39 }
 0x14e   : > { %1094 = vmatpush3.bf16.msra.mxu1 %v857_v47  ;;  %1095 = vmatprep.mubr.msk.bf16.mxu1 %vm1188_vm1, %v1187_v14 }
 0x155   : > { %1096 = vmatmul.mubr.msk.bf16.vlgmr.msra.gmra.mrb[8].mxu1 %vm458_vm4, %v720_v39 }
 0x217   : > { %v762_v50 = vpop.f32.mrb[4].mxu0 }
 0x218   : > { %v1316_v51 = vadd.f32 %v762_v50, %v451_v48  ;;  %v500_v52 = vpop.f32.mrb[0].mxu1  ;;  %v1091_v53 = vpop.f32.mrb[5].mxu0 }
 0x219   : > { %v1318_v54 = vadd.f32 %v500_v52, %v451_v48  ;;  %v1079_v55 = vpop.f32.mrb[1].mxu1  ;;  %v765_v56 = vpop.f32.mrb[6].mxu0 }
 0x21a   : > { %v771_v58 = vmul.f32 0.044715, %v1316_v51  ;;  %v1321_v60 = vadd.f32 %v765_v56, %v456_v49  ;;  %v503_v61 = vpop.f32.mrb[2].mxu1  ;;  %v1092_v63 = vpop.f32.mrb[7].mxu0  ;;  %v769_v45 = vmul.f32 0.5, %v1316_v51 }
 0x21b   : > { %v509_v14 = vmul.f32 0.044715, %v1318_v54  ;;  %v1324_v1 = vadd.f32 %v503_v61, %v456_v49  ;;  %v1080_v2 = vpop.f32.mrb[3].mxu1  ;;  %v507_v52 = vmul.f32 0.5, %v1318_v54 }
 0x21c   : > { %v773_v3 = vmul.f32 %v771_v58, %v1316_v51  ;;  %v772_v4 = vmul.f32 0.044715, %v1321_v60 }
 0x21d   : > { %v511_v5 = vmul.f32 %v509_v14, %v1318_v54  ;;  %v510_v6 = vmul.f32 0.044715, %v1324_v1 }
 0x21e   : > { %v775_v7 = vmul.f32 %v773_v3, %v1316_v51  ;;  %v774_v57 = vmul.f32 %v772_v4, %v1321_v60 }
 0x21f   : > { %v513_v8 = vmul.f32 %v511_v5, %v1318_v54  ;;  %v512_v59 = vmul.f32 %v510_v6, %v1324_v1 }
 0x220   : > { %v777_v9 = vadd.f32 %v775_v7, %v1316_v51  ;;  %v776_v10 = vmul.f32 %v774_v57, %v1321_v60  ;;  %v631_v62 = vpop.f32.mrb[4].mxu1 }
 0x221   : > { %v515_v11 = vadd.f32 %v513_v8, %v1318_v54  ;;  %v514_v12 = vmul.f32 %v512_v59, %v1324_v1  ;;  %v1338_v0 = vadd.f32 %v631_v62, %v451_v48  ;;  %v1085_v13 = vpop.f32.mrb[5].mxu1  ;;  %v508_v54 = vmul.f32 0.5, %v1324_v1 }
 0x222   : > { %v779_v15 = vmul.f32 0.7978846, %v777_v9  ;;  %v778_v16 = vadd.f32 %v776_v10, %v1321_v60  ;;  %v634_v17 = vpop.f32.mrb[6].mxu1 }
 0x223   : > { %v517_v18 = vmul.f32 0.7978846, %v515_v11  ;;  %v516_v19 = vadd.f32 %v514_v12, %v1324_v1  ;;  %v640_v20 = vmul.f32 0.044715, %v1338_v0  ;;  %v1086_v21 = vpop.f32.mrb[7].mxu1  ;;  %v1343_v23 = vadd.f32 %v634_v17, %v456_v49 }
 0x224   : > { %1146 = vtanh.f32 %v779_v15  ;;  %v780_v22 = vmul.f32 0.7978846, %v778_v16  ;;  %v638_v1 = vmul.f32 0.5, %v1338_v0 }
 0x225   : > { %1148 = vtanh.f32 %v517_v18  ;;  %v518_v24 = vmul.f32 0.7978846, %v516_v19  ;;  %v642_v25 = vmul.f32 %v640_v20, %v1338_v0  ;;  %v641_v26 = vmul.f32 0.044715, %v1343_v23 }
 0x226   : > { %1150 = vtanh.f32 %v780_v22  ;;  %v639_v11 = vmul.f32 0.5, %v1343_v23 }
 0x227   : > { %1152 = vtanh.f32 %v518_v24  ;;  %v644_v27 = vmul.f32 %v642_v25, %v1338_v0  ;;  %v643_v28 = vmul.f32 %v641_v26, %v1343_v23 }
 0x228   : > { %v893_v29 = vpop.f32.mrb[8].mxu1 }
 0x229   : > { %v646_v30 = vadd.f32 %v644_v27, %v1338_v0  ;;  %v894_v31 = vadd.f32 %v893_v29, %v451_v48  ;;  %v1097_v32 = vpop.f32.mrb[9].mxu1  ;;  %v645_v33 = vmul.f32 %v643_v28, %v1343_v23 }
 0x22a   : > { %v896_v34 = vpop.f32.mrb[10].mxu1 }
 0x22b   : > { %v648_v35 = vmul.f32 0.7978846, %v646_v30  ;;  %v902_v36 = vmul.f32 0.044715, %v894_v31  ;;  %v897_v37 = vadd.f32 %v896_v34, %v456_v49  ;;  %v1098_v38 = vpop.f32.mrb[11].mxu1  ;;  %v647_v39 = vadd.f32 %v645_v33, %v1343_v23 }
 0x22c   : > { %v770_v49 = vmul.f32 0.5, %v1321_v60  ;;  %v900_v18 = vmul.f32 0.5, %v894_v31 }
 0x22d   : > { %1154 = vtanh.f32 %v648_v35  ;;  %v904_v40 = vmul.f32 %v902_v36, %v894_v31  ;;  %v903_v41 = vmul.f32 0.044715, %v897_v37  ;;  %v649_v43 = vmul.f32 0.7978846, %v647_v39 }
 0x22e   : > { %v1147_v42 = vpop.eup %1146  ;;  %v901_v21 = vmul.f32 0.5, %v897_v37 }
 0x22f   : > { %v1149_v44 = vpop.eup %1148  ;;  %v783_v46 = vadd.f32 1.0, %v1147_v42  ;;  %v906_v47 = vmul.f32 %v904_v40, %v894_v31  ;;  %v905_v48 = vmul.f32 %v903_v41, %v897_v37  ;;  %1156 = vtanh.f32 %v649_v43 }
 0x230   : > { %v1151_v50 = vpop.eup %1150  ;;  %v521_v53 = vadd.f32 1.0, %v1149_v44 }
 0x231   : > { %v1153_v55 = vpop.eup %1152  ;;  %v785_v56 = vmul.f32 %v783_v46, %v769_v45  ;;  %v784_v58 = vadd.f32 1.0, %v1151_v50  ;;  %v908_v61 = vadd.f32 %v906_v47, %v894_v31  ;;  %v907_v63 = vmul.f32 %v905_v48, %v897_v37 }
 0x232   : > { %v523_v51 = vmul.f32 %v521_v53, %v507_v52  ;;  %v522_v14 = vadd.f32 1.0, %v1153_v55 }
 0x233   : > { %v1051_v60 = vpack.c.bf16 %v785_v56, %v785_v56  ;;  %v786_v2 = vmul.f32 %v784_v58, %v770_v49  ;;  %v910_v3 = vmul.f32 0.7978846, %v908_v61  ;;  %v909_v4 = vadd.f32 %v907_v63, %v897_v37 }
 0x234   : > { %v1047_v5 = vpack.c.bf16 %v523_v51, %v523_v51  ;;  %v524_v6 = vmul.f32 %v522_v14, %v508_v54 }
 0x235   : > { %1036 = vst.msk [vmem:[%s1359_s24 + $0x10] sm:$0xf] %vm533_vm5, %v1051_v60  ;;  %v1052_v7 = vpack.c.bf16 %v786_v2, %v786_v2  ;;  %1158 = vtanh.f32 %v910_v3  ;;  %v911_v57 = vmul.f32 0.7978846, %v909_v4 }
 0x236   : > { %534 = vst.msk [vmem:[%s1359_s24] sm:$0xf] %vm533_vm5, %v1047_v5  ;;  %v1048_v8 = vpack.c.bf16 %v524_v6, %v524_v6 }
 0x237   : > { %v1155_v59 = vpop.eup %1154  ;;  %1037 = vst.msk [vmem:[%s1359_s24 + $0x14] sm:$0xf] %vm533_vm5, %v1052_v7  ;;  %1160 = vtanh.f32 %v911_v57 }
 0x238   : > { %535 = vst.msk [vmem:[%s1359_s24 + $0x4] sm:$0xf] %vm533_vm5, %v1048_v8  ;;  %v652_v9 = vadd.f32 1.0, %v1155_v59 }
 0x239   : > { %v1157_v10 = vpop.eup %1156 }
 0x23a   : > { %v654_v62 = vmul.f32 %v652_v9, %v638_v1  ;;  %v653_v12 = vadd.f32 1.0, %v1157_v10 }
 0x23c   : > { %v1049_v13 = vpack.c.bf16 %v654_v62, %v654_v62  ;;  %v655_v15 = vmul.f32 %v653_v12, %v639_v11 }
 0x23e   : > { %1031 = vst.msk [vmem:[%s1359_s24 + $0x8] sm:$0xf] %vm533_vm5, %v1049_v13  ;;  %v1050_v17 = vpack.c.bf16 %v655_v15, %v655_v15 }
 0x23f   : > { %v1159_v16 = vpop.eup %1158 }
 0x240   : > { %v914_v19 = vadd.f32 1.0, %v1159_v16  ;;  %1032 = vst.msk [vmem:[%s1359_s24 + $0xc] sm:$0xf] %vm533_vm5, %v1050_v17 }
 0x241   : > { %v1161_v20 = vpop.eup %1160 }
 0x242   : > { %v916_v0 = vmul.f32 %v914_v19, %v900_v18  ;;  %v915_v22 = vadd.f32 1.0, %v1161_v20 }
 0x244   : > { %v1053_v24 = vpack.c.bf16 %v916_v0, %v916_v0  ;;  %v917_v25 = vmul.f32 %v915_v22, %v901_v21 }
 0x246   : > { %1041 = vst.msk [vmem:[%s1359_s24 + $0x18] sm:$0xf] %vm533_vm5, %v1053_v24  ;;  %v1054_v23 = vpack.c.bf16 %v917_v25, %v917_v25 }
 0x248   : > { %1042 = vst.msk [vmem:[%s1359_s24 + $0x1c] sm:$0xf] %vm533_vm5, %v1054_v23 }
 0x249 PF: > { %s17_s26 = sadd.s32 1, %s1184_s26   ;;  %s1397_s24 = smov %s1180_s25 }
 0x24a   : > { %p14_p5 = scmp.ge.s32.totalorder %s17_s26, 4   ;;  %s1398_s25 = smov %s1400_s27 }
 0x24c   :  { %16 = sbr.rel (!%p14_p5) target bundleno = 2 (0x2), region = 81 }

// kernel: mask_decoder_hq_forward.7
= control target key start
LH: loop header
LB: loop body
LE: loop exit
PB: predicated region body
PF: predicated region fallthrough
CT: control target
= control target key end

     0   :  { %s2549_s25 = smov 0   ;;  %s2551_s26 = smov 0   ;;  %s3327_s0 = inlined_call_operand.vmem [shape: bf16[2,32,64], index: 0, kind: input, shape index: {}]   ;;  %s3328_s1 = inlined_call_operand.vmem [shape: f32[2,64,48], index: 1, kind: input, shape index: {}]   ;;  %s3329_s2 = inlined_call_operand.vmem [shape: f32[32,32], index: 2, kind: input, shape index: {}]   ;;  %s3330_s3 = inlined_call_operand.vmem [shape: f32[8,1], index: 3, kind: input, shape index: {}]   ;;  %s3331_s4 = inlined_call_operand.vmem [shape: f32[8,1], index: 4, kind: input, shape index: {}]   ;;  %s3332_s5 = inlined_call_operand.vmem [shape: f32[8,1], index: 5, kind: input, shape index: {}]   ;;  %s3333_s6 = inlined_call_operand.vmem [shape: f32[16,8], index: 6, kind: input, shape index: {}]   ;;  %s3334_s7 = inlined_call_operand.vmem [shape: f32[128,48], index: 7, kind: input, shape index: {}]   ;;  %s3335_s8 = inlined_call_operand.vmem [shape: f32[32,1], index: 8, kind: input, shape index: {}]   ;;  %s3336_s9 = inlined_call_operand.vmem [shape: f32[32,1], index: 9, kind: input, shape index: {}]   ;;  %s3337_s10 = inlined_call_operand.vmem [shape: f32[32,1], index: 10, kind: input, shape index: {}]   ;;  %s3338_s11 = inlined_call_operand.vmem [shape: f32[16,32], index: 11, kind: input, shape index: {}]   ;;  %s3339_s12 = inlined_call_operand.vmem [shape: f32[16,1], index: 12, kind: input, shape index: {}]   ;;  %s3340_s13 = inlined_call_operand.vmem [shape: bf16[2,4,16,64], index: 13, kind: output, shape index: {}]  }
   0x1   :  { %s2553_s27 = smov 0  }
   0x2 LB: > { %s35_s28 = sadd.s32 1, %s2470_s26  ;;  %p2183_p0 = scmp.ge.s32.totalorder %s2474_s27, 1  ;;  %s2474_s27 = sphi %s2553_s27, %s23_s27   ;;  %s2470_s26 = sphi %s2551_s26, %s3371_s26   ;;  %s2466_s25 = sphi %s2549_s25, %s3370_s25  }
   0x3   : > { %p37_p1 = scmp.ge.s32.totalorder %s35_s28, 2  ;;  %p423_p2 = scmp.lt.s32.totalorder %s2474_s27, 3 }
   0x5   : > { %s3373_s28 = smov (%p37_p1, %s35_s28), 0  ;;  %p424_p3 = pnand %p2183_p0, %p423_p2 }
   0x7   : > { %427 = sbr.rel (%p424_p3) target bundleno = 646 (0x286), region = 72 }
   0xe   : > { %v2570_v0 = vld [vmem:[%s3335_s8 + $0x10] sm:$0xff]  ;;  %v2575_v1 = vld [vmem:[%s3335_s8] sm:$0xff]  ;;  %p482_p4 = scmp.lt.s32.totalorder %s2466_s25, 1  ;;  %v2476_v2 = vmov 0   ;;  %v522_v4 = vld [vmem:[%s3329_s2 + $0x8] sm:$0xff]  ;;  %vm539_vm0 = vcmask 261120  }
   0xf   : > { %2393 = vset.pattern.permute.xlu1 %v2476_v2  ;;  %2392 = vset.pattern.permute.xlu0 %v2476_v2  ;;  %v521_v3 = vld [vmem:[%s3329_s2] sm:$0xff]  ;;  %v815_v5 = vld [vmem:[%s3335_s8 + $0x18] sm:$0xff]  ;;  %v813_v7 = vld [vmem:[%s3335_s8 + $0x8] sm:$0xff]  ;;  %vm623_vm1 = vcmask 392192   ;;  %vm768_vm2 = vcmask 523264   ;;  %vm2478_vm3 = vmmov 0  }
  0x10   : > { %828 = vperm.xlu1 %2393, %v2570_v0   ;;  %818 = vperm.xlu0 %2392, %v2575_v1   ;;  %s3375_s25 = smov (!%p482_p4, %s2466_s25), 1  ;;  %v525_v6 = vpack.c.bf16 %v522_v4, %v521_v3  ;;  %v595_v8 = vld [vmem:[%s3334_s7] sm:$0xff]  ;;  %v596_v9 = vld [vmem:[%s3334_s7 + $0x8] sm:$0xff]  ;;  %v523_v17 = vld [vmem:[%s3329_s2 + $0x10] sm:$0xff]  ;;  %vm1032_vm4 = vcmask 1043456   ;;  %vm1028_vm5 = vcmask 64512  }
  0x11   : > { %s2226_s15 = sshll.u32 %s3375_s25, 4  ;;  %s2227_s16 = sshll.u32 %s3375_s25, 6  ;;  %v611_v10 = vpack.c.bf16 %v596_v9, %v595_v8  ;;  %v524_v18 = vld [vmem:[%s3329_s2 + $0x18] sm:$0xff]  ;;  %v759_v25 = vld [vmem:[%s3330_s3] sm:$0xff]  ;;  %v597_v34 = vld [vmem:[%s3334_s7 + $0x10] sm:$0xff]  ;;  %vm1097_vm6 = vcmask 519168  }
  0x12   : > { %2277 = vmatprep.mubr.msk.bf16.mxu0 %vm539_vm0, %v525_v6  ;;  %s489_s19 = scalar_lea.vmem %s3327_s0, %s2226_s15  ;;  %s2608_s22 = scalar_lea.vmem %s3328_s1, %s2227_s16  ;;  %v526_v22 = vpack.c.bf16 %v524_v18, %v523_v17  ;;  %v2646_v33 = vld [vmem:[%s3336_s9] sm:$0xff]  ;;  %v598_v35 = vld [vmem:[%s3334_s7 + $0x18] sm:$0xff]  ;;  %v600_v37 = vld [vmem:[%s3334_s7 + $0x28] sm:$0xff] }
  0x13   : > { %v2394_v11 = vld [vmem:[%s489_s19] sm:$0xff]   ;;  %v514_v13 = vld [vmem:[%s2608_s22 + $0x8] sm:$0xff]  ;;  %2289 = vmatprep.mubr.msk.bf16.mxu1 %vm623_vm1, %v611_v10  ;;  %v515_v16 = vld [vmem:[%s2608_s22 + $0x10] sm:$0xff]  ;;  %v612_v38 = vpack.c.bf16 %v598_v35, %v597_v34  ;;  %s2228_s24 = sshll.u32 %s3375_s25, 5 }
  0x14   : > { %833 = vperm.xlu1 %2393, %v815_v5   ;;  %823 = vperm.xlu0 %2392, %v813_v7   ;;  %v513_v12 = vld [vmem:[%s2608_s22] sm:$0xff]  ;;  %v2395_v15 = vld [vmem:[%s489_s19 + $0x8] sm:$0xff]   ;;  %v516_v19 = vld [vmem:[%s2608_s22 + $0x18] sm:$0xff]  ;;  %s3300_s14 = scalar_lea.vmem %s3340_s13, %s2228_s24 }
  0x15   : > { %2273 = vmatprep.subr.bf16.mxu0 %v2394_v11  ;;  %v619_v14 = vpack.c.bf16 %v514_v13, %v513_v12  ;;  %v620_v21 = vpack.c.bf16 %v516_v19, %v515_v16  ;;  %v517_v23 = vld [vmem:[%s2608_s22 + $0x20] sm:$0xff]  ;;  %v518_v24 = vld [vmem:[%s2608_s22 + $0x28] sm:$0xff]  ;;  %v519_v28 = vld [vmem:[%s2608_s22 + $0x30] sm:$0xff] }
  0x16   : > { %2274 = vmatpush3.bf16.msra.mxu0 %v2394_v11  ;;  %v621_v27 = vpack.c.bf16 %v518_v24, %v517_v23  ;;  %v520_v29 = vld [vmem:[%s2608_s22 + $0x38] sm:$0xff]  ;;  %v599_v36 = vld [vmem:[%s3334_s7 + $0x20] sm:$0xff]  ;;  %v841_v40 = vld [vmem:[%s3336_s9 + $0x8] sm:$0xff] }
  0x17   : > { %2361 = vmatprep.subr.msk.bf16.mxu1 %vm623_vm1, %v619_v14  ;;  %v649_v20 = vsel %vm623_vm1, %v619_v14, 0  ;;  %2275 = vmatprep.subr.bf16.mxu0 %v2395_v15  ;;  %v652_v26 = vsel %vm623_vm1, %v620_v21, 0  ;;  %v622_v31 = vpack.c.bf16 %v520_v29, %v519_v28  ;;  %v613_v39 = vpack.c.bf16 %v600_v37, %v599_v36  ;;  %v845_v41 = vld [vmem:[%s3337_s10 + $0x8] sm:$0xff]  ;;  %v601_v42 = vld [vmem:[%s3334_s7 + $0x30] sm:$0xff]  ;;  %v602_v43 = vld [vmem:[%s3334_s7 + $0x38] sm:$0xff] }
  0x18   : > { %1162 = vperm.xlu1 %2393, %v813_v7   ;;  %1157 = vperm.xlu0 %2392, %v2575_v1   ;;  %v655_v30 = vsel %vm623_vm1, %v621_v27, 0  ;;  %v844_v44 = vld [vmem:[%s3337_s10] sm:$0xff]  ;;  %v604_v46 = vld [vmem:[%s3334_s7 + $0x48] sm:$0xff]  ;;  %v614_v47 = vpack.c.bf16 %v602_v43, %v601_v42  ;;  %v843_v48 = vld [vmem:[%s3336_s9 + $0x18] sm:$0xff]  ;;  %v3341_v29 = vmov 0.0  }
  0x19   : > { %2282 = vmatpush3.bf16.xpose.msra.mxu1 %v649_v20  ;;  %v658_v32 = vsel %vm623_vm1, %v622_v31, 0  ;;  %v603_v45 = vld [vmem:[%s3334_s7 + $0x40] sm:$0xff]  ;;  %v842_v50 = vld [vmem:[%s3336_s9 + $0x10] sm:$0xff]  ;;  %v847_v51 = vld [vmem:[%s3337_s10 + $0x18] sm:$0xff] }
  0x1a   : > { %2362 = vmatprep.subr.msk.bf16.mxu1 %vm623_vm1, %v620_v21  ;;  %2276 = vmatpush3.bf16.msra.mxu0 %v2395_v15  ;;  %v615_v49 = vpack.c.bf16 %v604_v46, %v603_v45  ;;  %v605_v52 = vld [vmem:[%s3334_s7 + $0x50] sm:$0xff]  ;;  %v606_v53 = vld [vmem:[%s3334_s7 + $0x58] sm:$0xff]  ;;  %v607_v55 = vld [vmem:[%s3334_s7 + $0x60] sm:$0xff] }
  0x1b   : > { %v846_v54 = vld [vmem:[%s3337_s10 + $0x10] sm:$0xff]  ;;  %v608_v56 = vld [vmem:[%s3334_s7 + $0x68] sm:$0xff]  ;;  %v616_v57 = vpack.c.bf16 %v606_v53, %v605_v52  ;;  %v767_v58 = vld [vmem:[%s3332_s5] sm:$0xff]  ;;  %2305 = vmatprep.subr.bf16.mxu0 %v3341_v29 }
  0x1c   : > { %1172 = vperm.xlu1 %2393, %v815_v5   ;;  %1167 = vperm.xlu0 %2392, %v2570_v0   ;;  %v617_v59 = vpack.c.bf16 %v608_v56, %v607_v55  ;;  %v766_v60 = vld [vmem:[%s3331_s4] sm:$0xff]  ;;  %v609_v61 = vld [vmem:[%s3334_s7 + $0x70] sm:$0xff]  ;;  %v610_v62 = vld [vmem:[%s3334_s7 + $0x78] sm:$0xff] }
  0x1d   : > { %2278 = vmatmul.mubr.msk.bf16.vlgmr.msra.gmra.mrb[0].mxu0 %vm539_vm0, %v526_v22  ;;  %v618_v63 = vpack.c.bf16 %v610_v62, %v609_v61 }
  0x1e   : > { %2309 = vmatprep.mubr.msk.bf16.mxu0 %vm2478_vm3, %v3341_v29 }
  0x20   : > { %1483 = vperm.xlu1 %2393, %v2575_v1   ;;  %762 = vperm.xlu0 %2392, %v759_v25  }
  0x21   : > { %2284 = vmatpush3.bf16.xpose.msra.mxu1 %v652_v26 }
  0x22   : > { %2363 = vmatprep.subr.msk.bf16.mxu1 %vm623_vm1, %v621_v27 }
  0x24   : > { %1493 = vperm.xlu1 %2393, %v2570_v0   ;;  %1488 = vperm.xlu0 %2392, %v813_v7  }
  0x28   : > { %1103 = vperm.xlu1 %2393, %v759_v25   ;;  %1498 = vperm.xlu0 %2392, %v815_v5  }
  0x29   : > { %2286 = vmatpush3.bf16.xpose.msra.mxu1 %v655_v30 }
  0x2a   : > { %2364 = vmatprep.subr.msk.bf16.mxu1 %vm623_vm1, %v622_v31 }
  0x2c   : > { %1814 = vperm.xlu1 %2393, %v813_v7   ;;  %1809 = vperm.xlu0 %2392, %v2575_v1   ;;  %v757_v1 = vld [vmem:[%s3339_s12] sm:$0xff] }
  0x30   : > { %1824 = vperm.xlu1 %2393, %v815_v5   ;;  %1819 = vperm.xlu0 %2392, %v2570_v0   ;;  %v758_v0 = vld [vmem:[%s3339_s12 + $0x8] sm:$0xff] }
  0x31   : > { %2288 = vmatpush3.bf16.xpose.msra.mxu1 %v658_v32 }
  0x32   : > { %2355 = vmatprep.subr.bf16.mxu1 %v3341_v29 }
  0x34   : > { %893 = vperm.xlu1 %2393, %v2646_v33   ;;  %1429 = vperm.xlu0 %2392, %v759_v25  }
  0x38   : > { %2290 = vmatmul.mubr.msk.bf16.vlgmr.msra.gmra.mrb[0].mxu1 %vm623_vm1, %v612_v38  ;;  %1755 = vperm.xlu1 %2393, %v759_v25  }
  0x39   : > { %898 = vperm.xlu0 %2392, %v841_v40   ;;  %2293 = vmatprep.mubr.msk.bf16.mxu1 %vm623_vm1, %v613_v39 }
  0x3c   : > { %922 = vperm.xlu1 %2393, %v845_v41  }
  0x3d   : > { %917 = vperm.xlu0 %2392, %v844_v44  }
  0x40   : > { %2294 = vmatmul.mubr.msk.bf16.gmra.mrb[4].mxu1 %vm623_vm1, %v614_v47  ;;  %908 = vperm.xlu1 %2393, %v843_v48  }
  0x41   : > { %903 = vperm.xlu0 %2392, %v842_v50   ;;  %2297 = vmatprep.mubr.msk.bf16.mxu1 %vm623_vm1, %v615_v49 }
  0x44   : > { %932 = vperm.xlu1 %2393, %v847_v51  }
  0x45   : > { %927 = vperm.xlu0 %2392, %v846_v54  }
  0x48   : > { %2298 = vmatmul.mubr.msk.bf16.gmra.mrb[8].mxu1 %vm623_vm1, %v616_v57  ;;  %799 = vperm.xlu1 %2393, %v767_v58  }
  0x49   : > { %793 = vperm.xlu0 %2392, %v766_v60   ;;  %2301 = vmatprep.mubr.msk.bf16.mxu1 %vm623_vm1, %v617_v59 }
  0x4c   : > { %1236 = vperm.xlu1 %2393, %v841_v40  }
  0x4d   : > { %1231 = vperm.xlu0 %2392, %v2646_v33  }
  0x50   : > { %2302 = vmatmul.mubr.msk.bf16.gmra.mrb[12].mxu1 %vm623_vm1, %v618_v63  ;;  %1260 = vperm.xlu1 %2393, %v845_v41  }
  0x51   : > { %1255 = vperm.xlu0 %2392, %v844_v44   ;;  %2357 = vmatprep.mubr.msk.bf16.mxu1 %vm2478_vm3, %v3341_v29 }
  0x54   : > { %1246 = vperm.xlu1 %2393, %v843_v48  }
  0x55   : > { %1241 = vperm.xlu0 %2392, %v842_v50  }
  0x58   : > { %1270 = vperm.xlu1 %2393, %v847_v51  }
  0x59   : > { %1265 = vperm.xlu0 %2392, %v846_v54  }
  0x5c   : > { %1138 = vperm.xlu1 %2393, %v767_v58  }
  0x5d   : > { %1132 = vperm.xlu0 %2392, %v766_v60  }
  0x60   : > { %1562 = vperm.xlu1 %2393, %v841_v40  }
  0x61   : > { %1557 = vperm.xlu0 %2392, %v2646_v33  }
  0x64   : > { %1586 = vperm.xlu1 %2393, %v845_v41  }
  0x65   : > { %1581 = vperm.xlu0 %2392, %v844_v44  }
  0x68   : > { %1572 = vperm.xlu1 %2393, %v843_v48  }
  0x69   : > { %1567 = vperm.xlu0 %2392, %v842_v50  }
  0x6c   : > { %1596 = vperm.xlu1 %2393, %v847_v51  }
  0x6d   : > { %1591 = vperm.xlu0 %2392, %v846_v54  }
  0x70   : > { %1464 = vperm.xlu1 %2393, %v767_v58  }
  0x71   : > { %1458 = vperm.xlu0 %2392, %v766_v60  }
  0x74   : > { %1888 = vperm.xlu1 %2393, %v841_v40  }
  0x75   : > { %1883 = vperm.xlu0 %2392, %v2646_v33  }
  0x78   : > { %1912 = vperm.xlu1 %2393, %v845_v41  }
  0x79   : > { %1907 = vperm.xlu0 %2392, %v844_v44  }
  0x7c   : > { %1893 = vperm.xlu1 %2393, %v842_v50  }
  0x7d   : > { %1784 = vperm.xlu0 %2392, %v766_v60  }
  0x80   : > { %1790 = vperm.xlu1 %2393, %v767_v58  }
  0x81   : > { %1898 = vperm.xlu0 %2392, %v843_v48  }
  0x84   : > { %1922 = vperm.xlu1 %2393, %v847_v51  }
  0x85   : > { %1917 = vperm.xlu0 %2392, %v846_v54  }
  0x88   : > { %1084 = vperm.xlu1 %2393, %v758_v0  }
  0x89   : > { %1079 = vperm.xlu0 %2392, %v757_v1  }
  0x8f   : > { %v2734_v2 = vpop.permute.xlu1 %828  ;;  %v2736_v3 = vpop.permute.xlu0 %818 }
  0x93   : > { %v2738_v4 = vpop.permute.xlu1 %833  ;;  %v2740_v5 = vpop.permute.xlu0 %823 }
  0x97   : > { %v2742_v6 = vpop.permute.xlu1 %1162  ;;  %v2744_v7 = vpop.permute.xlu0 %1157 }
  0x9b   : > { %v2746_v8 = vpop.permute.xlu1 %1172  ;;  %v2748_v9 = vpop.permute.xlu0 %1167 }
  0x9f   : > { %v2750_v10 = vpop.permute.xlu1 %1483  ;;  %v763_v11 = vpop.permute.xlu0 %762 }
  0xa3   : > { %v2752_v12 = vpop.permute.xlu1 %1493  ;;  %v2754_v13 = vpop.permute.xlu0 %1488 }
  0xa7   : > { %v1104_v14 = vpop.permute.xlu1 %1103  ;;  %v2756_v15 = vpop.permute.xlu0 %1498 }
  0xab   : > { %v2758_v16 = vpop.permute.xlu1 %1814  ;;  %v2760_v17 = vpop.permute.xlu0 %1809 }
  0xaf   : > { %v2762_v18 = vpop.permute.xlu1 %1824  ;;  %v2764_v19 = vpop.permute.xlu0 %1819 }
  0xb3   : > { %v2766_v20 = vpop.permute.xlu1 %893  ;;  %v1430_v21 = vpop.permute.xlu0 %1429 }
  0xb7   : > { %v1756_v22 = vpop.permute.xlu1 %1755 }
  0xb8   : > { %v2768_v23 = vpop.permute.xlu0 %898 }
  0xbb   : > { %v2770_v24 = vpop.permute.xlu1 %922 }
  0xbc   : > { %v2772_v25 = vpop.permute.xlu0 %917 }
  0xbf   : > { %v2774_v26 = vpop.permute.xlu1 %908 }
  0xc0   : > { %v2776_v27 = vpop.permute.xlu0 %903 }
  0xc3   : > { %v2778_v28 = vpop.permute.xlu1 %932 }
  0xc4   : > { %v2782_v30 = vpop.permute.xlu0 %927 }
  0xc7   : > { %v2784_v31 = vpop.permute.xlu1 %799 }
  0xc8   : > { %v2786_v32 = vpop.permute.xlu0 %793 }
  0xcb   : > { %v2788_v33 = vpop.permute.xlu1 %1236 }
  0xcc   : > { %v2790_v34 = vpop.permute.xlu0 %1231 }
  0xcf   : > { %v2792_v35 = vpop.permute.xlu1 %1260 }
  0xd0   : > { %v2794_v36 = vpop.permute.xlu0 %1255 }
  0xd3   : > { %v2796_v37 = vpop.permute.xlu1 %1246 }
  0xd4   : > { %v2798_v38 = vpop.permute.xlu0 %1241 }
  0xd7   : > { %v2800_v39 = vpop.permute.xlu1 %1270 }
  0xd8   : > { %3343 = vst [vmem:[#allocation2_spill] sm:$0xff] %v2800_v39  ;;  %v2802_v40 = vpop.permute.xlu0 %1265 }
  0xd9   : > { %3344 = vst [vmem:[#allocation3_spill] sm:$0xff] %v2802_v40 }
  0xdb   : > { %v2804_v42 = vpop.permute.xlu1 %1138 }
  0xdc   : > { %v2808_v53 = vpop.permute.xlu0 %1132 }
  0xdf   : > { %v2812_v59 = vpop.permute.xlu1 %1562 }
  0xe0   : > { %3345 = vst [vmem:[#allocation4_spill] sm:$0xff] %v2812_v59 }
  0xf0   : > { %v2279_v41 = vpop.f32.mrb[0].mxu0 }
  0xf1   : > { %v1432_v43 = vadd.f32 %v2279_v41, %v1430_v21  ;;  %v580_v44 = vpop.f32.mrb[1].mxu0  ;;  %v2818_v21 = vpop.permute.xlu0 %1557 }
  0xf2   : > { %v765_v45 = vadd.f32 %v763_v11, %v580_v44  ;;  %v2280_v46 = vpop.f32.mrb[2].mxu0  ;;  %3346 = vst [vmem:[#allocation5_spill] sm:$0xff] %v2818_v21 }
  0xf3   : > { %v1435_v47 = vsel %vm768_vm2, %v1432_v43, 0.0  ;;  %v1758_v48 = vadd.f32 %v2280_v46, %v1756_v22  ;;  %v583_v49 = vpop.f32.mrb[3].mxu0 }
  0xf4   : > { %v1436_v50 = vrot.slane %v1435_v47, 4  ;;  %v769_v51 = vsel %vm768_vm2, %v765_v45, 0.0  ;;  %v1106_v52 = vadd.f32 %v1104_v14, %v583_v49 }
  0xf5   : > { %v770_v54 = vrot.slane %v769_v51, 4  ;;  %v1761_v55 = vsel %vm768_vm2, %v1758_v48, 0.0 }
  0xf6   : > { %v1437_v56 = vadd.f32 %v1436_v50, %v1435_v47  ;;  %v1762_v57 = vrot.slane %v1761_v55, 4  ;;  %v1109_v58 = vsel %vm768_vm2, %v1106_v52, 0.0  ;;  %v2820_v47 = vpop.permute.xlu1 %1586 }
  0xf7   : > { %v771_v60 = vadd.f32 %v770_v54, %v769_v51  ;;  %v1110_v61 = vrot.slane %v1109_v58, 4  ;;  %3347 = vst [vmem:[#allocation6_spill] sm:$0xff] %v2820_v47 }
  0xf8   : > { %v1438_v62 = vrot.slane %v1437_v56, 2  ;;  %v1763_v63 = vadd.f32 %v1762_v57, %v1761_v55  ;;  %v2822_v57 = vpop.permute.xlu0 %1581 }
  0xf9   : > { %v772_v0 = vrot.slane %v771_v60, 2  ;;  %v1111_v1 = vadd.f32 %v1110_v61, %v1109_v58  ;;  %3348 = vst [vmem:[#allocation7_spill] sm:$0xff] %v2822_v57 }
  0xfa   : > { %v1439_v11 = vadd.f32 %v1438_v62, %v1437_v56  ;;  %v1764_v14 = vrot.slane %v1763_v63, 2  ;;  %v2826_v62 = vpop.permute.xlu1 %1572 }
  0xfb   : > { %v773_v22 = vadd.f32 %v772_v0, %v771_v60  ;;  %v1112_v41 = vrot.slane %v1111_v1, 2  ;;  %3349 = vst [vmem:[#allocation8_spill] sm:$0xff] %v2826_v62 }
  0xfc   : > { %v1440_v44 = vrot.slane %v1439_v11, 1  ;;  %v1765_v46 = vadd.f32 %v1764_v14, %v1763_v63 }
  0xfd   : > { %v774_v49 = vrot.slane %v773_v22, 1  ;;  %v1113_v50 = vadd.f32 %v1112_v41, %v1111_v1 }
  0xfe   : > { %v1441_v51 = vadd.f32 %v1440_v44, %v1439_v11  ;;  %v1766_v54 = vrot.slane %v1765_v46, 1 }
  0xff   : > { %v775_v59 = vadd.f32 %v774_v49, %v773_v22  ;;  %v1114_v29 = vrot.slane %v1113_v50, 1 }
 0x100   : > { %v1442_v39 = vmul.f32 0.125, %v1441_v51  ;;  %v1767_v55 = vadd.f32 %v1766_v54, %v1765_v46  ;;  %v2847_v46 = vpop.permute.xlu1 %1596 }
 0x101   : > { %v777_v56 = vmul.f32 0.125, %v775_v59  ;;  %v1115_v58 = vadd.f32 %v1114_v29, %v1113_v50  ;;  %3351 = vst [vmem:[#allocation10_spill] sm:$0xff] %v2847_v46 }
 0x102   : > { %v2824_v61 = vsub.f32 %v1432_v43, %v1442_v39  ;;  %v1768_v60 = vmul.f32 0.125, %v1767_v55  ;;  %v2841_v43 = vpop.permute.xlu0 %1567 }
 0x103   : > { %v2828_v63 = vsub.f32 %v765_v45, %v777_v56  ;;  %v1116_v0 = vmul.f32 0.125, %v1115_v58  ;;  %3350 = vst [vmem:[#allocation9_spill] sm:$0xff] %v2841_v43 }
 0x104   : > { %v1444_v1 = vmul.f32 %v2824_v61, %v2824_v61  ;;  %v2832_v11 = vsub.f32 %v1758_v48, %v1768_v60 }
 0x105   : > { %v779_v14 = vmul.f32 %v2828_v63, %v2828_v63  ;;  %v2836_v22 = vsub.f32 %v1106_v52, %v1116_v0 }
 0x106   : > { %v1445_v29 = vsel %vm768_vm2, %v1444_v1, 0.0  ;;  %v1770_v39 = vmul.f32 %v2832_v11, %v2832_v11  ;;  %v2853_v43 = vpop.permute.xlu0 %1591 }
 0x107   : > { %v1446_v45 = vrot.slane %v1445_v29, 4  ;;  %v780_v59 = vsel %vm768_vm2, %v779_v14, 0.0  ;;  %v1118_v41 = vmul.f32 %v2836_v22, %v2836_v22  ;;  %3352 = vst [vmem:[#allocation11_spill] sm:$0xff] %v2853_v43 }
 0x108   : > { %v781_v48 = vrot.slane %v780_v59, 4  ;;  %v1771_v44 = vsel %vm768_vm2, %v1770_v39, 0.0 }
 0x109   : > { %v1447_v52 = vadd.f32 %v1446_v45, %v1445_v29  ;;  %v1772_v49 = vrot.slane %v1771_v44, 4  ;;  %v1119_v50 = vsel %vm768_vm2, %v1118_v41, 0.0 }
 0x10a   : > { %v782_v51 = vadd.f32 %v781_v48, %v780_v59  ;;  %v1120_v54 = vrot.slane %v1119_v50, 4  ;;  %v2861_v48 = vpop.permute.xlu1 %1464 }
 0x10b   : > { %v2291_v55 = vpop.f32.mrb[0].mxu1  ;;  %v1448_v56 = vrot.slane %v1447_v52, 2  ;;  %v1773_v58 = vadd.f32 %v1772_v49, %v1771_v44 }
 0x10c   : > { %v694_v60 = vpop.f32.mrb[1].mxu1  ;;  %v783_v0 = vrot.slane %v782_v51, 2  ;;  %v1121_v1 = vadd.f32 %v1120_v54, %v1119_v50  ;;  %v2856_v59 = vadd.f32 %v2291_v55, %v2734_v2 }
 0x10d   : > { %v2851_v14 = vadd.f32 %v2736_v3, %v694_v60  ;;  %v2292_v62 = vpop.f32.mrb[2].mxu1  ;;  %v1449_v39 = vadd.f32 %v1448_v56, %v1447_v52  ;;  %v1774_v46 = vrot.slane %v1773_v58, 2 }
 0x10e   : > { %v697_v29 = vpop.f32.mrb[3].mxu1  ;;  %v784_v45 = vadd.f32 %v783_v0, %v782_v51  ;;  %v1122_v47 = vrot.slane %v1121_v1, 2  ;;  %v2864_v3 = vadd.f32 %v2292_v62, %v2738_v4  ;;  %v851_v0 = vsel %vm768_vm2, %v2856_v59, 0.0 }
 0x10f   : > { %v2859_v41 = vadd.f32 %v2740_v5, %v697_v29  ;;  %v1450_v44 = vrot.slane %v1449_v39, 1  ;;  %v1775_v49 = vadd.f32 %v1774_v46, %v1773_v58  ;;  %v848_v52 = vsel %vm768_vm2, %v2851_v14, 0.0  ;;  %v2872_v58 = vpop.permute.xlu0 %1458 }
 0x110   : > { %v785_v50 = vrot.slane %v784_v45, 1  ;;  %v1123_v54 = vadd.f32 %v1122_v47, %v1121_v1  ;;  %v853_v57 = vsel %vm768_vm2, %v2864_v3, 0.0 }
 0x111   : > { %v849_v51 = vsel %vm768_vm2, %v2859_v41, 0.0  ;;  %v1451_v2 = vadd.f32 %v1450_v44, %v1449_v39  ;;  %v1776_v55 = vrot.slane %v1775_v49, 1 }
 0x112   : > { %v850_v56 = vadd.f32 %v849_v51, %v848_v52  ;;  %v786_v5 = vadd.f32 %v785_v50, %v784_v45  ;;  %v1124_v60 = vrot.slane %v1123_v54, 1  ;;  %v2879_v50 = vpop.permute.xlu1 %1888 }
 0x113   : > { %v2295_v46 = vpop.f32.mrb[4].mxu1  ;;  %v1452_v4 = vmul.f32 0.125, %v1451_v2  ;;  %v1777_v62 = vadd.f32 %v1776_v55, %v1775_v49 }
 0x114   : > { %v852_v47 = vadd.f32 %v851_v0, %v850_v56  ;;  %v710_v1 = vpop.f32.mrb[5].mxu1  ;;  %v787_v29 = vmul.f32 0.125, %v786_v5  ;;  %v1125_v43 = vadd.f32 %v1124_v60, %v1123_v54  ;;  %v2882_v49 = vadd.f32 %v2295_v46, %v2748_v9  ;;  %v2889_v60 = vpop.permute.xlu0 %1883 }
 0x115   : > { %v2877_v39 = vadd.f32 %v2744_v7, %v710_v1  ;;  %v2296_v45 = vpop.f32.mrb[6].mxu1  ;;  %v1453_v44 = vadd.f32 1e-06, %v1452_v4  ;;  %v1778_v52 = vmul.f32 0.125, %v1777_v62 }
 0x116   : > { %v854_v51 = vadd.f32 %v853_v57, %v852_v47  ;;  %v713_v21 = vpop.f32.mrb[7].mxu1  ;;  %v788_v40 = vadd.f32 1e-06, %v787_v29  ;;  %v1126_v2 = vmul.f32 0.125, %v1125_v43  ;;  %v2892_v43 = vadd.f32 %v2296_v45, %v2746_v8 }
 0x117   : > { %2396 = vrsqrt.f32 %v1453_v44  ;;  %v1779_v54 = vadd.f32 1e-06, %v1778_v52  ;;  %v2885_v56 = vadd.f32 %v2742_v6, %v713_v21  ;;  %v1187_v5 = vsel %vm768_vm2, %v2877_v39, 0.0  ;;  %v2896_v6 = vpop.permute.xlu1 %1912 }
 0x118   : > { %v855_v55 = vrot.slane %v854_v51, 4  ;;  %2398 = vrsqrt.f32 %v788_v40  ;;  %v1127_v7 = vadd.f32 1e-06, %v1126_v2  ;;  %3353 = vst [vmem:[#allocation12_spill] sm:$0xff] %v2896_v6  ;;  %v1190_v21 = vsel %vm768_vm2, %v2882_v49, 0.0  ;;  %v2911_v2 = vpop.permute.xlu0 %1907 }
 0x119   : > { %2400 = vrsqrt.f32 %v1779_v54  ;;  %v1188_v9 = vsel %vm768_vm2, %v2885_v56, 0.0  ;;  %v1192_v29 = vsel %vm768_vm2, %v2892_v43, 0.0  ;;  %3354 = vst [vmem:[#allocation13_spill] sm:$0xff] %v2911_v2 }
 0x11a   : > { %v856_v57 = vadd.f32 %v855_v55, %v854_v51  ;;  %2402 = vrsqrt.f32 %v1127_v7  ;;  %v1189_v0 = vadd.f32 %v1188_v9, %v1187_v5 }
 0x11b   : > { %v2299_v46 = vpop.f32.mrb[8].mxu1 }
 0x11c   : > { %v857_v40 = vrot.slane %v856_v57, 2  ;;  %v726_v4 = vpop.f32.mrb[9].mxu1  ;;  %v1191_v62 = vadd.f32 %v1190_v21, %v1189_v0  ;;  %v2906_v52 = vadd.f32 %v2299_v46, %v2752_v12 }
 0x11d   : > { %v2901_v47 = vadd.f32 %v2750_v10, %v726_v4  ;;  %v2300_v1 = vpop.f32.mrb[10].mxu1 }
 0x11e   : > { %v858_v8 = vadd.f32 %v857_v40, %v856_v57  ;;  %v729_v45 = vpop.f32.mrb[11].mxu1  ;;  %v1193_v44 = vadd.f32 %v1192_v29, %v1191_v62  ;;  %v2917_v57 = vpop.permute.xlu1 %1893  ;;  %v1516_v40 = vsel %vm768_vm2, %v2906_v52, 0.0 }
 0x11f   : > { %v2909_v51 = vadd.f32 %v2754_v13, %v729_v45  ;;  %v1513_v10 = vsel %vm768_vm2, %v2901_v47, 0.0  ;;  %3355 = vst [vmem:[#allocation14_spill] sm:$0xff] %v2917_v57  ;;  %v2924_v45 = vadd.f32 %v2300_v1, %v2756_v15 }
 0x120   : > { %v859_v54 = vrot.slane %v858_v8, 1  ;;  %v1194_v55 = vrot.slane %v1193_v44, 4 }
 0x121   : > { %v1514_v7 = vsel %vm768_vm2, %v2909_v51, 0.0  ;;  %v2397_v5 = vpop.eup %2396 }
 0x122   : > { %v860_v9 = vadd.f32 %v859_v54, %v858_v8  ;;  %v1515_v0 = vadd.f32 %v1514_v7, %v1513_v10  ;;  %v2399_v12 = vpop.eup %2398  ;;  %v1455_v46 = vmul.f32 %v2397_v5, %v2824_v61  ;;  %v1195_v13 = vadd.f32 %v1194_v55, %v1193_v44  ;;  %v1785_v10 = vpop.permute.xlu0 %1784 }
 0x123   : > { %v2303_v21 = vpop.f32.mrb[12].mxu1  ;;  %v2401_v4 = vpop.eup %2400  ;;  %v790_v62 = vmul.f32 %v2399_v12, %v2828_v63 }
 0x124   : > { %v862_v29 = vmul.f32 0.03125, %v860_v9  ;;  %v1517_v2 = vadd.f32 %v1516_v40, %v1515_v0  ;;  %v742_v6 = vpop.f32.mrb[13].mxu1  ;;  %v2403_v57 = vpop.eup %2402  ;;  %v1461_v8 = vmul.f32 %v2872_v58, %v1455_v46  ;;  %v1781_v54 = vmul.f32 %v2401_v4, %v2832_v11 }
 0x125   : > { %v1196_v61 = vrot.slane %v1195_v13, 2  ;;  %v2304_v44 = vpop.f32.mrb[14].mxu1  ;;  %v1129_v55 = vmul.f32 %v2403_v57, %v2836_v22  ;;  %v796_v22 = vmul.f32 %v2786_v32, %v790_v62  ;;  %v1791_v57 = vpop.permute.xlu1 %1790 }
 0x126   : > { %v2930_v7 = vsub.f32 %v2851_v14, %v862_v29  ;;  %v2933_v63 = vsub.f32 %v2859_v41, %v862_v29  ;;  %v745_v15 = vpop.f32.mrb[15].mxu1  ;;  %v2936_v1 = vadd.f32 %v2861_v48, %v1461_v8  ;;  %v1787_v5 = vmul.f32 %v1785_v10, %v1781_v54 }
 0x127   : > { %v2939_v58 = vsub.f32 %v2856_v59, %v862_v29  ;;  %v2942_v11 = vsub.f32 %v2864_v3, %v862_v29  ;;  %v1518_v48 = vsel %vm768_vm2, %v2924_v45, 0.0  ;;  %v1135_v9 = vmul.f32 %v2808_v53, %v1129_v55 }
 0x128   : > { %v867_v14 = vmul.f32 %v2930_v7, %v2930_v7  ;;  %v868_v41 = vmul.f32 %v2933_v63, %v2933_v63  ;;  %v2952_v0 = vadd.f32 %v1791_v57, %v1787_v5  ;;  %v1197_v3 = vadd.f32 %v1196_v61, %v1195_v13 }
 0x129   : > { %v869_v59 = vmul.f32 %v2939_v58, %v2939_v58  ;;  %v870_v32 = vmul.f32 %v2942_v11, %v2942_v11  ;;  %v1519_v40 = vadd.f32 %v1518_v48, %v1517_v2  ;;  %v2962_v29 = vadd.f32 %v2303_v21, %v2764_v19 }
 0x12a   : > { %v871_v12 = vsel %vm768_vm2, %v867_v14, 0.0  ;;  %v872_v46 = vsel %vm768_vm2, %v868_v41, 0.0  ;;  %v1795_v4 = vmul.f32 0.044715, %v2952_v0  ;;  %v2965_v53 = vadd.f32 %v2760_v17, %v742_v6 }
 0x12b   : > { %v873_v62 = vadd.f32 %v872_v46, %v871_v12  ;;  %v2968_v8 = vadd.f32 %v2784_v31, %v796_v22  ;;  %v874_v13 = vsel %vm768_vm2, %v869_v59, 0.0  ;;  %v1198_v54 = vrot.slane %v1197_v3, 1 }
 0x12c   : > { %v1520_v61 = vrot.slane %v1519_v40, 4  ;;  %v1796_v55 = vmul.f32 %v1795_v4, %v2952_v0  ;;  %v2973_v2 = vadd.f32 %v2304_v44, %v2762_v18  ;;  %v2976_v5 = vadd.f32 %v2758_v16, %v745_v15 }
 0x12d   : > { %v875_v10 = vadd.f32 %v874_v13, %v873_v62  ;;  %v2979_v19 = vadd.f32 %v2804_v42, %v1135_v9  ;;  %v876_v17 = vsel %vm768_vm2, %v870_v32, 0.0  ;;  %v1199_v31 = vadd.f32 %v1198_v54, %v1197_v3 }
 0x12e   : > { %v1521_v6 = vadd.f32 %v1520_v61, %v1519_v40  ;;  %v1797_v21 = vmul.f32 %v1796_v55, %v2952_v0  ;;  %v1839_v57 = vsel %vm768_vm2, %v2965_v53, 0.0  ;;  %v1840_v18 = vsel %vm768_vm2, %v2976_v5, 0.0 }
 0x12f   : > { %v877_v22 = vadd.f32 %v876_v17, %v875_v10  ;;  %v1200_v44 = vmul.f32 0.03125, %v1199_v31  ;;  %v1842_v16 = vsel %vm768_vm2, %v2962_v29, 0.0  ;;  %v1841_v42 = vadd.f32 %v1840_v18, %v1839_v57 }
 0x130   : > { %v1522_v14 = vrot.slane %v1521_v6, 2  ;;  %v1844_v41 = vsel %vm768_vm2, %v2973_v2, 0.0  ;;  %v1798_v48 = vadd.f32 %v1797_v21, %v2952_v0  ;;  %v804_v9 = vmul.f32 0.044715, %v2968_v8 }
 0x131   : > { %v878_v15 = vrot.slane %v877_v22, 4  ;;  %v2994_v59 = vsub.f32 %v2877_v39, %v1200_v44  ;;  %v2997_v3 = vsub.f32 %v2885_v56, %v1200_v44  ;;  %v3000_v32 = vsub.f32 %v2882_v49, %v1200_v44 }
 0x132   : > { %v3003_v12 = vsub.f32 %v2892_v43, %v1200_v44  ;;  %v1523_v40 = vadd.f32 %v1522_v14, %v1521_v6  ;;  %v1843_v4 = vadd.f32 %v1842_v16, %v1841_v42  ;;  %v1799_v62 = vmul.f32 0.7978846, %v1798_v48 }
 0x133   : > { %v879_v46 = vadd.f32 %v878_v15, %v877_v22  ;;  %v1205_v13 = vmul.f32 %v2994_v59, %v2994_v59  ;;  %v1206_v39 = vmul.f32 %v2997_v3, %v2997_v3  ;;  %v1207_v56 = vmul.f32 %v3000_v32, %v3000_v32 }
 0x134   : > { %v1143_v54 = vmul.f32 0.044715, %v2979_v19  ;;  %v1524_v61 = vrot.slane %v1523_v40, 1  ;;  %v1845_v55 = vadd.f32 %v1844_v41, %v1843_v4  ;;  %2404 = vtanh.f32 %v1799_v62 }
 0x135   : > { %v880_v49 = vrot.slane %v879_v46, 2  ;;  %v1208_v43 = vmul.f32 %v3003_v12, %v3003_v12  ;;  %v1209_v10 = vsel %vm768_vm2, %v1205_v13, 0.0  ;;  %v1210_v17 = vsel %vm768_vm2, %v1206_v39, 0.0 }
 0x136   : > { %v1211_v6 = vadd.f32 %v1210_v17, %v1209_v10  ;;  %v1525_v21 = vadd.f32 %v1524_v61, %v1523_v40  ;;  %v1846_v22 = vrot.slane %v1845_v55, 4  ;;  %v1212_v57 = vsel %vm768_vm2, %v1207_v56, 0.0 }
 0x137   : > { %v881_v31 = vadd.f32 %v880_v49, %v879_v46  ;;  %v805_v18 = vmul.f32 %v804_v9, %v2968_v8  ;;  %v1144_v44 = vmul.f32 %v1143_v54, %v2979_v19  ;;  %v1214_v41 = vsel %vm768_vm2, %v1208_v43, 0.0 }
 0x138   : > { %v1213_v16 = vadd.f32 %v1212_v57, %v1211_v6  ;;  %v1526_v42 = vmul.f32 0.03125, %v1525_v21  ;;  %v1847_v15 = vadd.f32 %v1846_v22, %v1845_v55  ;;  %v1794_v48 = vmul.f32 0.5, %v2952_v0 }
 0x139   : > { %v882_v14 = vrot.slane %v881_v31, 1  ;;  %v806_v4 = vmul.f32 %v805_v18, %v2968_v8  ;;  %v1145_v46 = vmul.f32 %v1144_v44, %v2979_v19 }
 0x13a   : > { %v1215_v62 = vadd.f32 %v1214_v41, %v1213_v16  ;;  %v3024_v13 = vsub.f32 %v2901_v47, %v1526_v42  ;;  %v3027_v9 = vsub.f32 %v2909_v51, %v1526_v42  ;;  %v3030_v39 = vsub.f32 %v2906_v52, %v1526_v42 }
 0x13b   : > { %v883_v40 = vadd.f32 %v882_v14, %v881_v31  ;;  %v3033_v56 = vsub.f32 %v2924_v45, %v1526_v42  ;;  %v1848_v54 = vrot.slane %v1847_v15, 2  ;;  %v807_v0 = vadd.f32 %v806_v4, %v2968_v8 }
 0x13c   : > { %v1216_v61 = vrot.slane %v1215_v62, 4  ;;  %v1531_v55 = vmul.f32 %v3024_v13, %v3024_v13  ;;  %v1532_v47 = vmul.f32 %v3027_v9, %v3027_v9  ;;  %v1533_v51 = vmul.f32 %v3030_v39, %v3030_v39 }
 0x13d   : > { %v884_v49 = vmul.f32 0.03125, %v883_v40  ;;  %v1534_v52 = vmul.f32 %v3033_v56, %v3033_v56  ;;  %v1849_v43 = vadd.f32 %v1848_v54, %v1847_v15  ;;  %v1469_v45 = vmul.f32 0.044715, %v2936_v1 }
 0x13e   : > { %v2405_v10 = vpop.eup %2404  ;;  %v1217_v31 = vadd.f32 %v1216_v61, %v1215_v62  ;;  %v1535_v6 = vsel %vm768_vm2, %v1531_v55, 0.0  ;;  %v1536_v21 = vsel %vm768_vm2, %v1532_v47, 0.0  ;;  %v1538_v57 = vsel %vm768_vm2, %v1533_v51, 0.0 }
 0x13f   : > { %v885_v17 = vadd.f32 1e-06, %v884_v49  ;;  %v1537_v22 = vadd.f32 %v1536_v21, %v1535_v6  ;;  %v1850_v18 = vrot.slane %v1849_v43, 1  ;;  %v808_v44 = vmul.f32 0.7978846, %v807_v0 }
 0x140   : > { %v1218_v14 = vrot.slane %v1217_v31, 2  ;;  %v1801_v16 = vadd.f32 1.0, %v2405_v10  ;;  %v1146_v42 = vadd.f32 %v1145_v46, %v2979_v19  ;;  %v1470_v4 = vmul.f32 %v1469_v45, %v2936_v1 }
 0x141   : > { %2406 = vrsqrt.f32 %v885_v17  ;;  %v1539_v15 = vadd.f32 %v1538_v57, %v1537_v22  ;;  %v1851_v41 = vadd.f32 %v1850_v18, %v1849_v43  ;;  %v1540_v62 = vsel %vm768_vm2, %v1534_v52, 0.0  ;;  %v976_v52 = vld [vmem:[%s3333_s6 + $0x8] sm:$0xff] }
 0x142   : > { %v1219_v40 = vadd.f32 %v1218_v14, %v1217_v31  ;;  %v1802_v54 = vmul.f32 %v1801_v16, %v1794_v48  ;;  %v1147_v49 = vmul.f32 0.7978846, %v1146_v42  ;;  %2408 = vtanh.f32 %v808_v44  ;;  %v975_v48 = vld [vmem:[%s3333_s6] sm:$0xff] }
 0x143   : > { %v1541_v61 = vadd.f32 %v1540_v62, %v1539_v15  ;;  %v1852_v55 = vmul.f32 0.03125, %v1851_v41  ;;  %v3079_v57 = vpack.c.bf16 %v976_v52, %v975_v48 }
 0x144   : > { %v1220_v47 = vrot.slane %v1219_v40, 1  ;;  %v1968_v0 = vpack.c.bf16 %v1802_v54, %v1802_v54  ;;  %2410 = vtanh.f32 %v1147_v49 }
 0x145   : > { %v1542_v51 = vrot.slane %v1541_v61, 4  ;;  %v3052_v10 = vsub.f32 %v2965_v53, %v1852_v55  ;;  %v3055_v46 = vsub.f32 %v2976_v5, %v1852_v55  ;;  %v3058_v43 = vsub.f32 %v2962_v29, %v1852_v55 }
 0x146   : > { %v1221_v45 = vadd.f32 %v1220_v47, %v1219_v40  ;;  %v3067_v17 = vsub.f32 %v2973_v2, %v1852_v55  ;;  %v2022_v53 = vsel %vm1032_vm4, %v1968_v0, 0  ;;  %v1471_v5 = vmul.f32 %v1470_v4, %v2936_v1 }
 0x147   : > { %v1543_v31 = vadd.f32 %v1542_v51, %v1541_v61  ;;  %v1857_v29 = vmul.f32 %v3052_v10, %v3052_v10  ;;  %v1858_v6 = vmul.f32 %v3055_v46, %v3055_v46  ;;  %v1859_v21 = vmul.f32 %v3058_v43, %v3058_v43  ;;  %2356 = vmatpush3.bf16.msra.mxu1 %v2022_v53 }
 0x148   : > { %v1222_v22 = vmul.f32 0.03125, %v1221_v45  ;;  %v1860_v2 = vmul.f32 %v3067_v17, %v3067_v17  ;;  %v1472_v4 = vadd.f32 %v1471_v5, %v2936_v1 }
 0x149   : > { %v1544_v18 = vrot.slane %v1543_v31, 2  ;;  %v1861_v44 = vsel %vm768_vm2, %v1857_v29, 0.0  ;;  %v1862_v14 = vsel %vm768_vm2, %v1858_v6, 0.0  ;;  %v1864_v41 = vsel %vm768_vm2, %v1859_v21, 0.0 }
 0x14a   : > { %v1223_v42 = vadd.f32 1e-06, %v1222_v22  ;;  %v1863_v15 = vadd.f32 %v1862_v14, %v1861_v44  ;;  %2358 = vmatmul.mubr.msk.bf16.vlgmr.msra.gmra.mrb[16].mxu1 %vm1028_vm5, %v3079_v57  ;;  %v1866_v47 = vsel %vm768_vm2, %v1860_v2, 0.0  ;;  %v1473_v6 = vmul.f32 0.7978846, %v1472_v4 }
 0x14b   : > { %v2407_v16 = vpop.eup %2406  ;;  %v1545_v61 = vadd.f32 %v1544_v18, %v1543_v31 }
 0x14c   : > { %v887_v40 = vmul.f32 %v2407_v16, %v2930_v7  ;;  %v888_v62 = vmul.f32 %v2407_v16, %v2933_v63  ;;  %v889_v54 = vmul.f32 %v2407_v16, %v2939_v58  ;;  %v890_v49 = vmul.f32 %v2407_v16, %v2942_v11  ;;  %v2409_v0 = vpop.eup %2408  ;;  %v979_v58 = vld [vmem:[%s3338_s11] sm:$0xff]  ;;  %v980_v11 = vld [vmem:[%s3338_s11 + $0x8] sm:$0xff] }
 0x14d   : > { %2412 = vrsqrt.f32 %v1223_v42  ;;  %v1865_v55 = vadd.f32 %v1864_v41, %v1863_v15  ;;  %v1546_v63 = vrot.slane %v1545_v61, 1  ;;  %v3110_v2 = vpack.c.bf16 %v980_v11, %v979_v58 }
 0x14e   : > { %v911_v51 = vmul.f32 %v2766_v20, %v887_v40  ;;  %v912_v48 = vmul.f32 %v2768_v23, %v888_v62  ;;  %v913_v52 = vmul.f32 %v2776_v27, %v889_v54  ;;  %v914_v7 = vmul.f32 %v2774_v26, %v890_v49  ;;  %v2411_v45 = vpop.eup %2410 }
 0x14f   : > { %v1867_v53 = vadd.f32 %v1866_v47, %v1865_v55  ;;  %v1547_v27 = vadd.f32 %v1546_v63, %v1545_v61  ;;  %v1149_v29 = vadd.f32 1.0, %v2411_v45  ;;  %v810_v18 = vadd.f32 1.0, %v2409_v0 }
 0x150   : > { %v935_v5 = vadd.f32 %v2772_v25, %v911_v51  ;;  %v936_v20 = vadd.f32 %v2770_v24, %v912_v48  ;;  %v3105_v23 = vadd.f32 %v2782_v30, %v913_v52  ;;  %v3108_v26 = vadd.f32 %v2778_v28, %v914_v7 }
 0x151   : > { %v1868_v31 = vrot.slane %v1867_v53, 4  ;;  %v1548_v44 = vmul.f32 0.03125, %v1547_v27  ;;  %v803_v25 = vmul.f32 0.5, %v2968_v8  ;;  %v1142_v24 = vmul.f32 0.5, %v2979_v19 }
 0x152   : > { %v944_v21 = vmul.f32 0.044715, %v936_v20  ;;  %v943_v22 = vmul.f32 0.044715, %v935_v5  ;;  %v945_v28 = vmul.f32 0.044715, %v3105_v23  ;;  %2414 = vtanh.f32 %v1473_v6 }
 0x153   : > { %v1869_v14 = vadd.f32 %v1868_v31, %v1867_v53  ;;  %v946_v42 = vmul.f32 0.044715, %v3108_v26  ;;  %v1549_v15 = vadd.f32 1e-06, %v1548_v44  ;;  %v1150_v4 = vmul.f32 %v1149_v29, %v1142_v24  ;;  %v3356_v6 = vld [vmem:[#allocation3_spill] sm:$0xff] }
 0x154   : > { %v947_v30 = vmul.f32 %v943_v22, %v935_v5  ;;  %v948_v16 = vmul.f32 %v944_v21, %v936_v20  ;;  %v949_v54 = vmul.f32 %v945_v28, %v3105_v23  ;;  %v3117_v49 = vmul.f32 %v810_v18, %v803_v25 }
 0x155   : > { %v1870_v41 = vrot.slane %v1869_v14, 2  ;;  %2416 = vrsqrt.f32 %v1549_v15  ;;  %v950_v19 = vmul.f32 %v946_v42, %v3108_v26  ;;  %v1316_v55 = vpack.c.bf16 %v1150_v4, %v1150_v4 }
 0x156   : > { %v951_v40 = vmul.f32 %v947_v30, %v935_v5  ;;  %v952_v62 = vmul.f32 %v948_v16, %v936_v20  ;;  %v953_v63 = vmul.f32 %v949_v54, %v3105_v23  ;;  %v939_v25 = vmul.f32 0.5, %v935_v5 }
 0x157   : > { %v2413_v61 = vpop.eup %2412  ;;  %v1871_v8 = vadd.f32 %v1870_v41, %v1869_v14  ;;  %v940_v24 = vmul.f32 0.5, %v936_v20  ;;  %v3147_v16 = vmul.f32 0.5, %v3105_v23 }
 0x158   : > { %v1225_v47 = vmul.f32 %v2413_v61, %v2994_v59  ;;  %v1226_v0 = vmul.f32 %v2413_v61, %v2997_v3  ;;  %v1227_v51 = vmul.f32 %v2413_v61, %v3000_v32  ;;  %v1228_v48 = vmul.f32 %v2413_v61, %v3003_v12 }
 0x159   : > { %v1872_v52 = vrot.slane %v1871_v8, 1  ;;  %v955_v7 = vadd.f32 %v951_v40, %v935_v5  ;;  %v956_v45 = vadd.f32 %v952_v62, %v936_v20  ;;  %v954_v32 = vmul.f32 %v950_v19, %v3108_v26 }
 0x15a   : > { %v1249_v53 = vmul.f32 %v2790_v34, %v1225_v47  ;;  %v1250_v58 = vmul.f32 %v2788_v33, %v1226_v0  ;;  %v1251_v11 = vmul.f32 %v2798_v38, %v1227_v51  ;;  %v1252_v27 = vmul.f32 %v2796_v37, %v1228_v48  ;;  %v3357_v34 = vld [vmem:[#allocation2_spill] sm:$0xff]  ;;  %v3359_v47 = vld [vmem:[#allocation4_spill] sm:$0xff]  ;;  %v3360_v51 = vld [vmem:[#allocation7_spill] sm:$0xff] }
 0x15b   : > { %v1873_v59 = vadd.f32 %v1872_v52, %v1871_v8  ;;  %v959_v31 = vmul.f32 0.7978846, %v955_v7  ;;  %v960_v3 = vmul.f32 0.7978846, %v956_v45  ;;  %v957_v37 = vadd.f32 %v953_v63, %v3105_v23  ;;  %v3358_v8 = vld [vmem:[#allocation5_spill] sm:$0xff]  ;;  %v3361_v52 = vld [vmem:[#allocation6_spill] sm:$0xff] }
 0x15c   : > { %v1273_v12 = vadd.f32 %v2794_v36, %v1249_v53  ;;  %v3132_v29 = vadd.f32 %v2792_v35, %v1250_v58  ;;  %v3135_v21 = vadd.f32 %v3356_v6, %v1251_v11  ;;  %v3138_v22 = vadd.f32 %v3357_v34, %v1252_v27  ;;  %v2415_v44 = vpop.eup %2414 }
 0x15d   : > { %v1874_v33 = vmul.f32 0.03125, %v1873_v59  ;;  %2418 = vtanh.f32 %v959_v31  ;;  %v958_v38 = vadd.f32 %v954_v32, %v3108_v26  ;;  %v978_v36 = vpack.c.bf16 %v3117_v49, %v3117_v49  ;;  %v3362_v31 = vld [vmem:[#allocation9_spill] sm:$0xff] }
 0x15e   : > { %v1282_v18 = vmul.f32 0.044715, %v3132_v29  ;;  %2420 = vtanh.f32 %v960_v3  ;;  %v1468_v35 = vmul.f32 0.5, %v2936_v1  ;;  %v961_v30 = vmul.f32 0.7978846, %v957_v37 }
 0x15f   : > { %v1875_v14 = vadd.f32 1e-06, %v1874_v33  ;;  %v962_v28 = vmul.f32 0.7978846, %v958_v38  ;;  %v1281_v42 = vmul.f32 0.044715, %v1273_v12  ;;  %v2417_v41 = vpop.eup %2416 }
 0x160   : > { %v1286_v15 = vmul.f32 %v1282_v18, %v3132_v29  ;;  %v1283_v4 = vmul.f32 0.044715, %v3135_v21  ;;  %v1284_v40 = vmul.f32 0.044715, %v3138_v22  ;;  %v3153_v1 = vsel %vm1032_vm4, %v1316_v55, 0  ;;  %v3363_v18 = vld [vmem:[#allocation8_spill] sm:$0xff] }
 0x161   : > { %2422 = vrsqrt.f32 %v1875_v14  ;;  %v1551_v5 = vmul.f32 %v2417_v41, %v3024_v13  ;;  %v1552_v20 = vmul.f32 %v2417_v41, %v3027_v9  ;;  %v1553_v23 = vmul.f32 %v2417_v41, %v3030_v39 }
 0x162   : > { %v1554_v62 = vmul.f32 %v2417_v41, %v3033_v56  ;;  %2424 = vtanh.f32 %v961_v30  ;;  %v1285_v54 = vmul.f32 %v1281_v42, %v1273_v12  ;;  %v1290_v49 = vmul.f32 %v1286_v15, %v3132_v29 }
 0x163   : > { %v1287_v61 = vmul.f32 %v1283_v4, %v3135_v21  ;;  %v1575_v19 = vmul.f32 %v3358_v8, %v1551_v5  ;;  %v1576_v0 = vmul.f32 %v3359_v47, %v1552_v20  ;;  %v3164_v55 = vmul.f32 0.5, %v3108_v26  ;;  %v3366_v47 = vld [vmem:[#allocation14_spill] sm:$0xff] }
 0x164   : > { %v1475_v13 = vadd.f32 1.0, %v2415_v44  ;;  %2426 = vtanh.f32 %v962_v28  ;;  %v1289_v9 = vmul.f32 %v1285_v54, %v1273_v12  ;;  %v1294_v39 = vadd.f32 %v1290_v49, %v3132_v29  ;;  %v3365_v49 = vld [vmem:[#allocation10_spill] sm:$0xff] }
 0x165   : > { %v1288_v56 = vmul.f32 %v1284_v40, %v3138_v22  ;;  %v3169_v48 = vadd.f32 %v3360_v51, %v1575_v19  ;;  %v3172_v7 = vadd.f32 %v3361_v52, %v1576_v0  ;;  %v3175_v45 = vsel %vm1032_vm4, %v978_v36, 0 }
 0x166   : > { %v3177_v63 = vmul.f32 0.5, %v1273_v12  ;;  %v1293_v53 = vadd.f32 %v1289_v9, %v1273_v12  ;;  %v1298_v58 = vmul.f32 0.7978846, %v1294_v39  ;;  %v1291_v11 = vmul.f32 %v1287_v61, %v3135_v21  ;;  %v3367_v9 = vld [vmem:[#allocation12_spill] sm:$0xff] }
 0x167   : > { %v2419_v26 = vpop.eup %2418  ;;  %v1292_v27 = vmul.f32 %v1288_v56, %v3138_v22  ;;  %v1577_v3 = vmul.f32 %v3362_v31, %v1553_v23  ;;  %v1608_v32 = vmul.f32 0.044715, %v3172_v7  ;;  %v1476_v34 = vmul.f32 %v1475_v13, %v1468_v35 }
 0x168   : > { %v2421_v59 = vpop.eup %2420  ;;  %v967_v6 = vadd.f32 1.0, %v2419_v26  ;;  %v1297_v37 = vmul.f32 0.7978846, %v1293_v53  ;;  %2428 = vtanh.f32 %v1298_v58  ;;  %v1295_v38 = vadd.f32 %v1291_v11, %v3135_v21  ;;  %v3369_v53 = vld [vmem:[#allocation13_spill] sm:$0xff] }
 0x169   : > { %v968_v33 = vadd.f32 1.0, %v2421_v59  ;;  %v1578_v36 = vmul.f32 %v3363_v18, %v1554_v62  ;;  %v1296_v44 = vadd.f32 %v1292_v27, %v3138_v22  ;;  %v1607_v14 = vmul.f32 0.044715, %v3169_v48  ;;  %v1899_v62 = vpop.permute.xlu0 %1898 }
 0x16a   : > { %v971_v12 = vmul.f32 %v967_v6, %v939_v25  ;;  %2430 = vtanh.f32 %v1297_v37  ;;  %v1299_v42 = vmul.f32 0.7978846, %v1295_v38  ;;  %v1612_v15 = vmul.f32 %v1608_v32, %v3172_v7 }
 0x16b   : > { %v2423_v30 = vpop.eup %2422  ;;  %v972_v28 = vmul.f32 %v968_v33, %v940_v24  ;;  %v1300_v20 = vmul.f32 0.7978846, %v1296_v44  ;;  %v1611_v23 = vmul.f32 %v1607_v14, %v3169_v48  ;;  %v3364_v24 = vld [vmem:[#allocation11_spill] sm:$0xff]  ;;  %v3197_v61 = vadd.f32 %v3365_v49, %v1578_v36  ;;  %v1923_v44 = vpop.permute.xlu1 %1922 }
 0x16c   : > { %v1877_v35 = vmul.f32 %v2423_v30, %v3052_v10  ;;  %v1878_v41 = vmul.f32 %v2423_v30, %v3055_v46  ;;  %v1879_v4 = vmul.f32 %v2423_v30, %v3058_v43  ;;  %v1880_v40 = vmul.f32 %v2423_v30, %v3067_v17  ;;  %v2425_v5 = vpop.eup %2424 }
 0x16d   : > { %v982_v25 = vpack.c.bf16 %v972_v28, %v971_v12  ;;  %2432 = vtanh.f32 %v1299_v42  ;;  %v3194_v54 = vadd.f32 %v3364_v24, %v1577_v3  ;;  %v969_v17 = vadd.f32 1.0, %v2425_v5 }
 0x16e   : > { %v1901_v10 = vmul.f32 %v2889_v60, %v1877_v35  ;;  %v1902_v46 = vmul.f32 %v2879_v50, %v1878_v41  ;;  %v2427_v43 = vpop.eup %2426  ;;  %2434 = vtanh.f32 %v1300_v20  ;;  %v1615_v8 = vmul.f32 %v1611_v23, %v3169_v48 }
 0x16f   : > { %2306 = vmatpush3.bf16.msra.mxu0 %v982_v25  ;;  %v1616_v19 = vmul.f32 %v1612_v15, %v3172_v7  ;;  %v1903_v0 = vmul.f32 %v3366_v47, %v1879_v4  ;;  %v1904_v13 = vmul.f32 %v1899_v62, %v1880_v40  ;;  %v3368_v56 = vmov 0.0  }
 0x170   : > { %v3205_v39 = vadd.f32 %v3367_v9, %v1902_v46  ;;  %2307 = vmatprep.subr.bf16.mxu0 %v3368_v56  ;;  %v1278_v60 = vmul.f32 0.5, %v3132_v29  ;;  %v970_v51 = vadd.f32 1.0, %v2427_v43  ;;  %v973_v50 = vmul.f32 %v969_v17, %v3147_v16  ;;  %v1918_v16 = vpop.permute.xlu0 %1917 }
 0x171   : > { %v1619_v52 = vadd.f32 %v1615_v8, %v3169_v48  ;;  %v1620_v26 = vadd.f32 %v1616_v19, %v3172_v7  ;;  %v3213_v58 = vadd.f32 %v3369_v53, %v1901_v10  ;;  %v1609_v27 = vmul.f32 0.044715, %v3194_v54 }
 0x172   : > { %v1934_v11 = vmul.f32 0.044715, %v3205_v39  ;;  %v1642_v59 = vpack.c.bf16 %v1476_v34, %v1476_v34  ;;  %v2429_v31 = vpop.eup %2428  ;;  %v974_v3 = vmul.f32 %v970_v51, %v3164_v55  ;;  %v1610_v6 = vmul.f32 0.044715, %v3197_v61 }
 0x173   : > { %v1623_v32 = vmul.f32 0.7978846, %v1619_v52  ;;  %v1624_v29 = vmul.f32 0.7978846, %v1620_v26  ;;  %v1306_v33 = vadd.f32 1.0, %v2429_v31  ;;  %v1279_v37 = vmul.f32 0.5, %v3135_v21 }
 0x174   : > { %v1613_v38 = vmul.f32 %v1609_v27, %v3194_v54  ;;  %v3222_v18 = vsel %vm1032_vm4, %v1642_v59, 0  ;;  %v2431_v36 = vpop.eup %2430  ;;  %v3224_v12 = vadd.f32 %v1918_v16, %v1903_v0  ;;  %v983_v34 = vpack.c.bf16 %v974_v3, %v973_v50 }
 0x175   : > { %2436 = vtanh.f32 %v1623_v32  ;;  %v1614_v55 = vmul.f32 %v1610_v6, %v3197_v61  ;;  %v1305_v14 = vadd.f32 1.0, %v2431_v36  ;;  %v1310_v30 = vmul.f32 %v1306_v33, %v1278_v60 }
 0x176   : > { %2438 = vtanh.f32 %v1624_v29  ;;  %v1617_v28 = vmul.f32 %v1613_v38, %v3194_v54  ;;  %v3228_v21 = vadd.f32 %v1923_v44, %v1904_v13  ;;  %2308 = vmatpush3.bf16.msra.mxu0 %v983_v34  ;;  %v1933_v35 = vmul.f32 0.044715, %v3213_v58 }
 0x177   : > { %v2433_v42 = vpop.eup %2432  ;;  %v1618_v15 = vmul.f32 %v1614_v55, %v3197_v61  ;;  %v1938_v41 = vmul.f32 %v1934_v11, %v3205_v39  ;;  %2313 = vmatprep.subr.bf16.mxu0 %v3368_v56  ;;  %v1309_v4 = vmul.f32 %v1305_v14, %v3177_v63  ;;  %v1280_v40 = vmul.f32 0.5, %v3138_v22 }
 0x178   : > { %v1307_v5 = vadd.f32 1.0, %v2433_v42  ;;  %v1621_v25 = vadd.f32 %v1617_v28, %v3194_v54  ;;  %v2435_v20 = vpop.eup %2434  ;;  %v1937_v62 = vmul.f32 %v1933_v35, %v3213_v58  ;;  %v1935_v49 = vmul.f32 0.044715, %v3224_v12 }
 0x179   : > { %v1622_v23 = vadd.f32 %v1618_v15, %v3197_v61  ;;  %v1942_v24 = vmul.f32 %v1938_v41, %v3205_v39  ;;  %2310 = vmatmul.mubr.msk.bf16.vlgmr.msra.gmra.mrb[4].mxu0 %vm539_vm0, %v3110_v2  ;;  %v1320_v10 = vpack.c.bf16 %v1310_v30, %v1309_v4  ;;  %v1308_v46 = vadd.f32 1.0, %v2435_v20 }
 0x17a   : > { %v1311_v63 = vmul.f32 %v1307_v5, %v1279_v37  ;;  %v1625_v43 = vmul.f32 0.7978846, %v1621_v25  ;;  %2314 = vmatpush3.bf16.msra.mxu0 %v3175_v45  ;;  %2315 = vmatprep.mubr.msk.bf16.mxu0 %vm2478_vm3, %v3368_v56  ;;  %v1941_v17 = vmul.f32 %v1937_v62, %v3213_v58  ;;  %v1936_v19 = vmul.f32 0.044715, %v3228_v21 }
 0x17b   : > { %v1626_v22 = vmul.f32 0.7978846, %v1622_v23  ;;  %v1946_v8 = vadd.f32 %v1942_v24, %v3205_v39  ;;  %2319 = vmatprep.subr.bf16.mxu0 %v3368_v56  ;;  %v1312_v47 = vmul.f32 %v1308_v46, %v1280_v40  ;;  %v1939_v0 = vmul.f32 %v1935_v49, %v3224_v12 }
 0x17c   : > { %2440 = vtanh.f32 %v1625_v43  ;;  %v1945_v13 = vadd.f32 %v1941_v17, %v3213_v58  ;;  %v1940_v9 = vmul.f32 %v1936_v19, %v3228_v21  ;;  %v1603_v11 = vmul.f32 0.5, %v3169_v48 }
 0x17d   : > { %2442 = vtanh.f32 %v1626_v22  ;;  %v1950_v45 = vmul.f32 0.7978846, %v1946_v8  ;;  %v1321_v60 = vpack.c.bf16 %v1312_v47, %v1311_v63  ;;  %v1943_v51 = vmul.f32 %v1939_v0, %v3224_v12  ;;  %v1080_v8 = vpop.permute.xlu0 %1079 }
 0x17e   : > { %v1949_v52 = vmul.f32 0.7978846, %v1945_v13  ;;  %v1944_v26 = vmul.f32 %v1940_v9, %v3228_v21  ;;  %v1604_v31 = vmul.f32 0.5, %v3172_v7  ;;  %v1605_v38 = vmul.f32 0.5, %v3194_v54 }
 0x17f   : > { %v2437_v50 = vpop.eup %2436  ;;  %2444 = vtanh.f32 %v1950_v45  ;;  %v1947_v59 = vadd.f32 %v1943_v51, %v3224_v12  ;;  %v1606_v34 = vmul.f32 0.5, %v3197_v61  ;;  %v1930_v28 = vmul.f32 0.5, %v3205_v39 }
 0x180   : > { %v2439_v53 = vpop.eup %2438  ;;  %v1631_v27 = vadd.f32 1.0, %v2437_v50  ;;  %2446 = vtanh.f32 %v1949_v52  ;;  %v1948_v32 = vadd.f32 %v1944_v26, %v3228_v21  ;;  %v1929_v61 = vmul.f32 0.5, %v3213_v58 }
 0x181   : > { %v1632_v3 = vadd.f32 1.0, %v2439_v53  ;;  %2316 = vmatmul.mubr.msk.bf16.vlgmr.msra.gmra.mrb[8].mxu0 %vm1028_vm5, %v3079_v57  ;;  %v1951_v6 = vmul.f32 0.7978846, %v1947_v59  ;;  %v1931_v25 = vmul.f32 0.5, %v3224_v12  ;;  %v1932_v23 = vmul.f32 0.5, %v3228_v21 }
 0x182   : > { %v1635_v29 = vmul.f32 %v1631_v27, %v1603_v11  ;;  %2320 = vmatpush3.bf16.msra.mxu0 %v1320_v10  ;;  %2323 = vmatprep.mubr.msk.bf16.mxu0 %vm2478_vm3, %v3368_v56  ;;  %v1952_v48 = vmul.f32 0.7978846, %v1948_v32 }
 0x183   : > { %v1636_v16 = vmul.f32 %v1632_v3, %v1604_v31  ;;  %2321 = vmatprep.subr.bf16.mxu0 %v3368_v56  ;;  %2448 = vtanh.f32 %v1951_v6 }
 0x184   : > { %2450 = vtanh.f32 %v1952_v48 }
 0x185   : > { %v1646_v33 = vpack.c.bf16 %v1636_v16, %v1635_v29 }
 0x186   : > { %v2441_v7 = vpop.eup %2440  ;;  %2322 = vmatpush3.bf16.msra.mxu0 %v1321_v60 }
 0x187   : > { %v2443_v37 = vpop.eup %2442  ;;  %v1633_v36 = vadd.f32 1.0, %v2441_v7  ;;  %2327 = vmatprep.subr.bf16.mxu0 %v3368_v56 }
 0x188   : > { %v1634_v55 = vadd.f32 1.0, %v2443_v37 }
 0x189   : > { %v2445_v44 = vpop.eup %2444  ;;  %v1637_v14 = vmul.f32 %v1633_v36, %v1605_v38  ;;  %2324 = vmatmul.mubr.msk.bf16.vlgmr.msra.gmra.mrb[12].mxu0 %vm539_vm0, %v3110_v2 }
 0x18a   : > { %v1638_v30 = vmul.f32 %v1634_v55, %v1606_v34  ;;  %v1958_v42 = vadd.f32 1.0, %v2445_v44  ;;  %v2447_v15 = vpop.eup %2446  ;;  %2328 = vmatpush3.bf16.msra.mxu0 %v3153_v1  ;;  %2329 = vmatprep.mubr.msk.bf16.mxu0 %vm2478_vm3, %v3368_v56 }
 0x18b   : > { %2333 = vmatprep.subr.bf16.mxu0 %v3368_v56  ;;  %v1957_v35 = vadd.f32 1.0, %v2447_v15 }
 0x18c   : > { %v1647_v54 = vpack.c.bf16 %v1638_v30, %v1637_v14  ;;  %v1962_v41 = vmul.f32 %v1958_v42, %v1930_v28 }
 0x18d   : > { %v2449_v4 = vpop.eup %2448  ;;  %v1961_v40 = vmul.f32 %v1957_v35, %v1929_v61 }
 0x18e   : > { %v2451_v5 = vpop.eup %2450  ;;  %v1959_v39 = vadd.f32 1.0, %v2449_v4 }
 0x18f   : > { %v1972_v20 = vpack.c.bf16 %v1962_v41, %v1961_v40  ;;  %v1960_v1 = vadd.f32 1.0, %v2451_v5 }
 0x190   : > { %v1963_v62 = vmul.f32 %v1959_v39, %v1931_v25 }
 0x191   : > { %2330 = vmatmul.mubr.msk.bf16.vlgmr.msra.gmra.mrb[16].mxu0 %vm1028_vm5, %v3079_v57  ;;  %v1964_v24 = vmul.f32 %v1960_v1, %v1932_v23 }
 0x192   : > { %2334 = vmatpush3.bf16.msra.mxu0 %v1646_v33  ;;  %2337 = vmatprep.mubr.msk.bf16.mxu0 %vm2478_vm3, %v3368_v56 }
 0x193   : > { %2335 = vmatprep.subr.bf16.mxu0 %v3368_v56  ;;  %v1973_v58 = vpack.c.bf16 %v1964_v24, %v1963_v62 }
 0x196   : > { %2336 = vmatpush3.bf16.msra.mxu0 %v1647_v54 }
 0x197   : > { %2341 = vmatprep.subr.bf16.mxu0 %v3368_v56 }
 0x199   : > { %2338 = vmatmul.mubr.msk.bf16.vlgmr.msra.gmra.mrb[20].mxu0 %vm539_vm0, %v3110_v2 }
 0x19a   : > { %2342 = vmatpush3.bf16.msra.mxu0 %v3222_v18  ;;  %2343 = vmatprep.mubr.msk.bf16.mxu0 %vm2478_vm3, %v3368_v56 }
 0x19b   : > { %2347 = vmatprep.subr.bf16.mxu0 %v3368_v56 }
 0x1a1   : > { %2344 = vmatmul.mubr.msk.bf16.vlgmr.msra.gmra.mrb[24].mxu0 %vm1028_vm5, %v3079_v57 }
 0x1a2   : > { %2348 = vmatpush3.bf16.msra.mxu0 %v1972_v20  ;;  %2351 = vmatprep.mubr.msk.bf16.mxu0 %vm2478_vm3, %v3368_v56 }
 0x1a3   : > { %2349 = vmatprep.subr.bf16.mxu0 %v3368_v56 }
 0x1a6   : > { %2350 = vmatpush3.bf16.msra.mxu0 %v1973_v58 }
 0x1a9   : > { %2352 = vmatmul.mubr.msk.bf16.vlgmr.msra.gmra.mrb[28].mxu0 %vm539_vm0, %v3110_v2  ;;  %v1085_v2 = vpop.permute.xlu1 %1084 }
 0x21d   : > { %v2058_v18 = vpop.f32.mrb[16].mxu1 }
 0x21e   : > { %v2359_v12 = vpop.f32.mrb[17].mxu1 }
 0x21f   : > { %v2061_v21 = vpop.f32.mrb[18].mxu1 }
 0x220   : > { %v2360_v49 = vpop.f32.mrb[19].mxu1 }
 0x24c   : > { %v1021_v10 = vpop.f32.mrb[4].mxu0 }
 0x24d   : > { %v2311_v46 = vpop.f32.mrb[5].mxu0 }
 0x24e   : > { %v1024_v63 = vpop.f32.mrb[6].mxu0 }
 0x24f   : > { %v2312_v43 = vpop.f32.mrb[7].mxu0 }
 0x254   : > { %v1070_v22 = vpop.f32.mrb[8].mxu0 }
 0x255   : > { %v1071_v57 = vadd.f32 %v1070_v22, %v1021_v10  ;;  %v2317_v17 = vpop.f32.mrb[9].mxu0 }
 0x256   : > { %v1073_v19 = vpop.f32.mrb[10].mxu0 }
 0x257   : > { %v1087_v47 = vadd.f32 %v1080_v8, %v1071_v57  ;;  %v1074_v56 = vadd.f32 %v1073_v19, %v1024_v63  ;;  %v2318_v0 = vpop.f32.mrb[11].mxu0 }
 0x259   : > { %v2229_v13 = vpack.c.bf16 %v1087_v47, %v1087_v47  ;;  %v1088_v45 = vadd.f32 %v1085_v2, %v1074_v56 }
 0x25b   : > { %1098 = vst.msk [vmem:[%s3300_s14] sm:$0xf] %vm1097_vm6, %v2229_v13  ;;  %v2230_v9 = vpack.c.bf16 %v1088_v45, %v1088_v45 }
 0x25c   : > { %v1359_v60 = vpop.f32.mrb[12].mxu0 }
 0x25d   : > { %1099 = vst.msk [vmem:[%s3300_s14 + $0x4] sm:$0xf] %vm1097_vm6, %v2230_v9  ;;  %v2325_v51 = vpop.f32.mrb[13].mxu0 }
 0x25e   : > { %v1362_v50 = vpop.f32.mrb[14].mxu0 }
 0x25f   : > { %v2326_v52 = vpop.f32.mrb[15].mxu0 }
 0x264   : > { %v1406_v26 = vpop.f32.mrb[16].mxu0 }
 0x265   : > { %v1407_v53 = vadd.f32 %v1406_v26, %v1359_v60  ;;  %v2331_v11 = vpop.f32.mrb[17].mxu0 }
 0x266   : > { %v1409_v27 = vpop.f32.mrb[18].mxu0 }
 0x267   : > { %v1413_v59 = vadd.f32 %v1407_v53, %v1080_v8  ;;  %v1410_v31 = vadd.f32 %v1409_v27, %v1362_v50  ;;  %v2332_v3 = vpop.f32.mrb[19].mxu0 }
 0x269   : > { %v2231_v32 = vpack.c.bf16 %v1413_v59, %v1413_v59  ;;  %v1414_v29 = vadd.f32 %v1410_v31, %v1085_v2 }
 0x26b   : > { %2210 = vst.msk [vmem:[%s3300_s14 + $0x8] sm:$0xf] %vm1097_vm6, %v2231_v32  ;;  %v2232_v6 = vpack.c.bf16 %v1414_v29, %v1414_v29 }
 0x26c   : > { %v1685_v16 = vpop.f32.mrb[20].mxu0 }
 0x26d   : > { %2211 = vst.msk [vmem:[%s3300_s14 + $0xc] sm:$0xf] %vm1097_vm6, %v2232_v6  ;;  %v2339_v48 = vpop.f32.mrb[21].mxu0 }
 0x26e   : > { %v1688_v33 = vpop.f32.mrb[22].mxu0 }
 0x26f   : > { %v2340_v7 = vpop.f32.mrb[23].mxu0 }
 0x274   : > { %v1732_v37 = vpop.f32.mrb[24].mxu0 }
 0x275   : > { %v1733_v38 = vadd.f32 %v1732_v37, %v1685_v16  ;;  %v2345_v36 = vpop.f32.mrb[25].mxu0 }
 0x276   : > { %v1735_v34 = vpop.f32.mrb[26].mxu0 }
 0x277   : > { %v1739_v55 = vadd.f32 %v1733_v38, %v1080_v8  ;;  %v1736_v44 = vadd.f32 %v1735_v34, %v1688_v33  ;;  %v2346_v14 = vpop.f32.mrb[27].mxu0 }
 0x279   : > { %v2233_v30 = vpack.c.bf16 %v1739_v55, %v1739_v55  ;;  %v1740_v28 = vadd.f32 %v1736_v44, %v1085_v2 }
 0x27b   : > { %2216 = vst.msk [vmem:[%s3300_s14 + $0x10] sm:$0xf] %vm1097_vm6, %v2233_v30  ;;  %v2234_v42 = vpack.c.bf16 %v1740_v28, %v1740_v28 }
 0x27c   : > { %v2011_v15 = vpop.f32.mrb[28].mxu0 }
 0x27d   : > { %2217 = vst.msk [vmem:[%s3300_s14 + $0x14] sm:$0xf] %vm1097_vm6, %v2234_v42  ;;  %v2059_v54 = vadd.f32 %v2058_v18, %v2011_v15  ;;  %v2353_v61 = vpop.f32.mrb[29].mxu0 }
 0x27e   : > { %v2014_v35 = vpop.f32.mrb[30].mxu0 }
 0x27f   : > { %v2065_v41 = vadd.f32 %v2059_v54, %v1080_v8  ;;  %v2062_v4 = vadd.f32 %v2061_v21, %v2014_v35  ;;  %v2354_v40 = vpop.f32.mrb[31].mxu0 }
 0x281   : > { %v2235_v5 = vpack.c.bf16 %v2065_v41, %v2065_v41  ;;  %v2066_v25 = vadd.f32 %v2062_v4, %v1085_v2 }
 0x283   : > { %2222 = vst.msk [vmem:[%s3300_s14 + $0x18] sm:$0xf] %vm1097_vm6, %v2235_v5  ;;  %v2236_v39 = vpack.c.bf16 %v2066_v25, %v2066_v25 }
 0x285   : > { %2223 = vst.msk [vmem:[%s3300_s14 + $0x1c] sm:$0xf] %vm1097_vm6, %v2236_v39 }
 0x286 PF: > { %s23_s27 = sadd.s32 1, %s2474_s27   ;;  %s3370_s25 = smov %s2470_s26 }
 0x287   : > { %p20_p5 = scmp.ge.s32.totalorder %s23_s27, 4   ;;  %s3371_s26 = smov %s3373_s28 }
 0x289   :  { %22 = sbr.rel (!%p20_p5) target bundleno = 2 (0x2), region = 108 }

// kernel: mask_decoder_hq_forward.11
= control target key start
LH: loop header
LB: loop body
LE: loop exit
PB: predicated region body
PF: predicated region fallthrough
CT: control target
= control target key end

     0   :  { %s6077_s30 = smov 0   ;;  %s7478_s0 = inlined_call_operand.vmem [shape: f32[2,2,4], index: 0, kind: input, shape index: {}]   ;;  %s7479_s1 = inlined_call_operand.vmem [shape: bf16[2,4,1024], index: 1, kind: input, shape index: {}]   ;;  %s7480_s2 = inlined_call_operand.vmem [shape: bf16[2,4,1024], index: 2, kind: input, shape index: {}]   ;;  %s7481_s3 = inlined_call_operand.vmem [shape: f32[9,8,4], index: 3, kind: input, shape index: {}]   ;;  %s7482_s4 = inlined_call_operand.vmem [shape: f32[8,1], index: 4, kind: input, shape index: {}]   ;;  %s7483_s5 = inlined_call_operand.vmem [shape: f32[8,1], index: 5, kind: input, shape index: {}]   ;;  %s7484_s6 = inlined_call_operand.vmem [shape: f32[8,1], index: 6, kind: input, shape index: {}]   ;;  %s7485_s7 = inlined_call_operand.vmem [shape: f32[9,4,8], index: 7, kind: input, shape index: {}]   ;;  %s7486_s8 = inlined_call_operand.vmem [shape: f32[4,1], index: 8, kind: input, shape index: {}]   ;;  %s7487_s9 = inlined_call_operand.vmem [shape: f32[2,1,1024], index: 9, kind: output, shape index: {}]  }
   0x1 LB: > { %s5746_s10 = sadd.s32 4294967295, %s6014_s30   ;;  %p5750_p0 = scmp.ge.s32.totalorder %s6014_s30, 1  ;;  %s6014_s30 = sphi %s6077_s30, %s19_s30  }
   0x2   : > { %p306_p1 = scmp.lt.s32.totalorder %s6014_s30, 3 }
   0x4   : > { %p307_p2 = pnand %p5750_p0, %p306_p1 }
   0x6   : > { %310 = sbr.rel (%p307_p2) target bundleno = 1279 (0x4ff), region = 56 }
   0xd   : > { %p350_p3 = scmp.lt.s32.totalorder %s5746_s10, 1  ;;  %v379_v0 = vlaneseq  ;;  %v6016_v1 = vmov 1983009808   ;;  %v7521_v5 = vmov 0   ;;  %s6018_s15 = smov 32   ;;  %vm7488_vm0 = vcmask 261120  }
   0xe   : > { %v377_v2 = vunpack.c.l.s4 %v6016_v1  ;;  %746 = vmatprep.mubr.bf16.mxu0 %v7521_v5  ;;  %787 = vmatprep.mubr.bf16.mxu1 %v7521_v5  ;;  %s6019_s16 = smov 33   ;;  %s6020_s17 = smov 31   ;;  %v5757_v33 = vld [vmem:[%s7481_s3 + $0x8] sm:$0xff]  ;;  %vm7490_vm3 = vcmask 1041408   ;;  %vm7489_vm7 = vcmask 31744   ;;  %vm7493_vm11 = vcmask 269312  }
   0xf   : > { %s7756_s10 = smov (!%p350_p3, %s5746_s10), 1  ;;  %v6088_v3 = vshrl.u32 %v379_v0, 7  ;;  %5972 = vset.pattern.permute.xlu0 %v7521_v5  ;;  %5973 = vset.pattern.permute.xlu1 %v7521_v5  ;;  %s6021_s18 = smov 1   ;;  %v6228_v19 = vand.u32 127, %v379_v0  ;;  %v6285_v42 = vpack.c.bf16 %v5757_v33, %v5757_v33 }
  0x10   : > { %v378_v4 = vunpack.c.0.s8 %v377_v2  ;;  %s5935_s11 = sshll.u32 %s7756_s10, 4  ;;  %s6022_s19 = smov 127  }
  0x11   : > { %7535 = vst [vmem:[#allocation2_spill] sm:$0xff] %v6088_v3  ;;  %s358_s14 = scalar_lea.vmem %s7479_s1, %s5935_s11  ;;  %s6023_s20 = smov 97   ;;  %v6235_v20 = vadd.s32 128, %v6228_v19  ;;  %v6240_v21 = vadd.s32 256, %v6228_v19  ;;  %v458_v22 = vand.u32 31, %v6228_v19  ;;  %v6244_v23 = vadd.s32 384, %v6228_v19 }
  0x12   : > { %v381_v6 = vsub.s32 %v378_v4, %v6088_v3  ;;  %v371_v7 = vld [vmem:[%s358_s14] sm:$0xff]  ;;  %v372_v10 = vld [vmem:[%s358_s14 + $0x8] sm:$0xff]  ;;  %s6024_s21 = smov 96   ;;  %s6025_s22 = smov 95   ;;  %v6260_v29 = vadd.s32 512, %v6228_v19  ;;  %v6263_v30 = vadd.s32 640, %v6228_v19 }
  0x13   : > { %v375_v9 = vcombine.high %v371_v7, %v371_v7  ;;  %v392_v15 = vcombine.high %v372_v10, %v372_v10  ;;  %v465_v24 = vand.u32 31, %v6235_v20  ;;  %v472_v25 = vand.u32 31, %v6240_v21  ;;  %s363_s27 = scalar_lea.vmem %s7480_s2, %s5935_s11  ;;  %s5756_s11 = sshll.u32 %s7756_s10, 3 }
  0x14   : > { %v6101_v8 = vrot.slane %v371_v7, %v381_v6  ;;  %v6117_v14 = vrot.slane %v372_v10, %v381_v6  ;;  %v550_v26 = vadd.s32 4294967295, %v458_v22  ;;  %v479_v27 = vand.u32 31, %v6244_v23  ;;  %s367_s12 = scalar_lea.vmem %s7487_s9, %s5756_s11 }
  0x15   : > { %v6105_v11 = vrot.slane %v375_v9, %v381_v6  ;;  %v6127_v17 = vrot.slane %v392_v15, %v381_v6  ;;  %v551_v28 = vadd.s32 4294967295, %v465_v24  ;;  %v552_v32 = vadd.s32 4294967295, %v472_v25 }
  0x16   : > { %656 = vrot.lane.b32.xlu0 %v6101_v8, %s6018_s15  ;;  %v6109_v12 = vcombine.high %v6101_v8, %v6101_v8  ;;  %v6125_v16 = vcombine.high %v6117_v14, %v6117_v14  ;;  %vm558_vm1 = vcmp.ge.s32.totalorder %v550_v26, 0  ;;  %v553_v34 = vadd.s32 4294967295, %v479_v27 }
  0x17   : > { %660 = vrot.lane.b32.xlu1 %v6105_v11, %s6018_s15  ;;  %v6115_v13 = vcombine.high %v6105_v11, %v6105_v11  ;;  %v6135_v18 = vcombine.high %v6127_v17, %v6127_v17  ;;  %v6275_v35 = vadd.s32 768, %v6228_v19  ;;  %vm559_vm2 = vcmp.ge.s32.totalorder %v551_v28, 0 }
  0x18   : > { %v486_v37 = vand.u32 31, %v6260_v29  ;;  %v493_v38 = vand.u32 31, %v6263_v30  ;;  %v6282_v39 = vadd.s32 896, %v6228_v19  ;;  %vm560_vm4 = vcmp.ge.s32.totalorder %v552_v32, 0  ;;  %vm6292_vm5 = vmpackc.low %vm559_vm2, %vm558_vm1 }
  0x19   : > { %vm561_vm6 = vcmp.ge.s32.totalorder %v553_v34, 0  ;;  %v500_v46 = vand.u32 31, %v6275_v35  ;;  %v6308_v53 = vsub.s32 0, %v6088_v3  ;;  %v602_v56 = vsel %vm6292_vm5, 65537, %v7521_v5 }
  0x1a   : > { %658 = vrot.lane.b32.xlu0 %v6109_v12, %s6018_s15  ;;  %v554_v49 = vadd.s32 4294967295, %v486_v37  ;;  %v555_v50 = vadd.s32 4294967295, %v493_v38  ;;  %v507_v51 = vand.u32 31, %v6282_v39  ;;  %v6319_v58 = vsub.s32 4, %v6088_v3  ;;  %vm599_vm8 = vmpackc.low %vm561_vm6, %vm560_vm4 }
  0x1b   : > { %662 = vrot.lane.b32.xlu1 %v6115_v13, %s6018_s15  ;;  %v556_v60 = vadd.s32 4294967295, %v500_v46  ;;  %v609_v63 = vrot.slane %v602_v56, %v6308_v53  ;;  %v603_v2 = vsel %vm599_vm8, 65537, %v7521_v5  ;;  %v1104_v9 = vadd.s32 1, %v458_v22 }
  0x1c   : > { %vm562_vm9 = vcmp.ge.s32.totalorder %v554_v49, 0  ;;  %vm563_vm10 = vcmp.ge.s32.totalorder %v555_v50, 0  ;;  %v557_v61 = vadd.s32 4294967295, %v507_v51  ;;  %v613_v6 = vrot.slane %v602_v56, %v6319_v58 }
  0x1d   : > { %vm600_vm12 = vmpackc.low %vm563_vm10, %vm562_vm9  ;;  %vm564_vm13 = vcmp.ge.s32.totalorder %v556_v60, 0  ;;  %v1105_v10 = vadd.s32 1, %v465_v24  ;;  %vm6351_vm15 = vcmp.ne.s16.totalorder %v609_v63, 0  ;;  %v7538_v26 = vmov 0 }
  0x1e   : > { %664 = vrot.lane.b32.xlu0 %v6117_v14, %s6018_s15  ;;  %vm565_vm14 = vcmp.ge.s32.totalorder %v557_v61, 0  ;;  %v7539_v26 = vsel %vm6351_vm15, 4294967295, %v7538_v26  ;;  %v617_v28 = vrot.slane %v603_v2, %v6308_v53  ;;  %v604_v33 = vsel %vm600_vm12, 65537, %v7521_v5 }
  0x1f   : > { %666 = vrot.lane.b32.xlu1 %v6125_v16, %s6018_s15  ;;  %vm6360_vm1 = vcmp.ne.s16.totalorder %v613_v6, 0  ;;  %v7540_v20 = vmov 0  ;;  %v621_v22 = vrot.slane %v603_v2, %v6319_v58  ;;  %vm6366_vm2 = vmpackc.low %vm565_vm14, %vm564_vm13  ;;  %v1106_v34 = vadd.s32 1, %v472_v25 }
  0x20   : > { %v7541_v20 = vsel %vm6360_vm1, 4294967295, %v7540_v20  ;;  %vm1120_vm4 = vcmp.lt.s32.totalorder %v1104_v9, 32  ;;  %vm1121_vm5 = vcmp.lt.s32.totalorder %v1105_v10, 32  ;;  %vm6384_vm6 = vcmp.ne.s16.totalorder %v617_v28, 0 }
  0x21   : > { %v7544_v25 = vmov 0  ;;  %v625_v45 = vrot.slane %v604_v33, %v6308_v53  ;;  %vm6399_vm8 = vcmp.ne.s16.totalorder %v621_v22, 0  ;;  %v7546_v50 = vmov 0  ;;  %vm1152_vm9 = vmpackc.low %vm1121_vm5, %vm1120_vm4 }
  0x22   : > { %668 = vrot.lane.b32.xlu0 %v6127_v17, %s6018_s15  ;;  %v7545_v25 = vsel %vm6384_vm6, 4294967295, %v7544_v25  ;;  %v7547_v50 = vsel %vm6399_vm8, 4294967295, %v7546_v50  ;;  %vm1122_vm10 = vcmp.lt.s32.totalorder %v1106_v34, 32  ;;  %v1109_v56 = vadd.s32 1, %v493_v38 }
  0x23   : > { %670 = vrot.lane.b32.xlu1 %v6135_v18, %s6018_s15  ;;  %vm6415_vm13 = vcmp.ne.s16.totalorder %v625_v45, 0  ;;  %v7550_v61 = vmov 0  ;;  %v1110_v2 = vadd.s32 1, %v500_v46 }
  0x24   : > { %vm1125_vm5 = vcmp.lt.s32.totalorder %v1109_v56, 32 }
  0x26   : > { %409 = vrot.lane.b32.xlu0 %v6101_v8, %s6019_s16 }
  0x27   : > { %411 = vrot.lane.b32.xlu1 %v6109_v12, %s6019_s16 }
  0x2a   : > { %413 = vrot.lane.b32.xlu0 %v6105_v11, %s6019_s16 }
  0x2b   : > { %415 = vrot.lane.b32.xlu1 %v6115_v13, %s6019_s16 }
  0x2e   : > { %417 = vrot.lane.b32.xlu0 %v6117_v14, %s6019_s16 }
  0x2f   : > { %419 = vrot.lane.b32.xlu1 %v6125_v16, %s6019_s16 }
  0x32   : > { %421 = vrot.lane.b32.xlu0 %v6127_v17, %s6019_s16 }
  0x33   : > { %423 = vrot.lane.b32.xlu1 %v6135_v18, %s6019_s16 }
  0x36   : > { %1069 = vrot.lane.b32.xlu0 %v6101_v8, %s6020_s17 }
  0x37   : > { %1071 = vrot.lane.b32.xlu1 %v6109_v12, %s6020_s17 }
  0x3a   : > { %1073 = vrot.lane.b32.xlu0 %v6105_v11, %s6020_s17 }
  0x3b   : > { %1075 = vrot.lane.b32.xlu1 %v6115_v13, %s6020_s17 }
  0x3e   : > { %1077 = vrot.lane.b32.xlu0 %v6117_v14, %s6020_s17 }
  0x3f   : > { %1079 = vrot.lane.b32.xlu1 %v6125_v16, %s6020_s17 }
  0x42   : > { %1081 = vrot.lane.b32.xlu0 %v6127_v17, %s6020_s17 }
  0x43   : > { %1083 = vrot.lane.b32.xlu1 %v6135_v18, %s6020_s17 }
  0x46   : > { %1410 = vrot.lane.b32.xlu0 %v6101_v8, %s6021_s18 }
  0x47   : > { %1412 = vrot.lane.b32.xlu1 %v6109_v12, %s6021_s18 }
  0x4a   : > { %1414 = vrot.lane.b32.xlu0 %v6105_v11, %s6021_s18 }
  0x4b   : > { %1416 = vrot.lane.b32.xlu1 %v6115_v13, %s6021_s18 }
  0x4e   : > { %1418 = vrot.lane.b32.xlu0 %v6117_v14, %s6021_s18 }
  0x4f   : > { %1420 = vrot.lane.b32.xlu1 %v6125_v16, %s6021_s18 }
  0x52   : > { %1422 = vrot.lane.b32.xlu0 %v6127_v17, %s6021_s18 }
  0x53   : > { %1424 = vrot.lane.b32.xlu1 %v6135_v18, %s6021_s18 }
  0x56   : > { %1857 = vrot.lane.b32.xlu0 %v6101_v8, %s6022_s19 }
  0x57   : > { %1859 = vrot.lane.b32.xlu1 %v6109_v12, %s6022_s19 }
  0x5a   : > { %1861 = vrot.lane.b32.xlu0 %v6105_v11, %s6022_s19 }
  0x5b   : > { %1863 = vrot.lane.b32.xlu1 %v6115_v13, %s6022_s19 }
  0x5e   : > { %1865 = vrot.lane.b32.xlu0 %v6117_v14, %s6022_s19 }
  0x5f   : > { %1867 = vrot.lane.b32.xlu1 %v6125_v16, %s6022_s19 }
  0x62   : > { %1869 = vrot.lane.b32.xlu0 %v6127_v17, %s6022_s19 }
  0x63   : > { %1871 = vrot.lane.b32.xlu1 %v6135_v18, %s6022_s19 }
  0x66   : > { %2102 = vrot.lane.b32.xlu0 %v6101_v8, %s6023_s20 }
  0x67   : > { %2104 = vrot.lane.b32.xlu1 %v6109_v12, %s6023_s20 }
  0x6a   : > { %2106 = vrot.lane.b32.xlu0 %v6105_v11, %s6023_s20 }
  0x6b   : > { %2108 = vrot.lane.b32.xlu1 %v6115_v13, %s6023_s20 }
  0x6e   : > { %2110 = vrot.lane.b32.xlu0 %v6117_v14, %s6023_s20 }
  0x6f   : > { %2112 = vrot.lane.b32.xlu1 %v6125_v16, %s6023_s20 }
  0x72   : > { %2114 = vrot.lane.b32.xlu0 %v6127_v17, %s6023_s20 }
  0x73   : > { %2116 = vrot.lane.b32.xlu1 %v6135_v18, %s6023_s20 }
  0x76   : > { %2347 = vrot.lane.b32.xlu0 %v6101_v8, %s6024_s21 }
  0x77   : > { %2349 = vrot.lane.b32.xlu1 %v6109_v12, %s6024_s21 }
  0x7a   : > { %2351 = vrot.lane.b32.xlu0 %v6105_v11, %s6024_s21 }
  0x7b   : > { %2353 = vrot.lane.b32.xlu1 %v6115_v13, %s6024_s21 }
  0x7e   : > { %2355 = vrot.lane.b32.xlu0 %v6117_v14, %s6024_s21 }
  0x7f   : > { %2357 = vrot.lane.b32.xlu1 %v6125_v16, %s6024_s21 }
  0x82   : > { %2359 = vrot.lane.b32.xlu0 %v6127_v17, %s6024_s21 }
  0x83   : > { %2361 = vrot.lane.b32.xlu1 %v6135_v18, %s6024_s21 }
  0x86   : > { %2575 = vrot.lane.b32.xlu0 %v6101_v8, %s6025_s22 }
  0x87   : > { %2577 = vrot.lane.b32.xlu1 %v6109_v12, %s6025_s22 }
  0x88   : > { %v657_v31 = vpop.permute.xlu0 %656 }
  0x89   : > { %v661_v36 = vpop.permute.xlu1 %660  ;;  %v682_v40 = vsel %vm7488_vm0, 0, %v657_v31 }
  0x8a   : > { %2579 = vrot.lane.b32.xlu0 %v6105_v11, %s6025_s22  ;;  %v691_v48 = vsel %vm7490_vm3, %v682_v40, 0 }
  0x8b   : > { %2581 = vrot.lane.b32.xlu1 %v6115_v13, %s6025_s22 }
  0x8c   : > { %v659_v41 = vpop.permute.xlu0 %658 }
  0x8d   : > { %v673_v43 = vsel %vm7488_vm0, %v657_v31, %v659_v41  ;;  %v674_v44 = vsel %vm7488_vm0, %v659_v41, %v661_v36  ;;  %v663_v47 = vpop.permute.xlu1 %662  ;;  %v654_v41 = vld [vmem:[%s7481_s3] sm:$0xff] }
  0x8e   : > { %5758 = vmatprep.subr.msk.bf16.mxu0 %vm7490_vm3, %v673_v43  ;;  %2583 = vrot.lane.b32.xlu0 %v6117_v14, %s6025_s22  ;;  %v675_v52 = vsel %vm7488_vm0, %v661_v36, %v663_v47  ;;  %v697_v55 = vsel %vm7490_vm3, %v674_v44, 0  ;;  %v1107_v43 = vadd.s32 1, %v479_v27  ;;  %v629_v27 = vrot.slane %v604_v33, %v6319_v58 }
  0x8f   : > { %715 = vmatpush1.bf16.msra.mxu0 %v691_v48  ;;  %5760 = vmatprep.subr.msk.bf16.mxu1 %vm7490_vm3, %v675_v52  ;;  %v605_v48 = vsel %vm6366_vm2, 65537, %v7521_v5  ;;  %v6403_v52 = vpack.c.bf16 %v654_v41, %v654_v41 }
  0x90   : > { %v665_v54 = vpop.permute.xlu0 %664  ;;  %2585 = vrot.lane.b32.xlu1 %v6125_v16, %s6025_s22  ;;  %756 = vmatpush1.bf16.msra.mxu1 %v697_v55  ;;  %vm1123_vm12 = vcmp.lt.s32.totalorder %v1107_v43, 32  ;;  %v633_v60 = vrot.slane %v605_v48, %v6308_v53  ;;  %vm6422_vm14 = vcmp.ne.s16.totalorder %v629_v27, 0  ;;  %v637_v63 = vrot.slane %v605_v48, %v6319_v58  ;;  %v5774_v27 = vld [vmem:[%s7481_s3 + $0x10] sm:$0xff] }
  0x91   : > { %v676_v57 = vsel %vm7488_vm0, %v663_v47, %v665_v54  ;;  %v667_v59 = vpop.permute.xlu1 %666  ;;  %v7551_v61 = vsel %vm6422_vm14, 4294967295, %v7550_v61  ;;  %vm1153_vm2 = vmpackc.low %vm1123_vm12, %vm1122_vm10  ;;  %v7564_v48 = vmov 0 }
  0x92   : > { %5759 = vmatmul.mubr.msk.bf16.vlgmr.msra.gmra.mrb[0].mxu0 %vm7489_vm7, %v6285_v42  ;;  %2587 = vrot.lane.b32.xlu0 %v6127_v17, %s6025_s22  ;;  %v677_v62 = vsel %vm7488_vm0, %v665_v54, %v667_v59  ;;  %v703_v1 = vsel %vm7490_vm3, %v676_v57, 0  ;;  %v1157_v35 = vsel %vm1153_vm2, 65537, %v7521_v5  ;;  %vm6454_vm10 = vcmp.ne.s16.totalorder %v637_v63, 0 }
  0x93   : > { %828 = vmatprep.mubr.bf16.mxu0 %v7521_v5  ;;  %5761 = vmatmul.mubr.msk.bf16.vlgmr.msra.gmra.mrb[0].mxu1 %vm7489_vm7, %v6285_v42  ;;  %vm7502_vm2 = vcmask 252928   ;;  %v1171_v22 = vrot.slane %v1157_v35, %v6308_v53 }
  0x94   : > { %v669_v0 = vpop.permute.xlu0 %668  ;;  %5762 = vmatprep.subr.msk.bf16.mxu0 %vm7490_vm3, %v677_v62  ;;  %869 = vmatprep.mubr.bf16.mxu1 %v7521_v5  ;;  %v1156_v62 = vsel %vm1152_vm9, 65537, %v7521_v5  ;;  %vm6441_vm9 = vcmp.ne.s16.totalorder %v633_v60, 0 }
  0x95   : > { %v678_v4 = vsel %vm7488_vm0, %v667_v59, %v669_v0  ;;  %797 = vmatpush1.bf16.msra.mxu0 %v703_v1  ;;  %v671_v7 = vpop.permute.xlu1 %670  ;;  %2589 = vrot.lane.b32.xlu1 %v6135_v18, %s6025_s22  ;;  %v7548_v59 = vmov 0  ;;  %v1163_v9 = vrot.slane %v1156_v62, %v6308_v53  ;;  %v1167_v28 = vrot.slane %v1156_v62, %v6319_v58 }
  0x96   : > { %v679_v15 = vsel %vm7488_vm0, %v669_v0, %v671_v7  ;;  %v709_v32 = vsel %vm7490_vm3, %v678_v4, 0  ;;  %v7549_v59 = vsel %vm6415_vm13, 4294967295, %v7548_v59  ;;  %v1111_v4 = vadd.s32 1, %v507_v51 }
  0x97   : > { %5764 = vmatprep.subr.msk.bf16.mxu1 %vm7490_vm3, %v679_v15  ;;  %v7552_v7 = vmov 0  ;;  %v7554_v51 = vmov 0  ;;  %vm1126_vm0 = vcmp.lt.s32.totalorder %v1110_v2, 32 }
  0x98   : > { %v410_v31 = vpop.permute.xlu0 %409  ;;  %838 = vmatpush1.bf16.msra.mxu1 %v709_v32  ;;  %v7553_v7 = vsel %vm6441_vm9, 4294967295, %v7552_v7  ;;  %v7555_v51 = vsel %vm6454_vm10, 4294967295, %v7554_v51 }
  0x99   : > { %v443_v19 = vsel %vm7493_vm11, 0, %v410_v31  ;;  %v412_v36 = vpop.permute.xlu1 %411 }
  0x9a   : > { %5763 = vmatmul.mubr.msk.bf16.vlgmr.msra.gmra.mrb[4].mxu0 %vm7489_vm7, %v6285_v42  ;;  %v646_v40 = vsel %vm6351_vm15, %v443_v19, 0  ;;  %v426_v44 = vsel %vm7493_vm11, %v410_v31, %v412_v36  ;;  %v7556_v19 = vmov 0 }
  0x9b   : > { %v882_v21 = vsel %vm7490_vm3, %v646_v40, 0  ;;  %937 = vmatprep.mubr.bf16.mxu0 %v7521_v5  ;;  %5765 = vmatmul.mubr.msk.bf16.vlgmr.msra.gmra.mrb[4].mxu1 %vm7489_vm7, %v6285_v42  ;;  %v647_v23 = vsel %vm6360_vm1, %v426_v44, 0  ;;  %v1108_v42 = vadd.s32 1, %v486_v37  ;;  %v1175_v44 = vrot.slane %v1157_v35, %v6319_v58 }
  0x9c   : > { %v414_v47 = vpop.permute.xlu0 %413  ;;  %5766 = vmatprep.subr.msk.bf16.mxu0 %vm7490_vm3, %v647_v23  ;;  %978 = vmatprep.mubr.bf16.mxu1 %v7521_v5 }
  0x9d   : > { %v427_v49 = vsel %vm7493_vm11, %v412_v36, %v414_v47  ;;  %v416_v54 = vpop.permute.xlu1 %415  ;;  %906 = vmatpush1.bf16.msra.mxu0 %v882_v21  ;;  %vm1124_vm4 = vcmp.lt.s32.totalorder %v1108_v42, 32 }
  0x9e   : > { %v648_v55 = vsel %vm6384_vm6, %v427_v49, 0  ;;  %v428_v57 = vsel %vm7493_vm11, %v414_v47, %v416_v54  ;;  %vm1154_vm12 = vmpackc.low %vm1125_vm5, %vm1124_vm4  ;;  %vm7558_vm4 = vcmask 1041408  }
  0x9f   : > { %v649_v37 = vsel %vm6399_vm8, %v428_v57, 0  ;;  %v888_v38 = vsel %vm7490_vm3, %v648_v55, 0  ;;  %v1158_v36 = vsel %vm1154_vm12, 65537, %v7521_v5  ;;  %vm7559_vm5 = vmmov %vm7558_vm4  ;;  %v7568_v57 = vmov 0 }
  0xa0   : > { %v418_v29 = vpop.permute.xlu0 %417  ;;  %5768 = vmatprep.subr.msk.bf16.mxu1 %vm7490_vm3, %v649_v37  ;;  %vm7563_vm12 = vmmov %vm7558_vm4  ;;  %v1179_v49 = vrot.slane %v1158_v36, %v6308_v53  ;;  %v1183_v60 = vrot.slane %v1158_v36, %v6319_v58  ;;  %v1210_v37 = vpack.c.bf16 %v5774_v27, %v5774_v27 }
  0xa1   : > { %v429_v30 = vsel %vm7493_vm11, %v416_v54, %v418_v29  ;;  %947 = vmatpush1.bf16.msra.mxu1 %v888_v38  ;;  %v420_v0 = vpop.permute.xlu1 %419 }
  0xa2   : > { %5767 = vmatmul.mubr.msk.bf16.vlgmr.msra.gmra.mrb[8].mxu0 %vm7489_vm7, %v6403_v52  ;;  %v650_v1 = vsel %vm6415_vm13, %v429_v30, 0  ;;  %v430_v6 = vsel %vm7493_vm11, %v418_v29, %v420_v0 }
  0xa3   : > { %1019 = vmatprep.mubr.bf16.mxu0 %v7521_v5  ;;  %v651_v15 = vsel %vm6422_vm14, %v430_v6, 0  ;;  %v894_v39 = vsel %vm7490_vm3, %v650_v1, 0  ;;  %vm7562_vm14 = vcmask 31744  }
  0xa4   : > { %v422_v10 = vpop.permute.xlu0 %421  ;;  %5769 = vmatmul.mubr.msk.bf16.vlgmr.msra.gmra.mrb[8].mxu1 %vm7489_vm7, %v6403_v52  ;;  %5770 = vmatprep.subr.msk.bf16.mxu0 %vm7490_vm3, %v651_v15  ;;  %vm1127_vm7 = vcmp.lt.s32.totalorder %v1111_v4, 32  ;;  %vm6465_vm3 = vcmp.ne.s16.totalorder %v1163_v9, 0  ;;  %v7573_v4 = vmov 0  ;;  %v7576_v15 = vmov 0 }
  0xa5   : > { %v431_v46 = vsel %vm7493_vm11, %v420_v0, %v422_v10  ;;  %988 = vmatpush1.bf16.msra.mxu0 %v894_v39  ;;  %v424_v31 = vpop.permute.xlu1 %423  ;;  %1060 = vmatprep.mubr.bf16.mxu1 %v7521_v5  ;;  %v7557_v19 = vsel %vm6465_vm3, 4294967295, %v7556_v19 }
  0xa6   : > { %v652_v32 = vsel %vm6441_vm9, %v431_v46, 0  ;;  %v432_v33 = vsel %vm7493_vm11, %v422_v10, %v424_v31  ;;  %vm6476_vm9 = vcmp.ne.s16.totalorder %v1167_v28, 0  ;;  %vm1155_vm11 = vmpackc.low %vm1127_vm7, %vm1126_vm0  ;;  %v7581_v28 = vmov 0 }
  0xa7   : > { %v653_v24 = vsel %vm6454_vm10, %v432_v33, 0  ;;  %v900_v41 = vsel %vm7559_vm5, %v652_v32, 0  ;;  %v1159_v55 = vsel %vm1155_vm11, 65537, %v7521_v5  ;;  %vm7566_vm0 = vmmov %vm7562_vm14  ;;  %vm6512_vm11 = vcmp.ne.s16.totalorder %v1179_v49, 0 }
  0xa8   : > { %v1070_v34 = vpop.permute.xlu0 %1069  ;;  %5772 = vmatprep.subr.msk.bf16.mxu1 %vm7558_vm4, %v653_v24  ;;  %vm6491_vm4 = vcmp.ne.s16.totalorder %v1171_v22, 0  ;;  %vm7567_vm7 = vmmov %vm7559_vm5  ;;  %v1187_v38 = vrot.slane %v1159_v55, %v6308_v53  ;;  %v1191_v6 = vrot.slane %v1159_v55, %v6319_v58 }
  0xa9   : > { %v1102_v40 = vsel %vm7502_vm2, 0, %v1070_v34  ;;  %1029 = vmatpush1.bf16.msra.mxu1 %v900_v41  ;;  %v1072_v21 = vpop.permute.xlu1 %1071  ;;  %v7565_v48 = vsel %vm6491_vm4, 4294967295, %v7564_v48 }
  0xaa   : > { %5771 = vmatmul.mubr.msk.bf16.vlgmr.msra.gmra.mrb[12].mxu0 %vm7562_vm14, %v6403_v52  ;;  %v1200_v45 = vsel %vm6465_vm3, %v1102_v40, 0  ;;  %v1086_v47 = vsel %vm7502_vm2, %v1070_v34, %v1072_v21  ;;  %vm6503_vm14 = vcmp.ne.s16.totalorder %v1175_v44, 0  ;;  %vm7507_vm3 = vcmask 7168  }
  0xab   : > { %v1215_v23 = vsel %vm7563_vm12, %v1200_v45, 0  ;;  %1270 = vmatprep.mubr.bf16.mxu0 %v7521_v5  ;;  %v1201_v54 = vsel %vm6476_vm9, %v1086_v47, 0  ;;  %v7569_v57 = vsel %vm6503_vm14, 4294967295, %v7568_v57  ;;  %vm7572_vm12 = vmmov %vm7559_vm5  ;;  %v5783_v45 = vld [vmem:[%s7481_s3 + $0x18] sm:$0xff] }
  0xac   : > { %v1074_v42 = vpop.permute.xlu0 %1073  ;;  %5773 = vmatmul.mubr.msk.bf16.vlgmr.msra.gmra.mrb[12].mxu1 %vm7566_vm0, %v6403_v52  ;;  %5775 = vmatprep.subr.msk.bf16.mxu0 %vm7567_vm7, %v1201_v54  ;;  %v7570_v52 = vmov 0  ;;  %vm6522_vm0 = vcmp.ne.s16.totalorder %v1183_v60, 0  ;;  %vm7575_vm7 = vcmask 31744  }
  0xad   : > { %v1087_v56 = vsel %vm7502_vm2, %v1072_v21, %v1074_v42  ;;  %v1076_v29 = vpop.permute.xlu1 %1075  ;;  %1239 = vmatpush1.bf16.msra.mxu0 %v1215_v23  ;;  %1311 = vmatprep.mubr.bf16.mxu1 %v7521_v5  ;;  %v7571_v52 = vsel %vm6512_vm11, 4294967295, %v7570_v52  ;;  %v7574_v4 = vsel %vm6522_vm0, 4294967295, %v7573_v4 }
  0xae   : > { %v1202_v62 = vsel %vm6491_vm4, %v1087_v56, 0  ;;  %v1088_v30 = vsel %vm7502_vm2, %v1074_v42, %v1076_v29  ;;  %v1455_v42 = vpack.c.bf16 %v5783_v45, %v5783_v45 }
  0xaf   : > { %v1203_v0 = vsel %vm6503_vm14, %v1088_v30, 0  ;;  %v1221_v2 = vsel %vm7572_vm12, %v1202_v62, 0  ;;  %vm7578_vm12 = vmmov %vm7575_vm7 }
  0xb0   : > { %v1078_v63 = vpop.permute.xlu0 %1077  ;;  %5777 = vmatprep.subr.msk.bf16.mxu1 %vm7559_vm5, %v1203_v0  ;;  %vm6532_vm5 = vcmp.ne.s16.totalorder %v1187_v38, 0 }
  0xb1   : > { %v1089_v1 = vsel %vm7502_vm2, %v1076_v29, %v1078_v63  ;;  %1280 = vmatpush1.bf16.msra.mxu1 %v1221_v2  ;;  %v1080_v53 = vpop.permute.xlu1 %1079  ;;  %v7577_v15 = vsel %vm6532_vm5, 4294967295, %v7576_v15 }
  0xb2   : > { %5776 = vmatmul.mubr.msk.bf16.vlgmr.msra.gmra.mrb[16].mxu0 %vm7575_vm7, %v1210_v37  ;;  %v1204_v9 = vsel %vm6512_vm11, %v1089_v1, 0  ;;  %v1090_v10 = vsel %vm7502_vm2, %v1078_v63, %v1080_v53  ;;  %vm7579_vm7 = vcmask 1041408   ;;  %vm6542_vm11 = vcmp.ne.s16.totalorder %v1191_v6, 0 }
  0xb3   : > { %1352 = vmatprep.mubr.bf16.mxu0 %v7521_v5  ;;  %v1205_v46 = vsel %vm6522_vm0, %v1090_v10, 0  ;;  %vm7580_vm4 = vmmov %vm7579_vm7  ;;  %v7582_v28 = vsel %vm6542_vm11, 4294967295, %v7581_v28 }
  0xb4   : > { %v1082_v35 = vpop.permute.xlu0 %1081  ;;  %5778 = vmatmul.mubr.msk.bf16.vlgmr.msra.gmra.mrb[16].mxu1 %vm7578_vm12, %v1210_v37  ;;  %5779 = vmatprep.subr.msk.bf16.mxu0 %vm7579_vm7, %v1205_v46  ;;  %v1227_v39 = vsel %vm7580_vm4, %v1204_v9, 0  ;;  %vm7583_vm12 = vmmov %vm7580_vm4  ;;  %vm7584_vm7 = vcmask 31744  }
  0xb5   : > { %v1091_v58 = vsel %vm7502_vm2, %v1080_v53, %v1082_v35  ;;  %1321 = vmatpush1.bf16.msra.mxu0 %v1227_v39  ;;  %v1084_v31 = vpop.permute.xlu1 %1083  ;;  %1393 = vmatprep.mubr.bf16.mxu1 %v7521_v5 }
  0xb6   : > { %v1206_v32 = vsel %vm6532_vm5, %v1091_v58, 0  ;;  %v1092_v33 = vsel %vm7502_vm2, %v1082_v35, %v1084_v31  ;;  %vm7585_vm2 = vmmov %vm7580_vm4  ;;  %v5792_v31 = vld [vmem:[%s7481_s3 + $0x20] sm:$0xff] }
  0xb7   : > { %v1207_v22 = vsel %vm6542_vm11, %v1092_v33, 0  ;;  %v1233_v36 = vsel %vm7583_vm12, %v1206_v32, 0  ;;  %vm7587_vm12 = vmmov %vm7585_vm2  ;;  %v1657_v33 = vpack.c.bf16 %v5792_v31, %v5792_v31 }
  0xb8   : > { %v1411_v24 = vpop.permute.xlu0 %1410  ;;  %5781 = vmatprep.subr.msk.bf16.mxu1 %vm7580_vm4, %v1207_v22  ;;  %vm7586_vm4 = vmmov %vm7584_vm7 }
  0xb9   : > { %v1443_v34 = vsel %vm7507_vm3, 0, %v1411_v24  ;;  %1362 = vmatpush1.bf16.msra.mxu1 %v1233_v36  ;;  %v1413_v40 = vpop.permute.xlu1 %1412 }
  0xba   : > { %5780 = vmatmul.mubr.msk.bf16.vlgmr.msra.gmra.mrb[20].mxu0 %vm7584_vm7, %v1210_v37  ;;  %v1445_v41 = vsel %vm6351_vm15, %v1443_v34, 0  ;;  %v1427_v44 = vsel %vm7507_vm3, %v1411_v24, %v1413_v40  ;;  %vm7588_vm7 = vmmov %vm7585_vm2 }
  0xbb   : > { %v1460_v21 = vsel %vm7585_vm2, %v1445_v41, 0  ;;  %1515 = vmatprep.mubr.bf16.mxu0 %v7521_v5  ;;  %v1446_v23 = vsel %vm6360_vm1, %v1427_v44, 0 }
  0xbc   : > { %v1415_v47 = vpop.permute.xlu0 %1414  ;;  %5782 = vmatmul.mubr.msk.bf16.vlgmr.msra.gmra.mrb[20].mxu1 %vm7586_vm4, %v1210_v37  ;;  %5784 = vmatprep.subr.msk.bf16.mxu0 %vm7587_vm12, %v1446_v23  ;;  %vm7589_vm12 = vnez %v7551_v61 }
  0xbd   : > { %v1428_v27 = vsel %vm7507_vm3, %v1413_v40, %v1415_v47  ;;  %v1417_v49 = vpop.permute.xlu1 %1416  ;;  %1484 = vmatpush1.bf16.msra.mxu0 %v1460_v21  ;;  %1556 = vmatprep.mubr.bf16.mxu1 %v7521_v5 }
  0xbe   : > { %v1447_v54 = vsel %vm6384_vm6, %v1428_v27, 0  ;;  %v1429_v55 = vsel %vm7507_vm3, %v1415_v47, %v1417_v49 }
  0xbf   : > { %v1448_v60 = vsel %vm6399_vm8, %v1429_v55, 0  ;;  %v1466_v37 = vsel %vm7588_vm7, %v1447_v54, 0 }
  0xc0   : > { %v1419_v56 = vpop.permute.xlu0 %1418  ;;  %5786 = vmatprep.subr.msk.bf16.mxu1 %vm7585_vm2, %v1448_v60  ;;  %vm7590_vm2 = vmmov %vm7586_vm4 }
  0xc1   : > { %v1430_v29 = vsel %vm7507_vm3, %v1417_v49, %v1419_v56  ;;  %1525 = vmatpush1.bf16.msra.mxu1 %v1466_v37  ;;  %v1421_v62 = vpop.permute.xlu1 %1420 }
  0xc2   : > { %5785 = vmatmul.mubr.msk.bf16.vlgmr.msra.gmra.mrb[24].mxu0 %vm7586_vm4, %v1455_v42  ;;  %v1449_v30 = vsel %vm6415_vm13, %v1430_v29, 0  ;;  %v1431_v38 = vsel %vm7507_vm3, %v1419_v56, %v1421_v62  ;;  %vm7591_vm4 = vmmov %vm7588_vm7  ;;  %vm7592_vm13 = vnez %v7553_v7 }
  0xc3   : > { %1597 = vmatprep.mubr.bf16.mxu0 %v7521_v5  ;;  %v1450_v0 = vsel %vm7589_vm12, %v1431_v38, 0  ;;  %v1472_v2 = vsel %vm7591_vm4, %v1449_v30, 0  ;;  %vm7593_vm6 = vmmov %vm7591_vm4 }
  0xc4   : > { %v1423_v63 = vpop.permute.xlu0 %1422  ;;  %5787 = vmatmul.mubr.msk.bf16.vlgmr.msra.gmra.mrb[24].mxu1 %vm7590_vm2, %v1455_v42  ;;  %5788 = vmatprep.subr.msk.bf16.mxu0 %vm7588_vm7, %v1450_v0  ;;  %vm7594_vm2 = vmmov %vm7591_vm4 }
  0xc5   : > { %v1432_v1 = vsel %vm7507_vm3, %v1421_v62, %v1423_v63  ;;  %1566 = vmatpush1.bf16.msra.mxu0 %v1472_v2  ;;  %v1425_v6 = vpop.permute.xlu1 %1424  ;;  %1638 = vmatprep.mubr.bf16.mxu1 %v7521_v5  ;;  %v6599_v35 = vsel %vm7594_vm2, %v6101_v8, 0  ;;  %vm7595_vm7 = vmmov %vm7594_vm2  ;;  %v5801_v62 = vld [vmem:[%s7481_s3 + $0x28] sm:$0xff] }
  0xc6   : > { %v1451_v53 = vsel %vm7592_vm13, %v1432_v1, 0  ;;  %v1433_v9 = vsel %vm7507_vm3, %v1423_v63, %v1425_v6  ;;  %5793 = vmatprep.subr.msk.bf16.mxu0 %vm7593_vm6, %v6109_v12  ;;  %vm7596_vm4 = vmmov %vm7594_vm2  ;;  %vm7597_vm13 = vcmask 31744   ;;  %v1902_v1 = vpack.c.bf16 %v5801_v62, %v5801_v62 }
  0xc7   : > { %v1452_v10 = vsel %vm6454_vm10, %v1433_v9, 0  ;;  %v1478_v58 = vsel %vm7596_vm4, %v1451_v53, 0  ;;  %vm7598_vm6 = vmmov %vm7594_vm2  ;;  %vm7508_vm2 = vcmask 1039360  }
  0xc8   : > { %v1858_v46 = vpop.permute.xlu0 %1857  ;;  %5790 = vmatprep.subr.msk.bf16.mxu1 %vm7595_vm7, %v1452_v10  ;;  %v6611_v8 = vsel %vm7598_vm6, %v6105_v11, 0  ;;  %vm7599_vm7 = vmmov %vm7596_vm4 }
  0xc9   : > { %1607 = vmatpush1.bf16.msra.mxu1 %v1478_v58  ;;  %v1860_v39 = vpop.permute.xlu1 %1859  ;;  %vm7602_vm3 = vmmov %vm7598_vm6 }
  0xca   : > { %5789 = vmatmul.mubr.msk.bf16.vlgmr.msra.gmra.mrb[28].mxu0 %vm7597_vm13, %v1455_v42  ;;  %5795 = vmatprep.subr.msk.bf16.mxu1 %vm7599_vm7, %v6115_v13  ;;  %vm7600_vm13 = vmmov %vm7596_vm4  ;;  %vm7601_vm4 = vcmask 31744   ;;  %v6625_v11 = vsel %vm7602_vm3, %v6117_v14, 0  ;;  %v1874_v41 = vsel %vm7508_vm2, %v1858_v46, %v1860_v39 }
  0xcb   : > { %1686 = vmatpush1.bf16.msra.mxu0 %v6599_v35  ;;  %1717 = vmatprep.mubr.bf16.mxu0 %v7521_v5  ;;  %vm7603_vm7 = vmmov %vm7601_vm4 }
  0xcc   : > { %5797 = vmatprep.subr.msk.bf16.mxu0 %vm7600_vm13, %v6125_v16  ;;  %v1862_v32 = vpop.permute.xlu0 %1861  ;;  %5791 = vmatmul.mubr.msk.bf16.vlgmr.msra.gmra.mrb[28].mxu1 %vm7601_vm4, %v1455_v42  ;;  %vm7604_vm13 = vmmov %vm7602_vm3 }
  0xcd   : > { %1727 = vmatpush1.bf16.msra.mxu1 %v6611_v8  ;;  %1758 = vmatprep.mubr.bf16.mxu1 %v7521_v5  ;;  %v1875_v22 = vsel %vm7508_vm2, %v1860_v39, %v1862_v32  ;;  %v1864_v24 = vpop.permute.xlu1 %1863  ;;  %v6636_v21 = vsel %vm7604_vm13, %v6127_v17, 0  ;;  %vm7607_vm13 = vmmov %vm7602_vm3 }
  0xce   : > { %5799 = vmatprep.subr.msk.bf16.mxu1 %vm7598_vm6, %v6135_v18  ;;  %v1893_v36 = vsel %vm6476_vm9, %v1875_v22, 0  ;;  %vm7605_vm6 = vnez %v7557_v19  ;;  %v1876_v23 = vsel %vm7508_vm2, %v1862_v32, %v1864_v24 }
  0xcf   : > { %v1892_v47 = vsel %vm7605_vm6, %v1874_v41, 0 }
  0xd0   : > { %v1866_v34 = vpop.permute.xlu0 %1865  ;;  %v1907_v49 = vsel %vm7607_vm13, %v1892_v47, 0 }
  0xd1   : > { %v1877_v40 = vsel %vm7508_vm2, %v1864_v24, %v1866_v34  ;;  %v1868_v44 = vpop.permute.xlu1 %1867 }
  0xd2   : > { %5794 = vmatmul.mubr.msk.bf16.vlgmr.msra.gmra.mrb[32].mxu0 %vm7603_vm7, %v1657_v33  ;;  %v1895_v14 = vsel %vm6503_vm14, %v1877_v40, 0  ;;  %vm7606_vm7 = vmmov %vm7602_vm3  ;;  %v1878_v60 = vsel %vm7508_vm2, %v1866_v34, %v1868_v44 }
  0xd3   : > { %1768 = vmatpush1.bf16.msra.mxu0 %v6625_v11  ;;  %1799 = vmatprep.mubr.bf16.mxu0 %v7521_v5  ;;  %vm7609_vm6 = vmmov %vm7606_vm7 }
  0xd4   : > { %5802 = vmatprep.subr.msk.bf16.mxu0 %vm7602_vm3, %v1893_v36  ;;  %v1870_v45 = vpop.permute.xlu0 %1869  ;;  %5796 = vmatmul.mubr.msk.bf16.vlgmr.msra.gmra.mrb[32].mxu1 %vm7601_vm4, %v1657_v33  ;;  %vm7608_vm3 = vnez %v7565_v48  ;;  %vm7610_vm13 = vmmov %vm7609_vm6 }
  0xd5   : > { %1809 = vmatpush1.bf16.msra.mxu1 %v6636_v21  ;;  %1840 = vmatprep.mubr.bf16.mxu1 %v7521_v5  ;;  %v1879_v17 = vsel %vm7508_vm2, %v1868_v44, %v1870_v45  ;;  %v1872_v27 = vpop.permute.xlu1 %1871  ;;  %v1894_v42 = vsel %vm7608_vm3, %v1876_v23, 0 }
  0xd6   : > { %5804 = vmatprep.subr.msk.bf16.mxu1 %vm7606_vm7, %v1895_v14  ;;  %v1897_v55 = vsel %vm6522_vm0, %v1879_v17, 0  ;;  %v1890_v56 = vsel %vm7508_vm2, %v1872_v27, 0  ;;  %v1913_v37 = vsel %vm7609_vm6, %v1894_v42, 0  ;;  %vm7516_vm7 = vcmask 793600   ;;  %v5810_v42 = vld [vmem:[%s7481_s3 + $0x30] sm:$0xff] }
  0xd7   : > { %v1899_v30 = vsel %vm6542_vm11, %v1890_v56, 0  ;;  %vm7611_vm2 = vnez %v7571_v52  ;;  %vm7612_vm0 = vcmask 1039360  }
  0xd8   : > { %v2103_v54 = vpop.permute.xlu0 %2102  ;;  %v1896_v63 = vsel %vm7611_vm2, %v1878_v60, 0  ;;  %v1880_v0 = vsel %vm7612_vm0, %v1870_v45, %v1872_v27  ;;  %vm7614_vm0 = vmmov %vm7601_vm4  ;;  %v2820_v45 = vld [vmem:[%s7482_s4] sm:$0xff] }
  0xd9   : > { %v2105_v29 = vpop.permute.xlu1 %2104  ;;  %v1898_v9 = vsel %vm6532_vm5, %v1880_v0, 0  ;;  %2823 = vperm.xlu0 %5972, %v2820_v45  }
  0xda   : > { %5798 = vmatmul.mubr.msk.bf16.vlgmr.msra.gmra.mrb[36].mxu0 %vm7601_vm4, %v1657_v33  ;;  %v2119_v39 = vsel %vm7516_vm7, %v2103_v54, %v2105_v29 }
  0xdb   : > { %1931 = vmatpush1.bf16.msra.mxu0 %v1907_v49  ;;  %1962 = vmatprep.mubr.bf16.mxu0 %v7521_v5  ;;  %v2137_v24 = vsel %vm6351_vm15, %v2119_v39, 0 }
  0xdc   : > { %5806 = vmatprep.subr.msk.bf16.mxu0 %vm7610_vm13, %v1897_v55  ;;  %v2107_v38 = vpop.permute.xlu0 %2106  ;;  %5800 = vmatmul.mubr.msk.bf16.vlgmr.msra.gmra.mrb[36].mxu1 %vm7601_vm4, %v1657_v33  ;;  %vm7613_vm13 = vmmov %vm7609_vm6 }
  0xdd   : > { %1972 = vmatpush1.bf16.msra.mxu1 %v1913_v37  ;;  %2003 = vmatprep.mubr.bf16.mxu1 %v7521_v5  ;;  %v2120_v2 = vsel %vm7516_vm7, %v2105_v29, %v2107_v38  ;;  %v2109_v6 = vpop.permute.xlu1 %2108  ;;  %v1919_v53 = vsel %vm7613_vm13, %v1896_v63, 0  ;;  %vm7615_vm4 = vmmov %vm7609_vm6  ;;  %v2147_v29 = vpack.c.bf16 %v5810_v42, %v5810_v42 }
  0xde   : > { %5808 = vmatprep.subr.msk.bf16.mxu1 %vm7609_vm6, %v1899_v30  ;;  %v2138_v46 = vsel %vm6360_vm1, %v2120_v2, 0  ;;  %v1925_v32 = vsel %vm7615_vm4, %v1898_v9, 0  ;;  %vm7616_vm6 = vmmov %vm7615_vm4  ;;  %v2121_v34 = vsel %vm7516_vm7, %v2107_v38, %v2109_v6 }
  0xdf   : > { %vm7617_vm13 = vmmov %vm7614_vm0 }
  0xe0   : > { %v2111_v10 = vpop.permute.xlu0 %2110 }
  0xe1   : > { %v2122_v58 = vsel %vm7516_vm7, %v2109_v6, %v2111_v10  ;;  %v2113_v31 = vpop.permute.xlu1 %2112 }
  0xe2   : > { %5803 = vmatmul.mubr.msk.bf16.vlgmr.msra.gmra.mrb[40].mxu0 %vm7614_vm0, %v1902_v1  ;;  %v2140_v33 = vsel %vm6399_vm8, %v2122_v58, 0  ;;  %vm7618_vm0 = vmmov %vm7615_vm4  ;;  %v2123_v17 = vsel %vm7516_vm7, %v2111_v10, %v2113_v31 }
  0xe3   : > { %2013 = vmatpush1.bf16.msra.mxu0 %v1919_v53  ;;  %2044 = vmatprep.mubr.bf16.mxu0 %v7521_v5  ;;  %vm7619_vm4 = vmmov %vm7618_vm0 }
  0xe4   : > { %5811 = vmatprep.subr.msk.bf16.mxu0 %vm7616_vm6, %v2138_v46  ;;  %v2115_v22 = vpop.permute.xlu0 %2114  ;;  %5805 = vmatmul.mubr.msk.bf16.vlgmr.msra.gmra.mrb[40].mxu1 %vm7617_vm13, %v1902_v1  ;;  %v2152_v41 = vsel %vm7619_vm4, %v2137_v24, 0  ;;  %vm7620_vm6 = vnez %v7545_v25  ;;  %vm7621_vm4 = vmmov %vm7618_vm0 }
  0xe5   : > { %2054 = vmatpush1.bf16.msra.mxu1 %v1925_v32  ;;  %2085 = vmatprep.mubr.bf16.mxu1 %v7521_v5  ;;  %v2124_v36 = vsel %vm7516_vm7, %v2113_v31, %v2115_v22  ;;  %v2117_v40 = vpop.permute.xlu1 %2116  ;;  %v2139_v44 = vsel %vm7620_vm6, %v2121_v34, 0  ;;  %vm7624_vm8 = vmmov %vm7621_vm4 }
  0xe6   : > { %5813 = vmatprep.subr.msk.bf16.mxu1 %vm7618_vm0, %v2140_v33  ;;  %v2142_v47 = vsel %vm7589_vm12, %v2124_v36, 0  ;;  %v2135_v23 = vsel %vm7516_vm7, %v2117_v40, 0  ;;  %v2158_v49 = vsel %vm7618_vm0, %v2139_v44, 0  ;;  %vm7622_vm12 = vmmov %vm7617_vm13  ;;  %v2125_v60 = vsel %vm7516_vm7, %v2115_v22, %v2117_v40  ;;  %v5819_v33 = vld [vmem:[%s7481_s3 + $0x38] sm:$0xff] }
  0xe7   : > { %v2144_v54 = vsel %vm6454_vm10, %v2135_v23, 0  ;;  %vm7517_vm0 = vcmask 785408   ;;  %vm7625_vm10 = vnez %v7553_v7  ;;  %vm7626_vm7 = vmmov %vm7621_vm4  ;;  %v2376_v36 = vpack.c.bf16 %v5819_v33, %v5819_v33 }
  0xe8   : > { %v2348_v14 = vpop.permute.xlu0 %2347  ;;  %v2143_v30 = vsel %vm7625_vm10, %v2125_v60, 0 }
  0xe9   : > { %v2350_v27 = vpop.permute.xlu1 %2349 }
  0xea   : > { %5807 = vmatmul.mubr.msk.bf16.vlgmr.msra.gmra.mrb[44].mxu0 %vm7617_vm13, %v1902_v1  ;;  %vm7623_vm13 = vnez %v7549_v59  ;;  %v2364_v53 = vsel %vm7517_vm0, %v2348_v14, %v2350_v27 }
  0xeb   : > { %2176 = vmatpush1.bf16.msra.mxu0 %v2152_v41  ;;  %2207 = vmatprep.mubr.bf16.mxu0 %v7521_v5  ;;  %v2141_v56 = vsel %vm7623_vm13, %v2123_v17, 0  ;;  %vm7627_vm13 = vmmov %vm7621_vm4 }
  0xec   : > { %5815 = vmatprep.subr.msk.bf16.mxu0 %vm7621_vm4, %v2142_v47  ;;  %v2352_v55 = vpop.permute.xlu0 %2351  ;;  %5809 = vmatmul.mubr.msk.bf16.vlgmr.msra.gmra.mrb[44].mxu1 %vm7622_vm12, %v1902_v1  ;;  %v2164_v62 = vsel %vm7621_vm4, %v2141_v56, 0  ;;  %v2170_v1 = vsel %vm7626_vm7, %v2143_v30, 0 }
  0xed   : > { %2217 = vmatpush1.bf16.msra.mxu1 %v2158_v49  ;;  %2248 = vmatprep.mubr.bf16.mxu1 %v7521_v5  ;;  %v2354_v37 = vpop.permute.xlu1 %2353  ;;  %v2365_v63 = vsel %vm7517_vm0, %v2350_v27, %v2352_v55 }
  0xee   : > { %5817 = vmatprep.subr.msk.bf16.mxu1 %vm7624_vm8, %v2144_v54  ;;  %vm7628_vm8 = vmmov %vm7622_vm12  ;;  %v2366_v46 = vsel %vm7517_vm0, %v2352_v55, %v2354_v37 }
  0xef   : > { %vm7630_vm7 = vmmov %vm7628_vm8 }
  0xf0   : > { %v2356_v38 = vpop.permute.xlu0 %2355 }
  0xf1   : > { %v2358_v0 = vpop.permute.xlu1 %2357  ;;  %v2367_v2 = vsel %vm7517_vm0, %v2354_v37, %v2356_v38 }
  0xf2   : > { %5812 = vmatmul.mubr.msk.bf16.vlgmr.msra.gmra.mrb[48].mxu0 %vm7622_vm12, %v2147_v29  ;;  %vm7629_vm12 = vmmov %vm7621_vm4  ;;  %v2368_v34 = vsel %vm7517_vm0, %v2356_v38, %v2358_v0 }
  0xf3   : > { %2258 = vmatpush1.bf16.msra.mxu0 %v2164_v62  ;;  %2289 = vmatprep.mubr.bf16.mxu0 %v7521_v5  ;;  %v2381_v10 = vsel %vm7629_vm12, %v2364_v53, 0  ;;  %vm7632_vm12 = vmmov %vm7630_vm7 }
  0xf4   : > { %5820 = vmatprep.subr.msk.bf16.mxu0 %vm7627_vm13, %v2365_v63  ;;  %v2360_v6 = vpop.permute.xlu0 %2359  ;;  %5814 = vmatmul.mubr.msk.bf16.vlgmr.msra.gmra.mrb[48].mxu1 %vm7628_vm8, %v2147_v29  ;;  %vm7631_vm13 = vmmov %vm7621_vm4  ;;  %vm7520_vm8 = vcmask 777216  }
  0xf5   : > { %2299 = vmatpush1.bf16.msra.mxu1 %v2170_v1  ;;  %2330 = vmatprep.mubr.bf16.mxu1 %v7521_v5  ;;  %v2362_v9 = vpop.permute.xlu1 %2361  ;;  %v2369_v39 = vsel %vm7517_vm0, %v2358_v0, %v2360_v6  ;;  %v2387_v32 = vsel %vm7631_vm13, %v2366_v46, 0  ;;  %vm7634_vm13 = vmmov %vm7621_vm4  ;;  %v5828_v1 = vld [vmem:[%s7481_s3 + $0x40] sm:$0xff] }
  0xf6   : > { %5822 = vmatprep.subr.msk.bf16.mxu1 %vm7621_vm4, %v2367_v2  ;;  %v2373_v22 = vsel %vm7517_vm0, %v2362_v9, 0  ;;  %v2393_v44 = vsel %vm7634_vm13, %v2368_v34, 0  ;;  %v2370_v14 = vsel %vm7517_vm0, %v2360_v6, %v2362_v9  ;;  %vm7638_vm0 = vnez %v7557_v19 }
  0xf7   : > { %v2620_v9 = vpack.c.bf16 %v5828_v1, %v5828_v1 }
  0xf8   : > { %v2576_v58 = vpop.permute.xlu0 %2575 }
  0xf9   : > { %v2578_v31 = vpop.permute.xlu1 %2577 }
  0xfa   : > { %5816 = vmatmul.mubr.msk.bf16.vlgmr.msra.gmra.mrb[52].mxu0 %vm7630_vm7, %v2147_v29  ;;  %vm7633_vm7 = vmmov %vm7621_vm4  ;;  %v2592_v17 = vsel %vm7520_vm8, %v2576_v58, %v2578_v31 }
  0xfb   : > { %2404 = vmatpush1.bf16.msra.mxu0 %v2381_v10  ;;  %2435 = vmatprep.mubr.bf16.mxu0 %v7521_v5  ;;  %v2610_v55 = vsel %vm7638_vm0, %v2592_v17, 0 }
  0xfc   : > { %5824 = vmatprep.subr.msk.bf16.mxu0 %vm7621_vm4, %v2369_v39  ;;  %v2580_v24 = vpop.permute.xlu0 %2579  ;;  %5818 = vmatmul.mubr.msk.bf16.vlgmr.msra.gmra.mrb[52].mxu1 %vm7632_vm12, %v2147_v29  ;;  %vm7635_vm4 = vmmov %vm7632_vm12  ;;  %v2834_v39 = vld [vmem:[%s7483_s5] sm:$0xff] }
  0xfd   : > { %2445 = vmatpush1.bf16.msra.mxu1 %v2387_v32  ;;  %2476 = vmatprep.mubr.bf16.mxu1 %v7521_v5  ;;  %v2593_v40 = vsel %vm7520_vm8, %v2578_v31, %v2580_v24  ;;  %v2582_v41 = vpop.permute.xlu1 %2581  ;;  %vm7636_vm12 = vmmov %vm7633_vm7  ;;  %v2835_v31 = vld [vmem:[%s7484_s6] sm:$0xff] }
  0xfe   : > { %5826 = vmatprep.subr.msk.bf16.mxu1 %vm7633_vm7, %v2373_v22  ;;  %v2611_v47 = vsel %vm6476_vm9, %v2593_v40, 0  ;;  %v2399_v49 = vsel %vm7636_vm12, %v2370_v14, 0  ;;  %vm7637_vm13 = vmmov %vm7635_vm4  ;;  %v2594_v56 = vsel %vm7520_vm8, %v2580_v24, %v2582_v41  ;;  %2991 = vperm.xlu1 %5973, %v2834_v39  }
  0xff   : > { %v2612_v37 = vsel %vm7608_vm3, %v2594_v56, 0 }
 0x100   : > { %v2584_v45 = vpop.permute.xlu0 %2583 }
 0x101   : > { %v2595_v23 = vsel %vm7520_vm8, %v2582_v41, %v2584_v45 }
 0x102   : > { %5821 = vmatmul.mubr.msk.bf16.vlgmr.msra.gmra.mrb[56].mxu0 %vm7635_vm4, %v2376_v36  ;;  %v2586_v27 = vpop.permute.xlu1 %2585  ;;  %v2613_v42 = vsel %vm6503_vm14, %v2595_v23, 0  ;;  %vm7639_vm4 = vmmov %vm7633_vm7  ;;  %3004 = vperm.xlu1 %5973, %v2835_v31  }
 0x103   : > { %2486 = vmatpush1.bf16.msra.mxu0 %v2393_v44  ;;  %2517 = vmatprep.mubr.bf16.mxu0 %v7521_v5  ;;  %vm7640_vm12 = vmmov %vm7639_vm4  ;;  %v2596_v63 = vsel %vm7520_vm8, %v2584_v45, %v2586_v27 }
 0x104   : > { %5829 = vmatprep.subr.msk.bf16.mxu0 %vm7633_vm7, %v2611_v47  ;;  %v2588_v54 = vpop.permute.xlu0 %2587  ;;  %5823 = vmatmul.mubr.msk.bf16.vlgmr.msra.gmra.mrb[56].mxu1 %vm7637_vm13, %v2376_v36  ;;  %v2625_v29 = vsel %vm7640_vm12, %v2610_v55, 0  ;;  %vm7641_vm7 = vnez %v7574_v4  ;;  %vm7642_vm14 = vmmov %vm7639_vm4  ;;  %v2614_v6 = vsel %vm7611_vm2, %v2596_v63, 0 }
 0x105   : > { %2527 = vmatpush1.bf16.msra.mxu1 %v2399_v49  ;;  %2558 = vmatprep.mubr.bf16.mxu1 %v7521_v5  ;;  %v2597_v60 = vsel %vm7520_vm8, %v2586_v27, %v2588_v54  ;;  %v2631_v0 = vsel %vm7642_vm14, %v2612_v37, 0  ;;  %vm7643_vm12 = vmmov %vm7637_vm13 }
 0x106   : > { %5831 = vmatprep.subr.msk.bf16.mxu1 %vm7639_vm4, %v2613_v42  ;;  %v2615_v30 = vsel %vm7641_vm7, %v2597_v60, 0  ;;  %vm7644_vm14 = vmmov %vm7639_vm4 }
 0x107   : > { %v2590_v62 = vpop.permute.xlu1 %2589 }
 0x108   : > { %v2608_v38 = vsel %vm7520_vm8, %v2590_v62, 0  ;;  %v2598_v53 = vsel %vm7520_vm8, %v2588_v54, %v2590_v62 }
 0x109   : > { %v2617_v2 = vsel %vm6542_vm11, %v2608_v38, 0  ;;  %v2616_v46 = vsel %vm6532_vm5, %v2598_v53, 0 }
 0x10a   : > { %5825 = vmatmul.mubr.msk.bf16.vlgmr.msra.gmra.mrb[60].mxu0 %vm7637_vm13, %v2376_v36  ;;  %vm7645_vm13 = vmmov %vm7639_vm4 }
 0x10b   : > { %2649 = vmatpush1.bf16.msra.mxu0 %v2625_v29  ;;  %2680 = vmatprep.mubr.bf16.mxu0 %v7521_v5  ;;  %v2637_v10 = vsel %vm7645_vm13, %v2614_v6, 0 }
 0x10c   : > { %5833 = vmatprep.subr.msk.bf16.mxu0 %vm7639_vm4, %v2615_v30  ;;  %5827 = vmatmul.mubr.msk.bf16.vlgmr.msra.gmra.mrb[60].mxu1 %vm7643_vm12, %v2376_v36  ;;  %vm7646_vm4 = vmmov %vm7643_vm12 }
 0x10d   : > { %2690 = vmatpush1.bf16.msra.mxu1 %v2631_v0  ;;  %2721 = vmatprep.mubr.bf16.mxu1 %v7521_v5  ;;  %vm7647_vm12 = vmmov %vm7645_vm13 }
 0x10e   : > { %5835 = vmatprep.subr.msk.bf16.mxu1 %vm7644_vm14, %v2617_v2  ;;  %v2643_v58 = vsel %vm7647_vm12, %v2616_v46, 0  ;;  %vm7648_vm8 = vmmov %vm7646_vm4 }
 0x10f   : > { %vm7649_vm14 = vmmov %vm7646_vm4 }
 0x110   : > { %vm7650_vm13 = vmmov %vm7646_vm4 }
 0x112   : > { %5830 = vmatmul.mubr.msk.bf16.vlgmr.msra.gmra.mrb[64].mxu0 %vm7646_vm4, %v2620_v9  ;;  %vm7651_vm4 = vcmask 261120  }
 0x113   : > { %2731 = vmatpush1.bf16.msra.mxu0 %v2637_v10  ;;  %2762 = vmatprep.mubr.bf16.mxu0 %v7521_v5  ;;  %vm7652_vm12 = vmmov %vm7651_vm4 }
 0x114   : > { %5832 = vmatmul.mubr.msk.bf16.vlgmr.msra.gmra.mrb[64].mxu1 %vm7648_vm8, %v2620_v9  ;;  %vm3178_vm8 = vcmask 1043456  }
 0x115   : > { %2772 = vmatpush1.bf16.msra.mxu1 %v2643_v58  ;;  %2803 = vmatprep.mubr.bf16.mxu1 %v7521_v5 }
 0x11a   : > { %5834 = vmatmul.mubr.msk.bf16.vlgmr.msra.gmra.mrb[68].mxu0 %vm7649_vm14, %v2620_v9  ;;  %vm7653_vm14 = vmmov %vm7651_vm4 }
 0x11b   : > { %3234 = vmatprep.mubr.bf16.mxu0 %v7521_v5 }
 0x11c   : > { %5836 = vmatmul.mubr.msk.bf16.vlgmr.msra.gmra.mrb[68].mxu1 %vm7650_vm13, %v2620_v9  ;;  %vm7527_vm13 = vcmask 64512  }
 0x11d   : > { %3275 = vmatprep.mubr.bf16.mxu1 %v7521_v5 }
 0x165   : > { %v748_v32 = vpop.f32.mrb[0].mxu0 }
 0x166   : > { %v750_v33 = vpop.f32.mrb[1].mxu0  ;;  %v789_v24 = vpop.f32.mrb[0].mxu1 }
 0x167   : > { %v752_v22 = vpop.f32.mrb[2].mxu0  ;;  %v791_v36 = vpop.f32.mrb[1].mxu1 }
 0x168   : > { %v753_v34 = vpop.f32.mrb[3].mxu0  ;;  %v793_v40 = vpop.f32.mrb[2].mxu1 }
 0x169   : > { %v794_v41 = vpop.f32.mrb[3].mxu1 }
 0x16d   : > { %v830_v44 = vpop.f32.mrb[4].mxu0 }
 0x16e   : > { %v832_v14 = vpop.f32.mrb[5].mxu0  ;;  %v871_v47 = vpop.f32.mrb[4].mxu1 }
 0x16f   : > { %v834_v45 = vpop.f32.mrb[6].mxu0  ;;  %v873_v17 = vpop.f32.mrb[5].mxu1 }
 0x170   : > { %v835_v23 = vpop.f32.mrb[7].mxu0  ;;  %v875_v27 = vpop.f32.mrb[6].mxu1 }
 0x171   : > { %v876_v49 = vpop.f32.mrb[7].mxu1 }
 0x175   : > { %v939_v42 = vpop.f32.mrb[8].mxu0 }
 0x176   : > { %v940_v54 = vadd.f32 %v939_v42, %v748_v32  ;;  %v941_v55 = vpop.f32.mrb[9].mxu0 }
 0x177   : > { %v942_v56 = vadd.f32 %v941_v55, %v750_v33  ;;  %v943_v60 = vpop.f32.mrb[10].mxu0  ;;  %v980_v37 = vpop.f32.mrb[8].mxu1 }
 0x178   : > { %v944_v29 = vpop.f32.mrb[11].mxu0  ;;  %v981_v62 = vadd.f32 %v980_v37, %v789_v24  ;;  %v982_v30 = vpop.f32.mrb[9].mxu1 }
 0x179   : > { %v983_v38 = vadd.f32 %v982_v30, %v791_v36  ;;  %v984_v63 = vpop.f32.mrb[10].mxu1 }
 0x17a   : > { %v985_v0 = vpop.f32.mrb[11].mxu1 }
 0x17d   : > { %v1021_v1 = vpop.f32.mrb[12].mxu0 }
 0x17e   : > { %v1022_v2 = vadd.f32 %v1021_v1, %v830_v44  ;;  %v1023_v6 = vpop.f32.mrb[13].mxu0 }
 0x17f   : > { %v1024_v53 = vadd.f32 %v1023_v6, %v832_v14  ;;  %v1025_v9 = vpop.f32.mrb[14].mxu0  ;;  %v1062_v46 = vpop.f32.mrb[12].mxu1 }
 0x180   : > { %v1026_v10 = vpop.f32.mrb[15].mxu0  ;;  %v1063_v58 = vadd.f32 %v1062_v46, %v871_v47  ;;  %v1064_v39 = vpop.f32.mrb[13].mxu1 }
 0x181   : > { %v1065_v31 = vadd.f32 %v1064_v39, %v873_v17  ;;  %v1066_v32 = vpop.f32.mrb[14].mxu1 }
 0x182   : > { %v1067_v33 = vpop.f32.mrb[15].mxu1 }
 0x185   : > { %v1272_v22 = vpop.f32.mrb[16].mxu0 }
 0x186   : > { %v1402_v34 = vadd.f32 %v1272_v22, %v940_v54  ;;  %v1274_v40 = vpop.f32.mrb[17].mxu0 }
 0x187   : > { %v1403_v24 = vadd.f32 %v1274_v40, %v942_v56  ;;  %v1276_v41 = vpop.f32.mrb[18].mxu0  ;;  %v1313_v45 = vpop.f32.mrb[16].mxu1 }
 0x188   : > { %v1277_v36 = vpop.f32.mrb[19].mxu0  ;;  %v1404_v23 = vadd.f32 %v1313_v45, %v981_v62  ;;  %v1315_v27 = vpop.f32.mrb[17].mxu1 }
 0x189   : > { %v1405_v44 = vadd.f32 %v1315_v27, %v983_v38  ;;  %v1317_v49 = vpop.f32.mrb[18].mxu1 }
 0x18a   : > { %v1318_v14 = vpop.f32.mrb[19].mxu1 }
 0x18d   : > { %v1354_v42 = vpop.f32.mrb[20].mxu0 }
 0x18e   : > { %v1406_v55 = vadd.f32 %v1354_v42, %v1022_v2  ;;  %v1356_v60 = vpop.f32.mrb[21].mxu0 }
 0x18f   : > { %v1407_v47 = vadd.f32 %v1356_v60, %v1024_v53  ;;  %v1358_v29 = vpop.f32.mrb[22].mxu0  ;;  %v1395_v37 = vpop.f32.mrb[20].mxu1 }
 0x190   : > { %v1359_v17 = vpop.f32.mrb[23].mxu0  ;;  %v1408_v30 = vadd.f32 %v1395_v37, %v1063_v58  ;;  %v1397_v63 = vpop.f32.mrb[21].mxu1 }
 0x191   : > { %v1409_v54 = vadd.f32 %v1397_v63, %v1065_v31  ;;  %v1399_v0 = vpop.f32.mrb[22].mxu1 }
 0x192   : > { %v1400_v56 = vpop.f32.mrb[23].mxu1 }
 0x195   : > { %v1517_v1 = vpop.f32.mrb[24].mxu0 }
 0x196   : > { %v1647_v6 = vadd.f32 %v1517_v1, %v1402_v34  ;;  %v1519_v9 = vpop.f32.mrb[25].mxu0 }
 0x197   : > { %v1648_v62 = vadd.f32 %v1519_v9, %v1403_v24  ;;  %v1521_v10 = vpop.f32.mrb[26].mxu0  ;;  %v1558_v46 = vpop.f32.mrb[24].mxu1 }
 0x198   : > { %v1522_v38 = vpop.f32.mrb[27].mxu0  ;;  %v1649_v39 = vadd.f32 %v1558_v46, %v1404_v23  ;;  %v1560_v32 = vpop.f32.mrb[25].mxu1 }
 0x199   : > { %v1650_v2 = vadd.f32 %v1560_v32, %v1405_v44  ;;  %v1562_v33 = vpop.f32.mrb[26].mxu1 }
 0x19a   : > { %v1563_v53 = vpop.f32.mrb[27].mxu1 }
 0x19d   : > { %v1599_v22 = vpop.f32.mrb[28].mxu0 }
 0x19e   : > { %v1651_v40 = vadd.f32 %v1599_v22, %v1406_v55  ;;  %v1601_v41 = vpop.f32.mrb[29].mxu0 }
 0x19f   : > { %v1652_v58 = vadd.f32 %v1601_v41, %v1407_v47  ;;  %v1603_v36 = vpop.f32.mrb[30].mxu0  ;;  %v1640_v45 = vpop.f32.mrb[28].mxu1 }
 0x1a0   : > { %v1604_v31 = vpop.f32.mrb[31].mxu0  ;;  %v1653_v27 = vadd.f32 %v1640_v45, %v1408_v30  ;;  %v1642_v49 = vpop.f32.mrb[29].mxu1 }
 0x1a1   : > { %v1654_v34 = vadd.f32 %v1642_v49, %v1409_v54  ;;  %v1644_v14 = vpop.f32.mrb[30].mxu1 }
 0x1a2   : > { %v1645_v24 = vpop.f32.mrb[31].mxu1 }
 0x1a5   : > { %v1719_v42 = vpop.f32.mrb[32].mxu0 }
 0x1a6   : > { %v1849_v60 = vadd.f32 %v1719_v42, %v1647_v6  ;;  %v1721_v29 = vpop.f32.mrb[33].mxu0 }
 0x1a7   : > { %v1850_v23 = vadd.f32 %v1721_v29, %v1648_v62  ;;  %v1723_v17 = vpop.f32.mrb[34].mxu0  ;;  %v1760_v37 = vpop.f32.mrb[32].mxu1 }
 0x1a8   : > { %v1724_v44 = vpop.f32.mrb[35].mxu0  ;;  %v1851_v63 = vadd.f32 %v1760_v37, %v1649_v39  ;;  %v1762_v0 = vpop.f32.mrb[33].mxu1 }
 0x1a9   : > { %v1852_v55 = vadd.f32 %v1762_v0, %v1650_v2  ;;  %v1764_v56 = vpop.f32.mrb[34].mxu1 }
 0x1aa   : > { %v1765_v47 = vpop.f32.mrb[35].mxu1 }
 0x1ad   : > { %v1801_v1 = vpop.f32.mrb[36].mxu0 }
 0x1ae   : > { %v1853_v9 = vadd.f32 %v1801_v1, %v1651_v40  ;;  %v1803_v10 = vpop.f32.mrb[37].mxu0 }
 0x1af   : > { %v1854_v30 = vadd.f32 %v1803_v10, %v1652_v58  ;;  %v1805_v38 = vpop.f32.mrb[38].mxu0  ;;  %v1842_v46 = vpop.f32.mrb[36].mxu1 }
 0x1b0   : > { %v1806_v54 = vpop.f32.mrb[39].mxu0  ;;  %v1855_v32 = vadd.f32 %v1842_v46, %v1653_v27  ;;  %v1844_v33 = vpop.f32.mrb[37].mxu1 }
 0x1b1   : > { %v1856_v6 = vadd.f32 %v1844_v33, %v1654_v34  ;;  %v1846_v53 = vpop.f32.mrb[38].mxu1 }
 0x1b2   : > { %v1847_v62 = vpop.f32.mrb[39].mxu1 }
 0x1b5   : > { %v1964_v22 = vpop.f32.mrb[40].mxu0 }
 0x1b6   : > { %v2094_v41 = vadd.f32 %v1964_v22, %v1849_v60  ;;  %v1966_v36 = vpop.f32.mrb[41].mxu0 }
 0x1b7   : > { %v2095_v39 = vadd.f32 %v1966_v36, %v1850_v23  ;;  %v1968_v31 = vpop.f32.mrb[42].mxu0  ;;  %v2005_v45 = vpop.f32.mrb[40].mxu1 }
 0x1b8   : > { %v1969_v2 = vpop.f32.mrb[43].mxu0  ;;  %v2096_v49 = vadd.f32 %v2005_v45, %v1851_v63  ;;  %v2007_v14 = vpop.f32.mrb[41].mxu1 }
 0x1b9   : > { %v2097_v40 = vadd.f32 %v2007_v14, %v1852_v55  ;;  %v2009_v24 = vpop.f32.mrb[42].mxu1 }
 0x1ba   : > { %v2010_v58 = vpop.f32.mrb[43].mxu1 }
 0x1bd   : > { %v2046_v42 = vpop.f32.mrb[44].mxu0 }
 0x1be   : > { %v2098_v29 = vadd.f32 %v2046_v42, %v1853_v9  ;;  %v2048_v17 = vpop.f32.mrb[45].mxu0 }
 0x1bf   : > { %v2099_v27 = vadd.f32 %v2048_v17, %v1854_v30  ;;  %v2050_v44 = vpop.f32.mrb[46].mxu0  ;;  %v2087_v37 = vpop.f32.mrb[44].mxu1 }
 0x1c0   : > { %v2051_v34 = vpop.f32.mrb[47].mxu0  ;;  %v2100_v0 = vadd.f32 %v2087_v37, %v1855_v32  ;;  %v2089_v56 = vpop.f32.mrb[45].mxu1 }
 0x1c1   : > { %v2101_v60 = vadd.f32 %v2089_v56, %v1856_v6  ;;  %v2091_v47 = vpop.f32.mrb[46].mxu1 }
 0x1c2   : > { %v2092_v23 = vpop.f32.mrb[47].mxu1 }
 0x1c5   : > { %v2209_v1 = vpop.f32.mrb[48].mxu0 }
 0x1c6   : > { %v2339_v10 = vadd.f32 %v2209_v1, %v2094_v41  ;;  %v2211_v38 = vpop.f32.mrb[49].mxu0 }
 0x1c7   : > { %v2340_v63 = vadd.f32 %v2211_v38, %v2095_v39  ;;  %v2213_v54 = vpop.f32.mrb[50].mxu0  ;;  %v2250_v46 = vpop.f32.mrb[48].mxu1 }
 0x1c8   : > { %v2214_v55 = vpop.f32.mrb[51].mxu0  ;;  %v2341_v33 = vadd.f32 %v2250_v46, %v2096_v49  ;;  %v2252_v53 = vpop.f32.mrb[49].mxu1 }
 0x1c9   : > { %v2342_v9 = vadd.f32 %v2252_v53, %v2097_v40  ;;  %v2254_v62 = vpop.f32.mrb[50].mxu1 }
 0x1ca   : > { %v2255_v30 = vpop.f32.mrb[51].mxu1 }
 0x1cd   : > { %v2291_v22 = vpop.f32.mrb[52].mxu0 }
 0x1ce   : > { %v2343_v36 = vadd.f32 %v2291_v22, %v2098_v29  ;;  %v2293_v31 = vpop.f32.mrb[53].mxu0 }
 0x1cf   : > { %v2344_v32 = vadd.f32 %v2293_v31, %v2099_v27  ;;  %v2295_v2 = vpop.f32.mrb[54].mxu0  ;;  %v2332_v45 = vpop.f32.mrb[52].mxu1 }
 0x1d0   : > { %v2296_v6 = vpop.f32.mrb[55].mxu0  ;;  %v2345_v14 = vadd.f32 %v2332_v45, %v2100_v0  ;;  %v2334_v24 = vpop.f32.mrb[53].mxu1 }
 0x1d1   : > { %v2346_v41 = vadd.f32 %v2334_v24, %v2101_v60  ;;  %v2336_v58 = vpop.f32.mrb[54].mxu1  ;;  %v2824_v31 = vpop.permute.xlu0 %2823 }
 0x1d2   : > { %v2337_v39 = vpop.f32.mrb[55].mxu1 }
 0x1d5   : > { %v2437_v42 = vpop.f32.mrb[56].mxu0 }
 0x1d6   : > { %v2567_v17 = vadd.f32 %v2437_v42, %v2339_v10  ;;  %v2439_v44 = vpop.f32.mrb[57].mxu0 }
 0x1d7   : > { %v2568_v49 = vadd.f32 %v2439_v44, %v2340_v63  ;;  %v2441_v34 = vpop.f32.mrb[58].mxu0  ;;  %v2478_v37 = vpop.f32.mrb[56].mxu1 }
 0x1d8   : > { %v2442_v40 = vpop.f32.mrb[59].mxu0  ;;  %v2569_v56 = vadd.f32 %v2478_v37, %v2341_v33  ;;  %v2480_v47 = vpop.f32.mrb[57].mxu1 }
 0x1d9   : > { %v2570_v29 = vadd.f32 %v2480_v47, %v2342_v9  ;;  %v2482_v23 = vpop.f32.mrb[58].mxu1 }
 0x1da   : > { %v2483_v27 = vpop.f32.mrb[59].mxu1 }
 0x1dd   : > { %v2519_v1 = vpop.f32.mrb[60].mxu0 }
 0x1de   : > { %v2571_v38 = vadd.f32 %v2519_v1, %v2343_v36  ;;  %v2521_v54 = vpop.f32.mrb[61].mxu0 }
 0x1df   : > { %v2572_v0 = vadd.f32 %v2521_v54, %v2344_v32  ;;  %v2523_v55 = vpop.f32.mrb[62].mxu0  ;;  %v2560_v46 = vpop.f32.mrb[60].mxu1 }
 0x1e0   : > { %v2524_v60 = vpop.f32.mrb[63].mxu0  ;;  %v2573_v53 = vadd.f32 %v2560_v46, %v2345_v14  ;;  %v2562_v62 = vpop.f32.mrb[61].mxu1 }
 0x1e1   : > { %v2574_v10 = vadd.f32 %v2562_v62, %v2346_v41  ;;  %v2564_v30 = vpop.f32.mrb[62].mxu1 }
 0x1e2   : > { %v2565_v63 = vpop.f32.mrb[63].mxu1 }
 0x1e5   : > { %v2682_v22 = vpop.f32.mrb[64].mxu0 }
 0x1e6   : > { %v2812_v2 = vadd.f32 %v2682_v22, %v2567_v17  ;;  %v2684_v33 = vpop.f32.mrb[65].mxu0 }
 0x1e7   : > { %v2813_v6 = vadd.f32 %v2684_v33, %v2568_v49  ;;  %v2686_v9 = vpop.f32.mrb[66].mxu0  ;;  %v2723_v36 = vpop.f32.mrb[64].mxu1 }
 0x1e8   : > { %v6805_v45 = vadd.f32 %v2824_v31, %v2812_v2  ;;  %v2687_v24 = vpop.f32.mrb[67].mxu0  ;;  %v2814_v32 = vadd.f32 %v2723_v36, %v2569_v56  ;;  %v2725_v39 = vpop.f32.mrb[65].mxu1 }
 0x1e9   : > { %v6807_v58 = vadd.f32 %v2824_v31, %v2813_v6  ;;  %v2815_v42 = vadd.f32 %v2725_v39, %v2570_v29  ;;  %v2727_v41 = vpop.f32.mrb[66].mxu1 }
 0x1ea   : > { %v2836_v14 = vrot.slane %v6805_v45, 4  ;;  %v6811_v34 = vadd.f32 %v2824_v31, %v2814_v32  ;;  %v2728_v17 = vpop.f32.mrb[67].mxu1 }
 0x1eb   : > { %v2842_v44 = vrot.slane %v6807_v58, 4  ;;  %v6814_v40 = vadd.f32 %v2824_v31, %v2815_v42 }
 0x1ec   : > { %v2837_v49 = vadd.f32 %v2836_v14, %v6805_v45  ;;  %v2848_v47 = vrot.slane %v6811_v34, 4 }
 0x1ed   : > { %v2843_v37 = vadd.f32 %v2842_v44, %v6807_v58  ;;  %v2764_v23 = vpop.f32.mrb[68].mxu0  ;;  %v2854_v27 = vrot.slane %v6814_v40, 4 }
 0x1ee   : > { %v2838_v56 = vrot.slane %v2837_v49, 2  ;;  %v2816_v1 = vadd.f32 %v2764_v23, %v2571_v38  ;;  %v2766_v29 = vpop.f32.mrb[69].mxu0  ;;  %v2849_v55 = vadd.f32 %v2848_v47, %v6811_v34 }
 0x1ef   : > { %v2844_v54 = vrot.slane %v2843_v37, 2  ;;  %v2817_v60 = vadd.f32 %v2766_v29, %v2572_v0  ;;  %v2768_v46 = vpop.f32.mrb[70].mxu0  ;;  %v2855_v30 = vadd.f32 %v2854_v27, %v6814_v40  ;;  %v2805_v2 = vpop.f32.mrb[68].mxu1 }
 0x1f0   : > { %v2839_v62 = vadd.f32 %v2838_v56, %v2837_v49  ;;  %v6821_v63 = vadd.f32 %v2824_v31, %v2816_v1  ;;  %v2769_v22 = vpop.f32.mrb[71].mxu0  ;;  %v2850_v6 = vrot.slane %v2849_v55, 2  ;;  %v2818_v24 = vadd.f32 %v2805_v2, %v2573_v53  ;;  %v2807_v36 = vpop.f32.mrb[69].mxu1 }
 0x1f1   : > { %v2845_v33 = vadd.f32 %v2844_v54, %v2843_v37  ;;  %v6823_v9 = vadd.f32 %v2824_v31, %v2817_v60  ;;  %v2856_v38 = vrot.slane %v2855_v30, 2  ;;  %v2819_v39 = vadd.f32 %v2807_v36, %v2574_v10  ;;  %v2809_v14 = vpop.f32.mrb[70].mxu1 }
 0x1f2   : > { %v2860_v32 = vrot.slane %v6821_v63, 4  ;;  %v2840_v0 = vrot.slane %v2839_v62, 1  ;;  %v2851_v42 = vadd.f32 %v2850_v6, %v2849_v55  ;;  %v6827_v44 = vadd.f32 %v2824_v31, %v2818_v24  ;;  %v2810_v17 = vpop.f32.mrb[71].mxu1 }
 0x1f3   : > { %v2866_v41 = vrot.slane %v6823_v9, 4  ;;  %v2846_v49 = vrot.slane %v2845_v33, 1  ;;  %v2857_v47 = vadd.f32 %v2856_v38, %v2855_v30  ;;  %v6830_v23 = vadd.f32 %v2824_v31, %v2819_v39 }
 0x1f4   : > { %v2861_v37 = vadd.f32 %v2860_v32, %v6821_v63  ;;  %v2841_v53 = vadd.f32 %v2840_v0, %v2839_v62  ;;  %v2852_v56 = vrot.slane %v2851_v42, 1  ;;  %v2872_v10 = vrot.slane %v6827_v44, 4 }
 0x1f5   : > { %v2867_v27 = vadd.f32 %v2866_v41, %v6823_v9  ;;  %v2847_v1 = vadd.f32 %v2846_v49, %v2845_v33  ;;  %v2858_v29 = vrot.slane %v2857_v47, 1  ;;  %v2878_v55 = vrot.slane %v6830_v23, 4 }
 0x1f6   : > { %v2862_v54 = vrot.slane %v2861_v37, 2  ;;  %v2885_v60 = vmul.f32 0.125, %v2841_v53  ;;  %v2853_v46 = vadd.f32 %v2852_v56, %v2851_v42  ;;  %v2873_v30 = vadd.f32 %v2872_v10, %v6827_v44 }
 0x1f7   : > { %v2868_v22 = vrot.slane %v2867_v27, 2  ;;  %v2886_v2 = vmul.f32 0.125, %v2847_v1  ;;  %v2859_v6 = vadd.f32 %v2858_v29, %v2857_v47  ;;  %v2879_v62 = vadd.f32 %v2878_v55, %v6830_v23 }
 0x1f8   : > { %v2863_v31 = vadd.f32 %v2862_v54, %v2861_v37  ;;  %v6838_v24 = vsub.f32 %v6805_v45, %v2885_v60  ;;  %v2887_v36 = vmul.f32 0.125, %v2853_v46  ;;  %v2874_v33 = vrot.slane %v2873_v30, 2 }
 0x1f9   : > { %v2869_v38 = vadd.f32 %v2868_v22, %v2867_v27  ;;  %v6841_v32 = vsub.f32 %v6807_v58, %v2886_v2  ;;  %v2888_v39 = vmul.f32 0.125, %v2859_v6  ;;  %v2880_v0 = vrot.slane %v2879_v62, 2 }
 0x1fa   : > { %v2864_v14 = vrot.slane %v2863_v31, 1  ;;  %v2901_v42 = vmul.f32 %v6838_v24, %v6838_v24  ;;  %v6846_v41 = vsub.f32 %v6811_v34, %v2887_v36  ;;  %v2875_v49 = vadd.f32 %v2874_v33, %v2873_v30 }
 0x1fb   : > { %v2870_v17 = vrot.slane %v2869_v38, 1  ;;  %v2902_v45 = vmul.f32 %v6841_v32, %v6841_v32  ;;  %v6851_v47 = vsub.f32 %v6814_v40, %v2888_v39  ;;  %v2881_v58 = vadd.f32 %v2880_v0, %v2879_v62 }
 0x1fc   : > { %v2865_v37 = vadd.f32 %v2864_v14, %v2863_v31  ;;  %v2909_v53 = vrot.slane %v2901_v42, 4  ;;  %v2903_v56 = vmul.f32 %v6846_v41, %v6846_v41  ;;  %v2876_v10 = vrot.slane %v2875_v49, 1 }
 0x1fd   : > { %v2871_v27 = vadd.f32 %v2870_v17, %v2869_v38  ;;  %v2915_v1 = vrot.slane %v2902_v45, 4  ;;  %v2904_v34 = vmul.f32 %v6851_v47, %v6851_v47  ;;  %v2882_v54 = vrot.slane %v2881_v58, 1 }
 0x1fe   : > { %v2889_v29 = vmul.f32 0.125, %v2865_v37  ;;  %v2910_v55 = vadd.f32 %v2909_v53, %v2901_v42  ;;  %v2921_v60 = vrot.slane %v2903_v56, 4  ;;  %v2877_v22 = vadd.f32 %v2876_v10, %v2875_v49 }
 0x1ff   : > { %v2890_v46 = vmul.f32 0.125, %v2871_v27  ;;  %v2916_v40 = vadd.f32 %v2915_v1, %v2902_v45  ;;  %v2927_v30 = vrot.slane %v2904_v34, 4  ;;  %v2883_v6 = vadd.f32 %v2882_v54, %v2881_v58 }
 0x200   : > { %v6858_v2 = vsub.f32 %v6821_v63, %v2889_v29  ;;  %v2911_v31 = vrot.slane %v2910_v55, 2  ;;  %v2922_v62 = vadd.f32 %v2921_v60, %v2903_v56  ;;  %v2891_v38 = vmul.f32 0.125, %v2877_v22 }
 0x201   : > { %v6861_v36 = vsub.f32 %v6823_v9, %v2890_v46  ;;  %v2917_v33 = vrot.slane %v2916_v40, 2  ;;  %v2928_v39 = vadd.f32 %v2927_v30, %v2904_v34  ;;  %v2892_v0 = vmul.f32 0.125, %v2883_v6 }
 0x202   : > { %v2905_v14 = vmul.f32 %v6858_v2, %v6858_v2  ;;  %v2912_v42 = vadd.f32 %v2911_v31, %v2910_v55  ;;  %v2923_v17 = vrot.slane %v2922_v62, 2  ;;  %v6868_v63 = vsub.f32 %v6827_v44, %v2891_v38 }
 0x203   : > { %v2906_v49 = vmul.f32 %v6861_v36, %v6861_v36  ;;  %v2918_v45 = vadd.f32 %v2917_v33, %v2916_v40  ;;  %v2929_v37 = vrot.slane %v2928_v39, 2  ;;  %v6871_v9 = vsub.f32 %v6830_v23, %v2892_v0 }
 0x204   : > { %v2933_v58 = vrot.slane %v2905_v14, 4  ;;  %v2913_v53 = vrot.slane %v2912_v42, 1  ;;  %v2924_v56 = vadd.f32 %v2923_v17, %v2922_v62  ;;  %v2907_v10 = vmul.f32 %v6868_v63, %v6868_v63 }
 0x205   : > { %v2939_v27 = vrot.slane %v2906_v49, 4  ;;  %v2919_v1 = vrot.slane %v2918_v45, 1  ;;  %v2930_v34 = vadd.f32 %v2929_v37, %v2928_v39  ;;  %v2908_v54 = vmul.f32 %v6871_v9, %v6871_v9 }
 0x206   : > { %v2934_v29 = vadd.f32 %v2933_v58, %v2905_v14  ;;  %v2914_v44 = vadd.f32 %v2913_v53, %v2912_v42  ;;  %v2925_v55 = vrot.slane %v2924_v56, 1  ;;  %v2945_v46 = vrot.slane %v2907_v10, 4 }
 0x207   : > { %v2940_v60 = vadd.f32 %v2939_v27, %v2906_v49  ;;  %v2920_v22 = vadd.f32 %v2919_v1, %v2918_v45  ;;  %v2931_v40 = vrot.slane %v2930_v34, 1  ;;  %v2951_v30 = vrot.slane %v2908_v54, 4 }
 0x208   : > { %v2935_v23 = vrot.slane %v2934_v29, 2  ;;  %v2957_v6 = vmul.f32 0.125, %v2914_v44  ;;  %v2926_v31 = vadd.f32 %v2925_v55, %v2924_v56  ;;  %v2946_v38 = vadd.f32 %v2945_v46, %v2907_v10 }
 0x209   : > { %v2941_v62 = vrot.slane %v2940_v60, 2  ;;  %v2958_v33 = vmul.f32 0.125, %v2920_v22  ;;  %v2932_v0 = vadd.f32 %v2931_v40, %v2930_v34  ;;  %v2952_v39 = vadd.f32 %v2951_v30, %v2908_v54 }
 0x20a   : > { %v2936_v17 = vadd.f32 %v2935_v23, %v2934_v29  ;;  %v2965_v14 = vadd.f32 1e-06, %v2957_v6  ;;  %v2959_v37 = vmul.f32 0.125, %v2926_v31  ;;  %v2947_v5 = vrot.slane %v2946_v38, 2  ;;  %v2992_v31 = vpop.permute.xlu1 %2991 }
 0x20b   : > { %v2942_v58 = vadd.f32 %v2941_v62, %v2940_v60  ;;  %v2966_v42 = vadd.f32 1e-06, %v2958_v33  ;;  %v2960_v53 = vmul.f32 0.125, %v2932_v0  ;;  %v2953_v27 = vrot.slane %v2952_v39, 2 }
 0x20c   : > { %v2937_v49 = vrot.slane %v2936_v17, 1  ;;  %5976 = vrsqrt.f32 %v2965_v14  ;;  %v2967_v45 = vadd.f32 1e-06, %v2959_v37  ;;  %v2948_v3 = vadd.f32 %v2947_v5, %v2946_v38 }
 0x20d   : > { %v2943_v1 = vrot.slane %v2942_v58, 1  ;;  %5978 = vrsqrt.f32 %v2966_v42  ;;  %v2968_v56 = vadd.f32 1e-06, %v2960_v53  ;;  %v2954_v10 = vadd.f32 %v2953_v27, %v2952_v39 }
 0x20e   : > { %v2938_v44 = vadd.f32 %v2937_v49, %v2936_v17  ;;  %5980 = vrsqrt.f32 %v2967_v45  ;;  %v2949_v29 = vrot.slane %v2948_v3, 1  ;;  %v3005_v42 = vpop.permute.xlu1 %3004 }
 0x20f   : > { %v2944_v34 = vadd.f32 %v2943_v1, %v2942_v58  ;;  %5982 = vrsqrt.f32 %v2968_v56  ;;  %v2955_v55 = vrot.slane %v2954_v10, 1 }
 0x210   : > { %v2961_v54 = vmul.f32 0.125, %v2938_v44  ;;  %v2950_v46 = vadd.f32 %v2949_v29, %v2948_v3 }
 0x211   : > { %v2962_v60 = vmul.f32 0.125, %v2944_v34  ;;  %v2956_v40 = vadd.f32 %v2955_v55, %v2954_v10 }
 0x212   : > { %v2969_v22 = vadd.f32 1e-06, %v2961_v54  ;;  %v2963_v30 = vmul.f32 0.125, %v2950_v46 }
 0x213   : > { %v2970_v23 = vadd.f32 1e-06, %v2962_v60  ;;  %v2964_v6 = vmul.f32 0.125, %v2956_v40 }
 0x214   : > { %5984 = vrsqrt.f32 %v2969_v22  ;;  %v2971_v5 = vadd.f32 1e-06, %v2963_v30 }
 0x215   : > { %5986 = vrsqrt.f32 %v2970_v23  ;;  %v2972_v38 = vadd.f32 1e-06, %v2964_v6 }
 0x216   : > { %v5977_v62 = vpop.eup %5976  ;;  %5988 = vrsqrt.f32 %v2971_v5 }
 0x217   : > { %v5979_v33 = vpop.eup %5978  ;;  %v2981_v0 = vmul.f32 %v5977_v62, %v6838_v24  ;;  %5990 = vrsqrt.f32 %v2972_v38 }
 0x218   : > { %v2982_v17 = vmul.f32 %v5979_v33, %v6841_v32  ;;  %v5981_v39 = vpop.eup %5980 }
 0x219   : > { %v2994_v3 = vmul.f32 %v2992_v31, %v2981_v0  ;;  %v5983_v14 = vpop.eup %5982  ;;  %v2983_v37 = vmul.f32 %v5981_v39, %v6846_v41 }
 0x21a   : > { %v2995_v58 = vmul.f32 %v2992_v31, %v2982_v17  ;;  %v2984_v53 = vmul.f32 %v5983_v14, %v6851_v47 }
 0x21b   : > { %v6881_v49 = vadd.f32 %v3005_v42, %v2994_v3  ;;  %v2996_v27 = vmul.f32 %v2992_v31, %v2983_v37 }
 0x21c   : > { %v6883_v45 = vadd.f32 %v3005_v42, %v2995_v58  ;;  %v2997_v1 = vmul.f32 %v2992_v31, %v2984_v53 }
 0x21d   : > { %v3023_v24 = vmul.f32 0.044715, %v6881_v49  ;;  %v6886_v44 = vadd.f32 %v3005_v42, %v2996_v27 }
 0x21e   : > { %v5985_v56 = vpop.eup %5984  ;;  %v3024_v32 = vmul.f32 0.044715, %v6883_v45  ;;  %v6890_v34 = vadd.f32 %v3005_v42, %v2997_v1 }
 0x21f   : > { %v5987_v10 = vpop.eup %5986  ;;  %v2985_v41 = vmul.f32 %v5985_v56, %v6858_v2  ;;  %v3031_v47 = vmul.f32 %v3023_v24, %v6881_v49  ;;  %v3025_v54 = vmul.f32 0.044715, %v6886_v44 }
 0x220   : > { %v2986_v29 = vmul.f32 %v5987_v10, %v6861_v36  ;;  %v3032_v55 = vmul.f32 %v3024_v32, %v6883_v45  ;;  %v5989_v60 = vpop.eup %5988  ;;  %v3026_v22 = vmul.f32 0.044715, %v6890_v34 }
 0x221   : > { %v2998_v46 = vmul.f32 %v2992_v31, %v2985_v41  ;;  %v3039_v40 = vmul.f32 %v3031_v47, %v6881_v49  ;;  %v5991_v23 = vpop.eup %5990  ;;  %v2987_v30 = vmul.f32 %v5989_v60, %v6868_v63  ;;  %v3033_v6 = vmul.f32 %v3025_v54, %v6886_v44 }
 0x222   : > { %v2999_v2 = vmul.f32 %v2992_v31, %v2986_v29  ;;  %v3040_v5 = vmul.f32 %v3032_v55, %v6883_v45  ;;  %v2988_v36 = vmul.f32 %v5991_v23, %v6871_v9  ;;  %v3034_v38 = vmul.f32 %v3026_v22, %v6890_v34 }
 0x223   : > { %v3011_v62 = vadd.f32 %v3005_v42, %v2998_v46  ;;  %v3047_v33 = vadd.f32 %v3039_v40, %v6881_v49  ;;  %v3000_v0 = vmul.f32 %v2992_v31, %v2987_v30  ;;  %v3041_v39 = vmul.f32 %v3033_v6, %v6886_v44 }
 0x224   : > { %v6904_v17 = vadd.f32 %v3005_v42, %v2999_v2  ;;  %v3048_v3 = vadd.f32 %v3040_v5, %v6883_v45  ;;  %v3001_v63 = vmul.f32 %v2992_v31, %v2988_v36  ;;  %v3042_v37 = vmul.f32 %v3034_v38, %v6890_v34 }
 0x225   : > { %v3027_v14 = vmul.f32 0.044715, %v3011_v62  ;;  %v6909_v58 = vadd.f32 %v3005_v42, %v3000_v0  ;;  %v3049_v53 = vadd.f32 %v3041_v39, %v6886_v44  ;;  %v3055_v56 = vmul.f32 0.7978846, %v3047_v33 }
 0x226   : > { %v3028_v9 = vmul.f32 0.044715, %v6904_v17  ;;  %v6913_v27 = vadd.f32 %v3005_v42, %v3001_v63  ;;  %v3050_v24 = vadd.f32 %v3042_v37, %v6890_v34  ;;  %v3056_v31 = vmul.f32 0.7978846, %v3048_v3 }
 0x227   : > { %v3035_v1 = vmul.f32 %v3027_v14, %v3011_v62  ;;  %v3029_v32 = vmul.f32 0.044715, %v6909_v58  ;;  %v3057_v29 = vmul.f32 0.7978846, %v3049_v53  ;;  %5992 = vtanh.f32 %v3055_v56 }
 0x228   : > { %v3036_v10 = vmul.f32 %v3028_v9, %v6904_v17  ;;  %v3030_v41 = vmul.f32 0.044715, %v6913_v27  ;;  %v3058_v60 = vmul.f32 0.7978846, %v3050_v24  ;;  %5994 = vtanh.f32 %v3056_v31 }
 0x229   : > { %v3043_v47 = vmul.f32 %v3035_v1, %v3011_v62  ;;  %v3037_v54 = vmul.f32 %v3029_v32, %v6909_v58  ;;  %5996 = vtanh.f32 %v3057_v29  ;;  %v3015_v39 = vmul.f32 0.5, %v6881_v49 }
 0x22a   : > { %v3044_v55 = vmul.f32 %v3036_v10, %v6904_v17  ;;  %v3038_v42 = vmul.f32 %v3030_v41, %v6913_v27  ;;  %5998 = vtanh.f32 %v3058_v60  ;;  %v3016_v14 = vmul.f32 0.5, %v6883_v45 }
 0x22b   : > { %v3051_v46 = vadd.f32 %v3043_v47, %v3011_v62  ;;  %v3045_v22 = vmul.f32 %v3037_v54, %v6909_v58  ;;  %v3017_v53 = vmul.f32 0.5, %v6886_v44  ;;  %v3018_v56 = vmul.f32 0.5, %v6890_v34 }
 0x22c   : > { %v3052_v40 = vadd.f32 %v3044_v55, %v6904_v17  ;;  %v3046_v23 = vmul.f32 %v3038_v42, %v6913_v27  ;;  %v3019_v49 = vmul.f32 0.5, %v3011_v62  ;;  %v3020_v45 = vmul.f32 0.5, %v6904_v17 }
 0x22d   : > { %v3059_v30 = vmul.f32 0.7978846, %v3051_v46  ;;  %v3053_v2 = vadd.f32 %v3045_v22, %v6909_v58  ;;  %v3022_v17 = vmul.f32 0.5, %v6913_v27 }
 0x22e   : > { %v3060_v6 = vmul.f32 0.7978846, %v3052_v40  ;;  %v3054_v5 = vadd.f32 %v3046_v23, %v6913_v27  ;;  %v3021_v40 = vmul.f32 0.5, %v6909_v58 }
 0x22f   : > { %6000 = vtanh.f32 %v3059_v30  ;;  %v3061_v36 = vmul.f32 0.7978846, %v3053_v2 }
 0x230   : > { %6002 = vtanh.f32 %v3060_v6  ;;  %v3062_v38 = vmul.f32 0.7978846, %v3054_v5 }
 0x231   : > { %6004 = vtanh.f32 %v3061_v36  ;;  %v5993_v33 = vpop.eup %5992 }
 0x232   : > { %6006 = vtanh.f32 %v3062_v38  ;;  %v5995_v0 = vpop.eup %5994  ;;  %v3071_v3 = vadd.f32 1.0, %v5993_v33 }
 0x233   : > { %v5997_v63 = vpop.eup %5996  ;;  %v3072_v37 = vadd.f32 1.0, %v5995_v0 }
 0x234   : > { %v5999_v9 = vpop.eup %5998  ;;  %v3073_v1 = vadd.f32 1.0, %v5997_v63  ;;  %v3079_v24 = vmul.f32 %v3071_v3, %v3015_v39  ;;  %v5837_v3 = vld [vmem:[%s7485_s7 + $0x4] sm:$0xf] }
 0x235   : > { %v3074_v32 = vadd.f32 1.0, %v5999_v9  ;;  %v3080_v10 = vmul.f32 %v3072_v37, %v3016_v14  ;;  %v3173_v9 = vpack.c.bf16 %v5837_v3, %v5837_v3 }
 0x236   : > { %v3081_v41 = vmul.f32 %v3073_v1, %v3017_v53  ;;  %v6931_v47 = vpack.c.bf16 %v3079_v24, %v3079_v24 }
 0x237   : > { %v3082_v55 = vmul.f32 %v3074_v32, %v3018_v56  ;;  %v6933_v60 = vpack.c.bf16 %v3080_v10, %v3080_v10 }
 0x238   : > { %v6936_v44 = vpack.c.bf16 %v3081_v41, %v3081_v41  ;;  %3146 = vrot.lane.b32.xlu0 %v6931_v47, %s6018_s15  ;;  %v7655_v41 = vmov 0  }
 0x239   : > { %v6001_v31 = vpop.eup %6000  ;;  %v6940_v22 = vpack.c.bf16 %v3082_v55, %v3082_v55  ;;  %3148 = vrot.lane.b32.xlu1 %v6933_v60, %s6018_s15 }
 0x23a   : > { %v6003_v29 = vpop.eup %6002  ;;  %v3075_v54 = vadd.f32 1.0, %v6001_v31 }
 0x23b   : > { %v3076_v42 = vadd.f32 1.0, %v6003_v29  ;;  %v6005_v34 = vpop.eup %6004 }
 0x23c   : > { %v3083_v46 = vmul.f32 %v3075_v54, %v3019_v49  ;;  %v6007_v62 = vpop.eup %6006  ;;  %v3077_v23 = vadd.f32 1.0, %v6005_v34  ;;  %3150 = vrot.lane.b32.xlu0 %v6936_v44, %s6018_s15  ;;  %v5200_v54 = vld [vmem:[%s7486_s8] sm:$0xf] }
 0x23d   : > { %v3084_v30 = vmul.f32 %v3076_v42, %v3020_v45  ;;  %v3078_v2 = vadd.f32 1.0, %v6007_v62  ;;  %3152 = vrot.lane.b32.xlu1 %v6940_v22, %s6018_s15 }
 0x23e   : > { %v3085_v6 = vmul.f32 %v3077_v23, %v3021_v40  ;;  %v6946_v5 = vpack.c.bf16 %v3083_v46, %v3083_v46 }
 0x23f   : > { %v3086_v36 = vmul.f32 %v3078_v2, %v3022_v17  ;;  %v6950_v38 = vpack.c.bf16 %v3084_v30, %v3084_v30  ;;  %v3144_v30 = vld [vmem:[%s7485_s7] sm:$0xf] }
 0x240   : > { %v6954_v33 = vpack.c.bf16 %v3085_v6, %v3085_v6  ;;  %3154 = vrot.lane.b32.xlu0 %v6946_v5, %s6018_s15 }
 0x241   : > { %v6958_v58 = vpack.c.bf16 %v3086_v36, %v3086_v36  ;;  %3156 = vrot.lane.b32.xlu1 %v6950_v38, %s6018_s15 }
 0x244   : > { %3158 = vrot.lane.b32.xlu0 %v6954_v33, %s6018_s15 }
 0x245   : > { %3160 = vrot.lane.b32.xlu1 %v6958_v58, %s6018_s15 }
 0x248   : > { %3103 = vrot.lane.b32.xlu0 %v6931_v47, %s6019_s16 }
 0x249   : > { %3105 = vrot.lane.b32.xlu1 %v6933_v60, %s6019_s16 }
 0x24c   : > { %3107 = vrot.lane.b32.xlu0 %v6936_v44, %s6019_s16 }
 0x24d   : > { %3109 = vrot.lane.b32.xlu1 %v6940_v22, %s6019_s16 }
 0x250   : > { %3111 = vrot.lane.b32.xlu0 %v6946_v5, %s6019_s16 }
 0x251   : > { %3113 = vrot.lane.b32.xlu1 %v6950_v38, %s6019_s16 }
 0x254   : > { %3115 = vrot.lane.b32.xlu0 %v6954_v33, %s6019_s16 }
 0x255   : > { %3117 = vrot.lane.b32.xlu1 %v6958_v58, %s6019_s16 }
 0x258   : > { %3557 = vrot.lane.b32.xlu0 %v6931_v47, %s6020_s17 }
 0x259   : > { %3559 = vrot.lane.b32.xlu1 %v6933_v60, %s6020_s17 }
 0x25c   : > { %3561 = vrot.lane.b32.xlu0 %v6936_v44, %s6020_s17 }
 0x25d   : > { %3563 = vrot.lane.b32.xlu1 %v6940_v22, %s6020_s17 }
 0x260   : > { %3565 = vrot.lane.b32.xlu0 %v6946_v5, %s6020_s17 }
 0x261   : > { %3567 = vrot.lane.b32.xlu1 %v6950_v38, %s6020_s17 }
 0x264   : > { %3569 = vrot.lane.b32.xlu0 %v6954_v33, %s6020_s17 }
 0x265   : > { %3571 = vrot.lane.b32.xlu1 %v6958_v58, %s6020_s17  ;;  %s5751_s17 = sshll.u32 %s7756_s10, 1 }
 0x268   : > { %3800 = vrot.lane.b32.xlu0 %v6931_v47, %s6021_s18 }
 0x269   : > { %3802 = vrot.lane.b32.xlu1 %v6933_v60, %s6021_s18 }
 0x26c   : > { %3804 = vrot.lane.b32.xlu0 %v6936_v44, %s6021_s18 }
 0x26d   : > { %3806 = vrot.lane.b32.xlu1 %v6940_v22, %s6021_s18 }
 0x270   : > { %3808 = vrot.lane.b32.xlu0 %v6946_v5, %s6021_s18 }
 0x271   : > { %3810 = vrot.lane.b32.xlu1 %v6950_v38, %s6021_s18 }
 0x274   : > { %3812 = vrot.lane.b32.xlu0 %v6954_v33, %s6021_s18 }
 0x275   : > { %3814 = vrot.lane.b32.xlu1 %v6958_v58, %s6021_s18 }
 0x278   : > { %4245 = vrot.lane.b32.xlu0 %v6931_v47, %s6022_s19 }
 0x279   : > { %4247 = vrot.lane.b32.xlu1 %v6933_v60, %s6022_s19 }
 0x27c   : > { %4249 = vrot.lane.b32.xlu0 %v6936_v44, %s6022_s19 }
 0x27d   : > { %4251 = vrot.lane.b32.xlu1 %v6940_v22, %s6022_s19 }
 0x280   : > { %4253 = vrot.lane.b32.xlu0 %v6946_v5, %s6022_s19 }
 0x281   : > { %4255 = vrot.lane.b32.xlu1 %v6950_v38, %s6022_s19 }
 0x284   : > { %4257 = vrot.lane.b32.xlu0 %v6954_v33, %s6022_s19 }
 0x285   : > { %4259 = vrot.lane.b32.xlu1 %v6958_v58, %s6022_s19 }
 0x288   : > { %4488 = vrot.lane.b32.xlu0 %v6931_v47, %s6023_s20 }
 0x289   : > { %4490 = vrot.lane.b32.xlu1 %v6933_v60, %s6023_s20 }
 0x28c   : > { %4492 = vrot.lane.b32.xlu0 %v6936_v44, %s6023_s20 }
 0x28d   : > { %4494 = vrot.lane.b32.xlu1 %v6940_v22, %s6023_s20 }
 0x290   : > { %4496 = vrot.lane.b32.xlu0 %v6946_v5, %s6023_s20 }
 0x291   : > { %4498 = vrot.lane.b32.xlu1 %v6950_v38, %s6023_s20 }
 0x294   : > { %4500 = vrot.lane.b32.xlu0 %v6954_v33, %s6023_s20 }
 0x295   : > { %4502 = vrot.lane.b32.xlu1 %v6958_v58, %s6023_s20  ;;  %s353_s20 = scalar_lea.vmem %s7478_s0, %s5751_s17 }
 0x298   : > { %4731 = vrot.lane.b32.xlu0 %v6931_v47, %s6024_s21 }
 0x299   : > { %4733 = vrot.lane.b32.xlu1 %v6933_v60, %s6024_s21 }
 0x29c   : > { %4735 = vrot.lane.b32.xlu0 %v6936_v44, %s6024_s21 }
 0x29d   : > { %4737 = vrot.lane.b32.xlu1 %v6940_v22, %s6024_s21 }
 0x2a0   : > { %4739 = vrot.lane.b32.xlu0 %v6946_v5, %s6024_s21 }
 0x2a1   : > { %4741 = vrot.lane.b32.xlu1 %v6950_v38, %s6024_s21 }
 0x2a4   : > { %4743 = vrot.lane.b32.xlu0 %v6954_v33, %s6024_s21 }
 0x2a5   : > { %4745 = vrot.lane.b32.xlu1 %v6958_v58, %s6024_s21 }
 0x2a8   : > { %4957 = vrot.lane.b32.xlu0 %v6931_v47, %s6025_s22 }
 0x2a9   : > { %4959 = vrot.lane.b32.xlu1 %v6933_v60, %s6025_s22 }
 0x2aa   : > { %v3147_v27 = vpop.permute.xlu0 %3146 }
 0x2ab   : > { %v3170_v0 = vsel %vm7651_vm4, 0, %v3147_v27  ;;  %v3149_v39 = vpop.permute.xlu1 %3148 }
 0x2ac   : > { %v3179_v63 = vsel %vm3178_vm8, %v3170_v0, 0  ;;  %v3162_v14 = vsel %vm7652_vm12, %v3147_v27, %v3149_v39  ;;  %4961 = vrot.lane.b32.xlu0 %v6936_v44, %s6025_s22  ;;  %vm7654_vm12 = vmmov %vm7651_vm4  ;;  %v3145_v0 = vpack.c.bf16 %v3144_v30, %v3144_v30 }
 0x2ad   : > { %4963 = vrot.lane.b32.xlu1 %v6940_v22, %s6025_s22  ;;  %5838 = vmatprep.subr.msk.bf16.mxu0 %vm3178_vm8, %v3162_v14 }
 0x2ae   : > { %3203 = vmatpush1.bf16.msra.mxu0 %v3179_v63  ;;  %v3151_v37 = vpop.permute.xlu0 %3150 }
 0x2af   : > { %v3163_v53 = vsel %vm7653_vm14, %v3149_v39, %v3151_v37  ;;  %v3153_v1 = vpop.permute.xlu1 %3152  ;;  %vm7656_vm14 = vmmov %vm7651_vm4 }
 0x2b0   : > { %v3185_v24 = vsel %vm3178_vm8, %v3163_v53, 0  ;;  %v3164_v56 = vsel %vm7651_vm4, %v3151_v37, %v3153_v1  ;;  %4965 = vrot.lane.b32.xlu0 %v6946_v5, %s6025_s22 }
 0x2b1   : > { %4967 = vrot.lane.b32.xlu1 %v6950_v38, %s6025_s22  ;;  %5840 = vmatprep.subr.msk.bf16.mxu1 %vm3178_vm8, %v3164_v56 }
 0x2b2   : > { %5839 = vmatmul.mubr.msk.bf16.vlgmr.msra.gmra.mrb[72].mxu0 %vm7527_vm13, %v3173_v9  ;;  %3244 = vmatpush1.bf16.msra.mxu1 %v3185_v24  ;;  %v3155_v32 = vpop.permute.xlu0 %3154 }
 0x2b3   : > { %v3165_v10 = vsel %vm7654_vm12, %v3153_v1, %v3155_v32  ;;  %v3157_v31 = vpop.permute.xlu1 %3156  ;;  %3316 = vmatprep.mubr.bf16.mxu0 %v7655_v41  ;;  %vm7657_vm12 = vmmov %vm7651_vm4 }
 0x2b4   : > { %v3191_v29 = vsel %vm3178_vm8, %v3165_v10, 0  ;;  %v3166_v49 = vsel %vm7656_vm14, %v3155_v32, %v3157_v31  ;;  %4969 = vrot.lane.b32.xlu0 %v6954_v33, %s6025_s22  ;;  %vm7658_vm14 = vcmask 269312  }
 0x2b5   : > { %4971 = vrot.lane.b32.xlu1 %v6958_v58, %s6025_s22  ;;  %5841 = vmatmul.mubr.msk.bf16.vlgmr.msra.gmra.mrb[72].mxu1 %vm7527_vm13, %v3173_v9 }
 0x2b6   : > { %5842 = vmatprep.subr.msk.bf16.mxu0 %vm3178_vm8, %v3166_v49  ;;  %v3159_v55 = vpop.permute.xlu0 %3158  ;;  %3357 = vmatprep.mubr.bf16.mxu1 %v7655_v41 }
 0x2b7   : > { %3285 = vmatpush1.bf16.msra.mxu0 %v3191_v29  ;;  %v3167_v45 = vsel %vm7651_vm4, %v3157_v31, %v3159_v55  ;;  %v3161_v42 = vpop.permute.xlu1 %3160  ;;  %vm7659_vm4 = vmmov %vm7658_vm14 }
 0x2b8   : > { %v3197_v34 = vsel %vm3178_vm8, %v3167_v45, 0  ;;  %v3168_v46 = vsel %vm7657_vm12, %v3159_v55, %v3161_v42  ;;  %5203 = vperm.xlu0 %5972, %v5200_v54   ;;  %vm7660_vm12 = vmmov %vm7659_vm4 }
 0x2b9   : > { %5844 = vmatprep.subr.msk.bf16.mxu1 %vm3178_vm8, %v3168_v46 }
 0x2ba   : > { %5843 = vmatmul.mubr.msk.bf16.vlgmr.msra.gmra.mrb[76].mxu0 %vm7527_vm13, %v3173_v9  ;;  %3326 = vmatpush1.bf16.msra.mxu1 %v3197_v34  ;;  %v3104_v62 = vpop.permute.xlu0 %3103 }
 0x2bb   : > { %v3134_v40 = vsel %vm7658_vm14, 0, %v3104_v62  ;;  %v3106_v23 = vpop.permute.xlu1 %3105  ;;  %3425 = vmatprep.mubr.bf16.mxu0 %v7655_v41  ;;  %vm7661_vm14 = vmmov %vm7659_vm4 }
 0x2bc   : > { %v3136_v17 = vsel %vm6351_vm15, %v3134_v40, 0  ;;  %v3119_v2 = vsel %vm7659_vm4, %v3104_v62, %v3106_v23  ;;  %vm7662_vm4 = vnez %v7547_v50 }
 0x2bd   : > { %v3137_v6 = vsel %vm6360_vm1, %v3119_v2, 0  ;;  %5845 = vmatmul.mubr.msk.bf16.vlgmr.msra.gmra.mrb[76].mxu1 %vm7527_vm13, %v3173_v9  ;;  %v3370_v36 = vsel %vm3178_vm8, %v3136_v17, 0  ;;  %vm7663_vm1 = vmmov %vm7660_vm12 }
 0x2be   : > { %5846 = vmatprep.subr.msk.bf16.mxu0 %vm3178_vm8, %v3137_v6  ;;  %v3108_v27 = vpop.permute.xlu0 %3107  ;;  %3466 = vmatprep.mubr.bf16.mxu1 %v7655_v41 }
 0x2bf   : > { %v3120_v39 = vsel %vm7660_vm12, %v3106_v23, %v3108_v27  ;;  %v3110_v3 = vpop.permute.xlu1 %3109  ;;  %3394 = vmatpush1.bf16.msra.mxu0 %v3370_v36  ;;  %vm7664_vm12 = vnez %v7549_v59  ;;  %v5854_v23 = vld [vmem:[%s7485_s7 + $0x8] sm:$0xf] }
 0x2c0   : > { %v3138_v63 = vsel %vm7620_vm6, %v3120_v39, 0  ;;  %v3121_v14 = vsel %vm7661_vm14, %v3108_v27, %v3110_v3  ;;  %vm7665_vm14 = vmmov %vm7663_vm1  ;;  %v3600_v27 = vpack.c.bf16 %v5854_v23, %v5854_v23 }
 0x2c1   : > { %v3139_v37 = vsel %vm7662_vm4, %v3121_v14, 0  ;;  %v3376_v9 = vsel %vm3178_vm8, %v3138_v63, 0  ;;  %vm7666_vm4 = vnez %v7551_v61 }
 0x2c2   : > { %5847 = vmatmul.mubr.msk.bf16.vlgmr.msra.gmra.mrb[80].mxu0 %vm7527_vm13, %v3145_v0  ;;  %5848 = vmatprep.subr.msk.bf16.mxu1 %vm3178_vm8, %v3139_v37  ;;  %v3112_v53 = vpop.permute.xlu0 %3111 }
 0x2c3   : > { %v3122_v1 = vsel %vm7663_vm1, %v3110_v3, %v3112_v53  ;;  %v3114_v24 = vpop.permute.xlu1 %3113  ;;  %3435 = vmatpush1.bf16.msra.mxu1 %v3376_v9  ;;  %3507 = vmatprep.mubr.bf16.mxu0 %v7655_v41 }
 0x2c4   : > { %v3140_v56 = vsel %vm7664_vm12, %v3122_v1, 0  ;;  %v3123_v32 = vsel %vm7665_vm14, %v3112_v53, %v3114_v24  ;;  %vm7667_vm14 = vmmov %vm7663_vm1 }
 0x2c5   : > { %v3141_v10 = vsel %vm7666_vm4, %v3123_v32, 0  ;;  %v3382_v31 = vsel %vm3178_vm8, %v3140_v56, 0  ;;  %vm7668_vm4 = vnez %v7555_v51 }
 0x2c6   : > { %5849 = vmatmul.mubr.msk.bf16.vlgmr.msra.gmra.mrb[80].mxu1 %vm7527_vm13, %v3145_v0  ;;  %5850 = vmatprep.subr.msk.bf16.mxu0 %vm3178_vm8, %v3141_v10  ;;  %v3116_v29 = vpop.permute.xlu0 %3115 }
 0x2c7   : > { %v3124_v49 = vsel %vm7663_vm1, %v3114_v24, %v3116_v29  ;;  %v3118_v54 = vpop.permute.xlu1 %3117  ;;  %3476 = vmatpush1.bf16.msra.mxu0 %v3382_v31  ;;  %3548 = vmatprep.mubr.bf16.mxu1 %v7655_v41  ;;  %vm7669_vm1 = vcmask 252928  }
 0x2c8   : > { %v3142_v55 = vsel %vm7625_vm10, %v3124_v49, 0  ;;  %v3125_v45 = vsel %vm7667_vm14, %v3116_v29, %v3118_v54  ;;  %vm7670_vm14 = vmmov %vm7669_vm1 }
 0x2c9   : > { %v3143_v42 = vsel %vm7668_vm4, %v3125_v45, 0  ;;  %v3388_v34 = vsel %vm3178_vm8, %v3142_v55, 0 }
 0x2ca   : > { %5851 = vmatmul.mubr.msk.bf16.vlgmr.msra.gmra.mrb[84].mxu0 %vm7527_vm13, %v3145_v0  ;;  %5852 = vmatprep.subr.msk.bf16.mxu1 %vm3178_vm8, %v3143_v42  ;;  %v3558_v46 = vpop.permute.xlu0 %3557 }
 0x2cb   : > { %v3588_v62 = vsel %vm7669_vm1, 0, %v3558_v46  ;;  %v3560_v40 = vpop.permute.xlu1 %3559  ;;  %3517 = vmatpush1.bf16.msra.mxu1 %v3388_v34  ;;  %3660 = vmatprep.mubr.bf16.mxu0 %v7655_v41 }
 0x2cc   : > { %v3590_v30 = vsel %vm7638_vm0, %v3588_v62, 0  ;;  %v3573_v17 = vsel %vm7670_vm14, %v3558_v46, %v3560_v40  ;;  %vm7671_vm14 = vmmov %vm7669_vm1  ;;  %vm7672_vm0 = vnez %v7569_v57 }
 0x2cd   : > { %v3591_v2 = vsel %vm6476_vm9, %v3573_v17, 0  ;;  %v3605_v6 = vsel %vm3178_vm8, %v3590_v30, 0 }
 0x2ce   : > { %5853 = vmatmul.mubr.msk.bf16.vlgmr.msra.gmra.mrb[84].mxu1 %vm7527_vm13, %v3145_v0  ;;  %5855 = vmatprep.subr.msk.bf16.mxu0 %vm3178_vm8, %v3591_v2  ;;  %v3562_v36 = vpop.permute.xlu0 %3561 }
 0x2cf   : > { %v3574_v39 = vsel %vm7669_vm1, %v3560_v40, %v3562_v36  ;;  %v3564_v3 = vpop.permute.xlu1 %3563  ;;  %3629 = vmatpush1.bf16.msra.mxu0 %v3605_v6  ;;  %3701 = vmatprep.mubr.bf16.mxu1 %v7655_v41  ;;  %v5863_v40 = vld [vmem:[%s7485_s7 + $0xc] sm:$0xf] }
 0x2d0   : > { %v3592_v63 = vsel %vm7608_vm3, %v3574_v39, 0  ;;  %v3575_v14 = vsel %vm7671_vm14, %v3562_v36, %v3564_v3  ;;  %vm7673_vm14 = vmmov %vm7669_vm1  ;;  %v3843_v36 = vpack.c.bf16 %v5863_v40, %v5863_v40 }
 0x2d1   : > { %v3593_v37 = vsel %vm7672_vm0, %v3575_v14, 0  ;;  %v3611_v0 = vsel %vm3178_vm8, %v3592_v63, 0 }
 0x2d2   : > { %5856 = vmatmul.mubr.msk.bf16.vlgmr.msra.gmra.mrb[88].mxu0 %vm7527_vm13, %v3600_v27  ;;  %5857 = vmatprep.subr.msk.bf16.mxu1 %vm3178_vm8, %v3593_v37  ;;  %v3566_v9 = vpop.permute.xlu0 %3565 }
 0x2d3   : > { %v3576_v53 = vsel %vm7669_vm1, %v3564_v3, %v3566_v9  ;;  %v3568_v1 = vpop.permute.xlu1 %3567  ;;  %3670 = vmatpush1.bf16.msra.mxu1 %v3611_v0  ;;  %3742 = vmatprep.mubr.bf16.mxu0 %v7655_v41 }
 0x2d4   : > { %v3594_v24 = vsel %vm7611_vm2, %v3576_v53, 0  ;;  %v3577_v56 = vsel %vm7673_vm14, %v3566_v9, %v3568_v1  ;;  %vm7674_vm14 = vmmov %vm7669_vm1 }
 0x2d5   : > { %v3595_v32 = vsel %vm7641_vm7, %v3577_v56, 0  ;;  %v3617_v10 = vsel %vm3178_vm8, %v3594_v24, 0 }
 0x2d6   : > { %5858 = vmatmul.mubr.msk.bf16.vlgmr.msra.gmra.mrb[88].mxu1 %vm7527_vm13, %v3600_v27  ;;  %5859 = vmatprep.subr.msk.bf16.mxu0 %vm3178_vm8, %v3595_v32  ;;  %v3570_v31 = vpop.permute.xlu0 %3569 }
 0x2d7   : > { %v3578_v29 = vsel %vm7669_vm1, %v3568_v1, %v3570_v31  ;;  %v3572_v49 = vpop.permute.xlu1 %3571  ;;  %3711 = vmatpush1.bf16.msra.mxu0 %v3617_v10  ;;  %3783 = vmatprep.mubr.bf16.mxu1 %v7655_v41  ;;  %vm7675_vm1 = vcmask 7168  }
 0x2d8   : > { %v3596_v54 = vsel %vm6532_vm5, %v3578_v29, 0  ;;  %v3579_v55 = vsel %vm7674_vm14, %v3570_v31, %v3572_v49  ;;  %vm7676_vm14 = vmmov %vm7675_vm1  ;;  %vm7678_vm5 = vcmask 64512  }
 0x2d9   : > { %v3597_v45 = vsel %vm6542_vm11, %v3579_v55, 0  ;;  %v3623_v42 = vsel %vm3178_vm8, %v3596_v54, 0 }
 0x2da   : > { %5860 = vmatmul.mubr.msk.bf16.vlgmr.msra.gmra.mrb[92].mxu0 %vm7527_vm13, %v3600_v27  ;;  %5861 = vmatprep.subr.msk.bf16.mxu1 %vm3178_vm8, %v3597_v45  ;;  %v3801_v34 = vpop.permute.xlu0 %3800  ;;  %vm7677_vm13 = vnez %v7541_v20 }
 0x2db   : > { %v3831_v46 = vsel %vm7675_vm1, 0, %v3801_v34  ;;  %v3803_v62 = vpop.permute.xlu1 %3802  ;;  %3752 = vmatpush1.bf16.msra.mxu1 %v3623_v42  ;;  %3903 = vmatprep.mubr.bf16.mxu0 %v7655_v41 }
 0x2dc   : > { %v3833_v23 = vsel %vm6351_vm15, %v3831_v46, 0  ;;  %v3816_v30 = vsel %vm7676_vm14, %v3801_v34, %v3803_v62  ;;  %vm7679_vm14 = vmmov %vm7675_vm1  ;;  %vm7680_vm15 = vnez %v7547_v50  ;;  %v4050_v34 = vsel %vm3178_vm8, %v6931_v47, 0 }
 0x2dd   : > { %v3834_v17 = vsel %vm7677_vm13, %v3816_v30, 0  ;;  %v3848_v2 = vsel %vm3178_vm8, %v3833_v23, 0  ;;  %v4056_v47 = vsel %vm3178_vm8, %v6936_v44, 0 }
 0x2de   : > { %5862 = vmatmul.mubr.msk.bf16.vlgmr.msra.gmra.mrb[92].mxu1 %vm7678_vm5, %v3600_v27  ;;  %5864 = vmatprep.subr.msk.bf16.mxu0 %vm3178_vm8, %v3834_v17  ;;  %v3805_v6 = vpop.permute.xlu0 %3804 }
 0x2df   : > { %v3817_v39 = vsel %vm7675_vm1, %v3803_v62, %v3805_v6  ;;  %v3807_v3 = vpop.permute.xlu1 %3806  ;;  %3872 = vmatpush1.bf16.msra.mxu0 %v3848_v2  ;;  %3944 = vmatprep.mubr.bf16.mxu1 %v7655_v41 }
 0x2e0   : > { %v3835_v63 = vsel %vm7620_vm6, %v3817_v39, 0  ;;  %v3818_v14 = vsel %vm7679_vm14, %v3805_v6, %v3807_v3  ;;  %vm7681_vm14 = vmmov %vm7675_vm1  ;;  %vm7682_vm6 = vnez %v7551_v61 }
 0x2e1   : > { %v3836_v37 = vsel %vm7680_vm15, %v3818_v14, 0  ;;  %v3854_v27 = vsel %vm3178_vm8, %v3835_v63, 0 }
 0x2e2   : > { %5865 = vmatmul.mubr.msk.bf16.vlgmr.msra.gmra.mrb[96].mxu0 %vm7678_vm5, %v3843_v36  ;;  %5866 = vmatprep.subr.msk.bf16.mxu1 %vm3178_vm8, %v3836_v37  ;;  %v3809_v0 = vpop.permute.xlu0 %3808 }
 0x2e3   : > { %v3819_v9 = vsel %vm7675_vm1, %v3807_v3, %v3809_v0  ;;  %v3811_v53 = vpop.permute.xlu1 %3810  ;;  %3913 = vmatpush1.bf16.msra.mxu1 %v3854_v27  ;;  %3985 = vmatprep.mubr.bf16.mxu0 %v7655_v41 }
 0x2e4   : > { %v3837_v1 = vsel %vm7664_vm12, %v3819_v9, 0  ;;  %v3820_v24 = vsel %vm7681_vm14, %v3809_v0, %v3811_v53  ;;  %vm7683_vm14 = vmmov %vm7675_vm1 }
 0x2e5   : > { %v3838_v56 = vsel %vm7682_vm6, %v3820_v24, 0  ;;  %v3860_v32 = vsel %vm3178_vm8, %v3837_v1, 0 }
 0x2e6   : > { %5867 = vmatmul.mubr.msk.bf16.vlgmr.msra.gmra.mrb[96].mxu1 %vm7678_vm5, %v3843_v36  ;;  %5868 = vmatprep.subr.msk.bf16.mxu0 %vm3178_vm8, %v3838_v56  ;;  %v3813_v10 = vpop.permute.xlu0 %3812 }
 0x2e7   : > { %v3821_v31 = vsel %vm7675_vm1, %v3811_v53, %v3813_v10  ;;  %v3815_v29 = vpop.permute.xlu1 %3814  ;;  %3954 = vmatpush1.bf16.msra.mxu0 %v3860_v32  ;;  %4026 = vmatprep.mubr.bf16.mxu1 %v7655_v41  ;;  %vm7684_vm1 = vmmov %vm7678_vm5  ;;  %v5881_v53 = vld [vmem:[%s7485_s7 + $0x14] sm:$0xf] }
 0x2e8   : > { %v3839_v49 = vsel %vm7625_vm10, %v3821_v31, 0  ;;  %v3822_v54 = vsel %vm7683_vm14, %v3813_v10, %v3815_v29  ;;  %5873 = vmatprep.subr.msk.bf16.mxu0 %vm3178_vm8, %v6933_v60  ;;  %v5872_v60 = vld [vmem:[%s7485_s7 + $0x10] sm:$0xf]  ;;  %vm7685_vm14 = vcmask 1039360   ;;  %v4288_v10 = vpack.c.bf16 %v5881_v53, %v5881_v53 }
 0x2e9   : > { %v3840_v55 = vsel %vm7668_vm4, %v3822_v54, 0  ;;  %v3866_v45 = vsel %vm3178_vm8, %v3839_v49, 0  ;;  %v4045_v40 = vpack.c.bf16 %v5872_v60, %v5872_v60 }
 0x2ea   : > { %5869 = vmatmul.mubr.msk.bf16.vlgmr.msra.gmra.mrb[100].mxu0 %vm7678_vm5, %v3843_v36  ;;  %5870 = vmatprep.subr.msk.bf16.mxu1 %vm3178_vm8, %v3840_v55  ;;  %v4246_v42 = vpop.permute.xlu0 %4245  ;;  %vm7686_vm5 = vmmov %vm7684_vm1 }
 0x2eb   : > { %v4248_v46 = vpop.permute.xlu1 %4247  ;;  %3995 = vmatpush1.bf16.msra.mxu1 %v3866_v45  ;;  %4074 = vmatpush1.bf16.msra.mxu0 %v4050_v34 }
 0x2ec   : > { %5875 = vmatprep.subr.msk.bf16.mxu1 %vm3178_vm8, %v6940_v22  ;;  %5877 = vmatprep.subr.msk.bf16.mxu0 %vm3178_vm8, %v6950_v38  ;;  %v4062_v38 = vsel %vm3178_vm8, %v6946_v5, 0 }
 0x2ed   : > { %4105 = vmatprep.mubr.bf16.mxu0 %v7655_v41 }
 0x2ee   : > { %5871 = vmatmul.mubr.msk.bf16.vlgmr.msra.gmra.mrb[100].mxu1 %vm7684_vm1, %v3843_v36  ;;  %v4250_v62 = vpop.permute.xlu0 %4249  ;;  %vm7687_vm1 = vmmov %vm7685_vm14 }
 0x2ef   : > { %v4252_v23 = vpop.permute.xlu1 %4251  ;;  %4115 = vmatpush1.bf16.msra.mxu1 %v4056_v47  ;;  %4146 = vmatprep.mubr.bf16.mxu1 %v7655_v41  ;;  %v4262_v30 = vsel %vm7685_vm14, %v4248_v46, %v4250_v62  ;;  %v4261_v2 = vsel %vm7687_vm1, %v4246_v42, %v4248_v46  ;;  %vm7688_vm10 = vmmov %vm7687_vm1 }
 0x2f0   : > { %5879 = vmatprep.subr.msk.bf16.mxu1 %vm3178_vm8, %v6958_v58  ;;  %v4279_v17 = vsel %vm6476_vm9, %v4262_v30, 0  ;;  %vm7689_vm14 = vmmov %vm7686_vm5  ;;  %v4068_v58 = vsel %vm3178_vm8, %v6954_v33, 0  ;;  %v4263_v63 = vsel %vm7687_vm1, %v4250_v62, %v4252_v23 }
 0x2f1   : > { %v4280_v27 = vsel %vm7608_vm3, %v4263_v63, 0 }
 0x2f2   : > { %v4254_v22 = vpop.permute.xlu0 %4253  ;;  %5874 = vmatmul.mubr.msk.bf16.vlgmr.msra.gmra.mrb[104].mxu0 %vm7686_vm5, %v4045_v40  ;;  %vm7690_vm5 = vnez %v7557_v19  ;;  %v4299_v56 = vsel %vm3178_vm8, %v4280_v27, 0 }
 0x2f3   : > { %4156 = vmatpush1.bf16.msra.mxu0 %v4062_v38  ;;  %v4256_v44 = vpop.permute.xlu1 %4255  ;;  %4187 = vmatprep.mubr.bf16.mxu0 %v7655_v41  ;;  %v4264_v6 = vsel %vm7688_vm10, %v4252_v23, %v4254_v22  ;;  %v4278_v5 = vsel %vm7690_vm5, %v4261_v2, 0  ;;  %vm7691_vm10 = vmmov %vm7687_vm1 }
 0x2f4   : > { %5882 = vmatprep.subr.msk.bf16.mxu0 %vm3178_vm8, %v4279_v17  ;;  %v4281_v39 = vsel %vm7672_vm0, %v4264_v6, 0  ;;  %v4293_v33 = vsel %vm3178_vm8, %v4278_v5, 0  ;;  %v4265_v1 = vsel %vm7687_vm1, %v4254_v22, %v4256_v44 }
 0x2f5   : > { %v4282_v31 = vsel %vm7611_vm2, %v4265_v1, 0  ;;  %vm7694_vm2 = vnez %v7577_v15 }
 0x2f6   : > { %5876 = vmatmul.mubr.msk.bf16.vlgmr.msra.gmra.mrb[104].mxu1 %vm7689_vm14, %v4045_v40  ;;  %v4258_v36 = vpop.permute.xlu0 %4257  ;;  %v4305_v42 = vsel %vm3178_vm8, %v4282_v31, 0 }
 0x2f7   : > { %4197 = vmatpush1.bf16.msra.mxu1 %v4068_v58  ;;  %v4260_v3 = vpop.permute.xlu1 %4259  ;;  %4228 = vmatprep.mubr.bf16.mxu1 %v7655_v41  ;;  %v4266_v14 = vsel %vm7691_vm10, %v4256_v44, %v4258_v36  ;;  %vm7692_vm10 = vmmov %vm7687_vm1  ;;  %v5890_v58 = vld [vmem:[%s7485_s7 + $0x18] sm:$0xf] }
 0x2f8   : > { %5884 = vmatprep.subr.msk.bf16.mxu1 %vm3178_vm8, %v4281_v39  ;;  %v4283_v0 = vsel %vm7641_vm7, %v4266_v14, 0  ;;  %v4276_v24 = vsel %vm7692_vm10, %v4260_v3, 0  ;;  %v4267_v54 = vsel %vm7687_vm1, %v4258_v36, %v4260_v3  ;;  %vm7693_vm10 = vcmask 793600  }
 0x2f9   : > { %v4285_v29 = vsel %vm6542_vm11, %v4276_v24, 0  ;;  %v4284_v34 = vsel %vm7694_vm2, %v4267_v54, 0  ;;  %vm7695_vm1 = vmmov %vm7693_vm10  ;;  %v4531_v39 = vpack.c.bf16 %v5890_v58, %v5890_v58  ;;  %v5908_v58 = vld [vmem:[%s7485_s7 + $0x20] sm:$0xf] }
 0x2fa   : > { %v4489_v37 = vpop.permute.xlu0 %4488  ;;  %5878 = vmatmul.mubr.msk.bf16.vlgmr.msra.gmra.mrb[108].mxu0 %vm7689_vm14, %v4045_v40  ;;  %vm7697_vm11 = vmmov %vm7689_vm14 }
 0x2fb   : > { %4317 = vmatpush1.bf16.msra.mxu0 %v4293_v33  ;;  %v4491_v9 = vpop.permute.xlu1 %4490  ;;  %4348 = vmatprep.mubr.bf16.mxu0 %v7655_v41 }
 0x2fc   : > { %5886 = vmatprep.subr.msk.bf16.mxu0 %vm3178_vm8, %v4283_v0  ;;  %v4504_v62 = vsel %vm7695_vm1, %v4489_v37, %v4491_v9 }
 0x2fe   : > { %5880 = vmatmul.mubr.msk.bf16.vlgmr.msra.gmra.mrb[108].mxu1 %vm7689_vm14, %v4045_v40  ;;  %v4493_v32 = vpop.permute.xlu0 %4492  ;;  %v4311_v40 = vsel %vm3178_vm8, %v4284_v34, 0 }
 0x2ff   : > { %4358 = vmatpush1.bf16.msra.mxu1 %v4299_v56  ;;  %v4495_v49 = vpop.permute.xlu1 %4494  ;;  %4389 = vmatprep.mubr.bf16.mxu1 %v7655_v41  ;;  %v4505_v55 = vsel %vm7693_vm10, %v4491_v9, %v4493_v32  ;;  %vm7696_vm10 = vmmov %vm7695_vm1 }
 0x300   : > { %5888 = vmatprep.subr.msk.bf16.mxu1 %vm3178_vm8, %v4285_v29  ;;  %v4522_v46 = vsel %vm7677_vm13, %v4505_v55, 0  ;;  %vm7699_vm13 = vmmov %vm7695_vm1 }
 0x301   : > { %v4506_v38 = vsel %vm7699_vm13, %v4493_v32, %v4495_v49  ;;  %vm7703_vm13 = vmmov %vm7697_vm11 }
 0x302   : > { %v4497_v45 = vpop.permute.xlu0 %4496  ;;  %5883 = vmatmul.mubr.msk.bf16.vlgmr.msra.gmra.mrb[112].mxu0 %vm7689_vm14, %v4288_v10  ;;  %vm7698_vm14 = vnez %v7539_v26 }
 0x303   : > { %4399 = vmatpush1.bf16.msra.mxu0 %v4305_v42  ;;  %v4499_v60 = vpop.permute.xlu1 %4498  ;;  %4430 = vmatprep.mubr.bf16.mxu0 %v7655_v41  ;;  %v4507_v47 = vsel %vm7696_vm10, %v4495_v49, %v4497_v45  ;;  %v4521_v30 = vsel %vm7698_vm14, %v4504_v62, 0  ;;  %vm7700_vm10 = vnez %v7545_v25  ;;  %vm7702_vm14 = vmmov %vm7695_vm1  ;;  %v5899_v49 = vld [vmem:[%s7485_s7 + $0x1c] sm:$0xf] }
 0x304   : > { %5891 = vmatprep.subr.msk.bf16.mxu0 %vm3178_vm8, %v4522_v46  ;;  %v4524_v20 = vsel %vm7680_vm15, %v4507_v47, 0  ;;  %v4536_v2 = vsel %vm3178_vm8, %v4521_v30, 0  ;;  %v4523_v26 = vsel %vm7700_vm10, %v4506_v38, 0  ;;  %vm7701_vm15 = vmmov %vm7695_vm1 }
 0x305   : > { %v4508_v36 = vsel %vm7701_vm15, %v4497_v45, %v4499_v60  ;;  %v4542_v25 = vsel %vm3178_vm8, %v4523_v26, 0  ;;  %v4758_v45 = vpack.c.bf16 %v5899_v49, %v5899_v49 }
 0x306   : > { %5885 = vmatmul.mubr.msk.bf16.vlgmr.msra.gmra.mrb[112].mxu1 %vm7697_vm11, %v4288_v10  ;;  %v4501_v23 = vpop.permute.xlu0 %4500  ;;  %v4525_v3 = vsel %vm7664_vm12, %v4508_v36, 0  ;;  %vm7707_vm12 = vcmask 785408  }
 0x307   : > { %4440 = vmatpush1.bf16.msra.mxu1 %v4311_v40  ;;  %v4503_v22 = vpop.permute.xlu1 %4502  ;;  %4471 = vmatprep.mubr.bf16.mxu1 %v7655_v41  ;;  %v4509_v17 = vsel %vm7695_vm1, %v4499_v60, %v4501_v23  ;;  %v4548_v27 = vsel %vm3178_vm8, %v4525_v3, 0  ;;  %vm7709_vm10 = vmmov %vm7707_vm12 }
 0x308   : > { %5893 = vmatprep.subr.msk.bf16.mxu1 %vm3178_vm8, %v4524_v20  ;;  %v4526_v50 = vsel %vm7682_vm6, %v4509_v17, 0  ;;  %v4519_v5 = vsel %vm7702_vm14, %v4503_v22, 0  ;;  %vm7704_vm6 = vmmov %vm7695_vm1 }
 0x309   : > { %v4528_v63 = vsel %vm7668_vm4, %v4519_v5, 0  ;;  %v4510_v37 = vsel %vm7704_vm6, %v4501_v23, %v4503_v22  ;;  %vm7705_vm1 = vmmov %vm7697_vm11 }
 0x30a   : > { %v4732_v44 = vpop.permute.xlu0 %4731  ;;  %5887 = vmatmul.mubr.msk.bf16.vlgmr.msra.gmra.mrb[116].mxu0 %vm7697_vm11, %v4288_v10  ;;  %vm7706_vm11 = vnez %v7553_v7  ;;  %vm7708_vm4 = vmmov %vm7705_vm1 }
 0x30b   : > { %4560 = vmatpush1.bf16.msra.mxu0 %v4536_v2  ;;  %v4734_v6 = vpop.permute.xlu1 %4733  ;;  %4591 = vmatprep.mubr.bf16.mxu0 %v7655_v41  ;;  %v4527_v59 = vsel %vm7706_vm11, %v4510_v37, 0  ;;  %vm7710_vm15 = vmmov %vm7709_vm10 }
 0x30c   : > { %5895 = vmatprep.subr.msk.bf16.mxu0 %vm3178_vm8, %v4526_v50  ;;  %v4554_v9 = vsel %vm3178_vm8, %v4527_v59, 0  ;;  %v4747_v1 = vsel %vm7709_vm10, %v4732_v44, %v4734_v6  ;;  %vm7711_vm14 = vmmov %vm7705_vm1 }
 0x30d   : > { %v4763_v56 = vsel %vm3178_vm8, %v4747_v1, 0  ;;  %vm7713_vm6 = vmmov %vm7709_vm10 }
 0x30e   : > { %5889 = vmatmul.mubr.msk.bf16.vlgmr.msra.gmra.mrb[116].mxu1 %vm7703_vm13, %v4288_v10  ;;  %v4736_v61 = vpop.permute.xlu0 %4735  ;;  %vm7712_vm13 = vmmov %vm7709_vm10 }
 0x30f   : > { %4601 = vmatpush1.bf16.msra.mxu1 %v4542_v25  ;;  %v4738_v14 = vpop.permute.xlu1 %4737  ;;  %4632 = vmatprep.mubr.bf16.mxu1 %v7655_v41  ;;  %v4748_v0 = vsel %vm7707_vm12, %v4734_v6, %v4736_v61  ;;  %vm7714_vm11 = vmmov %vm7713_vm6  ;;  %v5000_v25 = vpack.c.bf16 %v5908_v58, %v5908_v58 }
 0x310   : > { %5897 = vmatprep.subr.msk.bf16.mxu1 %vm3178_vm8, %v4528_v63  ;;  %v4749_v10 = vsel %vm7712_vm13, %v4736_v61, %v4738_v14  ;;  %vm7715_vm12 = vmmov %vm7713_vm6 }
 0x311   : > { %v4769_v54 = vsel %vm3178_vm8, %v4749_v10, 0  ;;  %vm7717_vm10 = vmmov %vm7705_vm1 }
 0x312   : > { %v4740_v33 = vpop.permute.xlu0 %4739  ;;  %5892 = vmatmul.mubr.msk.bf16.vlgmr.msra.gmra.mrb[120].mxu0 %vm7705_vm1, %v4531_v39 }
 0x313   : > { %4642 = vmatpush1.bf16.msra.mxu0 %v4548_v27  ;;  %v4742_v51 = vpop.permute.xlu1 %4741  ;;  %4673 = vmatprep.mubr.bf16.mxu0 %v7655_v41  ;;  %v4750_v24 = vsel %vm7710_vm15, %v4738_v14, %v4740_v33  ;;  %vm7718_vm15 = vmmov %vm7713_vm6 }
 0x314   : > { %5900 = vmatprep.subr.msk.bf16.mxu0 %vm3178_vm8, %v4748_v0  ;;  %v4751_v42 = vsel %vm7714_vm11, %v4740_v33, %v4742_v51 }
 0x315   : > { %v4775_v62 = vsel %vm3178_vm8, %v4751_v42, 0 }
 0x316   : > { %5894 = vmatmul.mubr.msk.bf16.vlgmr.msra.gmra.mrb[120].mxu1 %vm7708_vm4, %v4531_v39  ;;  %v4744_v53 = vpop.permute.xlu0 %4743  ;;  %vm7716_vm4 = vcmask 777216  }
 0x317   : > { %4683 = vmatpush1.bf16.msra.mxu1 %v4554_v9  ;;  %v4746_v7 = vpop.permute.xlu1 %4745  ;;  %4714 = vmatprep.mubr.bf16.mxu1 %v7655_v41  ;;  %v4752_v31 = vsel %vm7713_vm6, %v4742_v51, %v4744_v53  ;;  %vm7720_vm13 = vmmov %vm7716_vm4 }
 0x318   : > { %5902 = vmatprep.subr.msk.bf16.mxu1 %vm3178_vm8, %v4750_v24  ;;  %v4755_v34 = vsel %vm7715_vm12, %v4746_v7, 0  ;;  %v4753_v40 = vsel %vm7718_vm15, %v4744_v53, %v4746_v7  ;;  %vm7721_vm6 = vmmov %vm7705_vm1  ;;  %vm7732_vm15 = vcmask 1041408  }
 0x319   : > { %v4781_v38 = vsel %vm3178_vm8, %v4753_v40, 0  ;;  %vm7724_vm11 = vmmov %vm7721_vm6 }
 0x31a   : > { %v4958_v32 = vpop.permute.xlu0 %4957  ;;  %5896 = vmatmul.mubr.msk.bf16.vlgmr.msra.gmra.mrb[124].mxu0 %vm7711_vm14, %v4531_v39  ;;  %vm7719_vm14 = vmmov %vm7716_vm4 }
 0x31b   : > { %4786 = vmatpush1.bf16.msra.mxu0 %v4763_v56  ;;  %v4960_v29 = vpop.permute.xlu1 %4959  ;;  %4817 = vmatprep.mubr.bf16.mxu0 %v7655_v41  ;;  %vm7727_vm12 = vmmov %vm7721_vm6 }
 0x31c   : > { %5904 = vmatprep.subr.msk.bf16.mxu0 %vm3178_vm8, %v4752_v31  ;;  %v4973_v20 = vsel %vm7719_vm14, %v4958_v32, %v4960_v29  ;;  %vm7733_vm14 = vmmov %vm7721_vm6 }
 0x31d   : > { %v4990_v44 = vsel %vm7690_vm5, %v4973_v20, 0 }
 0x31e   : > { %5898 = vmatmul.mubr.msk.bf16.vlgmr.msra.gmra.mrb[124].mxu1 %vm7705_vm1, %v4531_v39  ;;  %v4962_v55 = vpop.permute.xlu0 %4961  ;;  %vm7723_vm1 = vmmov %vm7716_vm4  ;;  %v5005_v6 = vsel %vm3178_vm8, %v4990_v44, 0 }
 0x31f   : > { %4827 = vmatpush1.bf16.msra.mxu1 %v4769_v54  ;;  %v4964_v46 = vpop.permute.xlu1 %4963  ;;  %4858 = vmatprep.mubr.bf16.mxu1 %v7655_v41  ;;  %v4974_v60 = vsel %vm7716_vm4, %v4960_v29, %v4962_v55 }
 0x320   : > { %5906 = vmatprep.subr.msk.bf16.mxu1 %vm3178_vm8, %v4755_v34  ;;  %v4991_v23 = vsel %vm6476_vm9, %v4974_v60, 0  ;;  %vm7722_vm9 = vmmov %vm7716_vm4 }
 0x321   : > { %v4975_v2 = vsel %vm7722_vm9, %v4962_v55, %v4964_v46  ;;  %vm7736_vm9 = vmmov %vm7721_vm6 }
 0x322   : > { %v4966_v47 = vpop.permute.xlu0 %4965  ;;  %5901 = vmatmul.mubr.msk.bf16.vlgmr.msra.gmra.mrb[128].mxu0 %vm7717_vm10, %v4758_v45  ;;  %v4992_v19 = vsel %vm7608_vm3, %v4975_v2, 0  ;;  %vm7728_vm3 = vnez %v7571_v52  ;;  %vm7731_vm10 = vmmov %vm7721_vm6 }
 0x323   : > { %4868 = vmatpush1.bf16.msra.mxu0 %v4775_v62  ;;  %v4968_v30 = vpop.permute.xlu1 %4967  ;;  %4899 = vmatprep.mubr.bf16.mxu0 %v7655_v41  ;;  %v4976_v22 = vsel %vm7720_vm13, %v4964_v46, %v4966_v47  ;;  %v5011_v48 = vsel %vm3178_vm8, %v4992_v19, 0  ;;  %vm7734_vm13 = vmmov %vm7732_vm15 }
 0x324   : > { %5909 = vmatprep.subr.msk.bf16.mxu0 %vm3178_vm8, %v4991_v23  ;;  %v4993_v43 = vsel %vm7672_vm0, %v4976_v22, 0  ;;  %vm7725_vm0 = vmmov %vm7723_vm1 }
 0x325   : > { %v4977_v36 = vsel %vm7725_vm0, %v4966_v47, %v4968_v30  ;;  %vm7726_vm5 = vmmov %vm7725_vm0 }
 0x326   : > { %5903 = vmatmul.mubr.msk.bf16.vlgmr.msra.gmra.mrb[128].mxu1 %vm7721_vm6, %v4758_v45  ;;  %v4970_v17 = vpop.permute.xlu0 %4969  ;;  %v4994_v4 = vsel %vm7728_vm3, %v4977_v36, 0  ;;  %vm7730_vm4 = vmmov %vm7725_vm0 }
 0x327   : > { %4909 = vmatpush1.bf16.msra.mxu1 %v4781_v38  ;;  %4940 = vmatprep.mubr.bf16.mxu1 %v7655_v41  ;;  %v4978_v26 = vsel %vm7723_vm1, %v4968_v30, %v4970_v17  ;;  %v4972_v50 = vpop.permute.xlu1 %4971  ;;  %v5017_v3 = vsel %vm3178_vm8, %v4994_v4, 0  ;;  %vm7738_vm1 = vcmask 31744  }
 0x328   : > { %5911 = vmatprep.subr.msk.bf16.mxu1 %vm3178_vm8, %v4993_v43  ;;  %v4995_v57 = vsel %vm7641_vm7, %v4978_v26, 0  ;;  %v4988_v5 = vsel %vm7726_vm5, %v4972_v50, 0  ;;  %vm7729_vm7 = vnez %v7582_v28  ;;  %v4979_v39 = vsel %vm7730_vm4, %v4970_v17, %v4972_v50  ;;  %vm7740_vm0 = vmmov %vm7738_vm1 }
 0x329   : > { %v4997_v61 = vsel %vm7729_vm7, %v4988_v5, 0  ;;  %v4996_v63 = vsel %vm7694_vm2, %v4979_v39, 0  ;;  %vm7735_vm2 = vmmov %vm7734_vm13 }
 0x32a   : > { %5905 = vmatmul.mubr.msk.bf16.vlgmr.msra.gmra.mrb[132].mxu0 %vm7724_vm11, %v4758_v45  ;;  %v5023_v52 = vsel %vm3178_vm8, %v4996_v63, 0  ;;  %vm7739_vm11 = vmmov %vm7738_vm1 }
 0x32b   : > { %5029 = vmatpush1.bf16.msra.mxu0 %v5005_v6  ;;  %5060 = vmatprep.mubr.bf16.mxu0 %v7655_v41  ;;  %vm7741_vm5 = vmmov %vm7740_vm0 }
 0x32c   : > { %5913 = vmatprep.subr.msk.bf16.mxu0 %vm3178_vm8, %v4995_v57  ;;  %vm7743_vm3 = vmmov %vm7735_vm2 }
 0x32d   : > { %vm7744_vm7 = vmmov %vm7735_vm2 }
 0x32e   : > { %5907 = vmatmul.mubr.msk.bf16.vlgmr.msra.gmra.mrb[132].mxu1 %vm7727_vm12, %v4758_v45  ;;  %vm7742_vm12 = vmmov %vm7735_vm2 }
 0x32f   : > { %5070 = vmatpush1.bf16.msra.mxu1 %v5011_v48  ;;  %5101 = vmatprep.mubr.bf16.mxu1 %v7655_v41  ;;  %vm7745_vm4 = vmmov %vm7740_vm0 }
 0x330   : > { %5915 = vmatprep.subr.msk.bf16.mxu1 %vm3178_vm8, %v4997_v61  ;;  %vm7737_vm8 = vmmov %vm7735_vm2 }
 0x332   : > { %5910 = vmatmul.mubr.msk.bf16.vlgmr.msra.gmra.mrb[136].mxu0 %vm7731_vm10, %v5000_v25  ;;  %vm7746_vm10 = vmmov %vm7735_vm2 }
 0x333   : > { %5111 = vmatpush1.bf16.msra.mxu0 %v5017_v3  ;;  %5142 = vmatprep.mubr.bf16.mxu0 %v7655_v41 }
 0x334   : > { %5917 = vmatprep.subr.msk.bf16.mxu0 %vm7732_vm15, %v6109_v12  ;;  %v5240_v12 = vld [vmem:[%s353_s20] sm:$0x3]  ;;  %vm7747_vm15 = vmmov %vm7735_vm2 }
 0x336   : > { %5912 = vmatmul.mubr.msk.bf16.vlgmr.msra.gmra.mrb[136].mxu1 %vm7733_vm14, %v5000_v25  ;;  %vm7748_vm14 = vmmov %vm7740_vm0 }
 0x337   : > { %5152 = vmatpush1.bf16.msra.mxu1 %v5023_v52  ;;  %5183 = vmatprep.mubr.bf16.mxu1 %v7655_v41 }
 0x338   : > { %5919 = vmatprep.subr.msk.bf16.mxu1 %vm7734_vm13, %v6115_v13  ;;  %v7434_v13 = vpack.c.bf16 %v5240_v12, %v5240_v12  ;;  %vm7749_vm13 = vmmov %vm7735_vm2 }
 0x33a   : > { %5914 = vmatmul.mubr.msk.bf16.vlgmr.msra.gmra.mrb[140].mxu0 %vm7721_vm6, %v5000_v25  ;;  %vm7750_vm6 = vmmov %vm7735_vm2 }
 0x33b   : > { %5254 = vmatpush1.bf16.msra.mxu0 %v6599_v35  ;;  %5285 = vmatprep.mubr.bf16.mxu0 %v7655_v41 }
 0x33c   : > { %5921 = vmatprep.subr.msk.bf16.mxu0 %vm7735_vm2, %v6125_v16  ;;  %vm7751_vm2 = vmmov %vm7740_vm0 }
 0x33e   : > { %5916 = vmatmul.mubr.msk.bf16.vlgmr.msra.gmra.mrb[140].mxu1 %vm7736_vm9, %v5000_v25  ;;  %vm7752_vm9 = vmmov %vm7743_vm3 }
 0x33f   : > { %5295 = vmatpush1.bf16.msra.mxu1 %v6611_v8  ;;  %5326 = vmatprep.mubr.bf16.mxu1 %v7655_v41 }
 0x340   : > { %5923 = vmatprep.subr.msk.bf16.mxu1 %vm7737_vm8, %v6135_v18  ;;  %vm7753_vm8 = vmmov %vm7740_vm0 }
 0x342   : > { %5918 = vmatmul.mubr.msk.bf16.vlgmr.msra.gmra.mrb[144].mxu0 %vm7738_vm1, %v7434_v13 }
 0x343   : > { %5336 = vmatpush1.bf16.msra.mxu0 %v6625_v11  ;;  %5367 = vmatprep.mubr.bf16.mxu0 %v7655_v41 }
 0x346   : > { %5920 = vmatmul.mubr.msk.bf16.vlgmr.msra.gmra.mrb[144].mxu1 %vm7739_vm11, %v7434_v13 }
 0x347   : > { %5377 = vmatpush1.bf16.msra.mxu1 %v6636_v21  ;;  %5408 = vmatprep.mubr.bf16.mxu1 %v7655_v41 }
 0x34a   : > { %5922 = vmatmul.mubr.msk.bf16.vlgmr.msra.gmra.mrb[148].mxu0 %vm7740_vm0, %v7434_v13 }
 0x34b   : > { %5478 = vmatprep.mubr.bf16.mxu0 %v7655_v41 }
 0x34e   : > { %5924 = vmatmul.mubr.msk.bf16.vlgmr.msra.gmra.mrb[148].mxu1 %vm7741_vm5, %v7434_v13 }
 0x34f   : > { %5519 = vmatprep.mubr.bf16.mxu1 %v7655_v41 }
 0x385   : > { %v3236_v16 = vpop.f32.mrb[72].mxu0 }
 0x386   : > { %v3238_v18 = vpop.f32.mrb[73].mxu0 }
 0x387   : > { %v3240_v15 = vpop.f32.mrb[74].mxu0 }
 0x388   : > { %v3277_v28 = vpop.f32.mrb[72].mxu1  ;;  %v3241_v35 = vpop.f32.mrb[75].mxu0 }
 0x389   : > { %v3279_v8 = vpop.f32.mrb[73].mxu1 }
 0x38a   : > { %v3281_v14 = vpop.f32.mrb[74].mxu1 }
 0x38b   : > { %v3282_v37 = vpop.f32.mrb[75].mxu1 }
 0x38d   : > { %v3318_v11 = vpop.f32.mrb[76].mxu0 }
 0x38e   : > { %v3320_v21 = vpop.f32.mrb[77].mxu0 }
 0x38f   : > { %v3322_v33 = vpop.f32.mrb[78].mxu0 }
 0x390   : > { %v3359_v27 = vpop.f32.mrb[76].mxu1  ;;  %v3323_v59 = vpop.f32.mrb[79].mxu0 }
 0x391   : > { %v3361_v0 = vpop.f32.mrb[77].mxu1 }
 0x392   : > { %v3363_v51 = vpop.f32.mrb[78].mxu1 }
 0x393   : > { %v3364_v9 = vpop.f32.mrb[79].mxu1 }
 0x395   : > { %v3427_v53 = vpop.f32.mrb[80].mxu0 }
 0x396   : > { %v3428_v1 = vadd.f32 %v3427_v53, %v3236_v16  ;;  %v3429_v24 = vpop.f32.mrb[81].mxu0 }
 0x397   : > { %v3430_v7 = vadd.f32 %v3429_v24, %v3238_v18  ;;  %v3431_v56 = vpop.f32.mrb[82].mxu0 }
 0x398   : > { %v3432_v32 = vpop.f32.mrb[83].mxu0 }
 0x399   : > { %v3468_v10 = vpop.f32.mrb[80].mxu1 }
 0x39a   : > { %v3469_v31 = vadd.f32 %v3468_v10, %v3277_v28  ;;  %v3470_v29 = vpop.f32.mrb[81].mxu1 }
 0x39b   : > { %v3471_v49 = vadd.f32 %v3470_v29, %v3279_v8  ;;  %v3472_v54 = vpop.f32.mrb[82].mxu1 }
 0x39c   : > { %v3473_v55 = vpop.f32.mrb[83].mxu1 }
 0x39d   : > { %v3509_v45 = vpop.f32.mrb[84].mxu0 }
 0x39e   : > { %v3510_v42 = vadd.f32 %v3509_v45, %v3318_v11  ;;  %v3511_v34 = vpop.f32.mrb[85].mxu0 }
 0x39f   : > { %v3512_v46 = vadd.f32 %v3511_v34, %v3320_v21  ;;  %v3513_v60 = vpop.f32.mrb[86].mxu0 }
 0x3a0   : > { %v3514_v62 = vpop.f32.mrb[87].mxu0 }
 0x3a1   : > { %v3550_v47 = vpop.f32.mrb[84].mxu1 }
 0x3a2   : > { %v3551_v40 = vadd.f32 %v3550_v47, %v3359_v27  ;;  %v3552_v23 = vpop.f32.mrb[85].mxu1 }
 0x3a3   : > { %v3553_v30 = vadd.f32 %v3552_v23, %v3361_v0  ;;  %v3554_v20 = vpop.f32.mrb[86].mxu1 }
 0x3a4   : > { %v3555_v22 = vpop.f32.mrb[87].mxu1 }
 0x3a5   : > { %v3662_v38 = vpop.f32.mrb[88].mxu0 }
 0x3a6   : > { %v3792_v17 = vadd.f32 %v3662_v38, %v3428_v1  ;;  %v3664_v44 = vpop.f32.mrb[89].mxu0 }
 0x3a7   : > { %v3793_v43 = vadd.f32 %v3664_v44, %v3430_v7  ;;  %v3666_v2 = vpop.f32.mrb[90].mxu0 }
 0x3a8   : > { %v3667_v26 = vpop.f32.mrb[91].mxu0 }
 0x3a9   : > { %v3703_v50 = vpop.f32.mrb[88].mxu1 }
 0x3aa   : > { %v3794_v6 = vadd.f32 %v3703_v50, %v3469_v31  ;;  %v3705_v19 = vpop.f32.mrb[89].mxu1 }
 0x3ab   : > { %v3795_v57 = vadd.f32 %v3705_v19, %v3471_v49  ;;  %v3707_v58 = vpop.f32.mrb[90].mxu1 }
 0x3ac   : > { %v3708_v36 = vpop.f32.mrb[91].mxu1 }
 0x3ad   : > { %v3744_v5 = vpop.f32.mrb[92].mxu0 }
 0x3ae   : > { %v3796_v48 = vadd.f32 %v3744_v5, %v3510_v42  ;;  %v3746_v25 = vpop.f32.mrb[93].mxu0 }
 0x3af   : > { %v3797_v4 = vadd.f32 %v3746_v25, %v3512_v46  ;;  %v3748_v61 = vpop.f32.mrb[94].mxu0 }
 0x3b0   : > { %v3749_v39 = vpop.f32.mrb[95].mxu0 }
 0x3b1   : > { %v3785_v3 = vpop.f32.mrb[92].mxu1 }
 0x3b2   : > { %v3798_v63 = vadd.f32 %v3785_v3, %v3551_v40  ;;  %v3787_v52 = vpop.f32.mrb[93].mxu1 }
 0x3b3   : > { %v3799_v12 = vadd.f32 %v3787_v52, %v3553_v30  ;;  %v3789_v16 = vpop.f32.mrb[94].mxu1 }
 0x3b4   : > { %v3790_v18 = vpop.f32.mrb[95].mxu1 }
 0x3b5   : > { %v3905_v15 = vpop.f32.mrb[96].mxu0 }
 0x3b6   : > { %v4035_v28 = vadd.f32 %v3905_v15, %v3792_v17  ;;  %v3907_v35 = vpop.f32.mrb[97].mxu0 }
 0x3b7   : > { %v4036_v8 = vadd.f32 %v3907_v35, %v3793_v43  ;;  %v3909_v14 = vpop.f32.mrb[98].mxu0 }
 0x3b8   : > { %v3910_v37 = vpop.f32.mrb[99].mxu0 }
 0x3b9   : > { %v3946_v11 = vpop.f32.mrb[96].mxu1 }
 0x3ba   : > { %v4037_v21 = vadd.f32 %v3946_v11, %v3794_v6  ;;  %v3948_v33 = vpop.f32.mrb[97].mxu1 }
 0x3bb   : > { %v4038_v27 = vadd.f32 %v3948_v33, %v3795_v57  ;;  %v3950_v59 = vpop.f32.mrb[98].mxu1 }
 0x3bc   : > { %v3951_v0 = vpop.f32.mrb[99].mxu1 }
 0x3bd   : > { %v3987_v51 = vpop.f32.mrb[100].mxu0 }
 0x3be   : > { %v4039_v9 = vadd.f32 %v3987_v51, %v3796_v48  ;;  %v3989_v53 = vpop.f32.mrb[101].mxu0 }
 0x3bf   : > { %v4040_v1 = vadd.f32 %v3989_v53, %v3797_v4  ;;  %v3991_v24 = vpop.f32.mrb[102].mxu0 }
 0x3c0   : > { %v3992_v7 = vpop.f32.mrb[103].mxu0 }
 0x3c1   : > { %v4028_v56 = vpop.f32.mrb[100].mxu1 }
 0x3c2   : > { %v4041_v32 = vadd.f32 %v4028_v56, %v3798_v63  ;;  %v4030_v10 = vpop.f32.mrb[101].mxu1 }
 0x3c3   : > { %v4042_v31 = vadd.f32 %v4030_v10, %v3799_v12  ;;  %v4032_v29 = vpop.f32.mrb[102].mxu1 }
 0x3c4   : > { %v4033_v49 = vpop.f32.mrb[103].mxu1 }
 0x3c5   : > { %v4107_v54 = vpop.f32.mrb[104].mxu0 }
 0x3c6   : > { %v4237_v55 = vadd.f32 %v4107_v54, %v4035_v28  ;;  %v4109_v45 = vpop.f32.mrb[105].mxu0 }
 0x3c7   : > { %v4238_v42 = vadd.f32 %v4109_v45, %v4036_v8  ;;  %v4111_v34 = vpop.f32.mrb[106].mxu0 }
 0x3c8   : > { %v4112_v46 = vpop.f32.mrb[107].mxu0 }
 0x3c9   : > { %v4148_v60 = vpop.f32.mrb[104].mxu1 }
 0x3ca   : > { %v4239_v62 = vadd.f32 %v4148_v60, %v4037_v21  ;;  %v4150_v47 = vpop.f32.mrb[105].mxu1 }
 0x3cb   : > { %v4240_v40 = vadd.f32 %v4150_v47, %v4038_v27  ;;  %v4152_v23 = vpop.f32.mrb[106].mxu1 }
 0x3cc   : > { %v4153_v30 = vpop.f32.mrb[107].mxu1 }
 0x3cd   : > { %v4189_v20 = vpop.f32.mrb[108].mxu0 }
 0x3ce   : > { %v4241_v22 = vadd.f32 %v4189_v20, %v4039_v9  ;;  %v4191_v38 = vpop.f32.mrb[109].mxu0 }
 0x3cf   : > { %v4242_v17 = vadd.f32 %v4191_v38, %v4040_v1  ;;  %v4193_v44 = vpop.f32.mrb[110].mxu0 }
 0x3d0   : > { %v4194_v43 = vpop.f32.mrb[111].mxu0 }
 0x3d1   : > { %v4230_v2 = vpop.f32.mrb[108].mxu1 }
 0x3d2   : > { %v4243_v26 = vadd.f32 %v4230_v2, %v4041_v32  ;;  %v4232_v50 = vpop.f32.mrb[109].mxu1 }
 0x3d3   : > { %v4244_v6 = vadd.f32 %v4232_v50, %v4042_v31  ;;  %v4234_v19 = vpop.f32.mrb[110].mxu1 }
 0x3d4   : > { %v4235_v57 = vpop.f32.mrb[111].mxu1 }
 0x3d5   : > { %v4350_v58 = vpop.f32.mrb[112].mxu0 }
 0x3d6   : > { %v4480_v36 = vadd.f32 %v4350_v58, %v4237_v55  ;;  %v4352_v5 = vpop.f32.mrb[113].mxu0 }
 0x3d7   : > { %v4481_v48 = vadd.f32 %v4352_v5, %v4238_v42  ;;  %v4354_v25 = vpop.f32.mrb[114].mxu0 }
 0x3d8   : > { %v4355_v4 = vpop.f32.mrb[115].mxu0  ;;  %v5214_v25 = vld [vmem:[%s363_s27] sm:$0xff] }
 0x3d9   : > { %v4391_v61 = vpop.f32.mrb[112].mxu1 }
 0x3da   : > { %v4482_v39 = vadd.f32 %v4391_v61, %v4239_v62  ;;  %v4393_v3 = vpop.f32.mrb[113].mxu1 }
 0x3db   : > { %v4483_v63 = vadd.f32 %v4393_v3, %v4240_v40  ;;  %v4395_v52 = vpop.f32.mrb[114].mxu1 }
 0x3dc   : > { %v4396_v12 = vpop.f32.mrb[115].mxu1  ;;  %v5216_v52 = vunpack.c.l.bf16 %v5214_v25 }
 0x3dd   : > { %v4432_v16 = vpop.f32.mrb[116].mxu0 }
 0x3de   : > { %v4484_v18 = vadd.f32 %v4432_v16, %v4241_v22  ;;  %v4434_v15 = vpop.f32.mrb[117].mxu0 }
 0x3df   : > { %v4485_v28 = vadd.f32 %v4434_v15, %v4242_v17  ;;  %v4436_v35 = vpop.f32.mrb[118].mxu0 }
 0x3e0   : > { %v4437_v8 = vpop.f32.mrb[119].mxu0 }
 0x3e1   : > { %v4473_v14 = vpop.f32.mrb[116].mxu1  ;;  %v5224_v8 = vcombine.high %v5216_v52, %v5216_v52 }
 0x3e2   : > { %v4486_v37 = vadd.f32 %v4473_v14, %v4243_v26  ;;  %v4475_v11 = vpop.f32.mrb[117].mxu1 }
 0x3e3   : > { %v4487_v21 = vadd.f32 %v4475_v11, %v4244_v6  ;;  %v4477_v33 = vpop.f32.mrb[118].mxu1  ;;  %v5215_v11 = vld [vmem:[%s363_s27 + $0x8] sm:$0xff] }
 0x3e4   : > { %v4478_v27 = vpop.f32.mrb[119].mxu1 }
 0x3e5   : > { %v4593_v59 = vpop.f32.mrb[120].mxu0 }
 0x3e6   : > { %v4723_v0 = vadd.f32 %v4593_v59, %v4480_v36  ;;  %v4595_v51 = vpop.f32.mrb[121].mxu0 }
 0x3e7   : > { %v4724_v9 = vadd.f32 %v4595_v51, %v4481_v48  ;;  %v4597_v53 = vpop.f32.mrb[122].mxu0 }
 0x3e8   : > { %v4598_v1 = vpop.f32.mrb[123].mxu0  ;;  %v5218_v53 = vunpack.c.l.bf16 %v5215_v11 }
 0x3e9   : > { %v4634_v24 = vpop.f32.mrb[120].mxu1 }
 0x3ea   : > { %v4725_v7 = vadd.f32 %v4634_v24, %v4482_v39  ;;  %v4636_v56 = vpop.f32.mrb[121].mxu1 }
 0x3eb   : > { %v4726_v32 = vadd.f32 %v4636_v56, %v4483_v63  ;;  %v4638_v10 = vpop.f32.mrb[122].mxu1 }
 0x3ec   : > { %v4639_v31 = vpop.f32.mrb[123].mxu1 }
 0x3ed   : > { %v4675_v29 = vpop.f32.mrb[124].mxu0 }
 0x3ee   : > { %v4727_v49 = vadd.f32 %v4675_v29, %v4484_v18  ;;  %v4677_v54 = vpop.f32.mrb[125].mxu0 }
 0x3ef   : > { %v4728_v55 = vadd.f32 %v4677_v54, %v4485_v28  ;;  %v4679_v45 = vpop.f32.mrb[126].mxu0  ;;  %v5204_v28 = vpop.permute.xlu0 %5203 }
 0x3f0   : > { %v4680_v42 = vpop.f32.mrb[127].mxu0 }
 0x3f1   : > { %v4716_v34 = vpop.f32.mrb[124].mxu1 }
 0x3f2   : > { %v4729_v46 = vadd.f32 %v4716_v34, %v4486_v37  ;;  %v4718_v60 = vpop.f32.mrb[125].mxu1  ;;  %v5217_v37 = vunpack.c.h.bf16 %v5214_v25  ;;  %v5226_v34 = vcombine.high %v5218_v53, %v5218_v53 }
 0x3f3   : > { %v4730_v62 = vadd.f32 %v4718_v60, %v4487_v21  ;;  %v4720_v47 = vpop.f32.mrb[126].mxu1 }
 0x3f4   : > { %v4721_v40 = vpop.f32.mrb[127].mxu1 }
 0x3f5   : > { %v4819_v23 = vpop.f32.mrb[128].mxu0  ;;  %v5219_v40 = vunpack.c.h.bf16 %v5215_v11 }
 0x3f6   : > { %v4949_v30 = vadd.f32 %v4819_v23, %v4723_v0  ;;  %v4821_v20 = vpop.f32.mrb[129].mxu0  ;;  %v5417_v23 = vshrl.u32 %v7434_v13, 16 }
 0x3f7   : > { %v4950_v22 = vadd.f32 %v4821_v20, %v4724_v9  ;;  %v4823_v38 = vpop.f32.mrb[130].mxu0 }
 0x3f8   : > { %v4824_v17 = vpop.f32.mrb[131].mxu0 }
 0x3f9   : > { %v4860_v44 = vpop.f32.mrb[128].mxu1 }
 0x3fa   : > { %v4951_v43 = vadd.f32 %v4860_v44, %v4725_v7  ;;  %v4862_v2 = vpop.f32.mrb[129].mxu1  ;;  %v5225_v7 = vcombine.high %v5217_v37, %v5217_v37 }
 0x3fb   : > { %v4952_v26 = vadd.f32 %v4862_v2, %v4726_v32  ;;  %v4864_v50 = vpop.f32.mrb[130].mxu1 }
 0x3fc   : > { %v4865_v6 = vpop.f32.mrb[131].mxu1 }
 0x3fd   : > { %v4901_v19 = vpop.f32.mrb[132].mxu0 }
 0x3fe   : > { %v4953_v57 = vadd.f32 %v4901_v19, %v4727_v49  ;;  %v4903_v58 = vpop.f32.mrb[133].mxu0 }
 0x3ff   : > { %v4954_v36 = vadd.f32 %v4903_v58, %v4728_v55  ;;  %v4905_v5 = vpop.f32.mrb[134].mxu0 }
 0x400   : > { %v4906_v48 = vpop.f32.mrb[135].mxu0 }
 0x401   : > { %v4942_v4 = vpop.f32.mrb[132].mxu1 }
 0x402   : > { %v4955_v61 = vadd.f32 %v4942_v4, %v4729_v46  ;;  %v4944_v39 = vpop.f32.mrb[133].mxu1 }
 0x403   : > { %v4956_v3 = vadd.f32 %v4944_v39, %v4730_v62  ;;  %v4946_v63 = vpop.f32.mrb[134].mxu1 }
 0x404   : > { %v4947_v12 = vpop.f32.mrb[135].mxu1 }
 0x405   : > { %v5062_v16 = vpop.f32.mrb[136].mxu0  ;;  %v6026_v12 = vmov 1966171168  }
 0x406   : > { %v5192_v18 = vadd.f32 %v5062_v16, %v4949_v30  ;;  %v5064_v15 = vpop.f32.mrb[137].mxu0  ;;  %v5623_v16 = vunpack.c.l.s4 %v6026_v12 }
 0x407   : > { %v5193_v35 = vadd.f32 %v5064_v15, %v4950_v22  ;;  %v5066_v14 = vpop.f32.mrb[138].mxu0 }
 0x408   : > { %v5206_v21 = vadd.f32 %v5204_v28, %v5192_v18  ;;  %v5067_v33 = vpop.f32.mrb[139].mxu0  ;;  %v5624_v15 = vunpack.c.0.s8 %v5623_v16 }
 0x409   : > { %v5207_v27 = vadd.f32 %v5204_v28, %v5193_v35  ;;  %v5103_v59 = vpop.f32.mrb[136].mxu1 }
 0x40a   : > { %v5232_v0 = vadd.f32 %v5216_v52, %v5206_v21  ;;  %v5194_v51 = vadd.f32 %v5103_v59, %v4951_v43  ;;  %v5105_v9 = vpop.f32.mrb[137].mxu1 }
 0x40b   : > { %v5233_v1 = vadd.f32 %v5224_v8, %v5207_v27  ;;  %v5195_v24 = vadd.f32 %v5105_v9, %v4952_v26  ;;  %v5107_v56 = vpop.f32.mrb[138].mxu1 }
 0x40c   : > { %v5242_v32 = vpack.c.bf16 %v5232_v0, %v5232_v0  ;;  %v5208_v10 = vadd.f32 %v5204_v28, %v5194_v51  ;;  %v5108_v31 = vpop.f32.mrb[139].mxu1 }
 0x40d   : > { %v5243_v29 = vpack.c.bf16 %v5233_v1, %v5233_v1  ;;  %v5209_v49 = vadd.f32 %v5204_v28, %v5195_v24  ;;  %v5144_v54 = vpop.f32.mrb[140].mxu0 }
 0x40e   : > { %v5234_v55 = vadd.f32 %v5217_v37, %v5208_v10  ;;  %v5196_v45 = vadd.f32 %v5144_v54, %v4953_v57  ;;  %v5146_v42 = vpop.f32.mrb[141].mxu0  ;;  %v5423_v46 = vsel %vm7742_vm12, %v5242_v32, 0  ;;  %v5227_v57 = vcombine.high %v5219_v40, %v5219_v40  ;;  %v7754_v37 = vld [vmem:[#allocation2_spill] sm:$0xff] }
 0x40f   : > { %v5235_v60 = vadd.f32 %v5225_v7, %v5209_v49  ;;  %v5197_v62 = vadd.f32 %v5146_v42, %v4954_v36  ;;  %5925 = vmatprep.subr.msk.bf16.mxu0 %vm7743_vm3, %v5243_v29  ;;  %v5148_v47 = vpop.f32.mrb[142].mxu0 }
 0x410   : > { %v5244_v30 = vpack.c.bf16 %v5234_v55, %v5234_v55  ;;  %v5210_v20 = vadd.f32 %v5204_v28, %v5196_v45  ;;  %5447 = vmatpush1.bf16.msra.mxu0 %v5423_v46  ;;  %v5149_v22 = vpop.f32.mrb[143].mxu0 }
 0x411   : > { %v5245_v38 = vpack.c.bf16 %v5235_v60, %v5235_v60  ;;  %v5211_v17 = vadd.f32 %v5204_v28, %v5197_v62  ;;  %v5185_v44 = vpop.f32.mrb[140].mxu1 }
 0x412   : > { %v5236_v43 = vadd.f32 %v5218_v53, %v5210_v20  ;;  %v5198_v2 = vadd.f32 %v5185_v44, %v4955_v61  ;;  %v5187_v26 = vpop.f32.mrb[141].mxu1  ;;  %v5429_v50 = vsel %vm7744_vm7, %v5244_v30, 0 }
 0x413   : > { %v5237_v6 = vadd.f32 %v5226_v34, %v5211_v17  ;;  %v5199_v19 = vadd.f32 %v5187_v26, %v4956_v3  ;;  %v5189_v58 = vpop.f32.mrb[142].mxu1  ;;  %5926 = vmatmul.mubr.msk.bf16.vlgmr.msra.gmra.mrb[144].mxu0 %vm7745_vm4, %v5417_v23  ;;  %5927 = vmatprep.subr.msk.bf16.mxu1 %vm7746_vm10, %v5245_v38 }
 0x414   : > { %v5246_v13 = vpack.c.bf16 %v5236_v43, %v5236_v43  ;;  %v5212_v36 = vadd.f32 %v5204_v28, %v5198_v2  ;;  %v5190_v5 = vpop.f32.mrb[143].mxu1  ;;  %5488 = vmatpush1.bf16.msra.mxu1 %v5429_v50  ;;  %5560 = vmatprep.mubr.bf16.mxu0 %v7655_v41 }
 0x415   : > { %v5247_v48 = vpack.c.bf16 %v5237_v6, %v5237_v6  ;;  %v5213_v25 = vadd.f32 %v5204_v28, %v5199_v19 }
 0x416   : > { %v5238_v4 = vadd.f32 %v5219_v40, %v5212_v36  ;;  %v5435_v61 = vsel %vm7747_vm15, %v5246_v13, 0 }
 0x417   : > { %v5239_v39 = vadd.f32 %v5227_v57, %v5213_v25  ;;  %5928 = vmatmul.mubr.msk.bf16.vlgmr.msra.gmra.mrb[144].mxu1 %vm7748_vm14, %v5417_v23  ;;  %5929 = vmatprep.subr.msk.bf16.mxu0 %vm7749_vm13, %v5247_v48 }
 0x418   : > { %v5248_v3 = vpack.c.bf16 %v5238_v4, %v5238_v4  ;;  %5529 = vmatpush1.bf16.msra.mxu0 %v5435_v61  ;;  %5601 = vmatprep.mubr.bf16.mxu1 %v7655_v41  ;;  %v5627_v41 = vsub.s32 %v5624_v15, %v7754_v37 }
 0x419   : > { %v5249_v63 = vpack.c.bf16 %v5239_v39, %v5239_v39 }
 0x41a   : > { %v5441_v52 = vsel %vm7750_vm6, %v5248_v3, 0 }
 0x41b   : > { %5930 = vmatmul.mubr.msk.bf16.vlgmr.msra.gmra.mrb[148].mxu0 %vm7751_vm2, %v5417_v23  ;;  %5931 = vmatprep.subr.msk.bf16.mxu1 %vm7752_vm9, %v5249_v63 }
 0x41c   : > { %5570 = vmatpush1.bf16.msra.mxu1 %v5441_v52 }
 0x41f   : > { %5932 = vmatmul.mubr.msk.bf16.vlgmr.msra.gmra.mrb[148].mxu1 %vm7753_vm8, %v5417_v23 }
 0x4e6   : > { %v5480_v18 = vpop.f32.mrb[144].mxu0 }
 0x4e7   : > { %v5482_v28 = vpop.f32.mrb[145].mxu0 }
 0x4e8   : > { %v5618_v35 = vcombine.low %v5480_v18, %v5482_v28  ;;  %v5484_v8 = vpop.f32.mrb[146].mxu0 }
 0x4e9   : > { %v5485_v14 = vpop.f32.mrb[147].mxu0 }
 0x4ea   : > { %v5521_v11 = vpop.f32.mrb[144].mxu1  ;;  %v5628_v0 = vrot.slane %v5618_v35, %v5627_v41 }
 0x4eb   : > { %v5523_v21 = vpop.f32.mrb[145].mxu1 }
 0x4ec   : > { %v5619_v33 = vcombine.low %v5521_v11, %v5523_v21  ;;  %v5525_v27 = vpop.f32.mrb[146].mxu1 }
 0x4ed   : > { %v5526_v59 = vpop.f32.mrb[147].mxu1 }
 0x4ee   : > { %v5635_v51 = vrot.slane %v5619_v33, %v5627_v41  ;;  %v5562_v9 = vpop.f32.mrb[148].mxu0 }
 0x4ef   : > { %v5564_v53 = vpop.f32.mrb[149].mxu0 }
 0x4f0   : > { %v5650_v1 = vcombine.low %v5628_v0, %v5635_v51  ;;  %v5620_v24 = vcombine.low %v5562_v9, %v5564_v53  ;;  %v5566_v7 = vpop.f32.mrb[150].mxu0 }
 0x4f1   : > { %v5567_v56 = vpop.f32.mrb[151].mxu0 }
 0x4f2   : > { %v5603_v32 = vpop.f32.mrb[148].mxu1  ;;  %v5642_v54 = vrot.slane %v5620_v24, %v5627_v41  ;;  %v5658_v42 = vrot.slane %v5650_v1, %v5627_v41 }
 0x4f3   : > { %v5605_v10 = vpop.f32.mrb[149].mxu1 }
 0x4f4   : > { %v5621_v31 = vcombine.low %v5603_v32, %v5605_v10  ;;  %v5607_v29 = vpop.f32.mrb[150].mxu1 }
 0x4f5   : > { %v5608_v49 = vpop.f32.mrb[151].mxu1 }
 0x4f6   : > { %v5649_v55 = vrot.slane %v5621_v31, %v5627_v41 }
 0x4f8   : > { %v5651_v45 = vcombine.low %v5642_v54, %v5649_v55 }
 0x4fa   : > { %v5665_v34 = vrot.slane %v5651_v45, %v5627_v41 }
 0x4fc   : > { %v5666_v46 = vcombine.low %v5658_v42, %v5665_v34 }
 0x4fe   : > { %5668 = vst [vmem:[%s367_s12] sm:$0xff] %v5666_v46 }
 0x4ff PF: > { %s19_s30 = sadd.s32 1, %s6014_s30  }
 0x500   : > { %p16_p4 = scmp.ge.s32.totalorder %s19_s30, 4  }
 0x502   :  { %18 = sbr.rel (!%p16_p4) target bundleno = 1 (0x1), region = 108 }

</bundles_post_ra>
